<compile_context>
chip_gen: v6e
topology: v6e:2x2x1
jax: 0.10.0
libtpu: 0.0.40
codegen_flags: <defaults>
</compile_context>

<pallas_src>
import functools

import jax
import jax.numpy as jnp
from jax.experimental import pallas as pl
from jax.experimental.pallas import tpu as pltpu


# --------------------------------------------------------------------------- #
# Single fused kernel: conv1 -> conv2 -> pool -> conv3 -> pool -> fc1 -> fc2
# --------------------------------------------------------------------------- #
def _cnn_kernel(x_ref, w1_ref, b1_ref, w2_ref, b2_ref, w3_ref, b3_ref,
                fw1_ref, fb1_ref, fw2_ref, fb2_ref, out_ref,
                p1, p2, s2, s2h, p3, s3, s3h, *, H, W, bsz):
    H2, W2 = H // 2, W // 2
    H4, W4 = H // 4, W // 4
    cin0 = x_ref.shape[3]

    def zero_border(p, h, w, c):
        # Zero only the 1-pixel border of the padded scratch; the interior is
        # fully overwritten every grid step, so no full-tensor zero sweep.
        z_row = jnp.zeros((bsz, 1, w + 2, c), jnp.float32)
        z_col = jnp.zeros((bsz, h + 2, 1, c), jnp.float32)
        p[:, 0:1, :, :] = z_row
        p[:, h + 1:h + 2, :, :] = z_row
        p[:, :, 0:1, :] = z_col
        p[:, :, w + 1:w + 2, :] = z_col

    def conv3x3_relu(src_ref, w_ref, b_ref, oh, ow, cin, cout, tap_groups):
        # src_ref: zero-padded (bsz, oh+2, ow+2, cin) VMEM ref.
        # w_ref:   (9*cin, cout) bf16, row = (dy*3+dx)*cin + c.
        # Taps are folded into fat matmuls: each group of consecutive taps is one
        # (M, len(grp)*cin) x (len(grp)*cin, cout) MXU matmul.
        m = bsz * oh * ow
        acc = jnp.zeros((m, cout), jnp.float32)
        for grp in tap_groups:
            pieces = []
            for t in grp:
                dy, dx = divmod(t, 3)
                pieces.append(
                    src_ref[:, dy:dy + oh, dx:dx + ow, :].reshape(m, cin))
            lhs = pieces[0] if len(pieces) == 1 else jnp.concatenate(pieces, -1)
            wg = w_ref[grp[0] * cin:(grp[-1] + 1) * cin, :]
            acc = acc + jnp.dot(lhs.astype(jnp.bfloat16), wg,
                                preferred_element_type=jnp.float32)
        return jnp.maximum(acc + b_ref[...], 0.0).reshape(bsz, oh, ow, cout)

    ALL9 = (tuple(range(9)),)                       # conv1: one K=27 matmul
    BY_ROW = ((0, 1, 2), (3, 4, 5), (6, 7, 8))      # conv2/3: 3 matmuls (K=96/192)

    # ---- input padding folded in-kernel: unpadded NHWC block -> padded p1 ----
    zero_border(p1, H, W, cin0)
    p1[:, 1:H + 1, 1:W + 1, :] = x_ref[...]

    # ---- conv1 + ReLU ----
    h1 = conv3x3_relu(p1, w1_ref, b1_ref, H, W, cin0, 32, ALL9)
    zero_border(p2, H, W, 32)
    p2[:, 1:H + 1, 1:W + 1, :] = h1

    # ---- conv2 + ReLU ----
    s2[...] = conv3x3_relu(p2, w2_ref, b2_ref, H, W, 32, 64, BY_ROW)

    # ---- MaxPool2d(2,2): strided VMEM reads (H pairs, then W pairs) ----
    s2h[...] = jnp.maximum(s2[:, pl.ds(0, H2, 2), :, :],
                           s2[:, pl.ds(1, H2, 2), :, :])
    pooled1 = jnp.maximum(s2h[:, :, pl.ds(0, W2, 2), :],
                          s2h[:, :, pl.ds(1, W2, 2), :])
    zero_border(p3, H2, W2, 64)
    p3[:, 1:H2 + 1, 1:W2 + 1, :] = pooled1

    # ---- conv3 + ReLU ----
    s3[...] = conv3x3_relu(p3, w3_ref, b3_ref, H2, W2, 64, 128, BY_ROW)

    # ---- MaxPool2d(2,2) -> (bsz, H4, W4, 128) ----
    s3h[...] = jnp.maximum(s3[:, pl.ds(0, H4, 2), :, :],
                           s3[:, pl.ds(1, H4, 2), :, :])
    pooled2 = jnp.maximum(s3h[:, :, pl.ds(0, W4, 2), :],
                          s3h[:, :, pl.ds(1, W4, 2), :])

    # AdaptiveAvgPool2d((4,4)) is the identity here (features already 4x4).
    # TODO(synk): general adaptive-avg-pool bins (non-divisible spatial) not implemented.

    # ---- flatten NHWC (fc1_w rows pre-permuted to this order) ----
    flat = jnp.concatenate(
        [pooled2[:, i, j, :] for i in range(H4) for j in range(W4)], axis=-1)

    # ---- fc1 + ReLU -> (dropout = identity in eval) -> fc2 ----
    h = jnp.dot(flat.astype(jnp.bfloat16), fw1_ref[...],
                preferred_element_type=jnp.float32) + fb1_ref[...]
    h = jnp.maximum(h, 0.0)
    # TODO(synk): Dropout(0.5) is identity in inference/eval; a training path
    # would need pltpu.prng_seed / pltpu.prng_random_bits masking.
    logits = jnp.dot(h.astype(jnp.bfloat16), fw2_ref[...],
                     preferred_element_type=jnp.float32) + fb2_ref[...]
    out_ref[...] = logits[None].astype(out_ref.dtype)


def cnn_fused(x_nhwc, kp, *, num_programs=None):
    """x_nhwc: (N, H, W, 3) f32, unpadded. Returns logits (N, 10)."""
    n, H, W, cin = x_nhwc.shape
    assert H // 4 == 4 and W // 4 == 4 and H % 4 == 0 and W % 4 == 0, \
        "adaptive-pool identity path expects 16x16 spatial input"
    if num_programs is None:
        # v7x: 2 TensorCores -> 2 "parallel" programs; on single-TC v5e/v6e the
        # extra grid step costs ~0.35us (<< the removed second pallas_call).
        num_programs = 2 if (n >= 2 and n % 2 == 0) else 1
    assert n % num_programs == 0
    bsz = n // num_programs

    kernel = functools.partial(_cnn_kernel, H=H, W=W, bsz=bsz)

    flops = 2 * n * (H * W * 32 * 27 + H * W * 64 * 288
                     + (H // 2) * (W // 2) * 128 * 576
                     + 128 * 4 * 4 * 256 + 256 * 10)
    bytes_accessed = (2 * (27 * 32 + 288 * 64 + 576 * 128 + 2048 * 256 + 256 * 10)
                      + 4 * (x_nhwc.size + n * 10 + 32 + 64 + 128 + 256 + 10))

    const2d = lambda i: (0, 0)
    out = pl.pallas_call(
        kernel,
        out_shape=jax.ShapeDtypeStruct((num_programs, bsz, 10), jnp.float32),
        grid=(num_programs,),
        in_specs=[
            pl.BlockSpec((bsz, H, W, cin), lambda i: (i, 0, 0, 0)),
            pl.BlockSpec(kp["w1"].shape, const2d),
            pl.BlockSpec(kp["b1"].shape, const2d),
            pl.BlockSpec(kp["w2"].shape, const2d),
            pl.BlockSpec(kp["b2"].shape, const2d),
            pl.BlockSpec(kp["w3"].shape, const2d),
            pl.BlockSpec(kp["b3"].shape, const2d),
            pl.BlockSpec(kp["fc1_w"].shape, const2d),
            pl.BlockSpec(kp["fc1_b"].shape, const2d),
            pl.BlockSpec(kp["fc2_w"].shape, const2d),
            pl.BlockSpec(kp["fc2_b"].shape, const2d),
        ],
        out_specs=pl.BlockSpec((1, bsz, 10), lambda i: (i, 0, 0)),
        scratch_shapes=[
            pltpu.VMEM((bsz, H + 2, W + 2, cin), jnp.float32),           # p1: padded input
            pltpu.VMEM((bsz, H + 2, W + 2, 32), jnp.float32),            # p2: padded conv2 in
            pltpu.VMEM((bsz, H, W, 64), jnp.float32),                    # s2: conv2 out
            pltpu.VMEM((bsz, H // 2, W, 64), jnp.float32),               # s2h: after H-max
            pltpu.VMEM((bsz, H // 2 + 2, W // 2 + 2, 64), jnp.float32),  # p3: padded conv3 in
            pltpu.VMEM((bsz, H // 2, W // 2, 128), jnp.float32),         # s3: conv3 out
            pltpu.VMEM((bsz, H // 4, W // 2, 128), jnp.float32),         # s3h: after H-max
        ],
        compiler_params=pltpu.CompilerParams(
            dimension_semantics=("parallel",)),
        cost_estimate=pl.CostEstimate(flops=flops, transcendentals=0,
                                      bytes_accessed=bytes_accessed),
    )(x_nhwc, kp["w1"], kp["b1"], kp["w2"], kp["b2"], kp["w3"], kp["b3"],
      kp["fc1_w"], kp["fc1_b"], kp["fc2_w"], kp["fc2_b"])
    return out.reshape(n, 10)


# --------------------------------------------------------------------------- #
# Parameters (deterministic, synthetic) + one-time packing
# --------------------------------------------------------------------------- #
def init_params(key):
    ks = jax.random.split(key, 10)

    def winit(k, shape, fan_in):
        return jax.random.normal(k, shape, jnp.float32) / jnp.sqrt(float(fan_in))

    return {
        "conv1_w": winit(ks[0], (3, 3, 3, 32), 3 * 9),        # HWIO
        "conv1_b": 0.01 * jax.random.normal(ks[1], (32,), jnp.float32),
        "conv2_w": winit(ks[2], (3, 3, 32, 64), 32 * 9),
        "conv2_b": 0.01 * jax.random.normal(ks[3], (64,), jnp.float32),
        "conv3_w": winit(ks[4], (3, 3, 64, 128), 64 * 9),
        "conv3_b": 0.01 * jax.random.normal(ks[5], (128,), jnp.float32),
        # fc1_w rows in PyTorch flatten order: index = c*(4*4) + h*4 + w
        "fc1_w": winit(ks[6], (128 * 4 * 4, 256), 128 * 4 * 4),
        "fc1_b": 0.01 * jax.random.normal(ks[7], (256,), jnp.float32),
        "fc2_w": winit(ks[8], (256, 10), 256),
        "fc2_b": 0.01 * jax.random.normal(ks[9], (10,), jnp.float32),
    }


def pack_params(p):
    """One-time repack (outside the hot path): bf16 weights, tap-folded conv
    weights, fc1 rows permuted to NHWC-flatten order."""
    def taps2d(w):  # HWIO (3,3,Cin,Cout) -> (9*Cin, Cout), row = (dy*3+dx)*Cin + c
        return w.reshape(9 * w.shape[2], w.shape[3]).astype(jnp.bfloat16)

    fc1_w_nhwc = (p["fc1_w"].reshape(128, 4, 4, 256)
                  .transpose(1, 2, 0, 3)
                  .reshape(4 * 4 * 128, 256)).astype(jnp.bfloat16)
    return {
        "w1": taps2d(p["conv1_w"]), "b1": p["conv1_b"].reshape(1, -1),
        "w2": taps2d(p["conv2_w"]), "b2": p["conv2_b"].reshape(1, -1),
        "w3": taps2d(p["conv3_w"]), "b3": p["conv3_b"].reshape(1, -1),
        "fc1_w": fc1_w_nhwc, "fc1_b": p["fc1_b"].reshape(1, -1),
        "fc2_w": p["fc2_w"].astype(jnp.bfloat16), "fc2_b": p["fc2_b"].reshape(1, -1),
    }


# --------------------------------------------------------------------------- #
# Forward pass (NCHW input, like PyTorch)
# --------------------------------------------------------------------------- #
def cnn_forward(x_nchw, kp):
    x = jnp.transpose(x_nchw, (0, 2, 3, 1))   # NCHW -> NHWC (tiny XLA glue op)
    return cnn_fused(x, kp)


if __name__ == "__main__":
    key = jax.random.PRNGKey(0)
    kx, kparam = jax.random.split(key)
    x = jax.random.normal(kx, (2, 3, 16, 16), jnp.float32)     # NCHW, like PyTorch
    params = pack_params(init_params(kparam))

    out = jax.jit(cnn_forward)(x, params)
    out = jax.block_until_ready(out)

    assert out.shape == (2, 10)
    assert bool(jnp.all(jnp.isfinite(out)))
    print("KERNEL_OK")
</pallas_src>

<mosaic_0001>
module attributes {stable_mosaic.version = 11 : i64} {
  func.func @_cnn_kernel(%arg0: i32, %arg1: memref<1x16x16x3xf32, #tpu.memory_space<vmem>>, %arg2: memref<27x32xbf16, #tpu.memory_space<vmem>>, %arg3: memref<1x32xf32, #tpu.memory_space<vmem>>, %arg4: memref<288x64xbf16, #tpu.memory_space<vmem>>, %arg5: memref<1x64xf32, #tpu.memory_space<vmem>>, %arg6: memref<576x128xbf16, #tpu.memory_space<vmem>>, %arg7: memref<1x128xf32, #tpu.memory_space<vmem>>, %arg8: memref<2048x256xbf16, #tpu.memory_space<vmem>>, %arg9: memref<1x256xf32, #tpu.memory_space<vmem>>, %arg10: memref<256x10xbf16, #tpu.memory_space<vmem>>, %arg11: memref<1x10xf32, #tpu.memory_space<vmem>>, %arg12: memref<1x1x10xf32, #tpu.memory_space<vmem>>, %arg13: memref<1x18x18x3xf32, #tpu.memory_space<vmem>>, %arg14: memref<1x18x18x32xf32, #tpu.memory_space<vmem>>, %arg15: memref<1x16x16x64xf32, #tpu.memory_space<vmem>>, %arg16: memref<1x8x16x64xf32, #tpu.memory_space<vmem>>, %arg17: memref<1x10x10x64xf32, #tpu.memory_space<vmem>>, %arg18: memref<1x8x8x128xf32, #tpu.memory_space<vmem>>, %arg19: memref<1x4x8x128xf32, #tpu.memory_space<vmem>>) attributes {dimension_semantics = [#tpu.dimension_semantics<parallel>], iteration_bounds = array<i64: 2>, scalar_prefetch = 0 : i64, scratch_operands = 7 : i64, tpu.core_type = #tpu.core_type<tc>, window_params = [{transform_indices = @transform_0, window_bounds = array<i64: 1, 16, 16, 3>}, {pipeline_mode = #tpu.pipeline_mode<synchronous>, transform_indices = @transform_1, window_bounds = array<i64: 27, 32>}, {pipeline_mode = #tpu.pipeline_mode<synchronous>, transform_indices = @transform_2, window_bounds = array<i64: 1, 32>}, {pipeline_mode = #tpu.pipeline_mode<synchronous>, transform_indices = @transform_3, window_bounds = array<i64: 288, 64>}, {pipeline_mode = #tpu.pipeline_mode<synchronous>, transform_indices = @transform_4, window_bounds = array<i64: 1, 64>}, {pipeline_mode = #tpu.pipeline_mode<synchronous>, transform_indices = @transform_5, window_bounds = array<i64: 576, 128>}, {pipeline_mode = #tpu.pipeline_mode<synchronous>, transform_indices = @transform_6, window_bounds = array<i64: 1, 128>}, {pipeline_mode = #tpu.pipeline_mode<synchronous>, transform_indices = @transform_7, window_bounds = array<i64: 2048, 256>}, {pipeline_mode = #tpu.pipeline_mode<synchronous>, transform_indices = @transform_8, window_bounds = array<i64: 1, 256>}, {pipeline_mode = #tpu.pipeline_mode<synchronous>, transform_indices = @transform_9, window_bounds = array<i64: 256, 10>}, {pipeline_mode = #tpu.pipeline_mode<synchronous>, transform_indices = @transform_10, window_bounds = array<i64: 1, 10>}, {transform_indices = @transform_11, window_bounds = array<i64: 1, 1, 10>}]} {
    %cst = arith.constant 0.000000e+00 : f32
    %0 = vector.broadcast %cst : f32 to vector<1x1x18x3xf32>
    %cst_0 = arith.constant 0.000000e+00 : f32
    %1 = vector.broadcast %cst_0 : f32 to vector<1x18x1x3xf32>
    %c0 = arith.constant 0 : index
    %c0_1 = arith.constant 0 : index
    %c0_2 = arith.constant 0 : index
    %c0_3 = arith.constant 0 : index
    %2 = vector.load %arg13[%c0, %c0_1, %c0_2, %c0_3] : memref<1x18x18x3xf32, #tpu.memory_space<vmem>>, vector<1x1x18x3xf32>
    tpu.vector_store %arg13[%c0, %c0_1, %c0_2, %c0_3], %0 {strides = array<i32>} : memref<1x18x18x3xf32, #tpu.memory_space<vmem>>, vector<1x1x18x3xf32>,
    %c0_4 = arith.constant 0 : index
    %c17 = arith.constant 17 : index
    %c0_5 = arith.constant 0 : index
    %c0_6 = arith.constant 0 : index
    %3 = vector.load %arg13[%c0_4, %c17, %c0_5, %c0_6] : memref<1x18x18x3xf32, #tpu.memory_space<vmem>>, vector<1x1x18x3xf32>
    tpu.vector_store %arg13[%c0_4, %c17, %c0_5, %c0_6], %0 {strides = array<i32>} : memref<1x18x18x3xf32, #tpu.memory_space<vmem>>, vector<1x1x18x3xf32>,
    %c0_7 = arith.constant 0 : index
    %c0_8 = arith.constant 0 : index
    %c0_9 = arith.constant 0 : index
    %c0_10 = arith.constant 0 : index
    %4 = vector.load %arg13[%c0_7, %c0_8, %c0_9, %c0_10] : memref<1x18x18x3xf32, #tpu.memory_space<vmem>>, vector<1x18x1x3xf32>
    tpu.vector_store %arg13[%c0_7, %c0_8, %c0_9, %c0_10], %1 {strides = array<i32>} : memref<1x18x18x3xf32, #tpu.memory_space<vmem>>, vector<1x18x1x3xf32>,
    %c0_11 = arith.constant 0 : index
    %c0_12 = arith.constant 0 : index
    %c17_13 = arith.constant 17 : index
    %c0_14 = arith.constant 0 : index
    %5 = vector.load %arg13[%c0_11, %c0_12, %c17_13, %c0_14] : memref<1x18x18x3xf32, #tpu.memory_space<vmem>>, vector<1x18x1x3xf32>
    tpu.vector_store %arg13[%c0_11, %c0_12, %c17_13, %c0_14], %1 {strides = array<i32>} : memref<1x18x18x3xf32, #tpu.memory_space<vmem>>, vector<1x18x1x3xf32>,
    %c0_15 = arith.constant 0 : index
    %c0_16 = arith.constant 0 : index
    %c0_17 = arith.constant 0 : index
    %c0_18 = arith.constant 0 : index
    %6 = vector.load %arg1[%c0_15, %c0_16, %c0_17, %c0_18] : memref<1x16x16x3xf32, #tpu.memory_space<vmem>>, vector<1x16x16x3xf32>
    %c0_19 = arith.constant 0 : index
    %c1 = arith.constant 1 : index
    %c1_20 = arith.constant 1 : index
    %c0_21 = arith.constant 0 : index
    %7 = vector.load %arg13[%c0_19, %c1, %c1_20, %c0_21] : memref<1x18x18x3xf32, #tpu.memory_space<vmem>>, vector<1x16x16x3xf32>
    tpu.vector_store %arg13[%c0_19, %c1, %c1_20, %c0_21], %6 {strides = array<i32>} : memref<1x18x18x3xf32, #tpu.memory_space<vmem>>, vector<1x16x16x3xf32>,
    %cst_22 = arith.constant 0.000000e+00 : f32
    %8 = vector.broadcast %cst_22 : f32 to vector<256x32xf32>
    %c0_23 = arith.constant 0 : index
    %c0_24 = arith.constant 0 : index
    %c0_25 = arith.constant 0 : index
    %c0_26 = arith.constant 0 : index
    %9 = vector.load %arg13[%c0_23, %c0_24, %c0_25, %c0_26] : memref<1x18x18x3xf32, #tpu.memory_space<vmem>>, vector<1x16x16x3xf32>
    %10 = vector.shape_cast %9 : vector<1x16x16x3xf32> to vector<256x3xf32>
    %c0_27 = arith.constant 0 : index
    %c0_28 = arith.constant 0 : index
    %c1_29 = arith.constant 1 : index
    %c0_30 = arith.constant 0 : index
    %11 = vector.load %arg13[%c0_27, %c0_28, %c1_29, %c0_30] : memref<1x18x18x3xf32, #tpu.memory_space<vmem>>, vector<1x16x16x3xf32>
    %12 = vector.shape_cast %11 : vector<1x16x16x3xf32> to vector<256x3xf32>
    %c0_31 = arith.constant 0 : index
    %c0_32 = arith.constant 0 : index
    %c2 = arith.constant 2 : index
    %c0_33 = arith.constant 0 : index
    %13 = vector.load %arg13[%c0_31, %c0_32, %c2, %c0_33] : memref<1x18x18x3xf32, #tpu.memory_space<vmem>>, vector<1x16x16x3xf32>
    %14 = vector.shape_cast %13 : vector<1x16x16x3xf32> to vector<256x3xf32>
    %c0_34 = arith.constant 0 : index
    %c1_35 = arith.constant 1 : index
    %c0_36 = arith.constant 0 : index
    %c0_37 = arith.constant 0 : index
    %15 = vector.load %arg13[%c0_34, %c1_35, %c0_36, %c0_37] : memref<1x18x18x3xf32, #tpu.memory_space<vmem>>, vector<1x16x16x3xf32>
    %16 = vector.shape_cast %15 : vector<1x16x16x3xf32> to vector<256x3xf32>
    %c0_38 = arith.constant 0 : index
    %c1_39 = arith.constant 1 : index
    %c1_40 = arith.constant 1 : index
    %c0_41 = arith.constant 0 : index
    %17 = vector.load %arg13[%c0_38, %c1_39, %c1_40, %c0_41] : memref<1x18x18x3xf32, #tpu.memory_space<vmem>>, vector<1x16x16x3xf32>
    %18 = vector.shape_cast %17 : vector<1x16x16x3xf32> to vector<256x3xf32>
    %c0_42 = arith.constant 0 : index
    %c1_43 = arith.constant 1 : index
    %c2_44 = arith.constant 2 : index
    %c0_45 = arith.constant 0 : index
    %19 = vector.load %arg13[%c0_42, %c1_43, %c2_44, %c0_45] : memref<1x18x18x3xf32, #tpu.memory_space<vmem>>, vector<1x16x16x3xf32>
    %20 = vector.shape_cast %19 : vector<1x16x16x3xf32> to vector<256x3xf32>
    %c0_46 = arith.constant 0 : index
    %c2_47 = arith.constant 2 : index
    %c0_48 = arith.constant 0 : index
    %c0_49 = arith.constant 0 : index
    %21 = vector.load %arg13[%c0_46, %c2_47, %c0_48, %c0_49] : memref<1x18x18x3xf32, #tpu.memory_space<vmem>>, vector<1x16x16x3xf32>
    %22 = vector.shape_cast %21 : vector<1x16x16x3xf32> to vector<256x3xf32>
    %c0_50 = arith.constant 0 : index
    %c2_51 = arith.constant 2 : index
    %c1_52 = arith.constant 1 : index
    %c0_53 = arith.constant 0 : index
    %23 = vector.load %arg13[%c0_50, %c2_51, %c1_52, %c0_53] : memref<1x18x18x3xf32, #tpu.memory_space<vmem>>, vector<1x16x16x3xf32>
    %24 = vector.shape_cast %23 : vector<1x16x16x3xf32> to vector<256x3xf32>
    %c0_54 = arith.constant 0 : index
    %c2_55 = arith.constant 2 : index
    %c2_56 = arith.constant 2 : index
    %c0_57 = arith.constant 0 : index
    %25 = vector.load %arg13[%c0_54, %c2_55, %c2_56, %c0_57] : memref<1x18x18x3xf32, #tpu.memory_space<vmem>>, vector<1x16x16x3xf32>
    %26 = vector.shape_cast %25 : vector<1x16x16x3xf32> to vector<256x3xf32>
    %27 = tpu.concatenate %10, %12, %14, %16, %18, %20, %22, %24, %26 in 1 : vector<256x3xf32>, vector<256x3xf32>, vector<256x3xf32>, vector<256x3xf32>, vector<256x3xf32>, vector<256x3xf32>, vector<256x3xf32>, vector<256x3xf32>, vector<256x3xf32> -> vector<256x27xf32>
    %c0_58 = arith.constant 0 : index
    %c0_59 = arith.constant 0 : index
    %28 = vector.load %arg2[%c0_58, %c0_59] : memref<27x32xbf16, #tpu.memory_space<vmem>>, vector<27x32xbf16>
    %29 = arith.truncf %27 : vector<256x27xf32> to vector<256x27xbf16>
    %cst_60 = arith.constant dense<0.000000e+00> : vector<256x32xf32>
    %30 = tpu.matmul %29, %28, %cst_60 {dimension_numbers = #tpu.dot_dimension_numbers<[1], [0], [0], [1], [0, 0, 1, 1], [], []>} : vector<256x27xbf16>, vector<27x32xbf16>, vector<256x32xf32> -> vector<256x32xf32>
    %31 = arith.addf %8, %30 : vector<256x32xf32>
    %c0_61 = arith.constant 0 : index
    %c0_62 = arith.constant 0 : index
    %32 = vector.load %arg3[%c0_61, %c0_62] : memref<1x32xf32, #tpu.memory_space<vmem>>, vector<1x32xf32>
    %33 = vector.broadcast %32 : vector<1x32xf32> to vector<256x32xf32>
    %34 = arith.addf %31, %33 : vector<256x32xf32>
    %cst_63 = arith.constant 0.000000e+00 : f32
    %35 = vector.broadcast %cst_63 : f32 to vector<256x32xf32>
    %36 = arith.maximumf %34, %35 : vector<256x32xf32>
    %37 = vector.shape_cast %36 : vector<256x32xf32> to vector<1x16x16x32xf32>
    %cst_64 = arith.constant 0.000000e+00 : f32
    %38 = vector.broadcast %cst_64 : f32 to vector<1x1x18x32xf32>
    %cst_65 = arith.constant 0.000000e+00 : f32
    %39 = vector.broadcast %cst_65 : f32 to vector<1x18x1x32xf32>
    %c0_66 = arith.constant 0 : index
    %c0_67 = arith.constant 0 : index
    %c0_68 = arith.constant 0 : index
    %c0_69 = arith.constant 0 : index
    %40 = vector.load %arg14[%c0_66, %c0_67, %c0_68, %c0_69] : memref<1x18x18x32xf32, #tpu.memory_space<vmem>>, vector<1x1x18x32xf32>
    tpu.vector_store %arg14[%c0_66, %c0_67, %c0_68, %c0_69], %38 {strides = array<i32>} : memref<1x18x18x32xf32, #tpu.memory_space<vmem>>, vector<1x1x18x32xf32>,
    %c0_70 = arith.constant 0 : index
    %c17_71 = arith.constant 17 : index
    %c0_72 = arith.constant 0 : index
    %c0_73 = arith.constant 0 : index
    %41 = vector.load %arg14[%c0_70, %c17_71, %c0_72, %c0_73] : memref<1x18x18x32xf32, #tpu.memory_space<vmem>>, vector<1x1x18x32xf32>
    tpu.vector_store %arg14[%c0_70, %c17_71, %c0_72, %c0_73], %38 {strides = array<i32>} : memref<1x18x18x32xf32, #tpu.memory_space<vmem>>, vector<1x1x18x32xf32>,
    %c0_74 = arith.constant 0 : index
    %c0_75 = arith.constant 0 : index
    %c0_76 = arith.constant 0 : index
    %c0_77 = arith.constant 0 : index
    %42 = vector.load %arg14[%c0_74, %c0_75, %c0_76, %c0_77] : memref<1x18x18x32xf32, #tpu.memory_space<vmem>>, vector<1x18x1x32xf32>
    tpu.vector_store %arg14[%c0_74, %c0_75, %c0_76, %c0_77], %39 {strides = array<i32>} : memref<1x18x18x32xf32, #tpu.memory_space<vmem>>, vector<1x18x1x32xf32>,
    %c0_78 = arith.constant 0 : index
    %c0_79 = arith.constant 0 : index
    %c17_80 = arith.constant 17 : index
    %c0_81 = arith.constant 0 : index
    %43 = vector.load %arg14[%c0_78, %c0_79, %c17_80, %c0_81] : memref<1x18x18x32xf32, #tpu.memory_space<vmem>>, vector<1x18x1x32xf32>
    tpu.vector_store %arg14[%c0_78, %c0_79, %c17_80, %c0_81], %39 {strides = array<i32>} : memref<1x18x18x32xf32, #tpu.memory_space<vmem>>, vector<1x18x1x32xf32>,
    %c0_82 = arith.constant 0 : index
    %c1_83 = arith.constant 1 : index
    %c1_84 = arith.constant 1 : index
    %c0_85 = arith.constant 0 : index
    %44 = vector.load %arg14[%c0_82, %c1_83, %c1_84, %c0_85] : memref<1x18x18x32xf32, #tpu.memory_space<vmem>>, vector<1x16x16x32xf32>
    tpu.vector_store %arg14[%c0_82, %c1_83, %c1_84, %c0_85], %37 {strides = array<i32>} : memref<1x18x18x32xf32, #tpu.memory_space<vmem>>, vector<1x16x16x32xf32>,
    %cst_86 = arith.constant 0.000000e+00 : f32
    %45 = vector.broadcast %cst_86 : f32 to vector<256x64xf32>
    %c0_87 = arith.constant 0 : index
    %c0_88 = arith.constant 0 : index
    %c0_89 = arith.constant 0 : index
    %c0_90 = arith.constant 0 : index
    %46 = vector.load %arg14[%c0_87, %c0_88, %c0_89, %c0_90] : memref<1x18x18x32xf32, #tpu.memory_space<vmem>>, vector<1x16x16x32xf32>
    %47 = vector.shape_cast %46 : vector<1x16x16x32xf32> to vector<256x32xf32>
    %c0_91 = arith.constant 0 : index
    %c0_92 = arith.constant 0 : index
    %c1_93 = arith.constant 1 : index
    %c0_94 = arith.constant 0 : index
    %48 = vector.load %arg14[%c0_91, %c0_92, %c1_93, %c0_94] : memref<1x18x18x32xf32, #tpu.memory_space<vmem>>, vector<1x16x16x32xf32>
    %49 = vector.shape_cast %48 : vector<1x16x16x32xf32> to vector<256x32xf32>
    %c0_95 = arith.constant 0 : index
    %c0_96 = arith.constant 0 : index
    %c2_97 = arith.constant 2 : index
    %c0_98 = arith.constant 0 : index
    %50 = vector.load %arg14[%c0_95, %c0_96, %c2_97, %c0_98] : memref<1x18x18x32xf32, #tpu.memory_space<vmem>>, vector<1x16x16x32xf32>
    %51 = vector.shape_cast %50 : vector<1x16x16x32xf32> to vector<256x32xf32>
    %52 = tpu.concatenate %47, %49, %51 in 1 : vector<256x32xf32>, vector<256x32xf32>, vector<256x32xf32> -> vector<256x96xf32>
    %c0_99 = arith.constant 0 : index
    %c0_100 = arith.constant 0 : index
    %53 = vector.load %arg4[%c0_99, %c0_100] : memref<288x64xbf16, #tpu.memory_space<vmem>>, vector<96x64xbf16>
    %54 = arith.truncf %52 : vector<256x96xf32> to vector<256x96xbf16>
    %cst_101 = arith.constant dense<0.000000e+00> : vector<256x64xf32>
    %55 = tpu.matmul %54, %53, %cst_101 {dimension_numbers = #tpu.dot_dimension_numbers<[1], [0], [0], [1], [0, 0, 1, 1], [], []>} : vector<256x96xbf16>, vector<96x64xbf16>, vector<256x64xf32> -> vector<256x64xf32>
    %56 = arith.addf %45, %55 : vector<256x64xf32>
    %c0_102 = arith.constant 0 : index
    %c1_103 = arith.constant 1 : index
    %c0_104 = arith.constant 0 : index
    %c0_105 = arith.constant 0 : index
    %57 = vector.load %arg14[%c0_102, %c1_103, %c0_104, %c0_105] : memref<1x18x18x32xf32, #tpu.memory_space<vmem>>, vector<1x16x16x32xf32>
    %58 = vector.shape_cast %57 : vector<1x16x16x32xf32> to vector<256x32xf32>
    %c0_106 = arith.constant 0 : index
    %c1_107 = arith.constant 1 : index
    %c1_108 = arith.constant 1 : index
    %c0_109 = arith.constant 0 : index
    %59 = vector.load %arg14[%c0_106, %c1_107, %c1_108, %c0_109] : memref<1x18x18x32xf32, #tpu.memory_space<vmem>>, vector<1x16x16x32xf32>
    %60 = vector.shape_cast %59 : vector<1x16x16x32xf32> to vector<256x32xf32>
    %c0_110 = arith.constant 0 : index
    %c1_111 = arith.constant 1 : index
    %c2_112 = arith.constant 2 : index
    %c0_113 = arith.constant 0 : index
    %61 = vector.load %arg14[%c0_110, %c1_111, %c2_112, %c0_113] : memref<1x18x18x32xf32, #tpu.memory_space<vmem>>, vector<1x16x16x32xf32>
    %62 = vector.shape_cast %61 : vector<1x16x16x32xf32> to vector<256x32xf32>
    %63 = tpu.concatenate %58, %60, %62 in 1 : vector<256x32xf32>, vector<256x32xf32>, vector<256x32xf32> -> vector<256x96xf32>
    %c96 = arith.constant 96 : index
    %c0_114 = arith.constant 0 : index
    %64 = vector.load %arg4[%c96, %c0_114] : memref<288x64xbf16, #tpu.memory_space<vmem>>, vector<96x64xbf16>
    %65 = arith.truncf %63 : vector<256x96xf32> to vector<256x96xbf16>
    %cst_115 = arith.constant dense<0.000000e+00> : vector<256x64xf32>
    %66 = tpu.matmul %65, %64, %cst_115 {dimension_numbers = #tpu.dot_dimension_numbers<[1], [0], [0], [1], [0, 0, 1, 1], [], []>} : vector<256x96xbf16>, vector<96x64xbf16>, vector<256x64xf32> -> vector<256x64xf32>
    %67 = arith.addf %56, %66 : vector<256x64xf32>
    %c0_116 = arith.constant 0 : index
    %c2_117 = arith.constant 2 : index
    %c0_118 = arith.constant 0 : index
    %c0_119 = arith.constant 0 : index
    %68 = vector.load %arg14[%c0_116, %c2_117, %c0_118, %c0_119] : memref<1x18x18x32xf32, #tpu.memory_space<vmem>>, vector<1x16x16x32xf32>
    %69 = vector.shape_cast %68 : vector<1x16x16x32xf32> to vector<256x32xf32>
    %c0_120 = arith.constant 0 : index
    %c2_121 = arith.constant 2 : index
    %c1_122 = arith.constant 1 : index
    %c0_123 = arith.constant 0 : index
    %70 = vector.load %arg14[%c0_120, %c2_121, %c1_122, %c0_123] : memref<1x18x18x32xf32, #tpu.memory_space<vmem>>, vector<1x16x16x32xf32>
    %71 = vector.shape_cast %70 : vector<1x16x16x32xf32> to vector<256x32xf32>
    %c0_124 = arith.constant 0 : index
    %c2_125 = arith.constant 2 : index
    %c2_126 = arith.constant 2 : index
    %c0_127 = arith.constant 0 : index
    %72 = vector.load %arg14[%c0_124, %c2_125, %c2_126, %c0_127] : memref<1x18x18x32xf32, #tpu.memory_space<vmem>>, vector<1x16x16x32xf32>
    %73 = vector.shape_cast %72 : vector<1x16x16x32xf32> to vector<256x32xf32>
    %74 = tpu.concatenate %69, %71, %73 in 1 : vector<256x32xf32>, vector<256x32xf32>, vector<256x32xf32> -> vector<256x96xf32>
    %c192 = arith.constant 192 : index
    %c0_128 = arith.constant 0 : index
    %75 = vector.load %arg4[%c192, %c0_128] : memref<288x64xbf16, #tpu.memory_space<vmem>>, vector<96x64xbf16>
    %76 = arith.truncf %74 : vector<256x96xf32> to vector<256x96xbf16>
    %cst_129 = arith.constant dense<0.000000e+00> : vector<256x64xf32>
    %77 = tpu.matmul %76, %75, %cst_129 {dimension_numbers = #tpu.dot_dimension_numbers<[1], [0], [0], [1], [0, 0, 1, 1], [], []>} : vector<256x96xbf16>, vector<96x64xbf16>, vector<256x64xf32> -> vector<256x64xf32>
    %78 = arith.addf %67, %77 : vector<256x64xf32>
    %c0_130 = arith.constant 0 : index
    %c0_131 = arith.constant 0 : index
    %79 = vector.load %arg5[%c0_130, %c0_131] : memref<1x64xf32, #tpu.memory_space<vmem>>, vector<1x64xf32>
    %80 = vector.broadcast %79 : vector<1x64xf32> to vector<256x64xf32>
    %81 = arith.addf %78, %80 : vector<256x64xf32>
    %cst_132 = arith.constant 0.000000e+00 : f32
    %82 = vector.broadcast %cst_132 : f32 to vector<256x64xf32>
    %83 = arith.maximumf %81, %82 : vector<256x64xf32>
    %84 = vector.shape_cast %83 : vector<256x64xf32> to vector<1x16x16x64xf32>
    %c0_133 = arith.constant 0 : index
    %c0_134 = arith.constant 0 : index
    %c0_135 = arith.constant 0 : index
    %c0_136 = arith.constant 0 : index
    %85 = vector.load %arg15[%c0_133, %c0_134, %c0_135, %c0_136] : memref<1x16x16x64xf32, #tpu.memory_space<vmem>>, vector<1x16x16x64xf32>
    tpu.vector_store %arg15[%c0_133, %c0_134, %c0_135, %c0_136], %84 {strides = array<i32>} : memref<1x16x16x64xf32, #tpu.memory_space<vmem>>, vector<1x16x16x64xf32>,
    %c0_137 = arith.constant 0 : index
    %c0_138 = arith.constant 0 : index
    %c0_139 = arith.constant 0 : index
    %c0_140 = arith.constant 0 : index
    %86 = tpu.strided_load %arg15[%c0_137, %c0_138, %c0_139, %c0_140] {strides = array<i32: 1, 2, 1, 1>} : memref<1x16x16x64xf32, #tpu.memory_space<vmem>>, vector<1x8x16x64xf32>
    %c0_141 = arith.constant 0 : index
    %c1_142 = arith.constant 1 : index
    %c0_143 = arith.constant 0 : index
    %c0_144 = arith.constant 0 : index
    %87 = tpu.strided_load %arg15[%c0_141, %c1_142, %c0_143, %c0_144] {strides = array<i32: 1, 2, 1, 1>} : memref<1x16x16x64xf32, #tpu.memory_space<vmem>>, vector<1x8x16x64xf32>
    %88 = arith.maximumf %86, %87 : vector<1x8x16x64xf32>
    %c0_145 = arith.constant 0 : index
    %c0_146 = arith.constant 0 : index
    %c0_147 = arith.constant 0 : index
    %c0_148 = arith.constant 0 : index
    %89 = vector.load %arg16[%c0_145, %c0_146, %c0_147, %c0_148] : memref<1x8x16x64xf32, #tpu.memory_space<vmem>>, vector<1x8x16x64xf32>
    tpu.vector_store %arg16[%c0_145, %c0_146, %c0_147, %c0_148], %88 {strides = array<i32>} : memref<1x8x16x64xf32, #tpu.memory_space<vmem>>, vector<1x8x16x64xf32>,
    %c0_149 = arith.constant 0 : index
    %c0_150 = arith.constant 0 : index
    %c0_151 = arith.constant 0 : index
    %c0_152 = arith.constant 0 : index
    %90 = tpu.strided_load %arg16[%c0_149, %c0_150, %c0_151, %c0_152] {strides = array<i32: 1, 1, 2, 1>} : memref<1x8x16x64xf32, #tpu.memory_space<vmem>>, vector<1x8x8x64xf32>
    %c0_153 = arith.constant 0 : index
    %c0_154 = arith.constant 0 : index
    %c1_155 = arith.constant 1 : index
    %c0_156 = arith.constant 0 : index
    %91 = tpu.strided_load %arg16[%c0_153, %c0_154, %c1_155, %c0_156] {strides = array<i32: 1, 1, 2, 1>} : memref<1x8x16x64xf32, #tpu.memory_space<vmem>>, vector<1x8x8x64xf32>
    %92 = arith.maximumf %90, %91 : vector<1x8x8x64xf32>
    %cst_157 = arith.constant 0.000000e+00 : f32
    %93 = vector.broadcast %cst_157 : f32 to vector<1x1x10x64xf32>
    %cst_158 = arith.constant 0.000000e+00 : f32
    %94 = vector.broadcast %cst_158 : f32 to vector<1x10x1x64xf32>
    %c0_159 = arith.constant 0 : index
    %c0_160 = arith.constant 0 : index
    %c0_161 = arith.constant 0 : index
    %c0_162 = arith.constant 0 : index
    %95 = vector.load %arg17[%c0_159, %c0_160, %c0_161, %c0_162] : memref<1x10x10x64xf32, #tpu.memory_space<vmem>>, vector<1x1x10x64xf32>
    tpu.vector_store %arg17[%c0_159, %c0_160, %c0_161, %c0_162], %93 {strides = array<i32>} : memref<1x10x10x64xf32, #tpu.memory_space<vmem>>, vector<1x1x10x64xf32>,
    %c0_163 = arith.constant 0 : index
    %c9 = arith.constant 9 : index
    %c0_164 = arith.constant 0 : index
    %c0_165 = arith.constant 0 : index
    %96 = vector.load %arg17[%c0_163, %c9, %c0_164, %c0_165] : memref<1x10x10x64xf32, #tpu.memory_space<vmem>>, vector<1x1x10x64xf32>
    tpu.vector_store %arg17[%c0_163, %c9, %c0_164, %c0_165], %93 {strides = array<i32>} : memref<1x10x10x64xf32, #tpu.memory_space<vmem>>, vector<1x1x10x64xf32>,
    %c0_166 = arith.constant 0 : index
    %c0_167 = arith.constant 0 : index
    %c0_168 = arith.constant 0 : index
    %c0_169 = arith.constant 0 : index
    %97 = vector.load %arg17[%c0_166, %c0_167, %c0_168, %c0_169] : memref<1x10x10x64xf32, #tpu.memory_space<vmem>>, vector<1x10x1x64xf32>
    tpu.vector_store %arg17[%c0_166, %c0_167, %c0_168, %c0_169], %94 {strides = array<i32>} : memref<1x10x10x64xf32, #tpu.memory_space<vmem>>, vector<1x10x1x64xf32>,
    %c0_170 = arith.constant 0 : index
    %c0_171 = arith.constant 0 : index
    %c9_172 = arith.constant 9 : index
    %c0_173 = arith.constant 0 : index
    %98 = vector.load %arg17[%c0_170, %c0_171, %c9_172, %c0_173] : memref<1x10x10x64xf32, #tpu.memory_space<vmem>>, vector<1x10x1x64xf32>
    tpu.vector_store %arg17[%c0_170, %c0_171, %c9_172, %c0_173], %94 {strides = array<i32>} : memref<1x10x10x64xf32, #tpu.memory_space<vmem>>, vector<1x10x1x64xf32>,
    %c0_174 = arith.constant 0 : index
    %c1_175 = arith.constant 1 : index
    %c1_176 = arith.constant 1 : index
    %c0_177 = arith.constant 0 : index
    %99 = vector.load %arg17[%c0_174, %c1_175, %c1_176, %c0_177] : memref<1x10x10x64xf32, #tpu.memory_space<vmem>>, vector<1x8x8x64xf32>
    tpu.vector_store %arg17[%c0_174, %c1_175, %c1_176, %c0_177], %92 {strides = array<i32>} : memref<1x10x10x64xf32, #tpu.memory_space<vmem>>, vector<1x8x8x64xf32>,
    %cst_178 = arith.constant 0.000000e+00 : f32
    %100 = vector.broadcast %cst_178 : f32 to vector<64x128xf32>
    %c0_179 = arith.constant 0 : index
    %c0_180 = arith.constant 0 : index
    %c0_181 = arith.constant 0 : index
    %c0_182 = arith.constant 0 : index
    %101 = vector.load %arg17[%c0_179, %c0_180, %c0_181, %c0_182] : memref<1x10x10x64xf32, #tpu.memory_space<vmem>>, vector<1x8x8x64xf32>
    %102 = vector.shape_cast %101 : vector<1x8x8x64xf32> to vector<64x64xf32>
    %c0_183 = arith.constant 0 : index
    %c0_184 = arith.constant 0 : index
    %c1_185 = arith.constant 1 : index
    %c0_186 = arith.constant 0 : index
    %103 = vector.load %arg17[%c0_183, %c0_184, %c1_185, %c0_186] : memref<1x10x10x64xf32, #tpu.memory_space<vmem>>, vector<1x8x8x64xf32>
    %104 = vector.shape_cast %103 : vector<1x8x8x64xf32> to vector<64x64xf32>
    %c0_187 = arith.constant 0 : index
    %c0_188 = arith.constant 0 : index
    %c2_189 = arith.constant 2 : index
    %c0_190 = arith.constant 0 : index
    %105 = vector.load %arg17[%c0_187, %c0_188, %c2_189, %c0_190] : memref<1x10x10x64xf32, #tpu.memory_space<vmem>>, vector<1x8x8x64xf32>
    %106 = vector.shape_cast %105 : vector<1x8x8x64xf32> to vector<64x64xf32>
    %107 = tpu.concatenate %102, %104, %106 in 1 : vector<64x64xf32>, vector<64x64xf32>, vector<64x64xf32> -> vector<64x192xf32>
    %c0_191 = arith.constant 0 : index
    %c0_192 = arith.constant 0 : index
    %108 = vector.load %arg6[%c0_191, %c0_192] : memref<576x128xbf16, #tpu.memory_space<vmem>>, vector<192x128xbf16>
    %109 = arith.truncf %107 : vector<64x192xf32> to vector<64x192xbf16>
    %cst_193 = arith.constant dense<0.000000e+00> : vector<64x128xf32>
    %110 = tpu.matmul %109, %108, %cst_193 {dimension_numbers = #tpu.dot_dimension_numbers<[1], [0], [0], [1], [0, 0, 1, 1], [], []>} : vector<64x192xbf16>, vector<192x128xbf16>, vector<64x128xf32> -> vector<64x128xf32>
    %111 = arith.addf %100, %110 : vector<64x128xf32>
    %c0_194 = arith.constant 0 : index
    %c1_195 = arith.constant 1 : index
    %c0_196 = arith.constant 0 : index
    %c0_197 = arith.constant 0 : index
    %112 = vector.load %arg17[%c0_194, %c1_195, %c0_196, %c0_197] : memref<1x10x10x64xf32, #tpu.memory_space<vmem>>, vector<1x8x8x64xf32>
    %113 = vector.shape_cast %112 : vector<1x8x8x64xf32> to vector<64x64xf32>
    %c0_198 = arith.constant 0 : index
    %c1_199 = arith.constant 1 : index
    %c1_200 = arith.constant 1 : index
    %c0_201 = arith.constant 0 : index
    %114 = vector.load %arg17[%c0_198, %c1_199, %c1_200, %c0_201] : memref<1x10x10x64xf32, #tpu.memory_space<vmem>>, vector<1x8x8x64xf32>
    %115 = vector.shape_cast %114 : vector<1x8x8x64xf32> to vector<64x64xf32>
    %c0_202 = arith.constant 0 : index
    %c1_203 = arith.constant 1 : index
    %c2_204 = arith.constant 2 : index
    %c0_205 = arith.constant 0 : index
    %116 = vector.load %arg17[%c0_202, %c1_203, %c2_204, %c0_205] : memref<1x10x10x64xf32, #tpu.memory_space<vmem>>, vector<1x8x8x64xf32>
    %117 = vector.shape_cast %116 : vector<1x8x8x64xf32> to vector<64x64xf32>
    %118 = tpu.concatenate %113, %115, %117 in 1 : vector<64x64xf32>, vector<64x64xf32>, vector<64x64xf32> -> vector<64x192xf32>
    %c192_206 = arith.constant 192 : index
    %c0_207 = arith.constant 0 : index
    %119 = vector.load %arg6[%c192_206, %c0_207] : memref<576x128xbf16, #tpu.memory_space<vmem>>, vector<192x128xbf16>
    %120 = arith.truncf %118 : vector<64x192xf32> to vector<64x192xbf16>
    %cst_208 = arith.constant dense<0.000000e+00> : vector<64x128xf32>
    %121 = tpu.matmul %120, %119, %cst_208 {dimension_numbers = #tpu.dot_dimension_numbers<[1], [0], [0], [1], [0, 0, 1, 1], [], []>} : vector<64x192xbf16>, vector<192x128xbf16>, vector<64x128xf32> -> vector<64x128xf32>
    %122 = arith.addf %111, %121 : vector<64x128xf32>
    %c0_209 = arith.constant 0 : index
    %c2_210 = arith.constant 2 : index
    %c0_211 = arith.constant 0 : index
    %c0_212 = arith.constant 0 : index
    %123 = vector.load %arg17[%c0_209, %c2_210, %c0_211, %c0_212] : memref<1x10x10x64xf32, #tpu.memory_space<vmem>>, vector<1x8x8x64xf32>
    %124 = vector.shape_cast %123 : vector<1x8x8x64xf32> to vector<64x64xf32>
    %c0_213 = arith.constant 0 : index
    %c2_214 = arith.constant 2 : index
    %c1_215 = arith.constant 1 : index
    %c0_216 = arith.constant 0 : index
    %125 = vector.load %arg17[%c0_213, %c2_214, %c1_215, %c0_216] : memref<1x10x10x64xf32, #tpu.memory_space<vmem>>, vector<1x8x8x64xf32>
    %126 = vector.shape_cast %125 : vector<1x8x8x64xf32> to vector<64x64xf32>
    %c0_217 = arith.constant 0 : index
    %c2_218 = arith.constant 2 : index
    %c2_219 = arith.constant 2 : index
    %c0_220 = arith.constant 0 : index
    %127 = vector.load %arg17[%c0_217, %c2_218, %c2_219, %c0_220] : memref<1x10x10x64xf32, #tpu.memory_space<vmem>>, vector<1x8x8x64xf32>
    %128 = vector.shape_cast %127 : vector<1x8x8x64xf32> to vector<64x64xf32>
    %129 = tpu.concatenate %124, %126, %128 in 1 : vector<64x64xf32>, vector<64x64xf32>, vector<64x64xf32> -> vector<64x192xf32>
    %c384 = arith.constant 384 : index
    %c0_221 = arith.constant 0 : index
    %130 = vector.load %arg6[%c384, %c0_221] : memref<576x128xbf16, #tpu.memory_space<vmem>>, vector<192x128xbf16>
    %131 = arith.truncf %129 : vector<64x192xf32> to vector<64x192xbf16>
    %cst_222 = arith.constant dense<0.000000e+00> : vector<64x128xf32>
    %132 = tpu.matmul %131, %130, %cst_222 {dimension_numbers = #tpu.dot_dimension_numbers<[1], [0], [0], [1], [0, 0, 1, 1], [], []>} : vector<64x192xbf16>, vector<192x128xbf16>, vector<64x128xf32> -> vector<64x128xf32>
    %133 = arith.addf %122, %132 : vector<64x128xf32>
    %c0_223 = arith.constant 0 : index
    %c0_224 = arith.constant 0 : index
    %134 = vector.load %arg7[%c0_223, %c0_224] : memref<1x128xf32, #tpu.memory_space<vmem>>, vector<1x128xf32>
    %135 = vector.broadcast %134 : vector<1x128xf32> to vector<64x128xf32>
    %136 = arith.addf %133, %135 : vector<64x128xf32>
    %cst_225 = arith.constant 0.000000e+00 : f32
    %137 = vector.broadcast %cst_225 : f32 to vector<64x128xf32>
    %138 = arith.maximumf %136, %137 : vector<64x128xf32>
    %139 = vector.shape_cast %138 : vector<64x128xf32> to vector<1x8x8x128xf32>
    %c0_226 = arith.constant 0 : index
    %c0_227 = arith.constant 0 : index
    %c0_228 = arith.constant 0 : index
    %c0_229 = arith.constant 0 : index
    %140 = vector.load %arg18[%c0_226, %c0_227, %c0_228, %c0_229] : memref<1x8x8x128xf32, #tpu.memory_space<vmem>>, vector<1x8x8x128xf32>
    tpu.vector_store %arg18[%c0_226, %c0_227, %c0_228, %c0_229], %139 {strides = array<i32>} : memref<1x8x8x128xf32, #tpu.memory_space<vmem>>, vector<1x8x8x128xf32>,
    %c0_230 = arith.constant 0 : index
    %c0_231 = arith.constant 0 : index
    %c0_232 = arith.constant 0 : index
    %c0_233 = arith.constant 0 : index
    %141 = tpu.strided_load %arg18[%c0_230, %c0_231, %c0_232, %c0_233] {strides = array<i32: 1, 2, 1, 1>} : memref<1x8x8x128xf32, #tpu.memory_space<vmem>>, vector<1x4x8x128xf32>
    %c0_234 = arith.constant 0 : index
    %c1_235 = arith.constant 1 : index
    %c0_236 = arith.constant 0 : index
    %c0_237 = arith.constant 0 : index
    %142 = tpu.strided_load %arg18[%c0_234, %c1_235, %c0_236, %c0_237] {strides = array<i32: 1, 2, 1, 1>} : memref<1x8x8x128xf32, #tpu.memory_space<vmem>>, vector<1x4x8x128xf32>
    %143 = arith.maximumf %141, %142 : vector<1x4x8x128xf32>
    %c0_238 = arith.constant 0 : index
    %c0_239 = arith.constant 0 : index
    %c0_240 = arith.constant 0 : index
    %c0_241 = arith.constant 0 : index
    %144 = vector.load %arg19[%c0_238, %c0_239, %c0_240, %c0_241] : memref<1x4x8x128xf32, #tpu.memory_space<vmem>>, vector<1x4x8x128xf32>
    tpu.vector_store %arg19[%c0_238, %c0_239, %c0_240, %c0_241], %143 {strides = array<i32>} : memref<1x4x8x128xf32, #tpu.memory_space<vmem>>, vector<1x4x8x128xf32>,
    %c0_242 = arith.constant 0 : index
    %c0_243 = arith.constant 0 : index
    %c0_244 = arith.constant 0 : index
    %c0_245 = arith.constant 0 : index
    %145 = tpu.strided_load %arg19[%c0_242, %c0_243, %c0_244, %c0_245] {strides = array<i32: 1, 1, 2, 1>} : memref<1x4x8x128xf32, #tpu.memory_space<vmem>>, vector<1x4x4x128xf32>
    %c0_246 = arith.constant 0 : index
    %c0_247 = arith.constant 0 : index
    %c1_248 = arith.constant 1 : index
    %c0_249 = arith.constant 0 : index
    %146 = tpu.strided_load %arg19[%c0_246, %c0_247, %c1_248, %c0_249] {strides = array<i32: 1, 1, 2, 1>} : memref<1x4x8x128xf32, #tpu.memory_space<vmem>>, vector<1x4x4x128xf32>
    %147 = arith.maximumf %145, %146 : vector<1x4x4x128xf32>
    %148 = vector.extract_strided_slice %147 {offsets = [0, 0, 0, 0], sizes = [1, 1, 1, 128], strides = [1, 1, 1, 1]} : vector<1x4x4x128xf32> to vector<1x1x1x128xf32>
    %149 = vector.shape_cast %148 : vector<1x1x1x128xf32> to vector<1x128xf32>
    %150 = vector.extract_strided_slice %147 {offsets = [0, 0, 1, 0], sizes = [1, 1, 1, 128], strides = [1, 1, 1, 1]} : vector<1x4x4x128xf32> to vector<1x1x1x128xf32>
    %151 = vector.shape_cast %150 : vector<1x1x1x128xf32> to vector<1x128xf32>
    %152 = vector.extract_strided_slice %147 {offsets = [0, 0, 2, 0], sizes = [1, 1, 1, 128], strides = [1, 1, 1, 1]} : vector<1x4x4x128xf32> to vector<1x1x1x128xf32>
    %153 = vector.shape_cast %152 : vector<1x1x1x128xf32> to vector<1x128xf32>
    %154 = vector.extract_strided_slice %147 {offsets = [0, 0, 3, 0], sizes = [1, 1, 1, 128], strides = [1, 1, 1, 1]} : vector<1x4x4x128xf32> to vector<1x1x1x128xf32>
    %155 = vector.shape_cast %154 : vector<1x1x1x128xf32> to vector<1x128xf32>
    %156 = vector.extract_strided_slice %147 {offsets = [0, 1, 0, 0], sizes = [1, 1, 1, 128], strides = [1, 1, 1, 1]} : vector<1x4x4x128xf32> to vector<1x1x1x128xf32>
    %157 = vector.shape_cast %156 : vector<1x1x1x128xf32> to vector<1x128xf32>
    %158 = vector.extract_strided_slice %147 {offsets = [0, 1, 1, 0], sizes = [1, 1, 1, 128], strides = [1, 1, 1, 1]} : vector<1x4x4x128xf32> to vector<1x1x1x128xf32>
    %159 = vector.shape_cast %158 : vector<1x1x1x128xf32> to vector<1x128xf32>
    %160 = vector.extract_strided_slice %147 {offsets = [0, 1, 2, 0], sizes = [1, 1, 1, 128], strides = [1, 1, 1, 1]} : vector<1x4x4x128xf32> to vector<1x1x1x128xf32>
    %161 = vector.shape_cast %160 : vector<1x1x1x128xf32> to vector<1x128xf32>
    %162 = vector.extract_strided_slice %147 {offsets = [0, 1, 3, 0], sizes = [1, 1, 1, 128], strides = [1, 1, 1, 1]} : vector<1x4x4x128xf32> to vector<1x1x1x128xf32>
    %163 = vector.shape_cast %162 : vector<1x1x1x128xf32> to vector<1x128xf32>
    %164 = vector.extract_strided_slice %147 {offsets = [0, 2, 0, 0], sizes = [1, 1, 1, 128], strides = [1, 1, 1, 1]} : vector<1x4x4x128xf32> to vector<1x1x1x128xf32>
    %165 = vector.shape_cast %164 : vector<1x1x1x128xf32> to vector<1x128xf32>
    %166 = vector.extract_strided_slice %147 {offsets = [0, 2, 1, 0], sizes = [1, 1, 1, 128], strides = [1, 1, 1, 1]} : vector<1x4x4x128xf32> to vector<1x1x1x128xf32>
    %167 = vector.shape_cast %166 : vector<1x1x1x128xf32> to vector<1x128xf32>
    %168 = vector.extract_strided_slice %147 {offsets = [0, 2, 2, 0], sizes = [1, 1, 1, 128], strides = [1, 1, 1, 1]} : vector<1x4x4x128xf32> to vector<1x1x1x128xf32>
    %169 = vector.shape_cast %168 : vector<1x1x1x128xf32> to vector<1x128xf32>
    %170 = vector.extract_strided_slice %147 {offsets = [0, 2, 3, 0], sizes = [1, 1, 1, 128], strides = [1, 1, 1, 1]} : vector<1x4x4x128xf32> to vector<1x1x1x128xf32>
    %171 = vector.shape_cast %170 : vector<1x1x1x128xf32> to vector<1x128xf32>
    %172 = vector.extract_strided_slice %147 {offsets = [0, 3, 0, 0], sizes = [1, 1, 1, 128], strides = [1, 1, 1, 1]} : vector<1x4x4x128xf32> to vector<1x1x1x128xf32>
    %173 = vector.shape_cast %172 : vector<1x1x1x128xf32> to vector<1x128xf32>
    %174 = vector.extract_strided_slice %147 {offsets = [0, 3, 1, 0], sizes = [1, 1, 1, 128], strides = [1, 1, 1, 1]} : vector<1x4x4x128xf32> to vector<1x1x1x128xf32>
    %175 = vector.shape_cast %174 : vector<1x1x1x128xf32> to vector<1x128xf32>
    %176 = vector.extract_strided_slice %147 {offsets = [0, 3, 2, 0], sizes = [1, 1, 1, 128], strides = [1, 1, 1, 1]} : vector<1x4x4x128xf32> to vector<1x1x1x128xf32>
    %177 = vector.shape_cast %176 : vector<1x1x1x128xf32> to vector<1x128xf32>
    %178 = vector.extract_strided_slice %147 {offsets = [0, 3, 3, 0], sizes = [1, 1, 1, 128], strides = [1, 1, 1, 1]} : vector<1x4x4x128xf32> to vector<1x1x1x128xf32>
    %179 = vector.shape_cast %178 : vector<1x1x1x128xf32> to vector<1x128xf32>
    %180 = tpu.concatenate %149, %151, %153, %155, %157, %159, %161, %163, %165, %167, %169, %171, %173, %175, %177, %179 in 1 : vector<1x128xf32>, vector<1x128xf32>, vector<1x128xf32>, vector<1x128xf32>, vector<1x128xf32>, vector<1x128xf32>, vector<1x128xf32>, vector<1x128xf32>, vector<1x128xf32>, vector<1x128xf32>, vector<1x128xf32>, vector<1x128xf32>, vector<1x128xf32>, vector<1x128xf32>, vector<1x128xf32>, vector<1x128xf32> -> vector<1x2048xf32>
    %181 = arith.truncf %180 : vector<1x2048xf32> to vector<1x2048xbf16>
    %c0_250 = arith.constant 0 : index
    %c0_251 = arith.constant 0 : index
    %182 = vector.load %arg8[%c0_250, %c0_251] : memref<2048x256xbf16, #tpu.memory_space<vmem>>, vector<2048x256xbf16>
    %cst_252 = arith.constant dense<0.000000e+00> : vector<1x256xf32>
    %183 = tpu.matmul %181, %182, %cst_252 {dimension_numbers = #tpu.dot_dimension_numbers<[1], [0], [0], [1], [0, 0, 1, 1], [], []>} : vector<1x2048xbf16>, vector<2048x256xbf16>, vector<1x256xf32> -> vector<1x256xf32>
    %c0_253 = arith.constant 0 : index
    %c0_254 = arith.constant 0 : index
    %184 = vector.load %arg9[%c0_253, %c0_254] : memref<1x256xf32, #tpu.memory_space<vmem>>, vector<1x256xf32>
    %185 = arith.addf %183, %184 : vector<1x256xf32>
    %cst_255 = arith.constant 0.000000e+00 : f32
    %186 = vector.broadcast %cst_255 : f32 to vector<1x256xf32>
    %187 = arith.maximumf %185, %186 : vector<1x256xf32>
    %188 = arith.truncf %187 : vector<1x256xf32> to vector<1x256xbf16>
    %c0_256 = arith.constant 0 : index
    %c0_257 = arith.constant 0 : index
    %189 = vector.load %arg10[%c0_256, %c0_257] : memref<256x10xbf16, #tpu.memory_space<vmem>>, vector<256x10xbf16>
    %cst_258 = arith.constant dense<0.000000e+00> : vector<1x10xf32>
    %190 = tpu.matmul %188, %189, %cst_258 {dimension_numbers = #tpu.dot_dimension_numbers<[1], [0], [0], [1], [0, 0, 1, 1], [], []>} : vector<1x256xbf16>, vector<256x10xbf16>, vector<1x10xf32> -> vector<1x10xf32>
    %c0_259 = arith.constant 0 : index
    %c0_260 = arith.constant 0 : index
    %191 = vector.load %arg11[%c0_259, %c0_260] : memref<1x10xf32, #tpu.memory_space<vmem>>, vector<1x10xf32>
    %192 = arith.addf %190, %191 : vector<1x10xf32>
    %193 = vector.shape_cast %192 : vector<1x10xf32> to vector<1x1x10xf32>
    %c0_261 = arith.constant 0 : index
    %c0_262 = arith.constant 0 : index
    %c0_263 = arith.constant 0 : index
    %194 = vector.load %arg12[%c0_261, %c0_262, %c0_263] : memref<1x1x10xf32, #tpu.memory_space<vmem>>, vector<1x1x10xf32>
    tpu.vector_store %arg12[%c0_261, %c0_262, %c0_263], %193 {strides = array<i32>} : memref<1x1x10xf32, #tpu.memory_space<vmem>>, vector<1x1x10xf32>,
    return
  }
  func.func @transform_0(%arg0: i32) -> (i32, i32, i32, i32) {
    %c0_i32 = arith.constant 0 : i32
    %c0_i32_0 = arith.constant 0 : i32
    %c0_i32_1 = arith.constant 0 : i32
    %c0_i32_2 = arith.constant 0 : i32
    return %arg0, %c0_i32, %c0_i32_0, %c0_i32_1 : i32, i32, i32, i32
  }
  func.func @transform_1(%arg0: i32) -> (i32, i32) {
    %c0_i32 = arith.constant 0 : i32
    %c0_i32_0 = arith.constant 0 : i32
    %c0_i32_1 = arith.constant 0 : i32
    return %c0_i32, %c0_i32_0 : i32, i32
  }
  func.func @transform_2(%arg0: i32) -> (i32, i32) {
    %c0_i32 = arith.constant 0 : i32
    %c0_i32_0 = arith.constant 0 : i32
    %c0_i32_1 = arith.constant 0 : i32
    return %c0_i32, %c0_i32_0 : i32, i32
  }
  func.func @transform_3(%arg0: i32) -> (i32, i32) {
    %c0_i32 = arith.constant 0 : i32
    %c0_i32_0 = arith.constant 0 : i32
    %c0_i32_1 = arith.constant 0 : i32
    return %c0_i32, %c0_i32_0 : i32, i32
  }
  func.func @transform_4(%arg0: i32) -> (i32, i32) {
    %c0_i32 = arith.constant 0 : i32
    %c0_i32_0 = arith.constant 0 : i32
    %c0_i32_1 = arith.constant 0 : i32
    return %c0_i32, %c0_i32_0 : i32, i32
  }
  func.func @transform_5(%arg0: i32) -> (i32, i32) {
    %c0_i32 = arith.constant 0 : i32
    %c0_i32_0 = arith.constant 0 : i32
    %c0_i32_1 = arith.constant 0 : i32
    return %c0_i32, %c0_i32_0 : i32, i32
  }
  func.func @transform_6(%arg0: i32) -> (i32, i32) {
    %c0_i32 = arith.constant 0 : i32
    %c0_i32_0 = arith.constant 0 : i32
    %c0_i32_1 = arith.constant 0 : i32
    return %c0_i32, %c0_i32_0 : i32, i32
  }
  func.func @transform_7(%arg0: i32) -> (i32, i32) {
    %c0_i32 = arith.constant 0 : i32
    %c0_i32_0 = arith.constant 0 : i32
    %c0_i32_1 = arith.constant 0 : i32
    return %c0_i32, %c0_i32_0 : i32, i32
  }
  func.func @transform_8(%arg0: i32) -> (i32, i32) {
    %c0_i32 = arith.constant 0 : i32
    %c0_i32_0 = arith.constant 0 : i32
    %c0_i32_1 = arith.constant 0 : i32
    return %c0_i32, %c0_i32_0 : i32, i32
  }
  func.func @transform_9(%arg0: i32) -> (i32, i32) {
    %c0_i32 = arith.constant 0 : i32
    %c0_i32_0 = arith.constant 0 : i32
    %c0_i32_1 = arith.constant 0 : i32
    return %c0_i32, %c0_i32_0 : i32, i32
  }
  func.func @transform_10(%arg0: i32) -> (i32, i32) {
    %c0_i32 = arith.constant 0 : i32
    %c0_i32_0 = arith.constant 0 : i32
    %c0_i32_1 = arith.constant 0 : i32
    return %c0_i32, %c0_i32_0 : i32, i32
  }
  func.func @transform_11(%arg0: i32) -> (i32, i32, i32) {
    %c0_i32 = arith.constant 0 : i32
    %c0_i32_0 = arith.constant 0 : i32
    %c0_i32_1 = arith.constant 0 : i32
    return %arg0, %c0_i32, %c0_i32_0 : i32, i32, i32
  }
}

</mosaic_0001>

<bundles_post_ra>
// kernel: cnn_forward.1
= control target key start
LH: loop header
LB: loop body
LE: loop exit
PB: predicated region body
PF: predicated region fallthrough
CT: control target
= control target key end

     0   :  { %s12871_s0 = inlined_call_operand.vmem [shape: f32[2,16,16,3], index: 0, kind: input, shape index: {}]   ;;  %s12872_s1 = inlined_call_operand.vmem [shape: bf16[27,32], index: 1, kind: input, shape index: {}]   ;;  %s12873_s2 = inlined_call_operand.vmem [shape: f32[1,32], index: 2, kind: input, shape index: {}]   ;;  %s12874_s3 = inlined_call_operand.vmem [shape: bf16[288,64], index: 3, kind: input, shape index: {}]   ;;  %s12875_s4 = inlined_call_operand.vmem [shape: f32[1,64], index: 4, kind: input, shape index: {}]   ;;  %s12876_s5 = inlined_call_operand.vmem [shape: bf16[576,128], index: 5, kind: input, shape index: {}]   ;;  %s12877_s6 = inlined_call_operand.vmem [shape: f32[1,128], index: 6, kind: input, shape index: {}]   ;;  %s12878_s7 = inlined_call_operand.hbm [shape: bf16[2048,256], index: 7, kind: input, shape index: {}]   ;;  %s12879_s8 = inlined_call_operand.vmem [shape: f32[1,256], index: 8, kind: input, shape index: {}]   ;;  %s12880_s9 = inlined_call_operand.vmem [shape: bf16[256,10], index: 9, kind: input, shape index: {}]   ;;  %s12881_s10 = inlined_call_operand.vmem [shape: f32[1,10], index: 10, kind: input, shape index: {}]   ;;  %s12882_s11 = inlined_call_operand.hbm [shape: f32[2,1,10], index: 11, kind: output, shape index: {}]  }
   0x1   :  { %12889 = sst [smem:[#allocation15_spill]] %s12871_s0 }
   0x2   :  { %16 = vsyncpa [#allocation10], 0 }
   0x3   :  { %17 = vsyncpa [#allocation11], 0 }
   0x4   :  { %19 = vsyncpa [#allocation11 + $0x1], 0  ;;  %s10362_s17 = smov 0   ;;  %s10364_s18 = smov 0  }
   0x5   :  { %s10366_s19 = smov 0   ;;  %s10368_s20 = smov 0  }
   0x6 LB: > { %s10383_s21 = sadd.s32 4294967295, %s10283_s20   ;;  %s7784_s22 = sadd.s32 4294967294, %s10283_s20   ;;  %s10283_s20 = sphi %s10368_s20, %s12902_s20   ;;  %s10279_s19 = sphi %s10366_s19, %s12901_s19   ;;  %s10275_s18 = sphi %s10364_s18, %s12900_s18   ;;  %s10271_s17 = sphi %s10362_s17, %s12899_s17  }
   0x7   : > { %s10387_s23 = sadd.s32 1, %s10283_s20   ;;  %s268_s24 = sadd.s32 1, %s10279_s19 }
   0x8   : > { %s265_s25 = ssub.s32 %s10283_s20, %s10387_s23  ;;  %p278_p0 = scmp.ne.s32.totalorder %s10279_s19, %s10275_s18 }
   0x9   : > { %p266_p1 = scmp.eq.s32.totalorder %s265_s25, 0  ;;  %p279_p2 = scmp.eq.s32.totalorder %s10383_s21, 1 }
   0xa   : > { %p284_p3 = scmp.ne.s32.totalorder %s10275_s18, %s10271_s17  ;;  %p285_p4 = scmp.eq.s32.totalorder %s7784_s22, 1 }
   0xb   : > { %s10398_s26 = scalar_select %p266_p1, %s10279_s19, %s268_s24  }
   0xc   : > { %p10400_p5 = por %p279_p2, %p278_p0  ;;  %p10404_p6 = por %p285_p4, %p284_p3 }
   0xd   : > { %p7785_p7 = scmp.ge.s32.totalorder %s10283_s20, 1  ;;  %p292_p8 = scmp.lt.s32.totalorder %s10283_s20, 3 }
   0xe   : > { %s12891_s28 = scalar_select %p10404_p6, 1, 0 }
   0xf   : > { %p8491_p9 = scmp.eq.s32.totalorder %s10383_s21, 0  ;;  %p10411_p10 = pnand %p7785_p7, %p292_p8 }
  0x10   : > { %s10285_s30 = smov [#allocation9]  }
  0x11   : > { %s322_s12 = sshll.u32 %s10285_s30, 4  ;;  %p8483_p11 = pneg %p10411_p10  ;;  %s323_s12 = int_to_ptr.vmem [resolvable:$true] %s322_s12 }
  0x12   : > { %s10204_s13 = scalar_lea.vmem %s323_s12, 32768  ;;  %p10212_p3 = scmp.lt.s32.totalorder %s323_s12, %s323_s12 }
  0x13   : > { %p8484_p12 = pnand %p8491_p9, %p8483_p11  ;;  %p10205_p0 = scmp.ne.s32.totalorder %s323_s12, %s10204_s13 }
  0x14   : > { %p10213_p4 = scmp.lt.s32.totalorder %s10204_s13, %s10204_s13 }
  0x15   : > { %p10195_p13 = pneg %p8484_p12 }
  0x16   : > { %p10214_p6 = por %p10213_p4, %p10212_p3 }
  0x17   : > { %p10207_p1 = pnand %p10205_p0, %p10195_p13 }
  0x19   : > { %p10208_p2 = pneg %p10207_p1 }
  0x1b   : > { %p10215_p7 = pnand %p10214_p6, %p10208_p2 }
  0x1d   : > { %10218 = shalt.err (!%p10215_p7)
}
  0x1e   : > { %s10286_s14 = smov 128   ;;  %s10287_s15 = smov 8  }
  0x1f   : > { %8486 = dma.hbm_to_vmem [thread:$0]  (!%p8484_p12), %s12878_s7, 32768, %s323_s12, [#allocation10], %s10286_s14, %s10286_s14, %s10287_s15  }
  0x20   : > { %355 = sbr.rel (%p10411_p10) target bundleno = 2033 (0x7f1), region = 64 }
  0x25   : > { %10262 = dma.done.wait (%p8491_p9), [#allocation10], 32768  }
  0x26   : > { %10264 = vsyncadd (%p8491_p9), [#allocation10], 4294934528  ;;  %vm400_vm0 = vcmask 23552   ;;  %vm403_vm1 = vcmask 17408   ;;  %vm409_vm2 = vcmask 16384   ;;  %v12887_v0 = vmov 0.0  }
  0x27   : > { %401 = vst.msk [vmem:[#allocation2] sm:$0xff] %vm400_vm0, %v12887_v0  ;;  %402 = vst.msk [vmem:[#allocation2 + $0x8] sm:$0xff] %vm400_vm0, %v12887_v0  ;;  %p394_p6 = scmp.lt.s32.totalorder %s10383_s21, 1  ;;  %s12893_s0 = sld [smem:[#allocation15_spill]]  ;;  %vm2174_vm3 = vcmask 1044480   ;;  %vm2175_vm4 = vcmask 1045504  }
  0x28   : > { %404 = vst.msk [vmem:[#allocation2 + $0x10] sm:$0x3] %vm403_vm1, %v12887_v0  ;;  %408 = vst.msk [vmem:[#allocation2 + $0x1a8] sm:$0x3] %vm403_vm1, %v12887_v0  ;;  %s10289_s13 = smov 3   ;;  %s10290_s14 = smov 6  }
  0x29   : > { %406 = vst.msk [vmem:[#allocation2 + $0x198] sm:$0xff] %vm400_vm0, %v12887_v0  ;;  %407 = vst.msk [vmem:[#allocation2 + $0x1a0] sm:$0xff] %vm400_vm0, %v12887_v0  ;;  %s395_s24 = scalar_select %p394_p6, %s10383_s21, 1  ;;  %v10294_v48 = vmov 65535   ;;  %v9722_v54 = vld [vmem:[%s12872_s1 + $0x8] sm:$0x3f]  }
  0x2a   : > { %411 = vst.msk [vmem:[#allocation2 + $0x18] sm:$0x1] %vm409_vm2, %v12887_v0  ;;  %412 = vst.msk [vmem:[#allocation2 + $0x30] sm:$0x1] %vm409_vm2, %v12887_v0  ;;  %s10291_s15 = smov 9   ;;  %s12883_s16 = smov 12  }
  0x2b   : > { %413 = vst.msk [vmem:[#allocation2 + $0x48] sm:$0x1] %vm409_vm2, %v12887_v0  ;;  %414 = vst.msk [vmem:[#allocation2 + $0x60] sm:$0x1] %vm409_vm2, %v12887_v0  ;;  %s8202_s25 = sshll.u32 %s395_s24, 8  ;;  %s12885_s22 = smov 15  }
  0x2c   : > { %415 = vst.msk [vmem:[#allocation2 + $0x78] sm:$0x1] %vm409_vm2, %v12887_v0  ;;  %416 = vst.msk [vmem:[#allocation2 + $0x90] sm:$0x1] %vm409_vm2, %v12887_v0  ;;  %v2176_v49 = vsel %vm2174_vm3, 4294967295, %v10294_v48  ;;  %s10295_s24 = smov 18  }
  0x2d   : > { %417 = vst.msk [vmem:[#allocation2 + $0xa8] sm:$0x1] %vm409_vm2, %v12887_v0  ;;  %418 = vst.msk [vmem:[#allocation2 + $0xc0] sm:$0x1] %vm409_vm2, %v12887_v0  ;;  %s10515_s12 = scalar_lea.vmem %s12893_s0, %s8202_s25  ;;  %v2177_v52 = vsel %vm2175_vm4, %v2176_v49, 0  ;;  %v9723_v55 = vld [vmem:[%s12872_s1] sm:$0xff]  }
  0x2e   : > { %419 = vst.msk [vmem:[#allocation2 + $0xd8] sm:$0x1] %vm409_vm2, %v12887_v0  ;;  %420 = vst.msk [vmem:[#allocation2 + $0xf0] sm:$0x1] %vm409_vm2, %v12887_v0  ;;  %v575_v1 = vld [vmem:[#allocation2 + $0x2] sm:$0xff]  ;;  %v448_v9 = vld [vmem:[%s10515_s12 + $0x10] sm:$0xff]  ;;  %v2179_v57 = vand.u32 %v9722_v54, %v2177_v52 }
  0x2f   : > { %421 = vst.msk [vmem:[#allocation2 + $0x108] sm:$0x1] %vm409_vm2, %v12887_v0  ;;  %422 = vst.msk [vmem:[#allocation2 + $0x120] sm:$0x1] %vm409_vm2, %v12887_v0  ;;  %v543_v2 = vld [vmem:[#allocation2 + $0x1] sm:$0xff]  ;;  %v544_v3 = vld [vmem:[#allocation2 + $0x9] sm:$0xff] }
  0x30   : > { %423 = vst.msk [vmem:[#allocation2 + $0x138] sm:$0x1] %vm409_vm2, %v12887_v0  ;;  %424 = vst.msk [vmem:[#allocation2 + $0x150] sm:$0x1] %vm409_vm2, %v12887_v0  ;;  %v8542_v5 = vpack.i.bf16 %v544_v3, %v543_v2  ;;  %v446_v6 = vld [vmem:[%s10515_s12] sm:$0xff]  ;;  %v447_v7 = vld [vmem:[%s10515_s12 + $0x8] sm:$0xff]  ;;  %8309 = vmatprep.subr.bf16.mxu0 %v2179_v57 }
  0x31   : > { %425 = vst.msk [vmem:[#allocation2 + $0x168] sm:$0x1] %vm409_vm2, %v12887_v0  ;;  %426 = vst.msk [vmem:[#allocation2 + $0x180] sm:$0x1] %vm409_vm2, %v12887_v0  ;;  %v449_v10 = vld [vmem:[%s10515_s12 + $0x18] sm:$0xff]  ;;  %v450_v11 = vld [vmem:[%s10515_s12 + $0x20] sm:$0xff]  ;;  %8310 = vmatpush3.bf16.msra.mxu0 %v2179_v57 }
  0x32   : > { %429 = vst.msk [vmem:[#allocation2 + $0x29] sm:$0x1] %vm409_vm2, %v12887_v0  ;;  %430 = vst.msk [vmem:[#allocation2 + $0x41] sm:$0x1] %vm409_vm2, %v12887_v0  ;;  %8543 = vrot.lane.b32.xlu0 %v8542_v5, %s10289_s13  ;;  %v451_v12 = vld [vmem:[%s10515_s12 + $0x28] sm:$0xff]  ;;  %v452_v13 = vld [vmem:[%s10515_s12 + $0x30] sm:$0xff]  ;;  %8311 = vmatprep.subr.bf16.mxu0 %v9723_v55 }
  0x33   : > { %431 = vst.msk [vmem:[#allocation2 + $0x59] sm:$0x1] %vm409_vm2, %v12887_v0  ;;  %432 = vst.msk [vmem:[#allocation2 + $0x71] sm:$0x1] %vm409_vm2, %v12887_v0  ;;  %v453_v14 = vld [vmem:[%s10515_s12 + $0x38] sm:$0xff]  ;;  %v454_v15 = vld [vmem:[%s10515_s12 + $0x40] sm:$0xff] }
  0x34   : > { %433 = vst.msk [vmem:[#allocation2 + $0x89] sm:$0x1] %vm409_vm2, %v12887_v0  ;;  %434 = vst.msk [vmem:[#allocation2 + $0xa1] sm:$0x1] %vm409_vm2, %v12887_v0  ;;  %v455_v16 = vld [vmem:[%s10515_s12 + $0x48] sm:$0xff]  ;;  %v456_v17 = vld [vmem:[%s10515_s12 + $0x50] sm:$0xff] }
  0x35   : > { %435 = vst.msk [vmem:[#allocation2 + $0xb9] sm:$0x1] %vm409_vm2, %v12887_v0  ;;  %436 = vst.msk [vmem:[#allocation2 + $0xd1] sm:$0x1] %vm409_vm2, %v12887_v0  ;;  %v457_v18 = vld [vmem:[%s10515_s12 + $0x58] sm:$0xff]  ;;  %v458_v19 = vld [vmem:[%s10515_s12 + $0x60] sm:$0xff]  ;;  %8312 = vmatpush3.bf16.msra.mxu0 %v9723_v55 }
  0x36   : > { %437 = vst.msk [vmem:[#allocation2 + $0xe9] sm:$0x1] %vm409_vm2, %v12887_v0  ;;  %438 = vst.msk [vmem:[#allocation2 + $0x101] sm:$0x1] %vm409_vm2, %v12887_v0  ;;  %v459_v20 = vld [vmem:[%s10515_s12 + $0x68] sm:$0xff]  ;;  %v460_v21 = vld [vmem:[%s10515_s12 + $0x70] sm:$0xff] }
  0x37   : > { %439 = vst.msk [vmem:[#allocation2 + $0x119] sm:$0x1] %vm409_vm2, %v12887_v0  ;;  %440 = vst.msk [vmem:[#allocation2 + $0x131] sm:$0x1] %vm409_vm2, %v12887_v0  ;;  %v461_v22 = vld [vmem:[%s10515_s12 + $0x78] sm:$0xff]  ;;  %v462_v23 = vld [vmem:[%s10515_s12 + $0x80] sm:$0xff] }
  0x38   : > { %441 = vst.msk [vmem:[#allocation2 + $0x149] sm:$0x1] %vm409_vm2, %v12887_v0  ;;  %442 = vst.msk [vmem:[#allocation2 + $0x161] sm:$0x1] %vm409_vm2, %v12887_v0  ;;  %v463_v24 = vld [vmem:[%s10515_s12 + $0x88] sm:$0xff]  ;;  %v464_v25 = vld [vmem:[%s10515_s12 + $0x90] sm:$0xff] }
  0x39   : > { %443 = vst.msk [vmem:[#allocation2 + $0x179] sm:$0x1] %vm409_vm2, %v12887_v0  ;;  %444 = vst.msk [vmem:[#allocation2 + $0x191] sm:$0x1] %vm409_vm2, %v12887_v0  ;;  %v465_v26 = vld [vmem:[%s10515_s12 + $0x98] sm:$0xff]  ;;  %v466_v56 = vld [vmem:[%s10515_s12 + $0xa0] sm:$0xff] }
  0x3a   : > { %428 = vst.msk [vmem:[#allocation2 + $0x11] sm:$0x1] %vm409_vm2, %v12887_v0  ;;  %410 = vst.msk [vmem:[#allocation2] sm:$0x1] %vm409_vm2, %v12887_v0  ;;  %v467_v58 = vld [vmem:[%s10515_s12 + $0xa8] sm:$0xff]  ;;  %v469_v2 = vld [vmem:[%s10515_s12 + $0xb8] sm:$0xff] }
  0x3b   : > { %445 = vst.msk [vmem:[#allocation2 + $0x1a9] sm:$0x1] %vm409_vm2, %v12887_v0  ;;  %427 = vst.msk [vmem:[#allocation2 + $0x198] sm:$0x1] %vm409_vm2, %v12887_v0  ;;  %s12894_s25 = smov 12   ;;  %s12895_s29 = smov 15  }
  0x3c   : > { %479 = vst.msk [vmem:[#allocation2 + $0x19] sm:$0xff] %vm400_vm0, %v446_v6  ;;  %480 = vst.msk [vmem:[#allocation2 + $0x21] sm:$0xff] %vm400_vm0, %v447_v7  ;;  %v477_v48 = vld [vmem:[%s10515_s12 + $0xf8] sm:$0xff]  ;;  %vm1856_vm5 = vcmask 48128   ;;  %vm1889_vm6 = vcmask 72704   ;;  %vm1922_vm7 = vcmask 97280  }
  0x3d   : > { %481 = vst.msk [vmem:[#allocation2 + $0x31] sm:$0xff] %vm400_vm0, %v448_v9  ;;  %482 = vst.msk [vmem:[#allocation2 + $0x39] sm:$0xff] %vm400_vm0, %v449_v10  ;;  %v470_v9 = vld [vmem:[%s10515_s12 + $0xc0] sm:$0xff]  ;;  %vm1955_vm8 = vcmask 121856   ;;  %vm1988_vm9 = vcmask 146432   ;;  %vm2021_vm10 = vcmask 171008  }
  0x3e   : > { %483 = vst.msk [vmem:[#allocation2 + $0x49] sm:$0xff] %vm400_vm0, %v450_v11  ;;  %484 = vst.msk [vmem:[#allocation2 + $0x51] sm:$0xff] %vm400_vm0, %v451_v12  ;;  %v471_v12 = vld [vmem:[%s10515_s12 + $0xc8] sm:$0xff]  ;;  %vm2054_vm11 = vcmask 195584   ;;  %vm2125_vm12 = vcmask 220160   ;;  %vm2374_vm13 = vcmask 261120  }
  0x3f   : > { %485 = vst.msk [vmem:[#allocation2 + $0x61] sm:$0xff] %vm400_vm0, %v452_v13  ;;  %486 = vst.msk [vmem:[#allocation2 + $0x69] sm:$0xff] %vm400_vm0, %v453_v14  ;;  %vm2377_vm14 = vcmask 254976   ;;  %vm2383_vm15 = vcmask 253952   ;;  %vm2837_vm1 = vcmask 523264   ;;  %vm4763_vm2 = vcmask 517120  }
  0x40   : > { %487 = vst.msk [vmem:[#allocation2 + $0x79] sm:$0xff] %vm400_vm0, %v454_v15  ;;  %488 = vst.msk [vmem:[#allocation2 + $0x81] sm:$0xff] %vm400_vm0, %v455_v16  ;;  %vm4768_vm3 = vcmask 516096   ;;  %s392_s30 = sand.u32 1, %s10275_s18   ;;  %vm7702_vm4 = vcmask 73728  }
  0x41   : > { %v576_v4 = vld [vmem:[#allocation2 + $0xa] sm:$0xff]  ;;  %489 = vst.msk [vmem:[#allocation2 + $0x91] sm:$0xff] %vm400_vm0, %v456_v17  ;;  %490 = vst.msk [vmem:[#allocation2 + $0x99] sm:$0xff] %vm400_vm0, %v457_v18 }
  0x42   : > { %v8547_v8 = vpack.i.bf16 %v576_v4, %v575_v1  ;;  %491 = vst.msk [vmem:[#allocation2 + $0xa9] sm:$0xff] %vm400_vm0, %v458_v19  ;;  %492 = vst.msk [vmem:[#allocation2 + $0xb1] sm:$0xff] %vm400_vm0, %v459_v20  ;;  %v468_v1 = vld [vmem:[%s10515_s12 + $0xb0] sm:$0xff] }
  0x43   : > { %493 = vst.msk [vmem:[#allocation2 + $0xc1] sm:$0xff] %vm400_vm0, %v460_v21  ;;  %494 = vst.msk [vmem:[#allocation2 + $0xc9] sm:$0xff] %vm400_vm0, %v461_v22  ;;  %v577_v27 = vld [vmem:[#allocation2 + $0x1a] sm:$0xff]  ;;  %v578_v28 = vld [vmem:[#allocation2 + $0x22] sm:$0xff] }
  0x44   : > { %8548 = vrot.lane.b32.xlu1 %v8547_v8, %s10290_s14  ;;  %495 = vst.msk [vmem:[#allocation2 + $0xd9] sm:$0xff] %vm400_vm0, %v462_v23  ;;  %496 = vst.msk [vmem:[#allocation2 + $0xe1] sm:$0xff] %vm400_vm0, %v463_v24  ;;  %v545_v29 = vld [vmem:[#allocation2 + $0x19] sm:$0xff]  ;;  %v8557_v30 = vpack.i.bf16 %v578_v28, %v577_v27  ;;  %v546_v31 = vld [vmem:[#allocation2 + $0x21] sm:$0xff] }
  0x45   : > { %497 = vst.msk [vmem:[#allocation2 + $0xf1] sm:$0xff] %vm400_vm0, %v464_v25  ;;  %498 = vst.msk [vmem:[#allocation2 + $0xf9] sm:$0xff] %vm400_vm0, %v465_v26  ;;  %v609_v32 = vld [vmem:[#allocation2 + $0x30] sm:$0xff]  ;;  %v610_v33 = vld [vmem:[#allocation2 + $0x38] sm:$0xff]  ;;  %v8552_v34 = vpack.i.bf16 %v546_v31, %v545_v29 }
  0x46   : > { %v10559_v35 = vld [vmem:[#allocation2 + $0x18] sm:$0xff]  ;;  %v10561_v36 = vld [vmem:[#allocation2 + $0x20] sm:$0xff]  ;;  %v8567_v37 = vpack.i.bf16 %v610_v33, %v609_v32  ;;  %v706_v45 = vld [vmem:[#allocation2 + $0x48] sm:$0xff]  ;;  %499 = vst.msk [vmem:[#allocation2 + $0x109] sm:$0xff] %vm400_vm0, %v466_v56 }
  0x47   : > { %8553 = vrot.lane.b32.xlu0 %v8552_v34, %s10289_s13  ;;  %v8562_v38 = vpack.i.bf16 %v10561_v36, %v10559_v35  ;;  %v641_v39 = vld [vmem:[#allocation2 + $0x31] sm:$0xff]  ;;  %v642_v40 = vld [vmem:[#allocation2 + $0x39] sm:$0xff]  ;;  %v738_v50 = vld [vmem:[#allocation2 + $0x49] sm:$0xff]  ;;  %500 = vst.msk [vmem:[#allocation2 + $0x111] sm:$0xff] %vm400_vm0, %v467_v58 }
  0x48   : > { %8558 = vrot.lane.b32.xlu1 %v8557_v30, %s10290_s14  ;;  %v8577_v41 = vpack.i.bf16 %v642_v40, %v641_v39  ;;  %v673_v42 = vld [vmem:[#allocation2 + $0x32] sm:$0xff]  ;;  %v674_v43 = vld [vmem:[#allocation2 + $0x3a] sm:$0xff]  ;;  %v770_v59 = vld [vmem:[#allocation2 + $0x4a] sm:$0xff]  ;;  %501 = vst.msk [vmem:[#allocation2 + $0x121] sm:$0xff] %vm400_vm0, %v468_v1 }
  0x49   : > { %v8587_v44 = vpack.i.bf16 %v674_v43, %v673_v42  ;;  %v707_v46 = vld [vmem:[#allocation2 + $0x50] sm:$0xff]  ;;  %v613_v62 = vld [vmem:[#allocation2 + $0x60] sm:$0xff]  ;;  %v614_v63 = vld [vmem:[#allocation2 + $0x68] sm:$0xff]  ;;  %502 = vst.msk [vmem:[#allocation2 + $0x129] sm:$0xff] %vm400_vm0, %v469_v2 }
  0x4a   : > { %v8597_v47 = vpack.i.bf16 %v707_v46, %v706_v45  ;;  %v739_v51 = vld [vmem:[#allocation2 + $0x51] sm:$0xff]  ;;  %v645_v3 = vld [vmem:[#allocation2 + $0x61] sm:$0xff]  ;;  %v646_v4 = vld [vmem:[#allocation2 + $0x69] sm:$0xff]  ;;  %v8647_v5 = vpack.i.bf16 %v614_v63, %v613_v62  ;;  %503 = vst.msk [vmem:[#allocation2 + $0x139] sm:$0xff] %vm400_vm0, %v470_v9 }
  0x4b   : > { %8563 = vrot.lane.b32.xlu0 %v8562_v38, %s10291_s15  ;;  %v8607_v53 = vpack.i.bf16 %v739_v51, %v738_v50  ;;  %v771_v60 = vld [vmem:[#allocation2 + $0x52] sm:$0xff]  ;;  %v677_v6 = vld [vmem:[#allocation2 + $0x62] sm:$0xff]  ;;  %v678_v7 = vld [vmem:[#allocation2 + $0x6a] sm:$0xff]  ;;  %v8657_v8 = vpack.i.bf16 %v646_v4, %v645_v3  ;;  %504 = vst.msk [vmem:[#allocation2 + $0x141] sm:$0xff] %vm400_vm0, %v471_v12 }
  0x4c   : > { %8568 = vrot.lane.b32.xlu1 %v8567_v37, %s10291_s15  ;;  %v8622_v61 = vpack.i.bf16 %v771_v60, %v770_v59  ;;  %v710_v10 = vld [vmem:[#allocation2 + $0x78] sm:$0xff]  ;;  %v711_v11 = vld [vmem:[#allocation2 + $0x80] sm:$0xff]  ;;  %v8667_v13 = vpack.i.bf16 %v678_v7, %v677_v6  ;;  %v472_v21 = vld [vmem:[%s10515_s12 + $0xd0] sm:$0xff]  ;;  %510 = vst.msk [vmem:[#allocation2 + $0x189] sm:$0xff] %vm400_vm0, %v477_v48 }
  0x4d   : > { %v742_v14 = vld [vmem:[#allocation2 + $0x79] sm:$0xff]  ;;  %v743_v15 = vld [vmem:[#allocation2 + $0x81] sm:$0xff]  ;;  %v8677_v16 = vpack.i.bf16 %v711_v11, %v710_v10  ;;  %v617_v22 = vld [vmem:[#allocation2 + $0x90] sm:$0xff]  ;;  %505 = vst.msk [vmem:[#allocation2 + $0x151] sm:$0xff] %vm400_vm0, %v472_v21 }
  0x4e   : > { %v8687_v17 = vpack.i.bf16 %v743_v15, %v742_v14  ;;  %v774_v18 = vld [vmem:[#allocation2 + $0x7a] sm:$0xff]  ;;  %v775_v19 = vld [vmem:[#allocation2 + $0x82] sm:$0xff]  ;;  %v649_v25 = vld [vmem:[#allocation2 + $0x91] sm:$0xff]  ;;  %2375 = vst.msk [vmem:[#allocation3] sm:$0xff] %vm2374_vm13, %v12887_v0 }
  0x4f   : > { %8573 = vrot.lane.b32.xlu0 %v8552_v34, %s12883_s16  ;;  %v8702_v20 = vpack.i.bf16 %v775_v19, %v774_v18  ;;  %v618_v23 = vld [vmem:[#allocation2 + $0x98] sm:$0xff]  ;;  %v474_v31 = vld [vmem:[%s10515_s12 + $0xe0] sm:$0xff]  ;;  %v714_v32 = vld [vmem:[#allocation2 + $0xa8] sm:$0xff]  ;;  %2376 = vst.msk [vmem:[#allocation3 + $0x8] sm:$0xff] %vm2374_vm13, %v12887_v0 }
  0x50   : > { %8578 = vrot.lane.b32.xlu1 %v8577_v41, %s12883_s16  ;;  %s10297_s16 = smov 24   ;;  %v473_v24 = vld [vmem:[%s10515_s12 + $0xd8] sm:$0xff]  ;;  %v8727_v27 = vpack.i.bf16 %v618_v23, %v617_v22  ;;  %v715_v33 = vld [vmem:[#allocation2 + $0xb0] sm:$0xff]  ;;  %v475_v34 = vld [vmem:[%s10515_s12 + $0xe8] sm:$0xff]  ;;  %507 = vst.msk [vmem:[#allocation2 + $0x169] sm:$0xff] %vm400_vm0, %v474_v31 }
  0x51   : > { %506 = vst.msk [vmem:[#allocation2 + $0x159] sm:$0xff] %vm400_vm0, %v473_v24  ;;  %v650_v26 = vld [vmem:[#allocation2 + $0x99] sm:$0xff]  ;;  %508 = vst.msk [vmem:[#allocation2 + $0x171] sm:$0xff] %vm400_vm0, %v475_v34  ;;  %v746_v38 = vld [vmem:[#allocation2 + $0xa9] sm:$0xff]  ;;  %v8757_v40 = vpack.i.bf16 %v715_v33, %v714_v32 }
  0x52   : > { %v681_v28 = vld [vmem:[#allocation2 + $0x92] sm:$0xff]  ;;  %v682_v29 = vld [vmem:[#allocation2 + $0x9a] sm:$0xff]  ;;  %v778_v42 = vld [vmem:[#allocation2 + $0xaa] sm:$0xff]  ;;  %2380 = vst.msk [vmem:[#allocation3 + $0x198] sm:$0xff] %vm2374_vm13, %v12887_v0 }
  0x53   : > { %8583 = vrot.lane.b32.xlu0 %v8557_v30, %s12885_s22  ;;  %v8737_v30 = vpack.i.bf16 %v650_v26, %v649_v25  ;;  %v747_v39 = vld [vmem:[#allocation2 + $0xb1] sm:$0xff]  ;;  %v621_v46 = vld [vmem:[#allocation2 + $0xc0] sm:$0xff]  ;;  %v654_v50 = vld [vmem:[#allocation2 + $0xc9] sm:$0xff]  ;;  %2381 = vst.msk [vmem:[#allocation3 + $0x1a0] sm:$0xff] %vm2374_vm13, %v12887_v0 }
  0x54   : > { %8588 = vrot.lane.b32.xlu1 %v8587_v44, %s12885_s22  ;;  %s10296_s22 = smov 21   ;;  %v779_v43 = vld [vmem:[#allocation2 + $0xb2] sm:$0xff]  ;;  %v653_v49 = vld [vmem:[#allocation2 + $0xc1] sm:$0xff]  ;;  %2378 = vst.msk [vmem:[#allocation3 + $0x10] sm:$0x3] %vm2377_vm14, %v12887_v0 }
  0x55   : > { %v476_v45 = vld [vmem:[%s10515_s12 + $0xf0] sm:$0xff]  ;;  %v685_v52 = vld [vmem:[#allocation2 + $0xc2] sm:$0xff]  ;;  %v8817_v54 = vpack.i.bf16 %v654_v50, %v653_v49  ;;  %v718_v55 = vld [vmem:[#allocation2 + $0xd8] sm:$0xff]  ;;  %2382 = vst.msk [vmem:[#allocation3 + $0x1a8] sm:$0x3] %vm2377_vm14, %v12887_v0  ;;  %s10298_s12 = smov 32  }
  0x56   : > { %509 = vst.msk [vmem:[#allocation2 + $0x181] sm:$0xff] %vm400_vm0, %v476_v45  ;;  %v719_v56 = vld [vmem:[#allocation2 + $0xe0] sm:$0xff]  ;;  %v625_v10 = vld [vmem:[#allocation2 + $0xf0] sm:$0xff]  ;;  %v626_v11 = vld [vmem:[#allocation2 + $0xf8] sm:$0xff] }
  0x57   : > { %8593 = vrot.lane.b32.xlu0 %v8567_v37, %s10295_s24  ;;  %v8747_v37 = vpack.i.bf16 %v682_v29, %v681_v28  ;;  %v750_v58 = vld [vmem:[#allocation2 + $0xd9] sm:$0xff]  ;;  %v751_v59 = vld [vmem:[#allocation2 + $0xe1] sm:$0xff]  ;;  %v10687_v22 = vpack.i.bf16 %v626_v11, %v625_v10  ;;  %v723_v26 = vld [vmem:[#allocation2 + $0x110] sm:$0xff]  ;;  %2402 = vst.msk [vmem:[#allocation3 + $0x11] sm:$0x1] %vm2383_vm15, %v12887_v0 }
  0x58   : > { %8598 = vrot.lane.b32.xlu1 %v8597_v47, %s10295_s24  ;;  %v10657_v63 = vpack.i.bf16 %v751_v59, %v750_v58  ;;  %v782_v4 = vld [vmem:[#allocation2 + $0xda] sm:$0xff]  ;;  %v512_v12 = vld [vmem:[#allocation2 + $0x8] sm:$0xff]  ;;  %v689_v23 = vld [vmem:[#allocation2 + $0xf2] sm:$0xff]  ;;  %2384 = vst.msk [vmem:[#allocation3] sm:$0x1] %vm2383_vm15, %v12887_v0 }
  0x59   : > { %v658_v21 = vld [vmem:[#allocation2 + $0xf9] sm:$0xff]  ;;  %v722_v25 = vld [vmem:[#allocation2 + $0x108] sm:$0xff]  ;;  %v755_v10 = vld [vmem:[#allocation2 + $0x111] sm:$0xff]  ;;  %2385 = vst.msk [vmem:[#allocation3 + $0x18] sm:$0x1] %vm2383_vm15, %v12887_v0 }
  0x5a   : > { %v690_v24 = vld [vmem:[#allocation2 + $0xfa] sm:$0xff]  ;;  %v10716_v45 = vpack.i.bf16 %v723_v26, %v722_v25  ;;  %2386 = vst.msk [vmem:[#allocation3 + $0x30] sm:$0x1] %vm2383_vm15, %v12887_v0  ;;  %2387 = vst.msk [vmem:[#allocation3 + $0x48] sm:$0x1] %vm2383_vm15, %v12887_v0 }
  0x5b   : > { %8603 = vrot.lane.b32.xlu0 %v8577_v41, %s10296_s22  ;;  %2388 = vst.msk [vmem:[#allocation3 + $0x60] sm:$0x1] %vm2383_vm15, %v12887_v0  ;;  %2389 = vst.msk [vmem:[#allocation3 + $0x78] sm:$0x1] %vm2383_vm15, %v12887_v0 }
  0x5c   : > { %8608 = vrot.lane.b32.xlu1 %v8607_v53, %s10296_s22  ;;  %2390 = vst.msk [vmem:[#allocation3 + $0x90] sm:$0x1] %vm2383_vm15, %v12887_v0  ;;  %2391 = vst.msk [vmem:[#allocation3 + $0xa8] sm:$0x1] %vm2383_vm15, %v12887_v0 }
  0x5d   : > { %2392 = vst.msk [vmem:[#allocation3 + $0xc0] sm:$0x1] %vm2383_vm15, %v12887_v0  ;;  %2393 = vst.msk [vmem:[#allocation3 + $0xd8] sm:$0x1] %vm2383_vm15, %v12887_v0 }
  0x5e   : > { %2394 = vst.msk [vmem:[#allocation3 + $0xf0] sm:$0x1] %vm2383_vm15, %v12887_v0  ;;  %2395 = vst.msk [vmem:[#allocation3 + $0x108] sm:$0x1] %vm2383_vm15, %v12887_v0 }
  0x5f   : > { %8613 = vrot.lane.b32.xlu0 %v8587_v44, %s10297_s16  ;;  %2396 = vst.msk [vmem:[#allocation3 + $0x120] sm:$0x1] %vm2383_vm15, %v12887_v0  ;;  %2397 = vst.msk [vmem:[#allocation3 + $0x138] sm:$0x1] %vm2383_vm15, %v12887_v0 }
  0x60   : > { %8618 = vrot.lane.b32.xlu1 %v8577_v41, %s10289_s13  ;;  %v8767_v41 = vpack.i.bf16 %v747_v39, %v746_v38  ;;  %2398 = vst.msk [vmem:[#allocation3 + $0x150] sm:$0x1] %vm2383_vm15, %v12887_v0  ;;  %2399 = vst.msk [vmem:[#allocation3 + $0x168] sm:$0x1] %vm2383_vm15, %v12887_v0 }
  0x61   : > { %2400 = vst.msk [vmem:[#allocation3 + $0x180] sm:$0x1] %vm2383_vm15, %v12887_v0  ;;  %2401 = vst.msk [vmem:[#allocation3 + $0x198] sm:$0x1] %vm2383_vm15, %v12887_v0 }
  0x62   : > { %2403 = vst.msk [vmem:[#allocation3 + $0x29] sm:$0x1] %vm2383_vm15, %v12887_v0  ;;  %2404 = vst.msk [vmem:[#allocation3 + $0x41] sm:$0x1] %vm2383_vm15, %v12887_v0 }
  0x63   : > { %8623 = vrot.lane.b32.xlu0 %v8622_v61, %s10297_s16  ;;  %2405 = vst.msk [vmem:[#allocation3 + $0x59] sm:$0x1] %vm2383_vm15, %v12887_v0  ;;  %2406 = vst.msk [vmem:[#allocation3 + $0x71] sm:$0x1] %vm2383_vm15, %v12887_v0 }
  0x64   : > { %8628 = vrot.lane.b32.xlu1 %v8607_v53, %s10289_s13  ;;  %2407 = vst.msk [vmem:[#allocation3 + $0x89] sm:$0x1] %vm2383_vm15, %v12887_v0  ;;  %2408 = vst.msk [vmem:[#allocation3 + $0xa1] sm:$0x1] %vm2383_vm15, %v12887_v0 }
  0x65   : > { %2409 = vst.msk [vmem:[#allocation3 + $0xb9] sm:$0x1] %vm2383_vm15, %v12887_v0  ;;  %2410 = vst.msk [vmem:[#allocation3 + $0xd1] sm:$0x1] %vm2383_vm15, %v12887_v0 }
  0x66   : > { %2411 = vst.msk [vmem:[#allocation3 + $0xe9] sm:$0x1] %vm2383_vm15, %v12887_v0  ;;  %2412 = vst.msk [vmem:[#allocation3 + $0x101] sm:$0x1] %vm2383_vm15, %v12887_v0 }
  0x67   : > { %8633 = vrot.lane.b32.xlu0 %v8587_v44, %s10290_s14  ;;  %v8782_v44 = vpack.i.bf16 %v779_v43, %v778_v42  ;;  %2413 = vst.msk [vmem:[#allocation3 + $0x119] sm:$0x1] %vm2383_vm15, %v12887_v0  ;;  %2414 = vst.msk [vmem:[#allocation3 + $0x131] sm:$0x1] %vm2383_vm15, %v12887_v0 }
  0x68   : > { %8638 = vrot.lane.b32.xlu1 %v8622_v61, %s10290_s14  ;;  %2415 = vst.msk [vmem:[#allocation3 + $0x149] sm:$0x1] %vm2383_vm15, %v12887_v0  ;;  %2416 = vst.msk [vmem:[#allocation3 + $0x161] sm:$0x1] %vm2383_vm15, %v12887_v0 }
  0x69   : > { %2417 = vst.msk [vmem:[#allocation3 + $0x179] sm:$0x1] %vm2383_vm15, %v12887_v0  ;;  %2418 = vst.msk [vmem:[#allocation3 + $0x191] sm:$0x1] %vm2383_vm15, %v12887_v0 }
  0x6a   : > { %2419 = vst.msk [vmem:[#allocation3 + $0x1a9] sm:$0x1] %vm2383_vm15, %v12887_v0 }
  0x6b   : > { %8643 = vrot.lane.b32.xlu0 %v8597_v47, %s10291_s15  ;;  %v622_v47 = vld [vmem:[#allocation2 + $0xc8] sm:$0xff]  ;;  %4762 = vst.msk [vmem:[#allocation6] sm:$0xff] %vm2837_vm1, %v12887_v0  ;;  %4766 = vst.msk [vmem:[#allocation6 + $0x90] sm:$0xff] %vm2837_vm1, %v12887_v0 }
  0x6c   : > { %8648 = vrot.lane.b32.xlu1 %v8647_v5, %s10291_s15  ;;  %v8807_v51 = vpack.i.bf16 %v622_v47, %v621_v46 }
  0x6f   : > { %8653 = vrot.lane.b32.xlu0 %v8607_v53, %s12894_s25  ;;  %v686_v53 = vld [vmem:[#allocation2 + $0xca] sm:$0xff] }
  0x70   : > { %8658 = vrot.lane.b32.xlu1 %v8657_v8, %s12894_s25  ;;  %v8827_v57 = vpack.i.bf16 %v686_v53, %v685_v52 }
  0x73   : > { %8663 = vrot.lane.b32.xlu0 %v8622_v61, %s12895_s29  ;;  %v10652_v61 = vpack.i.bf16 %v719_v56, %v718_v55 }
  0x74   : > { %8668 = vrot.lane.b32.xlu1 %v8667_v13, %s12895_s29 }
  0x77   : > { %8673 = vrot.lane.b32.xlu0 %v8647_v5, %s10295_s24  ;;  %v783_v5 = vld [vmem:[#allocation2 + $0xe2] sm:$0xff] }
  0x78   : > { %8678 = vrot.lane.b32.xlu1 %v8677_v16, %s10295_s24  ;;  %v10671_v7 = vpack.i.bf16 %v783_v5, %v782_v4 }
  0x7b   : > { %8683 = vrot.lane.b32.xlu0 %v8657_v8, %s10296_s22 }
  0x7c   : > { %8688 = vrot.lane.b32.xlu1 %v8687_v17, %s10296_s22 }
  0x7f   : > { %8693 = vrot.lane.b32.xlu0 %v8667_v13, %s10297_s16 }
  0x80   : > { %8698 = vrot.lane.b32.xlu1 %v8657_v8, %s10289_s13 }
  0x83   : > { %8703 = vrot.lane.b32.xlu0 %v8702_v20, %s10297_s16 }
  0x84   : > { %8708 = vrot.lane.b32.xlu1 %v8687_v17, %s10289_s13 }
  0x87   : > { %8713 = vrot.lane.b32.xlu0 %v8667_v13, %s10290_s14  ;;  %v511_v13 = vld [vmem:[#allocation2] sm:$0xff] }
  0x88   : > { %8718 = vrot.lane.b32.xlu1 %v8702_v20, %s10290_s14 }
  0x8b   : > { %8723 = vrot.lane.b32.xlu0 %v8677_v16, %s10291_s15 }
  0x8c   : > { %8728 = vrot.lane.b32.xlu1 %v8727_v27, %s10291_s15 }
  0x8f   : > { %8733 = vrot.lane.b32.xlu0 %v8687_v17, %s12894_s25 }
  0x90   : > { %8738 = vrot.lane.b32.xlu1 %v8737_v30, %s12894_s25 }
  0x93   : > { %8743 = vrot.lane.b32.xlu0 %v8702_v20, %s12895_s29  ;;  %v657_v20 = vld [vmem:[#allocation2 + $0xf1] sm:$0xff] }
  0x94   : > { %8748 = vrot.lane.b32.xlu1 %v8747_v37, %s12895_s29  ;;  %v10708_v43 = vpack.i.bf16 %v658_v21, %v657_v20 }
  0x97   : > { %8753 = vrot.lane.b32.xlu0 %v8727_v27, %s10295_s24 }
  0x98   : > { %8758 = vrot.lane.b32.xlu1 %v8757_v40, %s10295_s24 }
  0x9b   : > { %8763 = vrot.lane.b32.xlu0 %v8737_v30, %s10296_s22 }
  0x9c   : > { %8768 = vrot.lane.b32.xlu1 %v8767_v41, %s10296_s22 }
  0x9f   : > { %8773 = vrot.lane.b32.xlu0 %v8747_v37, %s10297_s16 }
  0xa0   : > { %8778 = vrot.lane.b32.xlu1 %v8737_v30, %s10289_s13 }
  0xa3   : > { %8783 = vrot.lane.b32.xlu0 %v8782_v44, %s10297_s16 }
  0xa4   : > { %8788 = vrot.lane.b32.xlu1 %v8767_v41, %s10289_s13  ;;  %v8544_v62 = vpop.permute.xlu0 %8543 }
  0xa5   : > { %v8546_v14 = vunpack.i.h.bf16 %v8544_v62  ;;  %v8545_v15 = vunpack.i.l.bf16 %v8544_v62 }
  0xa7   : > { %8793 = vrot.lane.b32.xlu0 %v8747_v37, %s10290_s14  ;;  %v1825_v29 = vsel %vm400_vm0, %v512_v12, %v8546_v14  ;;  %v1824_v30 = vsel %vm400_vm0, %v511_v13, %v8545_v15 }
  0xa8   : > { %8798 = vrot.lane.b32.xlu1 %v8782_v44, %s10290_s14 }
  0xab   : > { %8803 = vrot.lane.b32.xlu0 %v8757_v40, %s10291_s15 }
  0xac   : > { %8808 = vrot.lane.b32.xlu1 %v8807_v51, %s10291_s15 }
  0xaf   : > { %8813 = vrot.lane.b32.xlu0 %v8767_v41, %s12894_s25 }
  0xb0   : > { %8818 = vrot.lane.b32.xlu1 %v8817_v54, %s12894_s25 }
  0xb3   : > { %8823 = vrot.lane.b32.xlu0 %v8782_v44, %s12895_s29 }
  0xb4   : > { %8828 = vrot.lane.b32.xlu1 %v8827_v57, %s12895_s29 }
  0xb6   : > { %v10650_v60 = vpop.permute.xlu1 %8548 }
  0xb7   : > { %8833 = vrot.lane.b32.xlu0 %v8807_v51, %s10295_s24  ;;  %v8551_v27 = vunpack.i.h.bf16 %v10650_v60  ;;  %v8550_v28 = vunpack.i.l.bf16 %v10650_v60 }
  0xb8   : > { %8838 = vrot.lane.b32.xlu1 %v10652_v61, %s10295_s24 }
  0xb9   : > { %v8554_v2 = vpop.permute.xlu0 %8553  ;;  %v1858_v44 = vsel %vm1856_vm5, %v1825_v29, %v8551_v27 }
  0xba   : > { %v10660_v1 = vpop.permute.xlu1 %8558  ;;  %v8556_v17 = vunpack.i.h.bf16 %v8554_v2  ;;  %v8555_v18 = vunpack.i.l.bf16 %v8554_v2 }
  0xbb   : > { %8843 = vrot.lane.b32.xlu0 %v8817_v54, %s10296_s22  ;;  %v8561_v31 = vunpack.i.h.bf16 %v10660_v1  ;;  %v8560_v32 = vunpack.i.l.bf16 %v10660_v1 }
  0xbc   : > { %8848 = vrot.lane.b32.xlu1 %v10657_v63, %s10296_s22  ;;  %v1827_v34 = vsel %vm400_vm0, %v10561_v36, %v8556_v17  ;;  %v1826_v37 = vsel %vm400_vm0, %v10559_v35, %v8555_v18  ;;  %v1857_v36 = vsel %vm1856_vm5, %v1824_v30, %v8550_v28  ;;  %v10714_v35 = vpack.i.bf16 %v690_v24, %v689_v23 }
  0xbd   : > { %v10667_v6 = vpop.permute.xlu0 %8563  ;;  %v1859_v46 = vsel %vm1856_vm5, %v1826_v37, %v8560_v32  ;;  %v1860_v47 = vsel %vm1856_vm5, %v1827_v34, %v8561_v31 }
  0xbe   : > { %v10665_v3 = vpop.permute.xlu1 %8568  ;;  %v8566_v41 = vunpack.i.h.bf16 %v10667_v6  ;;  %v8565_v42 = vunpack.i.l.bf16 %v10667_v6 }
  0xbf   : > { %8853 = vrot.lane.b32.xlu0 %v8827_v57, %s10297_s16  ;;  %v8571_v38 = vunpack.i.h.bf16 %v10665_v3  ;;  %v8570_v39 = vunpack.i.l.bf16 %v10665_v3 }
  0xc0   : > { %8858 = vrot.lane.b32.xlu1 %v8817_v54, %s10289_s13  ;;  %v1890_v56 = vsel %vm1889_vm6, %v1857_v36, %v8565_v42 }
  0xc1   : > { %v10675_v9 = vpop.permute.xlu0 %8573  ;;  %v1892_v51 = vsel %vm1889_vm6, %v1859_v46, %v8570_v39  ;;  %v1893_v52 = vsel %vm1889_vm6, %v1860_v47, %v8571_v38  ;;  %v786_v46 = vld [vmem:[#allocation2 + $0x10a] sm:$0xff]  ;;  %v787_v47 = vld [vmem:[#allocation2 + $0x112] sm:$0xff] }
  0xc2   : > { %v10673_v8 = vpop.permute.xlu1 %8578  ;;  %v8576_v48 = vunpack.i.h.bf16 %v10675_v9  ;;  %v8575_v49 = vunpack.i.l.bf16 %v10675_v9  ;;  %v754_v9 = vld [vmem:[#allocation2 + $0x109] sm:$0xff] }
  0xc3   : > { %8863 = vrot.lane.b32.xlu0 %v10671_v7, %s10297_s16  ;;  %v8581_v60 = vunpack.i.h.bf16 %v10673_v8  ;;  %v10760_v31 = vpack.i.bf16 %v755_v10, %v754_v9 }
  0xc4   : > { %8868 = vrot.lane.b32.xlu1 %v10657_v63, %s10289_s13  ;;  %v1923_v2 = vsel %vm1922_vm7, %v1890_v56, %v8575_v49  ;;  %v10784_v49 = vpack.i.bf16 %v787_v47, %v786_v46  ;;  %v693_v56 = vld [vmem:[#allocation2 + $0x122] sm:$0xff] }
  0xc5   : > { %v10683_v19 = vpop.permute.xlu0 %8583  ;;  %v1926_v24 = vsel %vm1922_vm7, %v1893_v52, %v8581_v60  ;;  %v629_v52 = vld [vmem:[#allocation2 + $0x120] sm:$0xff] }
  0xc6   : > { %v10681_v16 = vpop.permute.xlu1 %8588  ;;  %v8586_v53 = vunpack.i.h.bf16 %v10683_v19  ;;  %v8585_v54 = vunpack.i.l.bf16 %v10683_v19 }
  0xc7   : > { %8873 = vrot.lane.b32.xlu0 %v8827_v57, %s10290_s14  ;;  %v1891_v57 = vsel %vm1889_vm6, %v1858_v44, %v8566_v41  ;;  %v8591_v4 = vunpack.i.h.bf16 %v10681_v16  ;;  %v8590_v5 = vunpack.i.l.bf16 %v10681_v16 }
  0xc8   : > { %8878 = vrot.lane.b32.xlu1 %v10671_v7, %s10290_s14  ;;  %v1924_v3 = vsel %vm1922_vm7, %v1891_v57, %v8576_v48  ;;  %v1956_v11 = vsel %vm1955_vm8, %v1923_v2, %v8585_v54  ;;  %v661_v54 = vld [vmem:[#allocation2 + $0x121] sm:$0xff]  ;;  %v694_v57 = vld [vmem:[#allocation2 + $0x12a] sm:$0xff] }
  0xc9   : > { %v8594_v40 = vpop.permute.xlu0 %8593  ;;  %v1959_v29 = vsel %vm1955_vm8, %v1926_v24, %v8591_v4 }
  0xca   : > { %v10696_v33 = vpop.permute.xlu1 %8598  ;;  %v8596_v58 = vunpack.i.h.bf16 %v8594_v40  ;;  %v8595_v59 = vunpack.i.l.bf16 %v8594_v40 }
  0xcb   : > { %8883 = vrot.lane.b32.xlu0 %v10652_v61, %s10291_s15  ;;  %v8580_v61 = vunpack.i.l.bf16 %v10673_v8  ;;  %v1957_v8 = vsel %vm1955_vm8, %v1924_v3, %v8586_v53  ;;  %v8601_v12 = vunpack.i.h.bf16 %v10696_v33  ;;  %v630_v53 = vld [vmem:[#allocation2 + $0x128] sm:$0xff] }
  0xcc   : > { %8888 = vrot.lane.b32.xlu1 %v10687_v22, %s10291_s15  ;;  %v1989_v16 = vsel %vm1988_vm9, %v1956_v11, %v8595_v59  ;;  %v1990_v17 = vsel %vm1988_vm9, %v1957_v8, %v8596_v58  ;;  %v726_v58 = vld [vmem:[#allocation2 + $0x138] sm:$0xff]  ;;  %v727_v59 = vld [vmem:[#allocation2 + $0x140] sm:$0xff] }
  0xcd   : > { %v8604_v55 = vpop.permute.xlu0 %8603  ;;  %v1925_v23 = vsel %vm1922_vm7, %v1892_v51, %v8580_v61 }
  0xce   : > { %v8609_v50 = vpop.permute.xlu1 %8608  ;;  %v8606_v62 = vunpack.i.h.bf16 %v8604_v55  ;;  %v8605_v1 = vunpack.i.l.bf16 %v8604_v55  ;;  %v1958_v28 = vsel %vm1955_vm8, %v1925_v23, %v8590_v5  ;;  %v662_v55 = vld [vmem:[#allocation2 + $0x129] sm:$0xff] }
  0xcf   : > { %8893 = vrot.lane.b32.xlu0 %v10657_v63, %s12894_s25  ;;  %v8600_v63 = vunpack.i.l.bf16 %v10696_v33  ;;  %v8611_v18 = vunpack.i.h.bf16 %v8609_v50  ;;  %v8610_v19 = vunpack.i.l.bf16 %v8609_v50  ;;  %v1992_v33 = vsel %vm1988_vm9, %v1959_v29, %v8601_v12  ;;  %v10181_v23 = vld [vmem:[#allocation2 + $0x30] sm:$0xff] }
  0xd0   : > { %8898 = vrot.lane.b32.xlu1 %v10708_v43, %s12894_s25  ;;  %v2022_v20 = vsel %vm2021_vm10, %v1989_v16, %v8605_v1  ;;  %v2023_v21 = vsel %vm2021_vm10, %v1990_v17, %v8606_v62  ;;  %v10800_v1 = vpack.i.bf16 %v630_v53, %v629_v52  ;;  %v10808_v8 = vpack.i.bf16 %v662_v55, %v661_v54  ;;  %v10178_v16 = vld [vmem:[#allocation2 + $0x50] sm:$0xff]  ;;  %v10179_v17 = vld [vmem:[#allocation2 + $0x48] sm:$0xff] }
  0xd1   : > { %v8614_v13 = vpop.permute.xlu0 %8613  ;;  %v1991_v32 = vsel %vm1988_vm9, %v1958_v28, %v8600_v63  ;;  %v2025_v39 = vsel %vm2021_vm10, %v1992_v33, %v8611_v18 }
  0xd2   : > { %v10738_v6 = vpop.permute.xlu1 %8618  ;;  %v8616_v14 = vunpack.i.h.bf16 %v8614_v13  ;;  %v8615_v15 = vunpack.i.l.bf16 %v8614_v13  ;;  %v2024_v38 = vsel %vm2021_vm10, %v1991_v32, %v8610_v19 }
  0xd3   : > { %8903 = vrot.lane.b32.xlu0 %v10671_v7, %s12895_s29  ;;  %v8621_v2 = vunpack.i.h.bf16 %v10738_v6  ;;  %v8620_v3 = vunpack.i.l.bf16 %v10738_v6 }
  0xd4   : > { %8908 = vrot.lane.b32.xlu1 %v10714_v35, %s12895_s29  ;;  %v2055_v26 = vsel %vm2054_vm11, %v2022_v20, %v8615_v15  ;;  %v2056_v27 = vsel %vm2054_vm11, %v2023_v21, %v8616_v14  ;;  %v10810_v14 = vpack.i.bf16 %v694_v57, %v693_v56  ;;  %v10812_v15 = vpack.i.bf16 %v727_v59, %v726_v58  ;;  %v10180_v20 = vld [vmem:[#allocation2 + $0x38] sm:$0xff] }
  0xd5   : > { %v8624_v30 = vpop.permute.xlu0 %8623  ;;  %v2091_v7 = vpack.c.bf16 %v2056_v27, %v2055_v26  ;;  %v1829_v21 = vsel %vm400_vm0, %v10180_v20, %v8621_v2  ;;  %v1828_v24 = vsel %vm400_vm0, %v10181_v23, %v8620_v3 }
  0xd6   : > { %v10754_v25 = vpop.permute.xlu1 %8628  ;;  %v8626_v34 = vunpack.i.h.bf16 %v8624_v30  ;;  %v8625_v37 = vunpack.i.l.bf16 %v8624_v30 }
  0xd7   : > { %8913 = vrot.lane.b32.xlu0 %v10687_v22, %s10295_s24  ;;  %8313 = vmatprep.mubr.msk.bf16.mxu0 %vm2125_vm12, %v2091_v7  ;;  %v8631_v61 = vunpack.i.h.bf16 %v10754_v25  ;;  %v8630_v62 = vunpack.i.l.bf16 %v10754_v25 }
  0xd8   : > { %8918 = vrot.lane.b32.xlu1 %v10716_v45, %s10295_s24  ;;  %v2057_v40 = vsel %vm2054_vm11, %v2024_v38, %v8625_v37  ;;  %v2058_v41 = vsel %vm2054_vm11, %v2025_v39, %v8626_v34 }
  0xd9   : > { %v8634_v36 = vpop.permute.xlu0 %8633  ;;  %v2092_v44 = vpack.c.bf16 %v2058_v41, %v2057_v40  ;;  %v1831_v6 = vsel %vm400_vm0, %v10178_v16, %v8631_v61  ;;  %v1830_v18 = vsel %vm400_vm0, %v10179_v17, %v8630_v62 }
  0xda   : > { %v8639_v42 = vpop.permute.xlu1 %8638  ;;  %v8636_v9 = vunpack.i.h.bf16 %v8634_v36  ;;  %v8635_v10 = vunpack.i.l.bf16 %v8634_v36 }
  0xdb   : > { %8923 = vrot.lane.b32.xlu0 %v10708_v43, %s10296_s22  ;;  %8314 = vmatmul.mubr.msk.bf16.vlgmr.msra.gmra.mxu0 %vm2125_vm12, %v2092_v44  ;;  %v8641_v4 = vunpack.i.h.bf16 %v8639_v42  ;;  %v8640_v5 = vunpack.i.l.bf16 %v8639_v42 }
  0xdc   : > { %8928 = vrot.lane.b32.xlu1 %v10760_v31, %s10296_s22  ;;  %v1862_v27 = vsel %vm1856_vm5, %v1829_v21, %v8636_v9  ;;  %v1861_v28 = vsel %vm1856_vm5, %v1828_v24, %v8635_v10 }
  0xdd   : > { %v10778_v48 = vpop.permute.xlu0 %8643  ;;  %v1863_v25 = vsel %vm1856_vm5, %v1830_v18, %v8640_v5  ;;  %v1864_v26 = vsel %vm1856_vm5, %v1831_v6, %v8641_v4 }
  0xde   : > { %v8649_v22 = vpop.permute.xlu1 %8648  ;;  %v8645_v19 = vunpack.i.l.bf16 %v10778_v48 }
  0xdf   : > { %8933 = vrot.lane.b32.xlu0 %v10714_v35, %s10297_s16  ;;  %v8651_v12 = vunpack.i.h.bf16 %v8649_v22  ;;  %v8650_v63 = vunpack.i.l.bf16 %v8649_v22 }
  0xe0   : > { %8938 = vrot.lane.b32.xlu1 %v10708_v43, %s10289_s13  ;;  %v1894_v39 = vsel %vm1889_vm6, %v1861_v28, %v8645_v19  ;;  %v790_v28 = vld [vmem:[#allocation2 + $0x13a] sm:$0xff] }
  0xe1   : > { %v10788_v51 = vpop.permute.xlu0 %8653  ;;  %v1896_v32 = vsel %vm1889_vm6, %v1863_v25, %v8650_v63  ;;  %v1897_v33 = vsel %vm1889_vm6, %v1864_v26, %v8651_v12 }
  0xe2   : > { %v10786_v50 = vpop.permute.xlu1 %8658  ;;  %v8656_v29 = vunpack.i.h.bf16 %v10788_v51  ;;  %v8655_v30 = vunpack.i.l.bf16 %v10788_v51 }
  0xe3   : > { %8943 = vrot.lane.b32.xlu0 %v10784_v49, %s10297_s16  ;;  %v8661_v42 = vunpack.i.h.bf16 %v10786_v50  ;;  %v8660_v36 = vunpack.i.l.bf16 %v10786_v50 }
  0xe4   : > { %8948 = vrot.lane.b32.xlu1 %v10760_v31, %s10289_s13  ;;  %v1927_v47 = vsel %vm1922_vm7, %v1894_v39, %v8655_v30  ;;  %v666_v39 = vld [vmem:[#allocation2 + $0x159] sm:$0xff] }
  0xe5   : > { %v8664_v60 = vpop.permute.xlu0 %8663  ;;  %v1929_v4 = vsel %vm1922_vm7, %v1896_v32, %v8660_v36  ;;  %v1930_v5 = vsel %vm1922_vm7, %v1897_v33, %v8661_v42  ;;  %v633_v33 = vld [vmem:[#allocation2 + $0x150] sm:$0xff]  ;;  %v698_v36 = vld [vmem:[#allocation2 + $0x15a] sm:$0xff] }
  0xe6   : > { %v10794_v43 = vpop.permute.xlu1 %8668  ;;  %v8666_v34 = vunpack.i.h.bf16 %v8664_v60  ;;  %v8665_v37 = vunpack.i.l.bf16 %v8664_v60  ;;  %v759_v60 = vld [vmem:[#allocation2 + $0x141] sm:$0xff] }
  0xe7   : > { %8953 = vrot.lane.b32.xlu0 %v10714_v35, %s10290_s14  ;;  %v8646_v35 = vunpack.i.h.bf16 %v10778_v48  ;;  %v8671_v48 = vunpack.i.h.bf16 %v10794_v43  ;;  %v8670_v51 = vunpack.i.l.bf16 %v10794_v43  ;;  %v758_v43 = vld [vmem:[#allocation2 + $0x139] sm:$0xff] }
  0xe8   : > { %8958 = vrot.lane.b32.xlu1 %v10784_v49, %s10290_s14  ;;  %v1960_v53 = vsel %vm1955_vm8, %v1927_v47, %v8665_v37  ;;  %v10866_v6 = vpack.i.bf16 %v759_v60, %v758_v43  ;;  %v10182_v43 = vld [vmem:[#allocation2 + $0x80] sm:$0xff]  ;;  %v10183_v60 = vld [vmem:[#allocation2 + $0x78] sm:$0xff] }
  0xe9   : > { %v8674_v13 = vpop.permute.xlu0 %8673  ;;  %v1962_v12 = vsel %vm1955_vm8, %v1929_v4, %v8670_v51  ;;  %v1963_v63 = vsel %vm1955_vm8, %v1930_v5, %v8671_v48  ;;  %v10185_v4 = vld [vmem:[#allocation2 + $0x60] sm:$0xff] }
  0xea   : > { %v10806_v11 = vpop.permute.xlu1 %8678  ;;  %v8676_v40 = vunpack.i.h.bf16 %v8674_v13  ;;  %v8675_v41 = vunpack.i.l.bf16 %v8674_v13 }
  0xeb   : > { %8963 = vrot.lane.b32.xlu0 %v10716_v45, %s10291_s15  ;;  %v1895_v45 = vsel %vm1889_vm6, %v1862_v27, %v8646_v35  ;;  %v8681_v50 = vunpack.i.h.bf16 %v10806_v11  ;;  %v8680_v55 = vunpack.i.l.bf16 %v10806_v11 }
  0xec   : > { %8968 = vrot.lane.b32.xlu1 %v10800_v1, %s10291_s15  ;;  %v1928_v22 = vsel %vm1922_vm7, %v1895_v45, %v8656_v29  ;;  %v697_v45 = vld [vmem:[#allocation2 + $0x152] sm:$0xff] }
  0xed   : > { %v8684_v38 = vpop.permute.xlu0 %8683  ;;  %v1961_v54 = vsel %vm1955_vm8, %v1928_v22, %v8666_v34  ;;  %v1996_v17 = vsel %vm1988_vm9, %v1963_v63, %v8681_v50  ;;  %v634_v34 = vld [vmem:[#allocation2 + $0x158] sm:$0xff] }
  0xee   : > { %v8689_v7 = vpop.permute.xlu1 %8688  ;;  %v8686_v44 = vunpack.i.h.bf16 %v8684_v38  ;;  %v8685_v46 = vunpack.i.l.bf16 %v8684_v38  ;;  %v1994_v57 = vsel %vm1988_vm9, %v1961_v54, %v8676_v40  ;;  %v665_v38 = vld [vmem:[#allocation2 + $0x151] sm:$0xff]  ;;  %v10908_v42 = vpack.i.bf16 %v634_v34, %v633_v33 }
  0xef   : > { %8973 = vrot.lane.b32.xlu0 %v10760_v31, %s12894_s25  ;;  %v1993_v31 = vsel %vm1988_vm9, %v1960_v53, %v8675_v41  ;;  %v8691_v61 = vunpack.i.h.bf16 %v8689_v7  ;;  %v8690_v62 = vunpack.i.l.bf16 %v8689_v7 }
  0xf0   : > { %8978 = vrot.lane.b32.xlu1 %v10808_v8, %s12894_s25  ;;  %v2026_v2 = vsel %vm2021_vm10, %v1993_v31, %v8685_v46  ;;  %v2027_v3 = vsel %vm2021_vm10, %v1994_v57, %v8686_v44  ;;  %v730_v44 = vld [vmem:[#allocation2 + $0x168] sm:$0xff]  ;;  %v731_v46 = vld [vmem:[#allocation2 + $0x170] sm:$0xff] }
  0xf1   : > { %v8694_v56 = vpop.permute.xlu0 %8693  ;;  %v2029_v20 = vsel %vm2021_vm10, %v1996_v17, %v8691_v61 }
  0xf2   : > { %v10844_v52 = vpop.permute.xlu1 %8698  ;;  %v8696_v58 = vunpack.i.h.bf16 %v8694_v56  ;;  %v8695_v59 = vunpack.i.l.bf16 %v8694_v56 }
  0xf3   : > { %8983 = vrot.lane.b32.xlu0 %v10784_v49, %s12895_s29  ;;  %v1995_v49 = vsel %vm1988_vm9, %v1962_v12, %v8680_v55  ;;  %v8701_v47 = vunpack.i.h.bf16 %v10844_v52  ;;  %v8700_v22 = vunpack.i.l.bf16 %v10844_v52  ;;  %v10916_v55 = vpack.i.bf16 %v666_v39, %v665_v38 }
  0xf4   : > { %8988 = vrot.lane.b32.xlu1 %v10810_v14, %s12895_s29  ;;  %v2059_v9 = vsel %vm2054_vm11, %v2026_v2, %v8695_v59  ;;  %v2060_v10 = vsel %vm2054_vm11, %v2027_v3, %v8696_v58  ;;  %v2028_v19 = vsel %vm2021_vm10, %v1995_v49, %v8690_v62  ;;  %v10918_v58 = vpack.i.bf16 %v698_v36, %v697_v45  ;;  %v10184_v2 = vld [vmem:[#allocation2 + $0x68] sm:$0xff]  ;;  %v763_v36 = vld [vmem:[#allocation2 + $0x171] sm:$0xff] }
  0xf5   : > { %v8704_v13 = vpop.permute.xlu0 %8703  ;;  %v2093_v16 = vpack.c.bf16 %v2060_v10, %v2059_v9  ;;  %v10920_v59 = vpack.i.bf16 %v731_v46, %v730_v44  ;;  %v1833_v3 = vsel %vm400_vm0, %v10184_v2, %v8701_v47  ;;  %v1832_v5 = vsel %vm400_vm0, %v10185_v4, %v8700_v22 }
  0xf6   : > { %v10862_v11 = vpop.permute.xlu1 %8708  ;;  %v8706_v18 = vunpack.i.h.bf16 %v8704_v13  ;;  %v8705_v35 = vunpack.i.l.bf16 %v8704_v13 }
  0xf7   : > { %8993 = vrot.lane.b32.xlu0 %v10800_v1, %s10295_s24  ;;  %8317 = vmatprep.mubr.msk.bf16.mxu0 %vm2125_vm12, %v2093_v16  ;;  %v791_v1 = vld [vmem:[#allocation2 + $0x142] sm:$0xff]  ;;  %v8711_v40 = vunpack.i.h.bf16 %v10862_v11  ;;  %v8710_v41 = vunpack.i.l.bf16 %v10862_v11 }
  0xf8   : > { %8998 = vrot.lane.b32.xlu1 %v10812_v15, %s10295_s24  ;;  %v2062_v21 = vsel %vm2054_vm11, %v2029_v20, %v8706_v18  ;;  %v2061_v23 = vsel %vm2054_vm11, %v2028_v19, %v8705_v35  ;;  %v10890_v30 = vpack.i.bf16 %v791_v1, %v790_v28 }
  0xf9   : > { %v8714_v25 = vpop.permute.xlu0 %8713  ;;  %v2094_v26 = vpack.c.bf16 %v2062_v21, %v2061_v23  ;;  %v1835_v52 = vsel %vm400_vm0, %v10182_v43, %v8711_v40  ;;  %v1834_v61 = vsel %vm400_vm0, %v10183_v60, %v8710_v41 }
  0xfa   : > { %v8719_v24 = vpop.permute.xlu1 %8718  ;;  %v8716_v53 = vunpack.i.h.bf16 %v8714_v25  ;;  %v8715_v54 = vunpack.i.l.bf16 %v8714_v25 }
  0xfb   : > { %9003 = vrot.lane.b32.xlu0 %v10808_v8, %s10296_s22  ;;  %8318 = vmatmul.mubr.msk.bf16.gmra.mxu0 %vm2125_vm12, %v2094_v26  ;;  %v8721_v48 = vunpack.i.h.bf16 %v8719_v24  ;;  %v8720_v51 = vunpack.i.l.bf16 %v8719_v24 }
  0xfc   : > { %9008 = vrot.lane.b32.xlu1 %v10866_v6, %s10296_s22  ;;  %v1866_v11 = vsel %vm1856_vm5, %v1833_v3, %v8716_v53  ;;  %v1865_v12 = vsel %vm1856_vm5, %v1832_v5, %v8715_v54 }
  0xfd   : > { %v10884_v29 = vpop.permute.xlu0 %8723  ;;  %v1867_v9 = vsel %vm1856_vm5, %v1834_v61, %v8720_v51  ;;  %v1868_v10 = vsel %vm1856_vm5, %v1835_v52, %v8721_v48 }
  0xfe   : > { %v8729_v27 = vpop.permute.xlu1 %8728  ;;  %v8725_v62 = vunpack.i.l.bf16 %v10884_v29 }
  0xff   : > { %9013 = vrot.lane.b32.xlu0 %v10810_v14, %s10297_s16  ;;  %v8731_v56 = vunpack.i.h.bf16 %v8729_v27  ;;  %v8730_v31 = vunpack.i.l.bf16 %v8729_v27 }
 0x100   : > { %9018 = vrot.lane.b32.xlu1 %v10808_v8, %s10289_s13 }
 0x101   : > { %v10894_v32 = vpop.permute.xlu0 %8733  ;;  %v1900_v49 = vsel %vm1889_vm6, %v1867_v9, %v8730_v31  ;;  %v1901_v17 = vsel %vm1889_vm6, %v1868_v10, %v8731_v56 }
 0x102   : > { %v10892_v7 = vpop.permute.xlu1 %8738  ;;  %v8736_v63 = vunpack.i.h.bf16 %v10894_v32  ;;  %v8735_v13 = vunpack.i.l.bf16 %v10894_v32 }
 0x103   : > { %9023 = vrot.lane.b32.xlu0 %v10890_v30, %s10297_s16  ;;  %v8741_v24 = vunpack.i.h.bf16 %v10892_v7  ;;  %v8740_v25 = vunpack.i.l.bf16 %v10892_v7 }
 0x104   : > { %9028 = vrot.lane.b32.xlu1 %v10866_v6, %s10289_s13 }
 0x105   : > { %v10902_v8 = vpop.permute.xlu0 %8743  ;;  %v1933_v48 = vsel %vm1922_vm7, %v1900_v49, %v8740_v25  ;;  %v1934_v51 = vsel %vm1922_vm7, %v1901_v17, %v8741_v24  ;;  %v637_v49 = vld [vmem:[#allocation2 + $0x180] sm:$0xff]  ;;  %v638_v17 = vld [vmem:[#allocation2 + $0x188] sm:$0xff] }
 0x106   : > { %v10900_v37 = vpop.permute.xlu1 %8748  ;;  %v8746_v18 = vunpack.i.h.bf16 %v10902_v8  ;;  %v8745_v35 = vunpack.i.l.bf16 %v10902_v8  ;;  %v11106_v24 = vpack.i.bf16 %v638_v17, %v637_v49  ;;  %v702_v25 = vld [vmem:[#allocation2 + $0x18a] sm:$0xff] }
 0x107   : > { %9033 = vrot.lane.b32.xlu0 %v10810_v14, %s10290_s14  ;;  %v8726_v14 = vunpack.i.h.bf16 %v10884_v29  ;;  %v8751_v29 = vunpack.i.h.bf16 %v10900_v37  ;;  %v8750_v32 = vunpack.i.l.bf16 %v10900_v37  ;;  %v762_v37 = vld [vmem:[#allocation2 + $0x169] sm:$0xff] }
 0x108   : > { %9038 = vrot.lane.b32.xlu1 %v10890_v30, %s10290_s14  ;;  %v10976_v52 = vpack.i.bf16 %v763_v36, %v762_v37 }
 0x109   : > { %v8754_v57 = vpop.permute.xlu0 %8753  ;;  %v1899_v20 = vsel %vm1889_vm6, %v1866_v11, %v8726_v14  ;;  %v1966_v56 = vsel %vm1955_vm8, %v1933_v48, %v8750_v32  ;;  %v1967_v31 = vsel %vm1955_vm8, %v1934_v51, %v8751_v29  ;;  %v794_v11 = vld [vmem:[#allocation2 + $0x16a] sm:$0xff] }
 0x10a   : > { %v10914_v50 = vpop.permute.xlu1 %8758  ;;  %v8756_v21 = vunpack.i.h.bf16 %v8754_v57  ;;  %v8755_v23 = vunpack.i.l.bf16 %v8754_v57  ;;  %v1932_v1 = vsel %vm1922_vm7, %v1899_v20, %v8736_v63  ;;  %v701_v20 = vld [vmem:[#allocation2 + $0x182] sm:$0xff]  ;;  %v526_v32 = vld [vmem:[#allocation2 + $0xb0] sm:$0xff] }
 0x10b   : > { %9043 = vrot.lane.b32.xlu0 %v10812_v15, %s10291_s15  ;;  %v1898_v15 = vsel %vm1889_vm6, %v1865_v12, %v8725_v62  ;;  %v1965_v8 = vsel %vm1955_vm8, %v1932_v1, %v8746_v18  ;;  %v8761_v7 = vunpack.i.h.bf16 %v10914_v50  ;;  %v8760_v38 = vunpack.i.l.bf16 %v10914_v50  ;;  %v795_v12 = vld [vmem:[#allocation2 + $0x172] sm:$0xff]  ;;  %v525_v29 = vld [vmem:[#allocation2 + $0xa8] sm:$0xff] }
 0x10c   : > { %9048 = vrot.lane.b32.xlu1 %v10908_v42, %s10291_s15  ;;  %v1931_v28 = vsel %vm1922_vm7, %v1898_v15, %v8735_v13  ;;  %v1998_v45 = vsel %vm1988_vm9, %v1965_v8, %v8756_v21  ;;  %v11016_v13 = vpack.i.bf16 %v795_v12, %v794_v11  ;;  %v670_v15 = vld [vmem:[#allocation2 + $0x189] sm:$0xff]  ;;  %v11126_v36 = vpack.i.bf16 %v702_v25, %v701_v20  ;;  %v767_v25 = vld [vmem:[#allocation2 + $0x1a1] sm:$0xff] }
 0x10d   : > { %v8764_v19 = vpop.permute.xlu0 %8763  ;;  %v1964_v34 = vsel %vm1955_vm8, %v1931_v28, %v8745_v35  ;;  %v2000_v60 = vsel %vm1988_vm9, %v1967_v31, %v8761_v7  ;;  %v523_v7 = vld [vmem:[#allocation2 + $0x90] sm:$0xff] }
 0x10e   : > { %v8769_v16 = vpop.permute.xlu1 %8768  ;;  %v8766_v26 = vunpack.i.h.bf16 %v8764_v19  ;;  %v8765_v27 = vunpack.i.l.bf16 %v8764_v19  ;;  %v669_v19 = vld [vmem:[#allocation2 + $0x181] sm:$0xff] }
 0x10f   : > { %9053 = vrot.lane.b32.xlu0 %v10866_v6, %s12894_s25  ;;  %v1997_v6 = vsel %vm1988_vm9, %v1964_v34, %v8755_v23  ;;  %v8771_v44 = vunpack.i.h.bf16 %v8769_v16  ;;  %v8770_v46 = vunpack.i.l.bf16 %v8769_v16 }
 0x110   : > { %9058 = vrot.lane.b32.xlu1 %v10916_v55, %s12894_s25  ;;  %v2030_v47 = vsel %vm2021_vm10, %v1997_v6, %v8765_v27  ;;  %v2031_v22 = vsel %vm2021_vm10, %v1998_v45, %v8766_v26  ;;  %v11108_v26 = vld [vmem:[#allocation2 + $0x198] sm:$0xff]  ;;  %v11110_v27 = vld [vmem:[#allocation2 + $0x1a0] sm:$0xff] }
 0x111   : > { %v8774_v39 = vpop.permute.xlu0 %8773  ;;  %v2033_v2 = vsel %vm2021_vm10, %v2000_v60, %v8771_v44 }
 0x112   : > { %v10954_v33 = vpop.permute.xlu1 %8778  ;;  %v8776_v40 = vunpack.i.h.bf16 %v8774_v39  ;;  %v8775_v41 = vunpack.i.l.bf16 %v8774_v39 }
 0x113   : > { %9063 = vrot.lane.b32.xlu0 %v10890_v30, %s12895_s29  ;;  %v1999_v30 = vsel %vm1988_vm9, %v1966_v56, %v8760_v38  ;;  %v8781_v28 = vunpack.i.h.bf16 %v10954_v33  ;;  %v8780_v1 = vunpack.i.l.bf16 %v10954_v33  ;;  %v524_v38 = vld [vmem:[#allocation2 + $0x98] sm:$0xff] }
 0x114   : > { %9068 = vrot.lane.b32.xlu1 %v10918_v58, %s12895_s29  ;;  %v2063_v53 = vsel %vm2054_vm11, %v2030_v47, %v8775_v41  ;;  %v2064_v54 = vsel %vm2054_vm11, %v2031_v22, %v8776_v40  ;;  %v2032_v62 = vsel %vm2021_vm10, %v1999_v30, %v8770_v46  ;;  %v11122_v40 = vpack.i.bf16 %v670_v15, %v669_v19 }
 0x115   : > { %v8784_v57 = vpop.permute.xlu0 %8783  ;;  %v2095_v43 = vpack.c.bf16 %v2064_v54, %v2063_v53  ;;  %v1837_v48 = vsel %vm400_vm0, %v524_v38, %v8781_v28  ;;  %v1836_v51 = vsel %vm400_vm0, %v523_v7, %v8780_v1 }
 0x116   : > { %v10972_v50 = vpop.permute.xlu1 %8788  ;;  %v8786_v61 = vunpack.i.h.bf16 %v8784_v57  ;;  %v8785_v14 = vunpack.i.l.bf16 %v8784_v57 }
 0x117   : > { %9073 = vrot.lane.b32.xlu0 %v10908_v42, %s10295_s24  ;;  %8321 = vmatprep.mubr.msk.bf16.mxu0 %vm2125_vm12, %v2095_v43  ;;  %v8791_v21 = vunpack.i.h.bf16 %v10972_v50  ;;  %v8790_v23 = vunpack.i.l.bf16 %v10972_v50 }
 0x118   : > { %9078 = vrot.lane.b32.xlu1 %v10920_v59, %s10295_s24  ;;  %v2066_v3 = vsel %vm2054_vm11, %v2033_v2, %v8786_v61  ;;  %v2065_v4 = vsel %vm2054_vm11, %v2032_v62, %v8785_v14 }
 0x119   : > { %v10991_v9 = vpop.permute.xlu0 %8793  ;;  %v2096_v10 = vpack.c.bf16 %v2066_v3, %v2065_v4  ;;  %v1839_v44 = vsel %vm400_vm0, %v526_v32, %v8791_v21  ;;  %v1838_v46 = vsel %vm400_vm0, %v525_v29, %v8790_v23 }
 0x11a   : > { %v10989_v5 = vpop.permute.xlu1 %8798  ;;  %v8796_v39 = vunpack.i.h.bf16 %v10991_v9  ;;  %v8795_v6 = vunpack.i.l.bf16 %v10991_v9 }
 0x11b   : > { %9083 = vrot.lane.b32.xlu0 %v10916_v55, %s10296_s22  ;;  %8322 = vmatmul.mubr.msk.bf16.gmra.mxu0 %vm2125_vm12, %v2096_v10  ;;  %v8801_v34 = vunpack.i.h.bf16 %v10989_v5  ;;  %v8800_v8 = vunpack.i.l.bf16 %v10989_v5 }
 0x11c   : > { %9088 = vrot.lane.b32.xlu1 %v10976_v52, %s10296_s22  ;;  %v1870_v50 = vsel %vm1856_vm5, %v1837_v48, %v8796_v39  ;;  %v1869_v56 = vsel %vm1856_vm5, %v1836_v51, %v8795_v6  ;;  %v798_v51 = vld [vmem:[#allocation2 + $0x19a] sm:$0xff] }
 0x11d   : > { %v11010_v63 = vpop.permute.xlu0 %8803  ;;  %v1871_v53 = vsel %vm1856_vm5, %v1838_v46, %v8800_v8  ;;  %v1872_v54 = vsel %vm1856_vm5, %v1839_v44, %v8801_v34 }
 0x11e   : > { %v10998_v42 = vpop.permute.xlu1 %8808  ;;  %v8806_v47 = vunpack.i.h.bf16 %v11010_v63  ;;  %v8805_v22 = vunpack.i.l.bf16 %v11010_v63 }
 0x11f   : > { %9093 = vrot.lane.b32.xlu0 %v10918_v58, %s10297_s16  ;;  %v8811_v33 = vunpack.i.h.bf16 %v10998_v42  ;;  %v8810_v41 = vunpack.i.l.bf16 %v10998_v42 }
 0x120   : > { %9098 = vrot.lane.b32.xlu1 %v10916_v55, %s10289_s13  ;;  %v1903_v2 = vsel %vm1889_vm6, %v1870_v50, %v8806_v47 }
 0x121   : > { %v11092_v55 = vpop.permute.xlu0 %8813  ;;  %v1904_v30 = vsel %vm1889_vm6, %v1871_v53, %v8810_v41  ;;  %v1905_v60 = vsel %vm1889_vm6, %v1872_v54, %v8811_v33  ;;  %v799_v53 = vld [vmem:[#allocation2 + $0x1a2] sm:$0xff] }
 0x122   : > { %v11018_v16 = vpop.permute.xlu1 %8818  ;;  %v8816_v31 = vunpack.i.h.bf16 %v11092_v55  ;;  %v8815_v57 = vunpack.i.l.bf16 %v11092_v55 }
 0x123   : > { %9103 = vrot.lane.b32.xlu0 %v11016_v13, %s10297_s16  ;;  %v8821_v5 = vunpack.i.h.bf16 %v11018_v16  ;;  %v8820_v9 = vunpack.i.l.bf16 %v11018_v16 }
 0x124   : > { %9108 = vrot.lane.b32.xlu1 %v10976_v52, %s10289_s13  ;;  %v1936_v12 = vsel %vm1922_vm7, %v1903_v2, %v8816_v31  ;;  %s10299_s13 = smov 64  }
 0x125   : > { %v11100_v35 = vpop.permute.xlu0 %8823  ;;  %v1937_v34 = vsel %vm1922_vm7, %v1904_v30, %v8820_v9  ;;  %v1938_v8 = vsel %vm1922_vm7, %v1905_v60, %v8821_v5  ;;  %v529_v9 = vld [vmem:[#allocation2 + $0xd8] sm:$0xff] }
 0x126   : > { %v11098_v18 = vpop.permute.xlu1 %8828  ;;  %v8826_v61 = vunpack.i.h.bf16 %v11100_v35  ;;  %v8825_v14 = vunpack.i.l.bf16 %v11100_v35 }
 0x127   : > { %9113 = vrot.lane.b32.xlu0 %v10918_v58, %s10290_s14  ;;  %v9157_v58 = vpack.i.bf16 %v11110_v27, %v11108_v26  ;;  %v8831_v63 = vunpack.i.h.bf16 %v11098_v18  ;;  %v8830_v55 = vunpack.i.l.bf16 %v11098_v18  ;;  %v766_v18 = vld [vmem:[#allocation2 + $0x199] sm:$0xff]  ;;  %v9177_v26 = vpack.i.bf16 %v799_v53, %v798_v51  ;;  %v2485_v27 = vld [vmem:[#allocation3 + $0x1] sm:$0xff] }
 0x128   : > { %9118 = vrot.lane.b32.xlu1 %v11016_v13, %s10290_s14  ;;  %v1969_v35 = vsel %vm1955_vm8, %v1936_v12, %v8826_v61  ;;  %v2517_v61 = vld [vmem:[#allocation3 + $0x2] sm:$0xff]  ;;  %v527_v12 = vld [vmem:[#allocation2 + $0xc0] sm:$0xff] }
 0x129   : > { %v8834_v37 = vpop.permute.xlu0 %8833  ;;  %v1970_v6 = vsel %vm1955_vm8, %v1937_v34, %v8830_v55 }
 0x12a   : > { %v11120_v45 = vpop.permute.xlu1 %8838  ;;  %v8836_v3 = vunpack.i.h.bf16 %v8834_v37  ;;  %v8835_v4 = vunpack.i.l.bf16 %v8834_v37  ;;  %v9167_v37 = vpack.i.bf16 %v767_v25, %v766_v18 }
 0x12b   : > { %9123 = vrot.lane.b32.xlu0 %v10920_v59, %s10291_s15  ;;  %v1902_v59 = vsel %vm1889_vm6, %v1869_v56, %v8805_v22  ;;  %v8841_v16 = vunpack.i.h.bf16 %v11120_v45  ;;  %v8840_v19 = vunpack.i.l.bf16 %v11120_v45  ;;  %v1971_v45 = vsel %vm1955_vm8, %v1938_v8, %v8831_v63  ;;  %v528_v63 = vld [vmem:[#allocation2 + $0xc8] sm:$0xff] }
 0x12c   : > { %9128 = vrot.lane.b32.xlu1 %v11106_v24, %s10291_s15  ;;  %v1935_v11 = vsel %vm1922_vm7, %v1902_v59, %v8815_v57  ;;  %v2002_v20 = vsel %vm1988_vm9, %v1969_v35, %v8836_v3 }
 0x12d   : > { %v8844_v62 = vpop.permute.xlu0 %8843  ;;  %v1968_v17 = vsel %vm1955_vm8, %v1935_v11, %v8825_v14  ;;  %v2003_v44 = vsel %vm1988_vm9, %v1970_v6, %v8840_v19  ;;  %v2518_v14 = vld [vmem:[#allocation3 + $0xa] sm:$0xff] }
 0x12e   : > { %v8849_v43 = vpop.permute.xlu1 %8848  ;;  %v8846_v10 = vunpack.i.h.bf16 %v8844_v62  ;;  %v8845_v42 = vunpack.i.l.bf16 %v8844_v62 }
 0x12f   : > { %9133 = vrot.lane.b32.xlu0 %v10976_v52, %s12894_s25  ;;  %v2001_v52 = vsel %vm1988_vm9, %v1968_v17, %v8835_v4  ;;  %v8851_v28 = vunpack.i.h.bf16 %v8849_v43  ;;  %v8850_v1 = vunpack.i.l.bf16 %v8849_v43 }
 0x130   : > { %9138 = vrot.lane.b32.xlu1 %v11122_v40, %s12894_s25  ;;  %v2034_v29 = vsel %vm2021_vm10, %v2001_v52, %v8845_v42  ;;  %v2035_v32 = vsel %vm2021_vm10, %v2002_v20, %v8846_v10  ;;  %v530_v10 = vld [vmem:[#allocation2 + $0xe0] sm:$0xff]  ;;  %s8199_s25 = sshll.u32 %s10383_s21, 4  ;;  %s10301_s21 = smov [#allocation12]  }
 0x131   : > { %v8854_v15 = vpop.permute.xlu0 %8853  ;;  %v2036_v22 = vsel %vm2021_vm10, %v2003_v44, %v8850_v1 }
 0x132   : > { %v11162_v49 = vpop.permute.xlu1 %8858  ;;  %v8856_v21 = vunpack.i.h.bf16 %v8854_v15  ;;  %v8855_v23 = vunpack.i.l.bf16 %v8854_v15 }
 0x133   : > { %9143 = vrot.lane.b32.xlu0 %v11016_v13, %s12895_s29  ;;  %v2004_v13 = vsel %vm1988_vm9, %v1971_v45, %v8841_v16  ;;  %v8861_v5 = vunpack.i.h.bf16 %v11162_v49 }
 0x134   : > { %9148 = vrot.lane.b32.xlu1 %v11126_v36, %s12895_s29  ;;  %v2067_v7 = vsel %vm2054_vm11, %v2034_v29, %v8855_v23  ;;  %v2068_v38 = vsel %vm2054_vm11, %v2035_v32, %v8856_v21  ;;  %v2037_v48 = vsel %vm2021_vm10, %v2004_v13, %v8851_v28  ;;  %s393_s29 = scalar_lea.vmem [#allocation12], %s392_s30 }
 0x135   : > { %v8864_v33 = vpop.permute.xlu0 %8863  ;;  %v2097_v41 = vpack.c.bf16 %v2068_v38, %v2067_v7  ;;  %v1841_v23 = vsel %vm400_vm0, %v528_v63, %v8861_v5 }
 0x136   : > { %v11180_v39 = vpop.permute.xlu1 %8868  ;;  %v8866_v46 = vunpack.i.h.bf16 %v8864_v33  ;;  %v8865_v47 = vunpack.i.l.bf16 %v8864_v33 }
 0x137   : > { %9153 = vrot.lane.b32.xlu0 %v11106_v24, %s10295_s24  ;;  %8325 = vmatprep.mubr.msk.bf16.mxu0 %vm2125_vm12, %v2097_v41  ;;  %v8871_v3 = vunpack.i.h.bf16 %v11180_v39  ;;  %v8870_v4 = vunpack.i.l.bf16 %v11180_v39 }
 0x138   : > { %9158 = vrot.lane.b32.xlu1 %v9157_v58, %s10295_s24  ;;  %v2070_v54 = vsel %vm2054_vm11, %v2037_v48, %v8866_v46  ;;  %v2069_v50 = vsel %vm2054_vm11, %v2036_v22, %v8865_v47  ;;  %v2486_v58 = vld [vmem:[#allocation3 + $0x9] sm:$0xff]  ;;  %s7705_s24 = scalar_lea.sflag [#allocation11], %s392_s30 }
 0x139   : > { %v8874_v31 = vpop.permute.xlu0 %8873  ;;  %v2098_v57 = vpack.c.bf16 %v2070_v54, %v2069_v50  ;;  %v9182_v30 = vpack.i.bf16 %v2486_v58, %v2485_v27  ;;  %v1843_v52 = vsel %vm400_vm0, %v530_v10, %v8871_v3  ;;  %v1842_v20 = vsel %vm400_vm0, %v529_v9, %v8870_v4 }
 0x13a   : > { %v8879_v56 = vpop.permute.xlu1 %8878  ;;  %v8876_v55 = vunpack.i.h.bf16 %v8874_v31  ;;  %v8875_v17 = vunpack.i.l.bf16 %v8874_v31 }
 0x13b   : > { %9163 = vrot.lane.b32.xlu0 %v11122_v40, %s10296_s22  ;;  %8326 = vmatmul.mubr.msk.bf16.gmra.mxu0 %vm2125_vm12, %v2098_v57  ;;  %v9187_v40 = vpack.i.bf16 %v2518_v14, %v2517_v61  ;;  %v8881_v42 = vunpack.i.h.bf16 %v8879_v56  ;;  %v8880_v11 = vunpack.i.l.bf16 %v8879_v56 }
 0x13c   : > { %9168 = vrot.lane.b32.xlu1 %v9167_v37, %s10296_s22  ;;  %v1874_v1 = vsel %vm1856_vm5, %v1841_v23, %v8876_v55  ;;  %s12836_s22 = scalar_lea.hbm %s12882_s11, %s8199_s25 }
 0x13d   : > { %v8884_v43 = vpop.permute.xlu0 %8883  ;;  %v1875_v25 = vsel %vm1856_vm5, %v1842_v20, %v8880_v11  ;;  %v1876_v28 = vsel %vm1856_vm5, %v1843_v52, %v8881_v42 }
 0x13e   : > { %v8889_v24 = vpop.permute.xlu1 %8888  ;;  %v8885_v21 = vunpack.i.l.bf16 %v8884_v43 }
 0x13f   : > { %9173 = vrot.lane.b32.xlu0 %v11126_v36, %s10297_s16  ;;  %v8860_v36 = vunpack.i.l.bf16 %v11162_v49  ;;  %v8891_v16 = vunpack.i.h.bf16 %v8889_v24  ;;  %v8890_v19 = vunpack.i.l.bf16 %v8889_v24  ;;  %v8886_v49 = vunpack.i.h.bf16 %v8884_v43 }
 0x140   : > { %9178 = vrot.lane.b32.xlu1 %v9177_v26, %s10297_s16 }
 0x141   : > { %v8894_v62 = vpop.permute.xlu0 %8893  ;;  %v1840_v18 = vsel %vm400_vm0, %v527_v12, %v8860_v36  ;;  %v1908_v7 = vsel %vm1889_vm6, %v1875_v25, %v8890_v19  ;;  %v1909_v38 = vsel %vm1889_vm6, %v1876_v28, %v8891_v16  ;;  %v1907_v41 = vsel %vm1889_vm6, %v1874_v1, %v8886_v49 }
 0x142   : > { %v11204_v60 = vpop.permute.xlu1 %8898  ;;  %v1873_v29 = vsel %vm1856_vm5, %v1840_v18, %v8875_v17  ;;  %v8896_v32 = vunpack.i.h.bf16 %v8894_v62  ;;  %v8895_v34 = vunpack.i.l.bf16 %v8894_v62 }
 0x143   : > { %9183 = vrot.lane.b32.xlu0 %v9182_v30, %s10298_s12  ;;  %v1906_v33 = vsel %vm1889_vm6, %v1873_v29, %v8885_v21  ;;  %v8901_v13 = vunpack.i.h.bf16 %v11204_v60  ;;  %v8900_v46 = vunpack.i.l.bf16 %v11204_v60 }
 0x144   : > { %v1939_v48 = vsel %vm1922_vm7, %v1906_v33, %v8895_v34  ;;  %v1940_v51 = vsel %vm1922_vm7, %v1907_v41, %v8896_v32  ;;  %v533_v34 = vld [vmem:[#allocation2 + $0x108] sm:$0xff] }
 0x145   : > { %v8904_v2 = vpop.permute.xlu0 %8903 }
 0x146   : > { %v11207_v59 = vpop.permute.xlu1 %8908  ;;  %v8906_v39 = vunpack.i.h.bf16 %v8904_v2  ;;  %v8905_v6 = vunpack.i.l.bf16 %v8904_v2 }
 0x147   : > { %9188 = vrot.lane.b32.xlu0 %v9187_v40, %s10299_s13  ;;  %v8911_v53 = vunpack.i.h.bf16 %v11207_v59  ;;  %v8910_v54 = vunpack.i.l.bf16 %v11207_v59  ;;  %v1941_v40 = vsel %vm1922_vm7, %v1908_v7, %v8900_v46  ;;  %v1942_v59 = vsel %vm1922_vm7, %v1909_v38, %v8901_v13 }
 0x148   : > { %v1972_v56 = vsel %vm1955_vm8, %v1939_v48, %v8905_v6  ;;  %v1973_v31 = vsel %vm1955_vm8, %v1940_v51, %v8906_v39  ;;  %v531_v39 = vld [vmem:[#allocation2 + $0xf0] sm:$0xff]  ;;  %v532_v6 = vld [vmem:[#allocation2 + $0xf8] sm:$0xff] }
 0x149   : > { %v8914_v15 = vpop.permute.xlu0 %8913  ;;  %v1974_v5 = vsel %vm1955_vm8, %v1941_v40, %v8910_v54  ;;  %v1975_v36 = vsel %vm1955_vm8, %v1942_v59, %v8911_v53 }
 0x14a   : > { %v8919_v35 = vpop.permute.xlu1 %8918  ;;  %v8916_v37 = vunpack.i.h.bf16 %v8914_v15  ;;  %v8915_v44 = vunpack.i.l.bf16 %v8914_v15 }
 0x14b   : > { %v8921_v57 = vunpack.i.h.bf16 %v8919_v35  ;;  %v8920_v26 = vunpack.i.l.bf16 %v8919_v35 }
 0x14c   : > { %v2005_v27 = vsel %vm1988_vm9, %v1972_v56, %v8915_v44  ;;  %v2006_v58 = vsel %vm1988_vm9, %v1973_v31, %v8916_v37 }
 0x14d   : > { %v8924_v45 = vpop.permute.xlu0 %8923  ;;  %v2007_v42 = vsel %vm1988_vm9, %v1974_v5, %v8920_v26  ;;  %v2008_v11 = vsel %vm1988_vm9, %v1975_v36, %v8921_v57 }
 0x14e   : > { %v8929_v8 = vpop.permute.xlu1 %8928  ;;  %v8926_v47 = vunpack.i.h.bf16 %v8924_v45  ;;  %v8925_v22 = vunpack.i.l.bf16 %v8924_v45 }
 0x14f   : > { %v8931_v60 = vunpack.i.h.bf16 %v8929_v8  ;;  %v8930_v61 = vunpack.i.l.bf16 %v8929_v8  ;;  %v534_v8 = vld [vmem:[#allocation2 + $0x110] sm:$0xff] }
 0x150   : > { %v2038_v14 = vsel %vm2021_vm10, %v2005_v27, %v8925_v22  ;;  %v2039_v62 = vsel %vm2021_vm10, %v2006_v58, %v8926_v47 }
 0x151   : > { %v8934_v24 = vpop.permute.xlu0 %8933  ;;  %v2040_v55 = vsel %vm2021_vm10, %v2007_v42, %v8930_v61  ;;  %v2041_v17 = vsel %vm2021_vm10, %v2008_v11, %v8931_v60 }
 0x152   : > { %v11232_v50 = vpop.permute.xlu1 %8938  ;;  %v8936_v43 = vunpack.i.h.bf16 %v8934_v24  ;;  %v8935_v30 = vunpack.i.l.bf16 %v8934_v24 }
 0x153   : > { %v8941_v29 = vunpack.i.h.bf16 %v11232_v50  ;;  %v8940_v32 = vunpack.i.l.bf16 %v11232_v50 }
 0x154   : > { %v2071_v2 = vsel %vm2054_vm11, %v2038_v14, %v8935_v30  ;;  %v2072_v3 = vsel %vm2054_vm11, %v2039_v62, %v8936_v43 }
 0x155   : > { %v8944_v9 = vpop.permute.xlu0 %8943  ;;  %v2099_v10 = vpack.c.bf16 %v2072_v3, %v2071_v2  ;;  %v1845_v51 = vsel %vm400_vm0, %v532_v6, %v8941_v29  ;;  %v1844_v53 = vsel %vm400_vm0, %v531_v39, %v8940_v32 }
 0x156   : > { %v8949_v4 = vpop.permute.xlu1 %8948  ;;  %v8946_v12 = vunpack.i.h.bf16 %v8944_v9  ;;  %v8945_v63 = vunpack.i.l.bf16 %v8944_v9 }
 0x157   : > { %8329 = vmatprep.mubr.msk.bf16.mxu0 %vm2125_vm12, %v2099_v10  ;;  %v8951_v28 = vunpack.i.h.bf16 %v8949_v4  ;;  %v8950_v1 = vunpack.i.l.bf16 %v8949_v4 }
 0x158   : > { %v2074_v35 = vsel %vm2054_vm11, %v2041_v17, %v8946_v12  ;;  %v2073_v16 = vsel %vm2054_vm11, %v2040_v55, %v8945_v63 }
 0x159   : > { %v8954_v15 = vpop.permute.xlu0 %8953  ;;  %v2100_v52 = vpack.c.bf16 %v2074_v35, %v2073_v16  ;;  %v1847_v46 = vsel %vm400_vm0, %v534_v8, %v8951_v28  ;;  %v1846_v47 = vsel %vm400_vm0, %v533_v34, %v8950_v1 }
 0x15a   : > { %v8959_v19 = vpop.permute.xlu1 %8958  ;;  %v8956_v45 = vunpack.i.h.bf16 %v8954_v15  ;;  %v8955_v33 = vunpack.i.l.bf16 %v8954_v15 }
 0x15b   : > { %8330 = vmatmul.mubr.msk.bf16.gmra.mxu0 %vm2125_vm12, %v2100_v52  ;;  %v8961_v7 = vunpack.i.h.bf16 %v8959_v19  ;;  %v8960_v38 = vunpack.i.l.bf16 %v8959_v19 }
 0x15c   : > { %v1878_v56 = vsel %vm1856_vm5, %v1845_v51, %v8956_v45  ;;  %v1877_v31 = vsel %vm1856_vm5, %v1844_v53, %v8955_v33 }
 0x15d   : > { %v8964_v49 = vpop.permute.xlu0 %8963  ;;  %v1879_v54 = vsel %vm1856_vm5, %v1846_v47, %v8960_v38  ;;  %v1880_v50 = vsel %vm1856_vm5, %v1847_v46, %v8961_v7 }
 0x15e   : > { %v8969_v20 = vpop.permute.xlu1 %8968  ;;  %v8966_v22 = vunpack.i.h.bf16 %v8964_v49  ;;  %v8965_v48 = vunpack.i.l.bf16 %v8964_v49 }
 0x15f   : > { %v8971_v37 = vunpack.i.h.bf16 %v8969_v20  ;;  %v8970_v44 = vunpack.i.l.bf16 %v8969_v20 }
 0x160   : > { %v1910_v61 = vsel %vm1889_vm6, %v1877_v31, %v8965_v48  ;;  %v1911_v14 = vsel %vm1889_vm6, %v1878_v56, %v8966_v22 }
 0x161   : > { %v8974_v23 = vpop.permute.xlu0 %8973  ;;  %v1912_v27 = vsel %vm1889_vm6, %v1879_v54, %v8970_v44  ;;  %v1913_v58 = vsel %vm1889_vm6, %v1880_v50, %v8971_v37 }
 0x162   : > { %v11254_v21 = vpop.permute.xlu1 %8978  ;;  %v8976_v57 = vunpack.i.h.bf16 %v8974_v23  ;;  %v8975_v26 = vunpack.i.l.bf16 %v8974_v23 }
 0x163   : > { %v8981_v59 = vunpack.i.h.bf16 %v11254_v21  ;;  %v8980_v2 = vunpack.i.l.bf16 %v11254_v21 }
 0x164   : > { %v1943_v5 = vsel %vm1922_vm7, %v1910_v61, %v8975_v26  ;;  %v1944_v36 = vsel %vm1922_vm7, %v1911_v14, %v8976_v57 }
 0x165   : > { %v8984_v25 = vpop.permute.xlu0 %8983  ;;  %v1945_v23 = vsel %vm1922_vm7, %v1912_v27, %v8980_v2  ;;  %v535_v27 = vld [vmem:[#allocation2 + $0x120] sm:$0xff]  ;;  %v10187_v2 = vld [vmem:[#allocation2 + $0x138] sm:$0xff] }
 0x166   : > { %v11256_v18 = vpop.permute.xlu1 %8988  ;;  %v8986_v43 = vunpack.i.h.bf16 %v8984_v25  ;;  %v8985_v30 = vunpack.i.l.bf16 %v8984_v25 }
 0x167   : > { %v8991_v9 = vunpack.i.h.bf16 %v11256_v18  ;;  %v8990_v10 = vunpack.i.l.bf16 %v11256_v18  ;;  %v1946_v18 = vsel %vm1922_vm7, %v1913_v58, %v8981_v59  ;;  %v536_v58 = vld [vmem:[#allocation2 + $0x128] sm:$0xff] }
 0x168   : > { %v1976_v11 = vsel %vm1955_vm8, %v1943_v5, %v8985_v30  ;;  %v1977_v12 = vsel %vm1955_vm8, %v1944_v36, %v8986_v43 }
 0x169   : > { %v8994_v13 = vpop.permute.xlu0 %8993  ;;  %v1978_v29 = vsel %vm1955_vm8, %v1945_v23, %v8990_v10  ;;  %v1979_v32 = vsel %vm1955_vm8, %v1946_v18, %v8991_v9 }
 0x16a   : > { %v8999_v41 = vpop.permute.xlu1 %8998  ;;  %v8996_v62 = vunpack.i.h.bf16 %v8994_v13  ;;  %v8995_v40 = vunpack.i.l.bf16 %v8994_v13 }
 0x16b   : > { %v9001_v63 = vunpack.i.h.bf16 %v8999_v41  ;;  %v9000_v55 = vunpack.i.l.bf16 %v8999_v41 }
 0x16c   : > { %v2009_v35 = vsel %vm1988_vm9, %v1976_v11, %v8995_v40  ;;  %v2010_v16 = vsel %vm1988_vm9, %v1977_v12, %v8996_v62  ;;  %v10186_v40 = vld [vmem:[#allocation2 + $0x140] sm:$0xff] }
 0x16d   : > { %v9004_v60 = vpop.permute.xlu0 %9003  ;;  %v2011_v7 = vsel %vm1988_vm9, %v1978_v29, %v9000_v55  ;;  %v2012_v38 = vsel %vm1988_vm9, %v1979_v32, %v9001_v63 }
 0x16e   : > { %v9009_v24 = vpop.permute.xlu1 %9008  ;;  %v9006_v3 = vunpack.i.h.bf16 %v9004_v60  ;;  %v9005_v4 = vunpack.i.l.bf16 %v9004_v60 }
 0x16f   : > { %v9011_v52 = vunpack.i.h.bf16 %v9009_v24  ;;  %v9010_v20 = vunpack.i.l.bf16 %v9009_v24 }
 0x170   : > { %v2042_v49 = vsel %vm2021_vm10, %v2009_v35, %v9005_v4  ;;  %v2043_v21 = vsel %vm2021_vm10, %v2010_v16, %v9006_v3 }
 0x171   : > { %v9014_v17 = vpop.permute.xlu0 %9013  ;;  %v2044_v45 = vsel %vm2021_vm10, %v2011_v7, %v9010_v20  ;;  %v2045_v33 = vsel %vm2021_vm10, %v2012_v38, %v9011_v52 }
 0x172   : > { %v11278_v42 = vpop.permute.xlu1 %9018  ;;  %v9016_v19 = vunpack.i.h.bf16 %v9014_v17  ;;  %v9015_v15 = vunpack.i.l.bf16 %v9014_v17 }
 0x173   : > { %v9021_v31 = vunpack.i.h.bf16 %v11278_v42  ;;  %v9020_v57 = vunpack.i.l.bf16 %v11278_v42 }
 0x174   : > { %v2075_v25 = vsel %vm2054_vm11, %v2042_v49, %v9015_v15  ;;  %v2076_v28 = vsel %vm2054_vm11, %v2043_v21, %v9016_v19 }
 0x175   : > { %v9024_v34 = vpop.permute.xlu0 %9023  ;;  %v2101_v8 = vpack.c.bf16 %v2076_v28, %v2075_v25  ;;  %v1849_v36 = vsel %vm400_vm0, %v536_v58, %v9021_v31  ;;  %v1848_v9 = vsel %vm400_vm0, %v535_v27, %v9020_v57 }
 0x176   : > { %v9029_v1 = vpop.permute.xlu1 %9028  ;;  %v9026_v39 = vunpack.i.h.bf16 %v9024_v34  ;;  %v9025_v6 = vunpack.i.l.bf16 %v9024_v34 }
 0x177   : > { %8333 = vmatprep.mubr.msk.bf16.mxu0 %vm2125_vm12, %v2101_v8  ;;  %v9031_v50 = vunpack.i.h.bf16 %v9029_v1  ;;  %v9030_v56 = vunpack.i.l.bf16 %v9029_v1 }
 0x178   : > { %v2078_v41 = vsel %vm2054_vm11, %v2045_v33, %v9026_v39  ;;  %v2077_v37 = vsel %vm2054_vm11, %v2044_v45, %v9025_v6 }
 0x179   : > { %v9034_v13 = vpop.permute.xlu0 %9033  ;;  %v2102_v46 = vpack.c.bf16 %v2078_v41, %v2077_v37  ;;  %v1851_v59 = vsel %vm400_vm0, %v10186_v40, %v9031_v50  ;;  %v1850_v3 = vsel %vm400_vm0, %v10187_v2, %v9030_v56 }
 0x17a   : > { %v9039_v44 = vpop.permute.xlu1 %9038  ;;  %v9036_v43 = vunpack.i.h.bf16 %v9034_v13  ;;  %v9035_v30 = vunpack.i.l.bf16 %v9034_v13 }
 0x17b   : > { %8334 = vmatmul.mubr.msk.bf16.gmra.mxu0 %vm2125_vm12, %v2102_v46  ;;  %v9041_v26 = vunpack.i.h.bf16 %v9039_v44  ;;  %v9040_v24 = vunpack.i.l.bf16 %v9039_v44 }
 0x17c   : > { %v1882_v11 = vsel %vm1856_vm5, %v1849_v36, %v9036_v43  ;;  %v1881_v12 = vsel %vm1856_vm5, %v1848_v9, %v9035_v30 }
 0x17d   : > { %v9044_v22 = vpop.permute.xlu0 %9043  ;;  %v1883_v10 = vsel %vm1856_vm5, %v1850_v3, %v9040_v24  ;;  %v1884_v42 = vsel %vm1856_vm5, %v1851_v59, %v9041_v26  ;;  %v11357_v3 = vld [vmem:[%s12873_s2] ss:$0 sm:$0xff] }
 0x17e   : > { %v9049_v47 = vpop.permute.xlu1 %9048  ;;  %v9046_v4 = vunpack.i.h.bf16 %v9044_v22  ;;  %v9045_v5 = vunpack.i.l.bf16 %v9044_v22 }
 0x17f   : > { %v9051_v61 = vunpack.i.h.bf16 %v9049_v47  ;;  %v9050_v14 = vunpack.i.l.bf16 %v9049_v47 }
 0x180   : > { %v1914_v20 = vsel %vm1889_vm6, %v1881_v12, %v9045_v5  ;;  %v1915_v49 = vsel %vm1889_vm6, %v1882_v11, %v9046_v4 }
 0x181   : > { %v9054_v51 = vpop.permute.xlu0 %9053  ;;  %v1916_v35 = vsel %vm1889_vm6, %v1883_v10, %v9050_v14  ;;  %v1917_v16 = vsel %vm1889_vm6, %v1884_v42, %v9051_v61  ;;  %v9725_v10 = vld [vmem:[%s12874_s3 + $0x20] sm:$0xff]  }
 0x182   : > { %v11300_v48 = vpop.permute.xlu1 %9058  ;;  %v9056_v63 = vunpack.i.h.bf16 %v9054_v51  ;;  %v9055_v55 = vunpack.i.l.bf16 %v9054_v51 }
 0x183   : > { %v9061_v18 = vunpack.i.h.bf16 %v11300_v48  ;;  %v9060_v25 = vunpack.i.l.bf16 %v11300_v48 }
 0x184   : > { %v1947_v29 = vsel %vm1922_vm7, %v1914_v20, %v9055_v55  ;;  %v1948_v32 = vsel %vm1922_vm7, %v1915_v49, %v9056_v63 }
 0x185   : > { %v9064_v54 = vpop.permute.xlu0 %9063  ;;  %v1949_v51 = vsel %vm1922_vm7, %v1916_v35, %v9060_v25 }
 0x186   : > { %v11302_v53 = vpop.permute.xlu1 %9068  ;;  %v9066_v19 = vunpack.i.h.bf16 %v9064_v54  ;;  %v9065_v15 = vunpack.i.l.bf16 %v9064_v54 }
 0x187   : > { %v9071_v34 = vunpack.i.h.bf16 %v11302_v53  ;;  %v9070_v8 = vunpack.i.l.bf16 %v11302_v53  ;;  %v1950_v53 = vsel %vm1922_vm7, %v1917_v16, %v9061_v18  ;;  %v9727_v18 = vld [vmem:[%s12874_s3 + $0x58] sm:$0xff]  }
 0x188   : > { %v1980_v38 = vsel %vm1955_vm8, %v1947_v29, %v9065_v15  ;;  %v1981_v39 = vsel %vm1955_vm8, %v1948_v32, %v9066_v19  ;;  %8345 = vmatprep.subr.bf16.mxu1 %v9727_v18 }
 0x189   : > { %v9074_v62 = vpop.permute.xlu0 %9073  ;;  %v1982_v31 = vsel %vm1955_vm8, %v1949_v51, %v9070_v8  ;;  %v1983_v57 = vsel %vm1955_vm8, %v1950_v53, %v9071_v34  ;;  %8346 = vmatpush3.bf16.msra.mxu1 %v9727_v18 }
 0x18a   : > { %v9079_v60 = vpop.permute.xlu1 %9078  ;;  %v9076_v21 = vunpack.i.h.bf16 %v9074_v62  ;;  %v9075_v23 = vunpack.i.l.bf16 %v9074_v62 }
 0x18b   : > { %v9081_v6 = vunpack.i.h.bf16 %v9079_v60  ;;  %v9080_v45 = vunpack.i.l.bf16 %v9079_v60  ;;  %v9724_v60 = vld [vmem:[%s12874_s3 + $0x28] sm:$0xff]  }
 0x18c   : > { %v2013_v41 = vsel %vm1988_vm9, %v1980_v38, %v9075_v23  ;;  %v2014_v37 = vsel %vm1988_vm9, %v1981_v39, %v9076_v21  ;;  %8389 = vmatprep.subr.bf16.mxu0 %v9724_v60 }
 0x18d   : > { %v9084_v52 = vpop.permute.xlu0 %9083  ;;  %v2015_v27 = vsel %vm1988_vm9, %v1982_v31, %v9080_v45  ;;  %v2016_v58 = vsel %vm1988_vm9, %v1983_v57, %v9081_v6  ;;  %8390 = vmatpush3.bf16.msra.mxu0 %v9724_v60  ;;  %v9728_v6 = vld [vmem:[%s12874_s3 + $0x10] sm:$0xff]   ;;  %v10188_v45 = vld [vmem:[#allocation2 + $0x158] sm:$0xff]  ;;  %v9730_v60 = vld [vmem:[%s12874_s3 + $0x8] sm:$0xff]  }
 0x18e   : > { %v9089_v17 = vpop.permute.xlu1 %9088  ;;  %v9086_v28 = vunpack.i.h.bf16 %v9084_v52  ;;  %v9085_v1 = vunpack.i.l.bf16 %v9084_v52  ;;  %8391 = vmatprep.subr.bf16.mxu0 %v9725_v10  ;;  %v9726_v52 = vld [vmem:[%s12874_s3 + $0x18] sm:$0xff]  }
 0x18f   : > { %v9091_v46 = vunpack.i.h.bf16 %v9089_v17  ;;  %v9090_v47 = vunpack.i.l.bf16 %v9089_v17 }
 0x190   : > { %v2046_v22 = vsel %vm2021_vm10, %v2013_v41, %v9085_v1  ;;  %v2047_v48 = vsel %vm2021_vm10, %v2014_v37, %v9086_v28  ;;  %v10189_v41 = vld [vmem:[#allocation2 + $0x150] sm:$0xff] }
 0x191   : > { %v9094_v33 = vpop.permute.xlu0 %9093  ;;  %v2048_v61 = vsel %vm2021_vm10, %v2015_v27, %v9090_v47  ;;  %v2049_v14 = vsel %vm2021_vm10, %v2016_v58, %v9091_v46  ;;  %8392 = vmatpush3.bf16.msra.mxu0 %v9725_v10  ;;  %v9729_v46 = vld [vmem:[%s12874_s3 + $0x50] sm:$0xff]  }
 0x192   : > { %v11324_v7 = vpop.permute.xlu1 %9098  ;;  %v9096_v44 = vunpack.i.h.bf16 %v9094_v33  ;;  %v9095_v13 = vunpack.i.l.bf16 %v9094_v33  ;;  %8393 = vmatprep.subr.bf16.mxu0 %v9726_v52  ;;  %v10190_v47 = vld [vmem:[#allocation2 + $0x170] sm:$0xff]  ;;  %8347 = vmatprep.subr.bf16.mxu1 %v9729_v46 }
 0x193   : > { %v9101_v20 = vunpack.i.h.bf16 %v11324_v7  ;;  %v9100_v49 = vunpack.i.l.bf16 %v11324_v7  ;;  %8348 = vmatpush3.bf16.msra.mxu1 %v9729_v46 }
 0x194   : > { %v2079_v54 = vsel %vm2054_vm11, %v2046_v22, %v9095_v13  ;;  %v2080_v50 = vsel %vm2054_vm11, %v2047_v48, %v9096_v44  ;;  %v10191_v48 = vld [vmem:[#allocation2 + $0x168] sm:$0xff] }
 0x195   : > { %v9104_v26 = vpop.permute.xlu0 %9103  ;;  %v2103_v24 = vpack.c.bf16 %v2080_v50, %v2079_v54  ;;  %8394 = vmatpush3.bf16.msra.mxu0 %v9726_v52  ;;  %v1853_v33 = vsel %vm400_vm0, %v10188_v45, %v9101_v20  ;;  %v1852_v37 = vsel %vm400_vm0, %v10189_v41, %v9100_v49 }
 0x196   : > { %v11336_v56 = vpop.permute.xlu1 %9108  ;;  %v9106_v43 = vunpack.i.h.bf16 %v9104_v26  ;;  %v9105_v30 = vunpack.i.l.bf16 %v9104_v26  ;;  %8395 = vmatprep.subr.bf16.mxu0 %v9728_v6 }
 0x197   : > { %8337 = vmatprep.mubr.msk.bf16.mxu0 %vm2125_vm12, %v2103_v24  ;;  %v9111_v25 = vunpack.i.h.bf16 %v11336_v56  ;;  %v9110_v28 = vunpack.i.l.bf16 %v11336_v56 }
 0x198   : > { %v2082_v62 = vsel %vm2054_vm11, %v2049_v14, %v9106_v43  ;;  %v2081_v40 = vsel %vm2054_vm11, %v2048_v61, %v9105_v30 }
 0x199   : > { %v11352_v2 = vpop.permute.xlu0 %9113  ;;  %v2104_v4 = vpack.c.bf16 %v2082_v62, %v2081_v40  ;;  %v1855_v22 = vsel %vm400_vm0, %v10190_v47, %v9111_v25  ;;  %v1854_v51 = vsel %vm400_vm0, %v10191_v48, %v9110_v28  ;;  %8396 = vmatpush3.bf16.msra.mxu0 %v9728_v6  ;;  %v9732_v25 = vld [vmem:[%s12874_s3] sm:$0xff]   ;;  %v9734_v48 = vld [vmem:[%s12874_s3 + $0x38] sm:$0xff]   ;;  %vm3378_vm0 = vcmask 785408  }
 0x19a   : > { %v11350_v59 = vpop.permute.xlu1 %9118  ;;  %v9116_v32 = vunpack.i.h.bf16 %v11352_v2  ;;  %v9115_v7 = vunpack.i.l.bf16 %v11352_v2  ;;  %8397 = vmatprep.subr.bf16.mxu0 %v9730_v60  ;;  %v9733_v28 = vld [vmem:[%s12874_s3 + $0x40] sm:$0xff]  }
 0x19b   : > { %v8315_v5 = vpop.f32.mrf.mxu0  ;;  %8338 = vmatmul.mubr.msk.bf16.gmra.mxu0 %vm2125_vm12, %v2104_v4  ;;  %v9121_v1 = vunpack.i.h.bf16 %v11350_v59  ;;  %v9120_v29 = vunpack.i.l.bf16 %v11350_v59  ;;  %v9731_v59 = vld [vmem:[%s12874_s3 + $0x48] sm:$0xff]  }
 0x19c   : > { %v2224_v36 = vadd.f32 %v8315_v5, %v11357_v3  ;;  %v1886_v31 = vsel %vm1856_vm5, %v1853_v33, %v9116_v32  ;;  %v1885_v24 = vsel %vm1856_vm5, %v1852_v37, %v9115_v7  ;;  %8349 = vmatprep.subr.bf16.mxu1 %v9731_v59 }
 0x19d   : > { %v11366_v42 = vpop.permute.xlu0 %9123  ;;  %v2215_v11 = vpop.f32.mrf.mxu0  ;;  %v1887_v50 = vsel %vm1856_vm5, %v1854_v51, %v9120_v29  ;;  %v1888_v56 = vsel %vm1856_vm5, %v1855_v22, %v9121_v1  ;;  %8398 = vmatpush3.bf16.msra.mxu0 %v9730_v60  ;;  %8350 = vmatpush3.bf16.msra.mxu1 %v9731_v59  ;;  %v2453_v60 = vld [vmem:[#allocation3] sm:$0xff] }
 0x19e   : > { %v11361_v9 = vpop.permute.xlu1 %9128  ;;  %v2344_v12 = vmax.f32 %v2224_v36, 0.0  ;;  %v2216_v63 = vadd.f32 %v11357_v3, %v2215_v11  ;;  %v9125_v13 = vunpack.i.l.bf16 %v11366_v42  ;;  %v9126_v53 = vunpack.i.h.bf16 %v11366_v42  ;;  %8399 = vmatprep.subr.bf16.mxu0 %v9732_v25  ;;  %8351 = vmatprep.subr.bf16.mxu1 %v9733_v28 }
 0x19f   : > { %v8316_v55 = vpop.f32.mrf.mxu0  ;;  %v9130_v38 = vunpack.i.l.bf16 %v11361_v9  ;;  %v9131_v44 = vunpack.i.h.bf16 %v11361_v9 }
 0x1a0   : > { %2423 = vst.msk [vmem:[#allocation3 + $0x31] sm:$0xff] %vm2374_vm13, %v2344_v12  ;;  %v2342_v17 = vmax.f32 %v2216_v63, 0.0  ;;  %v2227_v35 = vadd.f32 %v8316_v55, %v11357_v3  ;;  %v1918_v14 = vsel %vm1889_vm6, %v1885_v24, %v9125_v13  ;;  %v1919_v2 = vsel %vm1889_vm6, %v1886_v31, %v9126_v53 }
 0x1a1   : > { %v11373_v19 = vpop.permute.xlu0 %9133  ;;  %v2218_v15 = vpop.f32.mrf.mxu0  ;;  %v1920_v27 = vsel %vm1889_vm6, %v1887_v50, %v9130_v38  ;;  %v1921_v61 = vsel %vm1889_vm6, %v1888_v56, %v9131_v44  ;;  %8400 = vmatpush3.bf16.msra.mxu0 %v9732_v25  ;;  %8352 = vmatpush3.bf16.msra.mxu1 %v9733_v28 }
 0x1a2   : > { %v11371_v16 = vpop.permute.xlu1 %9138  ;;  %2421 = vst.msk [vmem:[#allocation3 + $0x19] sm:$0xff] %vm2374_vm13, %v2342_v17  ;;  %v2345_v21 = vmax.f32 %v2227_v35, 0.0  ;;  %v2219_v23 = vadd.f32 %v11357_v3, %v2218_v15  ;;  %v9136_v58 = vunpack.i.h.bf16 %v11373_v19  ;;  %v9135_v43 = vunpack.i.l.bf16 %v11373_v19  ;;  %8353 = vmatprep.subr.bf16.mxu1 %v9734_v48 }
 0x1a3   : > { %v9140_v54 = vunpack.i.l.bf16 %v11371_v16  ;;  %v9141_v57 = vunpack.i.h.bf16 %v11371_v16 }
 0x1a4   : > { %2424 = vst.msk [vmem:[#allocation3 + $0x39] sm:$0xff] %vm2374_vm13, %v2345_v21  ;;  %v2343_v34 = vmax.f32 %v2219_v23, 0.0  ;;  %v1951_v17 = vsel %vm1922_vm7, %v1918_v14, %v9135_v43  ;;  %v1952_v35 = vsel %vm1922_vm7, %v1919_v2, %v9136_v58 }
 0x1a5   : > { %v11399_v39 = vpop.permute.xlu0 %9143  ;;  %v1953_v4 = vsel %vm1922_vm7, %v1920_v27, %v9140_v54  ;;  %v1954_v42 = vsel %vm1922_vm7, %v1921_v61, %v9141_v57  ;;  %8354 = vmatpush3.bf16.msra.mxu1 %v9734_v48  ;;  %v2454_v61 = vld [vmem:[#allocation3 + $0x8] sm:$0xff] }
 0x1a6   : > { %v11395_v8 = vpop.permute.xlu1 %9148  ;;  %2422 = vst.msk [vmem:[#allocation3 + $0x21] sm:$0xff] %vm2374_vm13, %v2343_v34  ;;  %v9146_v5 = vunpack.i.h.bf16 %v11399_v39  ;;  %v9145_v36 = vunpack.i.l.bf16 %v11399_v39 }
 0x1a7   : > { %v9151_v62 = vunpack.i.h.bf16 %v11395_v8  ;;  %v9150_v40 = vunpack.i.l.bf16 %v11395_v8  ;;  %v3866_v9 = vld [vmem:[#allocation3 + $0x31] sm:$0xff] }
 0x1a8   : > { %v1984_v1 = vsel %vm1955_vm8, %v1951_v17, %v9145_v36  ;;  %v1985_v29 = vsel %vm1955_vm8, %v1952_v35, %v9146_v5 }
 0x1a9   : > { %v9154_v30 = vpop.permute.xlu0 %9153  ;;  %v1986_v49 = vsel %vm1955_vm8, %v1953_v4, %v9150_v40  ;;  %v1987_v21 = vsel %vm1955_vm8, %v1954_v42, %v9151_v62  ;;  %v2487_v56 = vld [vmem:[#allocation3 + $0x19] sm:$0xff] }
 0x1aa   : > { %v9159_v26 = vpop.permute.xlu1 %9158  ;;  %v9156_v16 = vunpack.i.h.bf16 %v9154_v30  ;;  %v9155_v19 = vunpack.i.l.bf16 %v9154_v30  ;;  %v9735_v40 = vld [vmem:[%s12874_s3 + $0x30] sm:$0xff]  }
 0x1ab   : > { %v3867_v10 = vld [vmem:[#allocation3 + $0x39] sm:$0xff]  ;;  %v9161_v11 = vunpack.i.h.bf16 %v9159_v26  ;;  %v9160_v12 = vunpack.i.l.bf16 %v9159_v26  ;;  %8355 = vmatprep.subr.bf16.mxu1 %v9735_v40 }
 0x1ac   : > { %v9202_v55 = vpack.i.bf16 %v3867_v10, %v3866_v9  ;;  %v3898_v52 = vld [vmem:[#allocation3 + $0x32] sm:$0xff]  ;;  %v3899_v20 = vld [vmem:[#allocation3 + $0x3a] sm:$0xff]  ;;  %v2017_v6 = vsel %vm1988_vm9, %v1984_v1, %v9155_v19  ;;  %v2018_v45 = vsel %vm1988_vm9, %v1985_v29, %v9156_v16  ;;  %8356 = vmatpush3.bf16.msra.mxu1 %v9735_v40 }
 0x1ad   : > { %v9164_v15 = vpop.permute.xlu0 %9163  ;;  %v2019_v8 = vsel %vm1988_vm9, %v1986_v49, %v9160_v12  ;;  %v2020_v7 = vsel %vm1988_vm9, %v1987_v21, %v9161_v11  ;;  %v9207_v39 = vpack.i.bf16 %v3899_v20, %v3898_v52  ;;  %v2488_v44 = vld [vmem:[#allocation3 + $0x21] sm:$0xff] }
 0x1ae   : > { %v9169_v63 = vpop.permute.xlu1 %9168  ;;  %9203 = vrot.lane.b32.xlu0 %v9202_v55, %s10298_s12  ;;  %9193 = vrot.lane.b32.xlu1 %v9202_v55, %s10298_s12  ;;  %v9166_v32 = vunpack.i.h.bf16 %v9164_v15  ;;  %v9165_v34 = vunpack.i.l.bf16 %v9164_v15  ;;  %v9232_v26 = vpack.i.bf16 %v2488_v44, %v2487_v56  ;;  %v2519_v58 = vld [vmem:[#allocation3 + $0x1a] sm:$0xff]  ;;  %v2520_v43 = vld [vmem:[#allocation3 + $0x22] sm:$0xff] }
 0x1af   : > { %v9171_v23 = vunpack.i.h.bf16 %v9169_v63  ;;  %v9170_v18 = vunpack.i.l.bf16 %v9169_v63  ;;  %v9237_v59 = vpack.i.bf16 %v2520_v43, %v2519_v58 }
 0x1b0   : > { %v2050_v51 = vsel %vm2021_vm10, %v2017_v6, %v9165_v34  ;;  %v2051_v53 = vsel %vm2021_vm10, %v2018_v45, %v9166_v32 }
 0x1b1   : > { %v9174_v37 = vpop.permute.xlu0 %9173  ;;  %v2052_v13 = vsel %vm2021_vm10, %v2019_v8, %v9170_v18  ;;  %v2053_v46 = vsel %vm2021_vm10, %v2020_v7, %v9171_v23 }
 0x1b2   : > { %v9179_v38 = vpop.permute.xlu1 %9178  ;;  %v9176_v47 = vunpack.i.h.bf16 %v9174_v37  ;;  %v9175_v22 = vunpack.i.l.bf16 %v9174_v37  ;;  %9208 = vrot.lane.b32.xlu0 %v9207_v39, %s10299_s13  ;;  %9198 = vrot.lane.b32.xlu1 %v9207_v39, %s10299_s13 }
 0x1b3   : > { %v9181_v33 = vunpack.i.h.bf16 %v9179_v38  ;;  %v9180_v41 = vunpack.i.l.bf16 %v9179_v38 }
 0x1b4   : > { %v2083_v31 = vsel %vm2054_vm11, %v2050_v51, %v9175_v22  ;;  %v2084_v57 = vsel %vm2054_vm11, %v2051_v53, %v9176_v47 }
 0x1b5   : > { %v2085_v54 = vsel %vm2054_vm11, %v2052_v13, %v9180_v41  ;;  %v2086_v50 = vsel %vm2054_vm11, %v2053_v46, %v9181_v33  ;;  %v2105_v27 = vpack.c.bf16 %v2084_v57, %v2083_v31  ;;  %v9184_v30 = vpop.permute.xlu0 %9183 }
 0x1b6   : > { %v2106_v24 = vpack.c.bf16 %v2086_v50, %v2085_v54  ;;  %9213 = vrot.lane.b32.xlu0 %v9202_v55, %s10298_s12  ;;  %9233 = vrot.lane.b32.xlu1 %v9232_v26, %s10298_s12  ;;  %v9186_v14 = vunpack.i.h.bf16 %v9184_v30  ;;  %v9185_v62 = vunpack.i.l.bf16 %v9184_v30 }
 0x1b7   : > { %8341 = vmatprep.mubr.msk.bf16.mxu0 %vm2125_vm12, %v2105_v27 }
 0x1b8   : > { %8342 = vmatmul.mubr.msk.bf16.gmra.mxu0 %vm2125_vm12, %v2106_v24  ;;  %v2806_v2 = vsel %vm2374_vm13, %v2454_v61, %v9186_v14  ;;  %v2805_v4 = vsel %vm2374_vm13, %v2453_v60, %v9185_v62 }
 0x1b9   : > { %v9189_v5 = vpop.permute.xlu0 %9188 }
 0x1ba   : > { %9218 = vrot.lane.b32.xlu0 %v9207_v39, %s10299_s13  ;;  %9238 = vrot.lane.b32.xlu1 %v9237_v59, %s10299_s13  ;;  %v9191_v36 = vunpack.i.h.bf16 %v9189_v5  ;;  %v9190_v9 = vunpack.i.l.bf16 %v9189_v5 }
 0x1bb   : > { %v8319_v10 = vpop.f32.mrf.mxu0 }
 0x1bc   : > { %v2240_v42 = vadd.f32 %v8319_v10, %v11357_v3  ;;  %v2838_v11 = vsel %vm2837_vm1, %v2805_v4, %v9190_v9  ;;  %v2839_v12 = vsel %vm2837_vm1, %v2806_v2, %v9191_v36 }
 0x1bd   : > { %v2231_v63 = vpop.f32.mrf.mxu0  ;;  %v2882_v55 = vpack.c.bf16 %v2839_v12, %v2838_v11 }
 0x1be   : > { %v2348_v17 = vmax.f32 %v2240_v42, 0.0  ;;  %v2232_v35 = vadd.f32 %v11357_v3, %v2231_v63  ;;  %9223 = vrot.lane.b32.xlu0 %v9232_v26, %s10298_s12 }
 0x1bf   : > { %v8320_v16 = vpop.f32.mrf.mxu0  ;;  %8401 = vmatprep.mubr.msk.bf16.mxu0 %vm3378_vm0, %v2882_v55 }
 0x1c0   : > { %2427 = vst.msk [vmem:[#allocation3 + $0x61] sm:$0xff] %vm2374_vm13, %v2348_v17  ;;  %v2346_v19 = vmax.f32 %v2232_v35, 0.0  ;;  %v2243_v15 = vadd.f32 %v8320_v16, %v11357_v3 }
 0x1c1   : > { %v2234_v52 = vpop.f32.mrf.mxu0 }
 0x1c2   : > { %2425 = vst.msk [vmem:[#allocation3 + $0x49] sm:$0xff] %vm2374_vm13, %v2346_v19  ;;  %v2349_v20 = vmax.f32 %v2243_v15, 0.0  ;;  %v2235_v49 = vadd.f32 %v11357_v3, %v2234_v52  ;;  %9228 = vrot.lane.b32.xlu0 %v9237_v59, %s10299_s13 }
 0x1c4   : > { %2428 = vst.msk [vmem:[#allocation3 + $0x69] sm:$0xff] %vm2374_vm13, %v2349_v20  ;;  %v2347_v21 = vmax.f32 %v2235_v49, 0.0 }
 0x1c6   : > { %2426 = vst.msk [vmem:[#allocation3 + $0x51] sm:$0xff] %vm2374_vm13, %v2347_v21 }
 0x1c7   : > { %v3870_v23 = vld [vmem:[#allocation3 + $0x61] sm:$0xff] }
 0x1c9   : > { %v3868_v34 = vld [vmem:[#allocation3 + $0x49] sm:$0xff] }
 0x1cb   : > { %v3871_v18 = vld [vmem:[#allocation3 + $0x69] sm:$0xff] }
 0x1cc   : > { %v9252_v25 = vpack.i.bf16 %v3871_v18, %v3870_v23  ;;  %v3902_v28 = vld [vmem:[#allocation3 + $0x62] sm:$0xff]  ;;  %v3903_v1 = vld [vmem:[#allocation3 + $0x6a] sm:$0xff] }
 0x1cd   : > { %v9257_v29 = vpack.i.bf16 %v3903_v1, %v3902_v28  ;;  %v3869_v32 = vld [vmem:[#allocation3 + $0x51] sm:$0xff] }
 0x1ce   : > { %9253 = vrot.lane.b32.xlu0 %v9252_v25, %s10298_s12  ;;  %9243 = vrot.lane.b32.xlu1 %v9252_v25, %s10298_s12  ;;  %v9282_v8 = vpack.i.bf16 %v3869_v32, %v3868_v34  ;;  %v3900_v7 = vld [vmem:[#allocation3 + $0x4a] sm:$0xff]  ;;  %v3901_v38 = vld [vmem:[#allocation3 + $0x52] sm:$0xff] }
 0x1cf   : > { %v9287_v39 = vpack.i.bf16 %v3901_v38, %v3900_v7 }
 0x1d2   : > { %9258 = vrot.lane.b32.xlu0 %v9257_v29, %s10299_s13  ;;  %9248 = vrot.lane.b32.xlu1 %v9257_v29, %s10299_s13 }
 0x1d6   : > { %9263 = vrot.lane.b32.xlu0 %v9252_v25, %s10298_s12  ;;  %9283 = vrot.lane.b32.xlu1 %v9282_v8, %s10298_s12 }
 0x1da   : > { %9268 = vrot.lane.b32.xlu0 %v9257_v29, %s10299_s13  ;;  %9288 = vrot.lane.b32.xlu1 %v9287_v39, %s10299_s13 }
 0x1db   : > { %v8323_v6 = vpop.f32.mrf.mxu0 }
 0x1dc   : > { %v2256_v45 = vadd.f32 %v8323_v6, %v11357_v3 }
 0x1dd   : > { %v2247_v33 = vpop.f32.mrf.mxu0 }
 0x1de   : > { %v2352_v41 = vmax.f32 %v2256_v45, 0.0  ;;  %v2248_v37 = vadd.f32 %v11357_v3, %v2247_v33  ;;  %9273 = vrot.lane.b32.xlu0 %v9282_v8, %s10298_s12  ;;  %9293 = vrot.lane.b32.xlu1 %v9282_v8, %s10298_s12 }
 0x1df   : > { %v8324_v44 = vpop.f32.mrf.mxu0 }
 0x1e0   : > { %2431 = vst.msk [vmem:[#allocation3 + $0x91] sm:$0xff] %vm2374_vm13, %v2352_v41  ;;  %v2350_v13 = vmax.f32 %v2248_v37, 0.0  ;;  %v2259_v46 = vadd.f32 %v8324_v44, %v11357_v3  ;;  %v3834_v37 = vld [vmem:[#allocation3 + $0x30] sm:$0xff]  ;;  %v3835_v44 = vld [vmem:[#allocation3 + $0x38] sm:$0xff] }
 0x1e1   : > { %v2250_v47 = vpop.f32.mrf.mxu0 }
 0x1e2   : > { %2429 = vst.msk [vmem:[#allocation3 + $0x79] sm:$0xff] %vm2374_vm13, %v2350_v13  ;;  %v2353_v22 = vmax.f32 %v2259_v46, 0.0  ;;  %v2251_v48 = vadd.f32 %v11357_v3, %v2250_v47  ;;  %9278 = vrot.lane.b32.xlu0 %v9287_v39, %s10299_s13  ;;  %9298 = vrot.lane.b32.xlu1 %v9287_v39, %s10299_s13 }
 0x1e4   : > { %2432 = vst.msk [vmem:[#allocation3 + $0x99] sm:$0xff] %vm2374_vm13, %v2353_v22  ;;  %v2351_v51 = vmax.f32 %v2251_v48, 0.0 }
 0x1e6   : > { %2430 = vst.msk [vmem:[#allocation3 + $0x81] sm:$0xff] %vm2374_vm13, %v2351_v51 }
 0x1e7   : > { %v3874_v53 = vld [vmem:[#allocation3 + $0x91] sm:$0xff] }
 0x1e9   : > { %v3872_v24 = vld [vmem:[#allocation3 + $0x79] sm:$0xff] }
 0x1eb   : > { %v3875_v54 = vld [vmem:[#allocation3 + $0x99] sm:$0xff] }
 0x1ec   : > { %v9312_v50 = vpack.i.bf16 %v3875_v54, %v3874_v53  ;;  %v3906_v56 = vld [vmem:[#allocation3 + $0x92] sm:$0xff]  ;;  %v3907_v31 = vld [vmem:[#allocation3 + $0x9a] sm:$0xff] }
 0x1ed   : > { %v9317_v57 = vpack.i.bf16 %v3907_v31, %v3906_v56  ;;  %v3873_v26 = vld [vmem:[#allocation3 + $0x81] sm:$0xff] }
 0x1ee   : > { %9313 = vrot.lane.b32.xlu0 %v9312_v50, %s10298_s12  ;;  %9303 = vrot.lane.b32.xlu1 %v9312_v50, %s10298_s12  ;;  %v9342_v27 = vpack.i.bf16 %v3873_v26, %v3872_v24  ;;  %v3904_v58 = vld [vmem:[#allocation3 + $0x7a] sm:$0xff]  ;;  %v3905_v43 = vld [vmem:[#allocation3 + $0x82] sm:$0xff] }
 0x1ef   : > { %v9347_v30 = vpack.i.bf16 %v3905_v43, %v3904_v58  ;;  %v2455_v43 = vld [vmem:[#allocation3 + $0x18] sm:$0xff] }
 0x1f2   : > { %9318 = vrot.lane.b32.xlu0 %v9317_v57, %s10299_s13  ;;  %9308 = vrot.lane.b32.xlu1 %v9317_v57, %s10299_s13 }
 0x1f6   : > { %9323 = vrot.lane.b32.xlu0 %v9312_v50, %s10298_s12  ;;  %9343 = vrot.lane.b32.xlu1 %v9342_v27, %s10298_s12 }
 0x1fa   : > { %9328 = vrot.lane.b32.xlu0 %v9317_v57, %s10299_s13  ;;  %9348 = vrot.lane.b32.xlu1 %v9347_v30, %s10299_s13 }
 0x1fb   : > { %v8327_v60 = vpop.f32.mrf.mxu0 }
 0x1fc   : > { %v2272_v61 = vadd.f32 %v8327_v60, %v11357_v3 }
 0x1fd   : > { %v2263_v14 = vpop.f32.mrf.mxu0 }
 0x1fe   : > { %v2356_v62 = vmax.f32 %v2272_v61, 0.0  ;;  %v2264_v40 = vadd.f32 %v11357_v3, %v2263_v14  ;;  %9333 = vrot.lane.b32.xlu0 %v9342_v27, %s10298_s12  ;;  %9353 = vrot.lane.b32.xlu1 %v9342_v27, %s10298_s12 }
 0x1ff   : > { %v8328_v59 = vpop.f32.mrf.mxu0 }
 0x200   : > { %2435 = vst.msk [vmem:[#allocation3 + $0xc1] sm:$0xff] %vm2374_vm13, %v2356_v62  ;;  %v2354_v2 = vmax.f32 %v2264_v40, 0.0  ;;  %v2275_v4 = vadd.f32 %v8328_v59, %v11357_v3 }
 0x201   : > { %v2266_v5 = vpop.f32.mrf.mxu0 }
 0x202   : > { %2433 = vst.msk [vmem:[#allocation3 + $0xa9] sm:$0xff] %vm2374_vm13, %v2354_v2  ;;  %v2357_v36 = vmax.f32 %v2275_v4, 0.0  ;;  %v2267_v9 = vadd.f32 %v11357_v3, %v2266_v5  ;;  %9338 = vrot.lane.b32.xlu0 %v9347_v30, %s10299_s13  ;;  %9358 = vrot.lane.b32.xlu1 %v9347_v30, %s10299_s13  ;;  %v2456_v30 = vld [vmem:[#allocation3 + $0x20] sm:$0xff] }
 0x204   : > { %2436 = vst.msk [vmem:[#allocation3 + $0xc9] sm:$0xff] %vm2374_vm13, %v2357_v36  ;;  %v2355_v10 = vmax.f32 %v2267_v9, 0.0 }
 0x206   : > { %2434 = vst.msk [vmem:[#allocation3 + $0xb1] sm:$0xff] %vm2374_vm13, %v2355_v10 }
 0x207   : > { %v3878_v42 = vld [vmem:[#allocation3 + $0xc1] sm:$0xff] }
 0x209   : > { %v2942_v16 = vld [vmem:[#allocation3 + $0xa9] sm:$0xff] }
 0x20b   : > { %v3879_v11 = vld [vmem:[#allocation3 + $0xc9] sm:$0xff] }
 0x20c   : > { %v9372_v12 = vpack.i.bf16 %v3879_v11, %v3878_v42  ;;  %v3910_v63 = vld [vmem:[#allocation3 + $0xc2] sm:$0xff]  ;;  %v3911_v55 = vld [vmem:[#allocation3 + $0xca] sm:$0xff] }
 0x20d   : > { %v9377_v17 = vpack.i.bf16 %v3911_v55, %v3910_v63  ;;  %v2943_v35 = vld [vmem:[#allocation3 + $0xb1] sm:$0xff] }
 0x20e   : > { %9373 = vrot.lane.b32.xlu0 %v9372_v12, %s10298_s12  ;;  %9363 = vrot.lane.b32.xlu1 %v9372_v12, %s10298_s12  ;;  %v9382_v19 = vpack.i.bf16 %v2943_v35, %v2942_v16  ;;  %v2974_v15 = vld [vmem:[#allocation3 + $0xaa] sm:$0xff]  ;;  %v2975_v52 = vld [vmem:[#allocation3 + $0xb2] sm:$0xff] }
 0x20f   : > { %v9387_v20 = vpack.i.bf16 %v2975_v52, %v2974_v15 }
 0x212   : > { %9378 = vrot.lane.b32.xlu0 %v9377_v17, %s10299_s13  ;;  %9368 = vrot.lane.b32.xlu1 %v9377_v17, %s10299_s13 }
 0x216   : > { %9383 = vrot.lane.b32.xlu0 %v9382_v19, %s10298_s12  ;;  %9393 = vrot.lane.b32.xlu1 %v9382_v19, %s10298_s12 }
 0x21a   : > { %9388 = vrot.lane.b32.xlu0 %v9387_v20, %s10299_s13  ;;  %9398 = vrot.lane.b32.xlu1 %v9387_v20, %s10299_s13 }
 0x21b   : > { %v8331_v49 = vpop.f32.mrf.mxu0 }
 0x21c   : > { %v2288_v21 = vadd.f32 %v8331_v49, %v11357_v3 }
 0x21d   : > { %v2279_v23 = vpop.f32.mrf.mxu0 }
 0x21e   : > { %v2360_v18 = vmax.f32 %v2288_v21, 0.0  ;;  %v2280_v25 = vadd.f32 %v11357_v3, %v2279_v23  ;;  %9403 = vrot.lane.b32.xlu1 %v9382_v19, %s10298_s12 }
 0x21f   : > { %v8332_v28 = vpop.f32.mrf.mxu0 }
 0x220   : > { %2439 = vst.msk [vmem:[#allocation3 + $0xf1] sm:$0xff] %vm2374_vm13, %v2360_v18  ;;  %v2358_v1 = vmax.f32 %v2280_v25, 0.0  ;;  %v2291_v29 = vadd.f32 %v8332_v28, %v11357_v3  ;;  %v9204_v32 = vpop.permute.xlu0 %9203  ;;  %v11547_v34 = vpop.permute.xlu1 %9193 }
 0x221   : > { %v2282_v8 = vpop.f32.mrf.mxu0  ;;  %v9206_v38 = vunpack.i.h.bf16 %v9204_v32  ;;  %v9205_v39 = vunpack.i.l.bf16 %v9204_v32  ;;  %v9196_v21 = vunpack.i.h.bf16 %v11547_v34  ;;  %v9195_v23 = vunpack.i.l.bf16 %v11547_v34 }
 0x222   : > { %2437 = vst.msk [vmem:[#allocation3 + $0xd9] sm:$0xff] %vm2374_vm13, %v2358_v1  ;;  %v2361_v7 = vmax.f32 %v2291_v29, 0.0  ;;  %v2283_v6 = vadd.f32 %v11357_v3, %v2282_v8  ;;  %9408 = vrot.lane.b32.xlu1 %v9387_v20, %s10299_s13 }
 0x223   : > { %v4186_v47 = vsel %vm2374_vm13, %v3834_v37, %v9205_v39  ;;  %v4187_v22 = vsel %vm2374_vm13, %v3835_v44, %v9206_v38  ;;  %v3252_v34 = vsel %vm2374_vm13, %v3834_v37, %v9195_v23  ;;  %v3253_v8 = vsel %vm2374_vm13, %v3835_v44, %v9196_v21 }
 0x224   : > { %2440 = vst.msk [vmem:[#allocation3 + $0xf9] sm:$0xff] %vm2374_vm13, %v2361_v7  ;;  %v2359_v45 = vmax.f32 %v2283_v6, 0.0  ;;  %v9209_v33 = vpop.permute.xlu0 %9208  ;;  %v11553_v41 = vpop.permute.xlu1 %9198 }
 0x225   : > { %v9211_v13 = vunpack.i.h.bf16 %v9209_v33  ;;  %v9210_v46 = vunpack.i.l.bf16 %v9209_v33  ;;  %v9201_v18 = vunpack.i.h.bf16 %v11553_v41  ;;  %v9200_v25 = vunpack.i.l.bf16 %v11553_v41 }
 0x226   : > { %2438 = vst.msk [vmem:[#allocation3 + $0xe1] sm:$0xff] %vm2374_vm13, %v2359_v45 }
 0x227   : > { %v11559_v48 = vsel %vm2837_vm1, %v4186_v47, %v9210_v46  ;;  %v11562_v51 = vsel %vm2837_vm1, %v4187_v22, %v9211_v13  ;;  %v2948_v24 = vld [vmem:[#allocation3 + $0xf1] sm:$0xff]  ;;  %v3284_v39 = vsel %vm2837_vm1, %v3252_v34, %v9200_v25  ;;  %v3285_v6 = vsel %vm2837_vm1, %v3253_v8, %v9201_v18 }
 0x228   : > { %v9214_v53 = vpop.permute.xlu0 %9213  ;;  %v9234_v54 = vpop.permute.xlu1 %9233  ;;  %v4262_v50 = vpack.c.bf16 %v11562_v51, %v11559_v48  ;;  %v3327_v46 = vpack.c.bf16 %v3285_v6, %v3284_v39 }
 0x229   : > { %v9215_v56 = vunpack.i.l.bf16 %v9214_v53  ;;  %v9216_v31 = vunpack.i.h.bf16 %v9214_v53  ;;  %v9236_v57 = vunpack.i.h.bf16 %v9234_v54  ;;  %v9235_v26 = vunpack.i.l.bf16 %v9234_v54  ;;  %v2946_v62 = vld [vmem:[#allocation3 + $0xd9] sm:$0xff] }
 0x22b   : > { %v2949_v27 = vld [vmem:[#allocation3 + $0xf9] sm:$0xff]  ;;  %v2809_v58 = vsel %vm2374_vm13, %v3834_v37, %v9215_v56  ;;  %v2810_v10 = vsel %vm2374_vm13, %v3835_v44, %v9216_v31  ;;  %v2807_v42 = vsel %vm2374_vm13, %v2455_v43, %v9235_v26  ;;  %v2808_v11 = vsel %vm2374_vm13, %v2456_v30, %v9236_v57 }
 0x22c   : > { %v9219_v60 = vpop.permute.xlu0 %9218  ;;  %v9239_v61 = vpop.permute.xlu1 %9238  ;;  %v11567_v14 = vpack.i.bf16 %v2949_v27, %v2948_v24  ;;  %v2980_v36 = vld [vmem:[#allocation3 + $0xf2] sm:$0xff]  ;;  %v2981_v9 = vld [vmem:[#allocation3 + $0xfa] sm:$0xff] }
 0x22d   : > { %v9221_v40 = vunpack.i.h.bf16 %v9219_v60  ;;  %v9220_v59 = vunpack.i.l.bf16 %v9219_v60  ;;  %v9241_v2 = vunpack.i.h.bf16 %v9239_v61  ;;  %v9240_v4 = vunpack.i.l.bf16 %v9239_v61  ;;  %v2947_v5 = vld [vmem:[#allocation3 + $0xe1] sm:$0xff] }
 0x22e   : > { %9413 = vrot.lane.b32.xlu1 %v11567_v14, %s10298_s12  ;;  %v11574_v12 = vpack.i.bf16 %v2947_v5, %v2946_v62  ;;  %v2978_v16 = vld [vmem:[#allocation3 + $0xda] sm:$0xff]  ;;  %v2979_v19 = vld [vmem:[#allocation3 + $0xe2] sm:$0xff]  ;;  %v11582_v49 = vpack.i.bf16 %v2981_v9, %v2980_v36 }
 0x22f   : > { %v2842_v63 = vsel %vm2837_vm1, %v2809_v58, %v9220_v59  ;;  %v2843_v55 = vsel %vm2837_vm1, %v2810_v10, %v9221_v40  ;;  %v2840_v17 = vsel %vm2837_vm1, %v2807_v42, %v9240_v4  ;;  %v2841_v35 = vsel %vm2837_vm1, %v2808_v11, %v9241_v2  ;;  %v11617_v60 = vld [vmem:[#allocation3 + $0x60] sm:$0xff]  ;;  %v11619_v61 = vld [vmem:[#allocation3 + $0x68] sm:$0xff] }
 0x230   : > { %v2884_v15 = vpack.c.bf16 %v2843_v55, %v2842_v63  ;;  %v2883_v52 = vpack.c.bf16 %v2841_v35, %v2840_v17  ;;  %9423 = vrot.lane.b32.xlu0 %v11574_v12, %s10298_s12  ;;  %v9224_v20 = vpop.permute.xlu0 %9223  ;;  %v11591_v29 = vpack.i.bf16 %v2979_v19, %v2978_v16  ;;  %v11636_v16 = vld [vmem:[#allocation3 + $0x48] sm:$0xff]  ;;  %v3837_v19 = vld [vmem:[#allocation3 + $0x50] sm:$0xff] }
 0x231   : > { %v9226_v28 = vunpack.i.h.bf16 %v9224_v20  ;;  %v9225_v1 = vunpack.i.l.bf16 %v9224_v20 }
 0x232   : > { %9418 = vrot.lane.b32.xlu1 %v11582_v49, %s10299_s13  ;;  %8402 = vmatmul.mubr.msk.bf16.vlgmr.msra.gmra.mxu0 %vm3378_vm0, %v2883_v52 }
 0x233   : > { %8405 = vmatprep.mubr.msk.bf16.mxu0 %vm3378_vm0, %v2884_v15  ;;  %v3250_v45 = vsel %vm2374_vm13, %v2455_v43, %v9225_v1  ;;  %v3251_v33 = vsel %vm2374_vm13, %v2456_v30, %v9226_v28 }
 0x234   : > { %9428 = vrot.lane.b32.xlu0 %v11591_v29, %s10299_s13  ;;  %v9229_v32 = vpop.permute.xlu0 %9228 }
 0x235   : > { %v9231_v7 = vunpack.i.h.bf16 %v9229_v32  ;;  %v9230_v38 = vunpack.i.l.bf16 %v9229_v32 }
 0x236   : > { %9433 = vrot.lane.b32.xlu1 %v11574_v12, %s10298_s12 }
 0x237   : > { %v3282_v41 = vsel %vm2837_vm1, %v3250_v45, %v9230_v38  ;;  %v3283_v13 = vsel %vm2837_vm1, %v3251_v33, %v9231_v7 }
 0x238   : > { %v3326_v37 = vpack.c.bf16 %v3283_v13, %v3282_v41 }
 0x23a   : > { %8357 = vmatprep.mubr.msk.bf16.mxu1 %vm3378_vm0, %v3326_v37  ;;  %9438 = vrot.lane.b32.xlu1 %v11591_v29, %s10299_s13 }
 0x23b   : > { %v8335_v44 = vpop.f32.mrf.mxu0  ;;  %8358 = vmatmul.mubr.msk.bf16.vlgmr.msra.gmra.mxu1 %vm3378_vm0, %v3327_v46 }
 0x23c   : > { %v2304_v47 = vadd.f32 %v8335_v44, %v11357_v3 }
 0x23d   : > { %v2295_v22 = vpop.f32.mrf.mxu0 }
 0x23e   : > { %v2364_v53 = vmax.f32 %v2304_v47, 0.0  ;;  %v2296_v54 = vadd.f32 %v11357_v3, %v2295_v22 }
 0x23f   : > { %v8336_v56 = vpop.f32.mrf.mxu0 }
 0x240   : > { %2443 = vst.msk [vmem:[#allocation3 + $0x121] sm:$0xff] %vm2374_vm13, %v2364_v53  ;;  %v2362_v31 = vmax.f32 %v2296_v54, 0.0  ;;  %v2307_v57 = vadd.f32 %v8336_v56, %v11357_v3  ;;  %v9254_v26 = vpop.permute.xlu0 %9253  ;;  %v11614_v24 = vpop.permute.xlu1 %9243 }
 0x241   : > { %v9256_v27 = vunpack.i.h.bf16 %v9254_v26  ;;  %v9255_v58 = vunpack.i.l.bf16 %v9254_v26  ;;  %v2298_v43 = vpop.f32.mrf.mxu0  ;;  %v9245_v1 = vunpack.i.l.bf16 %v11614_v24  ;;  %v9246_v39 = vunpack.i.h.bf16 %v11614_v24  ;;  %v9736_v26 = vld [vmem:[%s12874_s3 + $0x88] sm:$0xff]  }
 0x242   : > { %2441 = vst.msk [vmem:[#allocation3 + $0x109] sm:$0xff] %vm2374_vm13, %v2362_v31  ;;  %v2365_v30 = vmax.f32 %v2307_v57, 0.0  ;;  %v2299_v62 = vadd.f32 %v11357_v3, %v2298_v43  ;;  %8433 = vmatprep.subr.bf16.mxu1 %v9736_v26 }
 0x243   : > { %v4191_v40 = vsel %vm2374_vm13, %v11619_v61, %v9256_v27  ;;  %v4190_v59 = vsel %vm2374_vm13, %v11617_v60, %v9255_v58  ;;  %v3256_v24 = vsel %vm2374_vm13, %v11617_v60, %v9245_v1  ;;  %8434 = vmatpush3.bf16.msra.mxu1 %v9736_v26 }
 0x244   : > { %2444 = vst.msk [vmem:[#allocation3 + $0x129] sm:$0xff] %vm2374_vm13, %v2365_v30  ;;  %v2363_v2 = vmax.f32 %v2299_v62, 0.0  ;;  %v9259_v4 = vpop.permute.xlu0 %9258  ;;  %v9249_v5 = vpop.permute.xlu1 %9248 }
 0x245   : > { %v9261_v36 = vunpack.i.h.bf16 %v9259_v4  ;;  %v9260_v9 = vunpack.i.l.bf16 %v9259_v4  ;;  %v9251_v6 = vunpack.i.h.bf16 %v9249_v5  ;;  %v9250_v45 = vunpack.i.l.bf16 %v9249_v5 }
 0x246   : > { %2442 = vst.msk [vmem:[#allocation3 + $0x111] sm:$0xff] %vm2374_vm13, %v2363_v2 }
 0x247   : > { %v11629_v10 = vsel %vm2837_vm1, %v4190_v59, %v9260_v9  ;;  %v11632_v42 = vsel %vm2837_vm1, %v4191_v40, %v9261_v36  ;;  %v2952_v20 = vld [vmem:[#allocation3 + $0x121] sm:$0xff]  ;;  %v9737_v40 = vld [vmem:[%s12874_s3 + $0x80] sm:$0xff]   ;;  %v3257_v59 = vsel %vm2374_vm13, %v11619_v61, %v9246_v39  ;;  %v3288_v2 = vsel %vm2837_vm1, %v3256_v24, %v9250_v45 }
 0x248   : > { %v4264_v11 = vpack.c.bf16 %v11632_v42, %v11629_v10  ;;  %v9264_v63 = vpop.permute.xlu0 %9263  ;;  %v9284_v55 = vpop.permute.xlu1 %9283  ;;  %v3289_v36 = vsel %vm2837_vm1, %v3257_v59, %v9251_v6  ;;  %8435 = vmatprep.subr.bf16.mxu1 %v9737_v40  ;;  %v11706_v24 = vld [vmem:[#allocation3 + $0x90] sm:$0xff] }
 0x249   : > { %v9286_v17 = vunpack.i.h.bf16 %v9284_v55  ;;  %v9285_v35 = vunpack.i.l.bf16 %v9284_v55  ;;  %v2950_v28 = vld [vmem:[#allocation3 + $0x109] sm:$0xff]  ;;  %v9266_v37 = vunpack.i.h.bf16 %v9264_v63  ;;  %v9265_v46 = vunpack.i.l.bf16 %v9264_v63  ;;  %8436 = vmatpush3.bf16.msra.mxu1 %v9737_v40 }
 0x24b   : > { %v4189_v15 = vsel %vm2374_vm13, %v3837_v19, %v9286_v17  ;;  %v4188_v52 = vsel %vm2374_vm13, %v11636_v16, %v9285_v35  ;;  %v2953_v21 = vld [vmem:[#allocation3 + $0x129] sm:$0xff]  ;;  %v2814_v4 = vsel %vm2374_vm13, %v11619_v61, %v9266_v37  ;;  %v2813_v5 = vsel %vm2374_vm13, %v11617_v60, %v9265_v46 }
 0x24c   : > { %v9269_v23 = vpop.permute.xlu0 %9268  ;;  %v9289_v18 = vpop.permute.xlu1 %9288  ;;  %v11641_v25 = vpack.i.bf16 %v2953_v21, %v2952_v20  ;;  %v2984_v7 = vld [vmem:[#allocation3 + $0x122] sm:$0xff]  ;;  %v2985_v38 = vld [vmem:[#allocation3 + $0x12a] sm:$0xff] }
 0x24d   : > { %v9291_v32 = vunpack.i.h.bf16 %v9289_v18  ;;  %v9290_v34 = vunpack.i.l.bf16 %v9289_v18  ;;  %v2951_v8 = vld [vmem:[#allocation3 + $0x111] sm:$0xff]  ;;  %v9271_v22 = vunpack.i.h.bf16 %v9269_v23  ;;  %v9270_v53 = vunpack.i.l.bf16 %v9269_v23 }
 0x24e   : > { %9443 = vrot.lane.b32.xlu1 %v11641_v25, %s10298_s12  ;;  %v11647_v33 = vpack.i.bf16 %v2951_v8, %v2950_v28  ;;  %v2982_v41 = vld [vmem:[#allocation3 + $0x10a] sm:$0xff]  ;;  %v2983_v13 = vld [vmem:[#allocation3 + $0x112] sm:$0xff]  ;;  %v11659_v57 = vpack.i.bf16 %v2985_v38, %v2984_v7  ;;  %v3329_v7 = vpack.c.bf16 %v3289_v36, %v3288_v2 }
 0x24f   : > { %v11650_v44 = vsel %vm2837_vm1, %v4188_v52, %v9290_v34  ;;  %v11653_v47 = vsel %vm2837_vm1, %v4189_v15, %v9291_v32  ;;  %v11666_v27 = vpack.i.bf16 %v2983_v13, %v2982_v41  ;;  %v2846_v9 = vsel %vm2837_vm1, %v2813_v5, %v9270_v53 }
 0x250   : > { %v4263_v54 = vpack.c.bf16 %v11653_v47, %v11650_v44  ;;  %9453 = vrot.lane.b32.xlu0 %v11647_v33, %s10298_s12  ;;  %v9274_v56 = vpop.permute.xlu0 %9273  ;;  %v9294_v31 = vpop.permute.xlu1 %9293  ;;  %v2847_v63 = vsel %vm2837_vm1, %v2814_v4, %v9271_v22 }
 0x251   : > { %v9276_v58 = vunpack.i.h.bf16 %v9274_v56  ;;  %v9275_v43 = vunpack.i.l.bf16 %v9274_v56  ;;  %v9296_v30 = vunpack.i.h.bf16 %v9294_v31  ;;  %v9295_v62 = vunpack.i.l.bf16 %v9294_v31 }
 0x252   : > { %9448 = vrot.lane.b32.xlu1 %v11659_v57, %s10299_s13  ;;  %v2886_v38 = vpack.c.bf16 %v2847_v63, %v2846_v9 }
 0x253   : > { %v3255_v20 = vsel %vm2374_vm13, %v3837_v19, %v9276_v58  ;;  %v3254_v60 = vsel %vm2374_vm13, %v11636_v16, %v9275_v43  ;;  %v2812_v21 = vsel %vm2374_vm13, %v3837_v19, %v9296_v30  ;;  %v2811_v23 = vsel %vm2374_vm13, %v11636_v16, %v9295_v62  ;;  %v11708_v58 = vld [vmem:[#allocation3 + $0x98] sm:$0xff]  ;;  %v11713_v43 = vld [vmem:[%s12873_s2] ss:$0 sm:$0xff] }
 0x254   : > { %9458 = vrot.lane.b32.xlu0 %v11666_v27, %s10299_s13  ;;  %v9279_v55 = vpop.permute.xlu0 %9278  ;;  %v9299_v17 = vpop.permute.xlu1 %9298 }
 0x255   : > { %v9281_v35 = vunpack.i.h.bf16 %v9279_v55  ;;  %v9280_v15 = vunpack.i.l.bf16 %v9279_v55  ;;  %v9301_v52 = vunpack.i.h.bf16 %v9299_v17  ;;  %v9300_v61 = vunpack.i.l.bf16 %v9299_v17 }
 0x257   : > { %v3286_v18 = vsel %vm2837_vm1, %v3254_v60, %v9280_v15  ;;  %v3287_v28 = vsel %vm2837_vm1, %v3255_v20, %v9281_v35  ;;  %v2844_v1 = vsel %vm2837_vm1, %v2811_v23, %v9300_v61  ;;  %v2845_v32 = vsel %vm2837_vm1, %v2812_v21, %v9301_v52  ;;  %v11732_v52 = vld [vmem:[#allocation3 + $0x78] sm:$0xff]  ;;  %v11734_v61 = vld [vmem:[#allocation3 + $0x80] sm:$0xff]  ;;  %v9738_v20 = vld [vmem:[%s12874_s3 + $0x78] sm:$0xff]  }
 0x258   : > { %v3328_v34 = vpack.c.bf16 %v3287_v28, %v3286_v18  ;;  %v2885_v8 = vpack.c.bf16 %v2845_v32, %v2844_v1  ;;  %8437 = vmatprep.subr.bf16.mxu1 %v9738_v20 }
 0x259   : > { %8438 = vmatpush3.bf16.msra.mxu1 %v9738_v20 }
 0x25a   : > { %8361 = vmatprep.mubr.msk.bf16.mxu1 %vm3378_vm0, %v3328_v34  ;;  %8406 = vmatmul.mubr.msk.bf16.gmra.mxu0 %vm3378_vm0, %v2885_v8 }
 0x25b   : > { %v8339_v19 = vpop.f32.mrf.mxu0  ;;  %8362 = vmatmul.mubr.msk.bf16.gmra.mxu1 %vm3378_vm0, %v3329_v7  ;;  %8409 = vmatprep.mubr.msk.bf16.mxu0 %vm3378_vm0, %v2886_v38 }
 0x25c   : > { %v2320_v16 = vadd.f32 %v8339_v19, %v11357_v3 }
 0x25d   : > { %v2311_v39 = vpop.f32.mrf.mxu0 }
 0x25e   : > { %v2368_v6 = vmax.f32 %v2320_v16, 0.0  ;;  %v2312_v45 = vadd.f32 %v11357_v3, %v2311_v39 }
 0x25f   : > { %v8340_v41 = vpop.f32.mrf.mxu0 }
 0x260   : > { %2447 = vst.msk [vmem:[#allocation3 + $0x151] sm:$0xff] %vm2374_vm13, %v2368_v6  ;;  %v2366_v13 = vmax.f32 %v2312_v45, 0.0  ;;  %v2323_v37 = vadd.f32 %v8340_v41, %v11357_v3  ;;  %v9314_v46 = vpop.permute.xlu0 %9313  ;;  %v11703_v22 = vpop.permute.xlu1 %9303 }
 0x261   : > { %v9316_v53 = vunpack.i.h.bf16 %v9314_v46  ;;  %v9315_v56 = vunpack.i.l.bf16 %v9314_v46  ;;  %v2314_v31 = vpop.f32.mrf.mxu0  ;;  %v9306_v8 = vunpack.i.h.bf16 %v11703_v22  ;;  %v9305_v6 = vunpack.i.l.bf16 %v11703_v22 }
 0x262   : > { %2445 = vst.msk [vmem:[#allocation3 + $0x139] sm:$0xff] %vm2374_vm13, %v2366_v13  ;;  %v2369_v26 = vmax.f32 %v2323_v37, 0.0  ;;  %v2315_v3 = vadd.f32 %v11713_v43, %v2314_v31 }
 0x263   : > { %v4195_v30 = vsel %vm2374_vm13, %v11708_v58, %v9316_v53  ;;  %v4194_v62 = vsel %vm2374_vm13, %v11706_v24, %v9315_v56  ;;  %v9739_v53 = vld [vmem:[%s12874_s3 + $0x70] sm:$0xff]   ;;  %v3260_v20 = vsel %vm2374_vm13, %v11706_v24, %v9305_v6 }
 0x264   : > { %2448 = vst.msk [vmem:[#allocation3 + $0x159] sm:$0xff] %vm2374_vm13, %v2369_v26  ;;  %v2367_v40 = vmax.f32 %v2315_v3, 0.0  ;;  %v9319_v59 = vpop.permute.xlu0 %9318  ;;  %v11721_v2 = vpop.permute.xlu1 %9308  ;;  %8439 = vmatprep.subr.bf16.mxu1 %v9739_v53 }
 0x265   : > { %v9321_v4 = vunpack.i.h.bf16 %v9319_v59  ;;  %v9320_v5 = vunpack.i.l.bf16 %v9319_v59  ;;  %v9311_v45 = vunpack.i.h.bf16 %v11721_v2  ;;  %v9310_v41 = vunpack.i.l.bf16 %v11721_v2  ;;  %8440 = vmatpush3.bf16.msra.mxu1 %v9739_v53 }
 0x266   : > { %2446 = vst.msk [vmem:[#allocation3 + $0x141] sm:$0xff] %vm2374_vm13, %v2367_v40 }
 0x267   : > { %v11725_v36 = vsel %vm2837_vm1, %v4194_v62, %v9320_v5  ;;  %v11728_v9 = vsel %vm2837_vm1, %v4195_v30, %v9321_v4  ;;  %v2956_v23 = vld [vmem:[#allocation3 + $0x151] sm:$0xff] }
 0x268   : > { %v4266_v63 = vpack.c.bf16 %v11728_v9, %v11725_v36  ;;  %v9324_v55 = vpop.permute.xlu0 %9323  ;;  %v9344_v17 = vpop.permute.xlu1 %9343 }
 0x269   : > { %v9346_v35 = vunpack.i.h.bf16 %v9344_v17  ;;  %v9345_v15 = vunpack.i.l.bf16 %v9344_v17  ;;  %v2954_v34 = vld [vmem:[#allocation3 + $0x139] sm:$0xff]  ;;  %v9326_v56 = vunpack.i.h.bf16 %v9324_v55  ;;  %v9325_v31 = vunpack.i.l.bf16 %v9324_v55 }
 0x26b   : > { %v4193_v60 = vsel %vm2374_vm13, %v11734_v61, %v9346_v35  ;;  %v4192_v21 = vsel %vm2374_vm13, %v11732_v52, %v9345_v15  ;;  %v2957_v18 = vld [vmem:[#allocation3 + $0x159] sm:$0xff]  ;;  %v3261_v15 = vsel %vm2374_vm13, %v11708_v58, %v9306_v8 }
 0x26c   : > { %v9329_v28 = vpop.permute.xlu0 %9328  ;;  %v9349_v1 = vpop.permute.xlu1 %9348  ;;  %v11743_v32 = vpack.i.bf16 %v2957_v18, %v2956_v23  ;;  %v2988_v16 = vld [vmem:[#allocation3 + $0x152] sm:$0xff]  ;;  %v2989_v39 = vld [vmem:[#allocation3 + $0x15a] sm:$0xff]  ;;  %v3292_v23 = vsel %vm2837_vm1, %v3260_v20, %v9310_v41  ;;  %v3293_v18 = vsel %vm2837_vm1, %v3261_v15, %v9311_v45 }
 0x26d   : > { %v9351_v7 = vunpack.i.h.bf16 %v9349_v1  ;;  %v9350_v38 = vunpack.i.l.bf16 %v9349_v1  ;;  %v2955_v19 = vld [vmem:[#allocation3 + $0x141] sm:$0xff]  ;;  %v9331_v3 = vunpack.i.h.bf16 %v9329_v28  ;;  %v9330_v30 = vunpack.i.l.bf16 %v9329_v28 }
 0x26e   : > { %9463 = vrot.lane.b32.xlu1 %v11743_v32, %s10298_s12  ;;  %v11751_v13 = vpack.i.bf16 %v2955_v19, %v2954_v34  ;;  %v2986_v37 = vld [vmem:[#allocation3 + $0x13a] sm:$0xff]  ;;  %v2987_v46 = vld [vmem:[#allocation3 + $0x142] sm:$0xff]  ;;  %v11766_v2 = vpack.i.bf16 %v2989_v39, %v2988_v16 }
 0x26f   : > { %v11757_v26 = vsel %vm2837_vm1, %v4192_v21, %v9350_v38  ;;  %v11760_v22 = vsel %vm2837_vm1, %v4193_v60, %v9351_v7  ;;  %v11768_v4 = vpack.i.bf16 %v2987_v46, %v2986_v37  ;;  %v2818_v60 = vsel %vm2374_vm13, %v11708_v58, %v9326_v56 }
 0x270   : > { %v4265_v62 = vpack.c.bf16 %v11760_v22, %v11757_v26  ;;  %9473 = vrot.lane.b32.xlu0 %v11751_v13, %s10298_s12  ;;  %v9334_v40 = vpop.permute.xlu0 %9333  ;;  %v9354_v59 = vpop.permute.xlu1 %9353  ;;  %v2817_v21 = vsel %vm2374_vm13, %v11706_v24, %v9325_v31  ;;  %v2851_v1 = vsel %vm2837_vm1, %v2818_v60, %v9331_v3  ;;  %v3331_v3 = vpack.c.bf16 %v3293_v18, %v3292_v23 }
 0x271   : > { %v9336_v5 = vunpack.i.h.bf16 %v9334_v40  ;;  %v9335_v55 = vunpack.i.l.bf16 %v9334_v40  ;;  %v9356_v17 = vunpack.i.h.bf16 %v9354_v59  ;;  %v9355_v35 = vunpack.i.l.bf16 %v9354_v59 }
 0x272   : > { %9468 = vrot.lane.b32.xlu1 %v11766_v2, %s10299_s13  ;;  %v2850_v28 = vsel %vm2837_vm1, %v2817_v21, %v9330_v30 }
 0x273   : > { %v3259_v24 = vsel %vm2374_vm13, %v11734_v61, %v9336_v5  ;;  %v3258_v16 = vsel %vm2374_vm13, %v11732_v52, %v9335_v55  ;;  %v2816_v39 = vsel %vm2374_vm13, %v11734_v61, %v9356_v17  ;;  %v2815_v6 = vsel %vm2374_vm13, %v11732_v52, %v9355_v35  ;;  %v9740_v55 = vld [vmem:[%s12874_s3 + $0x68] sm:$0xff]  }
 0x274   : > { %9478 = vrot.lane.b32.xlu0 %v11768_v4, %s10299_s13  ;;  %v9339_v34 = vpop.permute.xlu0 %9338  ;;  %v9359_v8 = vpop.permute.xlu1 %9358  ;;  %v2888_v30 = vpack.c.bf16 %v2851_v1, %v2850_v28  ;;  %8441 = vmatprep.subr.bf16.mxu1 %v9740_v55 }
 0x275   : > { %v9341_v7 = vunpack.i.h.bf16 %v9339_v34  ;;  %v9340_v38 = vunpack.i.l.bf16 %v9339_v34  ;;  %v9361_v19 = vunpack.i.h.bf16 %v9359_v8  ;;  %v9360_v58 = vunpack.i.l.bf16 %v9359_v8  ;;  %8442 = vmatpush3.bf16.msra.mxu1 %v9740_v55 }
 0x277   : > { %v3290_v45 = vsel %vm2837_vm1, %v3258_v16, %v9340_v38  ;;  %v3291_v41 = vsel %vm2837_vm1, %v3259_v24, %v9341_v7  ;;  %v2848_v37 = vsel %vm2837_vm1, %v2815_v6, %v9360_v58  ;;  %v2849_v46 = vsel %vm2837_vm1, %v2816_v39, %v9361_v19  ;;  %v11813_v7 = vld [vmem:[#allocation3 + $0xc0] sm:$0xff]  ;;  %v11815_v38 = vld [vmem:[#allocation3 + $0xc8] sm:$0xff] }
 0x278   : > { %v3330_v53 = vpack.c.bf16 %v3291_v41, %v3290_v45  ;;  %v2887_v56 = vpack.c.bf16 %v2849_v46, %v2848_v37  ;;  %v8343_v31 = vpop.f32.mrf.mxu0 }
 0x279   : > { %v2336_v40 = vadd.f32 %v11713_v43, %v8343_v31 }
 0x27a   : > { %v2327_v59 = vpop.f32.mrf.mxu0  ;;  %8365 = vmatprep.mubr.msk.bf16.mxu1 %vm3378_vm0, %v3330_v53  ;;  %8410 = vmatmul.mubr.msk.bf16.gmra.mxu0 %vm3378_vm0, %v2887_v56 }
 0x27b   : > { %v2372_v52 = vmax.f32 %v2336_v40, 0.0  ;;  %v2328_v61 = vadd.f32 %v11713_v43, %v2327_v59  ;;  %8366 = vmatmul.mubr.msk.bf16.gmra.mxu1 %vm3378_vm0, %v3331_v3  ;;  %8413 = vmatprep.mubr.msk.bf16.mxu0 %vm3378_vm0, %v2888_v30  ;;  %v2910_v3 = vld [vmem:[#allocation3 + $0xa8] sm:$0xff] }
 0x27c   : > { %v8344_v5 = vpop.f32.mrf.mxu0 }
 0x27d   : > { %2451 = vst.msk [vmem:[#allocation3 + $0x181] sm:$0xff] %vm2374_vm13, %v2372_v52  ;;  %v2370_v17 = vmax.f32 %v2328_v61, 0.0  ;;  %v2339_v35 = vadd.f32 %v11713_v43, %v8344_v5  ;;  %v2911_v52 = vld [vmem:[#allocation3 + $0xb0] sm:$0xff] }
 0x27e   : > { %v2330_v15 = vpop.f32.mrf.mxu0 }
 0x27f   : > { %2449 = vst.msk [vmem:[#allocation3 + $0x169] sm:$0xff] %vm2374_vm13, %v2370_v17  ;;  %v2373_v20 = vmax.f32 %v2339_v35, 0.0  ;;  %v2331_v60 = vadd.f32 %v11713_v43, %v2330_v15 }
 0x280   : > { %v9374_v21 = vpop.permute.xlu0 %9373  ;;  %v9364_v23 = vpop.permute.xlu1 %9363 }
 0x281   : > { %2452 = vst.msk [vmem:[#allocation3 + $0x189] sm:$0xff] %vm2374_vm13, %v2373_v20  ;;  %v2371_v18 = vmax.f32 %v2331_v60, 0.0  ;;  %v9376_v28 = vunpack.i.h.bf16 %v9374_v21  ;;  %v9375_v1 = vunpack.i.l.bf16 %v9374_v21  ;;  %v9366_v16 = vunpack.i.h.bf16 %v9364_v23 }
 0x282   : > { %v9365_v39 = vunpack.i.l.bf16 %v9364_v23 }
 0x283   : > { %2450 = vst.msk [vmem:[#allocation3 + $0x171] sm:$0xff] %vm2374_vm13, %v2371_v18  ;;  %v4199_v43 = vsel %vm2374_vm13, %v11815_v38, %v9376_v28  ;;  %v4198_v24 = vsel %vm2374_vm13, %v11813_v7, %v9375_v1  ;;  %v3265_v15 = vsel %vm2374_vm13, %v11815_v38, %v9366_v16  ;;  %v9741_v28 = vld [vmem:[%s12874_s3 + $0x60] sm:$0xff]  }
 0x284   : > { %v9379_v34 = vpop.permute.xlu0 %9378  ;;  %v9369_v8 = vpop.permute.xlu1 %9368  ;;  %v2960_v59 = vld [vmem:[#allocation3 + $0x181] sm:$0xff]  ;;  %v3264_v20 = vsel %vm2374_vm13, %v11813_v7, %v9365_v39  ;;  %8443 = vmatprep.subr.bf16.mxu1 %v9741_v28 }
 0x285   : > { %v9381_v19 = vunpack.i.h.bf16 %v9379_v34  ;;  %v9380_v58 = vunpack.i.l.bf16 %v9379_v34  ;;  %v9371_v37 = vunpack.i.h.bf16 %v9369_v8  ;;  %v9370_v46 = vunpack.i.l.bf16 %v9369_v8  ;;  %8444 = vmatpush3.bf16.msra.mxu1 %v9741_v28 }
 0x286   : > { %v2958_v17 = vld [vmem:[#allocation3 + $0x169] sm:$0xff] }
 0x287   : > { %v11822_v6 = vsel %vm2837_vm1, %v4198_v24, %v9380_v58  ;;  %v11825_v45 = vsel %vm2837_vm1, %v4199_v43, %v9381_v19  ;;  %v3296_v1 = vsel %vm2837_vm1, %v3264_v20, %v9370_v46  ;;  %v3297_v34 = vsel %vm2837_vm1, %v3265_v15, %v9371_v37 }
 0x288   : > { %v4268_v41 = vpack.c.bf16 %v11825_v45, %v11822_v6  ;;  %v9384_v53 = vpop.permute.xlu0 %9383  ;;  %v9394_v56 = vpop.permute.xlu1 %9393  ;;  %v2961_v31 = vld [vmem:[#allocation3 + $0x189] sm:$0xff]  ;;  %v3333_v20 = vpack.c.bf16 %v3297_v34, %v3296_v1 }
 0x289   : > { %v9396_v30 = vunpack.i.h.bf16 %v9394_v56  ;;  %v9395_v40 = vunpack.i.l.bf16 %v9394_v56  ;;  %v9386_v61 = vunpack.i.h.bf16 %v9384_v53  ;;  %v9385_v5 = vunpack.i.l.bf16 %v9384_v53  ;;  %v2992_v23 = vld [vmem:[#allocation3 + $0x182] sm:$0xff]  ;;  %v2993_v18 = vld [vmem:[#allocation3 + $0x18a] sm:$0xff] }
 0x28a   : > { %v11829_v55 = vpack.i.bf16 %v2961_v31, %v2960_v59  ;;  %v2959_v35 = vld [vmem:[#allocation3 + $0x171] sm:$0xff]  ;;  %v11850_v37 = vpack.i.bf16 %v2993_v18, %v2992_v23  ;;  %v2502_v23 = vld [vmem:[#allocation3 + $0xc9] sm:$0xff] }
 0x28b   : > { %v4197_v60 = vsel %vm2374_vm13, %v2911_v52, %v9396_v30  ;;  %v4196_v21 = vsel %vm2374_vm13, %v2910_v3, %v9395_v40  ;;  %v11844_v58 = vpack.i.bf16 %v2959_v35, %v2958_v17  ;;  %v2990_v53 = vld [vmem:[#allocation3 + $0x16a] sm:$0xff]  ;;  %v2991_v56 = vld [vmem:[#allocation3 + $0x172] sm:$0xff]  ;;  %v3263_v31 = vsel %vm2374_vm13, %v2911_v52, %v9386_v61 }
 0x28c   : > { %9483 = vrot.lane.b32.xlu1 %v11829_v55, %s10298_s12  ;;  %v9389_v8 = vpop.permute.xlu0 %9388  ;;  %v9399_v19 = vpop.permute.xlu1 %9398  ;;  %v3262_v46 = vsel %vm2374_vm13, %v2910_v3, %v9385_v5  ;;  %v11864_v15 = vpack.i.bf16 %v2991_v56, %v2990_v53  ;;  %v2534_v1 = vld [vmem:[#allocation3 + $0xca] sm:$0xff] }
 0x28d   : > { %v9391_v43 = vunpack.i.h.bf16 %v9389_v8  ;;  %v9390_v24 = vunpack.i.l.bf16 %v9389_v8  ;;  %v9401_v16 = vunpack.i.h.bf16 %v9399_v19  ;;  %v9400_v39 = vunpack.i.l.bf16 %v9399_v19  ;;  %9493 = vrot.lane.b32.xlu0 %v11844_v58, %s10298_s12 }
 0x28f   : > { %v3294_v30 = vsel %vm2837_vm1, %v3262_v46, %v9390_v24  ;;  %v3295_v40 = vsel %vm2837_vm1, %v3263_v31, %v9391_v43  ;;  %v11855_v59 = vsel %vm2837_vm1, %v4196_v21, %v9400_v39  ;;  %v11858_v17 = vsel %vm2837_vm1, %v4197_v60, %v9401_v16  ;;  %v2501_v60 = vld [vmem:[#allocation3 + $0xc1] sm:$0xff] }
 0x290   : > { %v3332_v35 = vpack.c.bf16 %v3295_v40, %v3294_v30  ;;  %v4267_v61 = vpack.c.bf16 %v11858_v17, %v11855_v59  ;;  %9488 = vrot.lane.b32.xlu1 %v11850_v37, %s10299_s13  ;;  %v9404_v5 = vpop.permute.xlu1 %9403  ;;  %v9502_v8 = vpack.i.bf16 %v2502_v23, %v2501_v60  ;;  %v2533_v24 = vld [vmem:[#allocation3 + $0xc2] sm:$0xff]  ;;  %v11893_v23 = vld [vmem:[#allocation3 + $0xf8] sm:$0xff] }
 0x291   : > { %v9406_v18 = vunpack.i.h.bf16 %v9404_v5  ;;  %v9405_v28 = vunpack.i.l.bf16 %v9404_v5  ;;  %9498 = vrot.lane.b32.xlu0 %v11864_v15, %s10299_s13 }
 0x292   : > { %8369 = vmatprep.mubr.msk.bf16.mxu1 %vm3378_vm0, %v3332_v35 }
 0x293   : > { %8370 = vmatmul.mubr.msk.bf16.gmra.mxu1 %vm3378_vm0, %v3333_v20  ;;  %v2820_v34 = vsel %vm2374_vm13, %v2911_v52, %v9406_v18  ;;  %v2819_v16 = vsel %vm2374_vm13, %v2910_v3, %v9405_v28  ;;  %v11891_v20 = vld [vmem:[#allocation3 + $0xf0] sm:$0xff] }
 0x294   : > { %9508 = vrot.lane.b32.xlu1 %v11574_v12, %s10298_s12  ;;  %v9409_v21 = vpop.permute.xlu1 %9408  ;;  %v9512_v12 = vpack.i.bf16 %v2534_v1, %v2533_v24 }
 0x295   : > { %v9411_v19 = vunpack.i.h.bf16 %v9409_v21  ;;  %v9410_v43 = vunpack.i.l.bf16 %v9409_v21  ;;  %9503 = vrot.lane.b32.xlu0 %v9502_v8, %s10298_s12  ;;  %v11901_v21 = vld [vmem:[#allocation3 + $0xd8] sm:$0xff] }
 0x297   : > { %v2852_v39 = vsel %vm2837_vm1, %v2819_v16, %v9410_v43  ;;  %v2853_v53 = vsel %vm2837_vm1, %v2820_v34, %v9411_v19 }
 0x298   : > { %v2889_v56 = vpack.c.bf16 %v2853_v53, %v2852_v39  ;;  %9518 = vrot.lane.b32.xlu1 %v11591_v29, %s10299_s13 }
 0x299   : > { %9513 = vrot.lane.b32.xlu0 %v9512_v12, %s10299_s13 }
 0x29a   : > { %8414 = vmatmul.mubr.msk.bf16.gmra.mxu0 %vm3378_vm0, %v2889_v56 }
 0x29c   : > { %9528 = vrot.lane.b32.xlu1 %v11647_v33, %s10298_s12 }
 0x29d   : > { %9523 = vrot.lane.b32.xlu0 %v11567_v14, %s10298_s12 }
 0x2a0   : > { %9538 = vrot.lane.b32.xlu1 %v11666_v27, %s10299_s13  ;;  %v9414_v3 = vpop.permute.xlu1 %9413 }
 0x2a1   : > { %9533 = vrot.lane.b32.xlu0 %v11582_v49, %s10299_s13  ;;  %v9416_v29 = vunpack.i.h.bf16 %v9414_v3  ;;  %v9415_v31 = vunpack.i.l.bf16 %v9414_v3 }
 0x2a2   : > { %v9424_v52 = vpop.permute.xlu0 %9423 }
 0x2a3   : > { %v9426_v46 = vunpack.i.h.bf16 %v9424_v52  ;;  %v9425_v30 = vunpack.i.l.bf16 %v9424_v52  ;;  %v3269_v28 = vsel %vm2374_vm13, %v11893_v23, %v9416_v29  ;;  %v3268_v60 = vsel %vm2374_vm13, %v11891_v20, %v9415_v31 }
 0x2a4   : > { %9548 = vrot.lane.b32.xlu1 %v11647_v33, %s10298_s12  ;;  %v9419_v40 = vpop.permute.xlu1 %9418  ;;  %v11903_v33 = vld [vmem:[#allocation3 + $0xe0] sm:$0xff] }
 0x2a5   : > { %v9421_v35 = vunpack.i.h.bf16 %v9419_v40  ;;  %v9420_v5 = vunpack.i.l.bf16 %v9419_v40  ;;  %9543 = vrot.lane.b32.xlu0 %v11567_v14, %s10298_s12  ;;  %v3267_v43 = vsel %vm2374_vm13, %v11903_v33, %v9426_v46  ;;  %v3266_v24 = vsel %vm2374_vm13, %v11901_v21, %v9425_v30 }
 0x2a6   : > { %v9429_v18 = vpop.permute.xlu0 %9428 }
 0x2a7   : > { %v9431_v8 = vunpack.i.h.bf16 %v9429_v18  ;;  %v9430_v19 = vunpack.i.l.bf16 %v9429_v18  ;;  %v3300_v14 = vsel %vm2837_vm1, %v3268_v60, %v9420_v5  ;;  %v3301_v1 = vsel %vm2837_vm1, %v3269_v28, %v9421_v35  ;;  %v3897_v18 = vld [vmem:[#allocation3 + $0x1a1] sm:$0xff] }
 0x2a8   : > { %9558 = vrot.lane.b32.xlu1 %v11666_v27, %s10299_s13  ;;  %v9434_v34 = vpop.permute.xlu1 %9433  ;;  %v3335_v3 = vpack.c.bf16 %v3301_v1, %v3300_v14 }
 0x2a9   : > { %v3298_v16 = vsel %vm2837_vm1, %v3266_v24, %v9430_v19  ;;  %v3299_v39 = vsel %vm2837_vm1, %v3267_v43, %v9431_v8  ;;  %v9436_v56 = vunpack.i.h.bf16 %v9434_v34  ;;  %v9435_v12 = vunpack.i.l.bf16 %v9434_v34  ;;  %9553 = vrot.lane.b32.xlu0 %v11582_v49, %s10299_s13  ;;  %v11957_v43 = vld [vmem:[#allocation3 + $0x120] sm:$0xff]  ;;  %v11959_v24 = vld [vmem:[#allocation3 + $0x128] sm:$0xff] }
 0x2aa   : > { %v3334_v53 = vpack.c.bf16 %v3299_v39, %v3298_v16  ;;  %v11967_v39 = vld [vmem:[#allocation3 + $0x108] sm:$0xff] }
 0x2ab   : > { %v4201_v31 = vsel %vm2374_vm13, %v11903_v33, %v9436_v56  ;;  %v4200_v46 = vsel %vm2374_vm13, %v11901_v21, %v9435_v12 }
 0x2ac   : > { %9568 = vrot.lane.b32.xlu1 %v11751_v13, %s10298_s12  ;;  %v9439_v52 = vpop.permute.xlu1 %9438  ;;  %8373 = vmatprep.mubr.msk.bf16.mxu1 %vm3378_vm0, %v3334_v53 }
 0x2ad   : > { %v9441_v29 = vunpack.i.h.bf16 %v9439_v52  ;;  %v9440_v27 = vunpack.i.l.bf16 %v9439_v52  ;;  %8374 = vmatmul.mubr.msk.bf16.gmra.mxu1 %vm3378_vm0, %v3335_v3  ;;  %9563 = vrot.lane.b32.xlu0 %v11641_v25, %s10298_s12 }
 0x2af   : > { %v11928_v49 = vsel %vm2837_vm1, %v4200_v46, %v9440_v27  ;;  %v11931_v30 = vsel %vm2837_vm1, %v4201_v31, %v9441_v29  ;;  %v3928_v31 = vld [vmem:[#allocation3 + $0x19a] sm:$0xff]  ;;  %v3929_v46 = vld [vmem:[#allocation3 + $0x1a2] sm:$0xff] }
 0x2b0   : > { %9578 = vrot.lane.b32.xlu1 %v11768_v4, %s10299_s13 }
 0x2b1   : > { %9573 = vrot.lane.b32.xlu0 %v11659_v57, %s10299_s13 }
 0x2b4   : > { %9588 = vrot.lane.b32.xlu1 %v11751_v13, %s10298_s12 }
 0x2b5   : > { %9583 = vrot.lane.b32.xlu0 %v11641_v25, %s10298_s12 }
 0x2b8   : > { %9598 = vrot.lane.b32.xlu1 %v11768_v4, %s10299_s13  ;;  %v3896_v4 = vld [vmem:[#allocation3 + $0x199] sm:$0xff] }
 0x2b9   : > { %9593 = vrot.lane.b32.xlu0 %v11659_v57, %s10299_s13  ;;  %v9647_v1 = vpack.i.bf16 %v3897_v18, %v3896_v4 }
 0x2bc   : > { %9608 = vrot.lane.b32.xlu1 %v11844_v58, %s10298_s12 }
 0x2bd   : > { %9603 = vrot.lane.b32.xlu0 %v11743_v32, %s10298_s12 }
 0x2c0   : > { %9618 = vrot.lane.b32.xlu1 %v11864_v15, %s10299_s13  ;;  %v9444_v35 = vpop.permute.xlu1 %9443 }
 0x2c1   : > { %9613 = vrot.lane.b32.xlu0 %v11766_v2, %s10299_s13  ;;  %v9446_v13 = vunpack.i.h.bf16 %v9444_v35  ;;  %v9445_v5 = vunpack.i.l.bf16 %v9444_v35 }
 0x2c2   : > { %v9454_v25 = vpop.permute.xlu0 %9453 }
 0x2c3   : > { %v9456_v28 = vunpack.i.h.bf16 %v9454_v25  ;;  %v9455_v57 = vunpack.i.l.bf16 %v9454_v25  ;;  %v3273_v34 = vsel %vm2374_vm13, %v11959_v24, %v9446_v13  ;;  %v3272_v16 = vsel %vm2374_vm13, %v11957_v43, %v9445_v5 }
 0x2c4   : > { %9628 = vrot.lane.b32.xlu1 %v11844_v58, %s10298_s12  ;;  %v9449_v60 = vpop.permute.xlu1 %9448  ;;  %v11969_v58 = vld [vmem:[#allocation3 + $0x110] sm:$0xff]  ;;  %v9657_v13 = vpack.i.bf16 %v3929_v46, %v3928_v31 }
 0x2c5   : > { %v9451_v8 = vunpack.i.h.bf16 %v9449_v60  ;;  %v9450_v19 = vunpack.i.l.bf16 %v9449_v60  ;;  %9623 = vrot.lane.b32.xlu0 %v11743_v32, %s10298_s12  ;;  %v3271_v12 = vsel %vm2374_vm13, %v11969_v58, %v9456_v28  ;;  %v3270_v32 = vsel %vm2374_vm13, %v11967_v39, %v9455_v57 }
 0x2c6   : > { %v9459_v14 = vpop.permute.xlu0 %9458 }
 0x2c7   : > { %v9461_v53 = vunpack.i.h.bf16 %v9459_v14  ;;  %v9460_v56 = vunpack.i.l.bf16 %v9459_v14  ;;  %v3304_v3 = vsel %vm2837_vm1, %v3272_v16, %v9450_v19  ;;  %v3305_v52 = vsel %vm2837_vm1, %v3273_v34, %v9451_v8  ;;  %v11991_v19 = vld [vmem:[#allocation3 + $0x150] sm:$0xff]  ;;  %v11993_v14 = vld [vmem:[#allocation3 + $0x158] sm:$0xff]  ;;  %v12001_v16 = vld [vmem:[#allocation3 + $0x140] sm:$0xff] }
 0x2c8   : > { %9638 = vrot.lane.b32.xlu1 %v11864_v15, %s10299_s13  ;;  %v3337_v25 = vpack.c.bf16 %v3305_v52, %v3304_v3  ;;  %v11999_v34 = vld [vmem:[#allocation3 + $0x138] sm:$0xff] }
 0x2c9   : > { %v3302_v29 = vsel %vm2837_vm1, %v3270_v32, %v9460_v56  ;;  %v3303_v27 = vsel %vm2837_vm1, %v3271_v12, %v9461_v53  ;;  %9633 = vrot.lane.b32.xlu0 %v11766_v2, %s10299_s13 }
 0x2ca   : > { %v3336_v35 = vpack.c.bf16 %v3303_v27, %v3302_v29 }
 0x2cc   : > { %9648 = vrot.lane.b32.xlu1 %v9647_v1, %s10298_s12  ;;  %8377 = vmatprep.mubr.msk.bf16.mxu1 %vm3378_vm0, %v3336_v35 }
 0x2cd   : > { %8378 = vmatmul.mubr.msk.bf16.gmra.mxu1 %vm3378_vm0, %v3337_v25  ;;  %9643 = vrot.lane.b32.xlu0 %v11829_v55, %s10298_s12  ;;  %s7717_s12 = sshll.u32 %s393_s29, 4  ;;  %s7718_s12 = int_to_ptr.vmem [resolvable:$true] %s7717_s12 }
 0x2ce   : > { %s10219_s16 = scalar_lea.vmem %s7718_s12, 16 }
 0x2cf   : > { %p10220_p8 = scmp.ne.s32.totalorder %s7718_s12, %s10219_s16 }
 0x2d0   : > { %9658 = vrot.lane.b32.xlu1 %v9657_v13, %s10299_s13 }
 0x2d1   : > { %9653 = vrot.lane.b32.xlu0 %v11850_v37, %s10299_s13  ;;  %p10221_p9 = pnand %p10220_p8, %p10400_p5 }
 0x2d3   : > { %p10222_p10 = pneg %p10221_p9 }
 0x2e0   : > { %v9464_v15 = vpop.permute.xlu1 %9463 }
 0x2e1   : > { %v9466_v4 = vunpack.i.h.bf16 %v9464_v15  ;;  %v9465_v2 = vunpack.i.l.bf16 %v9464_v15 }
 0x2e2   : > { %v9474_v5 = vpop.permute.xlu0 %9473 }
 0x2e3   : > { %v9476_v18 = vunpack.i.h.bf16 %v9474_v5  ;;  %v9475_v28 = vunpack.i.l.bf16 %v9474_v5  ;;  %v3277_v55 = vsel %vm2374_vm13, %v11993_v14, %v9466_v4  ;;  %v3276_v37 = vsel %vm2374_vm13, %v11991_v19, %v9465_v2 }
 0x2e4   : > { %v9469_v57 = vpop.permute.xlu1 %9468 }
 0x2e5   : > { %v9471_v60 = vunpack.i.h.bf16 %v9469_v57  ;;  %v9470_v8 = vunpack.i.l.bf16 %v9469_v57  ;;  %v3275_v12 = vsel %vm2374_vm13, %v12001_v16, %v9476_v18  ;;  %v3274_v32 = vsel %vm2374_vm13, %v11999_v34, %v9475_v28  ;;  %v12013_v57 = vld [vmem:[#allocation3 + $0x180] sm:$0xff] }
 0x2e6   : > { %v9479_v1 = vpop.permute.xlu0 %9478 }
 0x2e7   : > { %v9481_v53 = vunpack.i.h.bf16 %v9479_v1  ;;  %v9480_v56 = vunpack.i.l.bf16 %v9479_v1  ;;  %v3308_v3 = vsel %vm2837_vm1, %v3276_v37, %v9470_v8  ;;  %v3309_v52 = vsel %vm2837_vm1, %v3277_v55, %v9471_v60  ;;  %v12015_v60 = vld [vmem:[#allocation3 + $0x188] sm:$0xff] }
 0x2e8   : > { %v3339_v46 = vpack.c.bf16 %v3309_v52, %v3308_v3  ;;  %v12021_v37 = vld [vmem:[#allocation3 + $0x168] sm:$0xff] }
 0x2e9   : > { %v3306_v29 = vsel %vm2837_vm1, %v3274_v32, %v9480_v56  ;;  %v3307_v27 = vsel %vm2837_vm1, %v3275_v12, %v9481_v53  ;;  %v12023_v53 = vld [vmem:[#allocation3 + $0x170] sm:$0xff] }
 0x2ea   : > { %v3338_v31 = vpack.c.bf16 %v3307_v27, %v3306_v29 }
 0x2ec   : > { %8381 = vmatprep.mubr.msk.bf16.mxu1 %vm3378_vm0, %v3338_v31 }
 0x2ed   : > { %8382 = vmatmul.mubr.msk.bf16.gmra.mxu1 %vm3378_vm0, %v3339_v46 }
 0x2fe   : > { %v9484_v35 = vpop.permute.xlu1 %9483 }
 0x2ff   : > { %v9494_v25 = vpop.permute.xlu0 %9493  ;;  %v9486_v13 = vunpack.i.h.bf16 %v9484_v35  ;;  %v9485_v15 = vunpack.i.l.bf16 %v9484_v35 }
 0x300   : > { %v9496_v5 = vunpack.i.h.bf16 %v9494_v25  ;;  %v9495_v4 = vunpack.i.l.bf16 %v9494_v25 }
 0x301   : > { %v3281_v1 = vsel %vm2374_vm13, %v12015_v60, %v9486_v13  ;;  %v3280_v55 = vsel %vm2374_vm13, %v12013_v57, %v9485_v15 }
 0x302   : > { %v9489_v2 = vpop.permute.xlu1 %9488  ;;  %v3279_v32 = vsel %vm2374_vm13, %v12023_v53, %v9496_v5  ;;  %v3278_v3 = vsel %vm2374_vm13, %v12021_v37, %v9495_v4 }
 0x303   : > { %v9491_v18 = vunpack.i.h.bf16 %v9489_v2  ;;  %v9490_v28 = vunpack.i.l.bf16 %v9489_v2  ;;  %v9499_v8 = vpop.permute.xlu0 %9498 }
 0x304   : > { %v9501_v56 = vunpack.i.h.bf16 %v9499_v8  ;;  %v9500_v12 = vunpack.i.l.bf16 %v9499_v8 }
 0x305   : > { %v3312_v52 = vsel %vm2837_vm1, %v3280_v55, %v9490_v28  ;;  %v3313_v29 = vsel %vm2837_vm1, %v3281_v1, %v9491_v18 }
 0x306   : > { %v9509_v27 = vpop.permute.xlu1 %9508  ;;  %v3310_v31 = vsel %vm2837_vm1, %v3278_v3, %v9500_v12  ;;  %v3311_v46 = vsel %vm2837_vm1, %v3279_v32, %v9501_v56  ;;  %v3341_v13 = vpack.c.bf16 %v3313_v29, %v3312_v52 }
 0x307   : > { %v3340_v35 = vpack.c.bf16 %v3311_v46, %v3310_v31  ;;  %v9504_v25 = vpop.permute.xlu0 %9503  ;;  %v9511_v15 = vunpack.i.h.bf16 %v9509_v27  ;;  %v9510_v2 = vunpack.i.l.bf16 %v9509_v27 }
 0x308   : > { %v9506_v8 = vunpack.i.h.bf16 %v9504_v25  ;;  %v9505_v0 = vunpack.i.l.bf16 %v9504_v25 }
 0x309   : > { %8385 = vmatprep.mubr.msk.bf16.mxu1 %vm3378_vm0, %v3340_v35  ;;  %v2824_v28 = vsel %vm2374_vm13, %v11903_v33, %v9511_v15  ;;  %v2823_v1 = vsel %vm2374_vm13, %v11901_v21, %v9510_v2 }
 0x30a   : > { %v9519_v5 = vpop.permute.xlu1 %9518  ;;  %8386 = vmatmul.mubr.msk.bf16.gmra.mxu1 %vm3378_vm0, %v3341_v13  ;;  %v2822_v12 = vsel %vm2374_vm13, %v11815_v38, %v9506_v8  ;;  %v2821_v32 = vsel %vm2374_vm13, %v11813_v7, %v9505_v0 }
 0x30b   : > { %v9521_v4 = vunpack.i.h.bf16 %v9519_v5  ;;  %v9520_v40 = vunpack.i.l.bf16 %v9519_v5  ;;  %v9514_v18 = vpop.permute.xlu0 %9513  ;;  %8445 = vmatprep.mubr.msk.bf16.mxu1 %vm3378_vm0, %v4262_v50 }
 0x30c   : > { %v9516_v55 = vunpack.i.h.bf16 %v9514_v18  ;;  %v9515_v56 = vunpack.i.l.bf16 %v9514_v18 }
 0x30d   : > { %v2856_v3 = vsel %vm2837_vm1, %v2823_v1, %v9520_v40  ;;  %v2857_v48 = vsel %vm2837_vm1, %v2824_v28, %v9521_v4 }
 0x30e   : > { %v12049_v51 = vpop.permute.xlu1 %9528  ;;  %v2854_v50 = vsel %vm2837_vm1, %v2821_v32, %v9515_v56  ;;  %v2855_v33 = vsel %vm2837_vm1, %v2822_v12, %v9516_v55  ;;  %v2891_v29 = vpack.c.bf16 %v2857_v48, %v2856_v3 }
 0x30f   : > { %v2890_v52 = vpack.c.bf16 %v2855_v33, %v2854_v50  ;;  %v9524_v21 = vpop.permute.xlu0 %9523  ;;  %v9531_v12 = vunpack.i.h.bf16 %v12049_v51  ;;  %v9530_v32 = vunpack.i.l.bf16 %v12049_v51 }
 0x310   : > { %v9526_v4 = vunpack.i.h.bf16 %v9524_v21  ;;  %v9525_v18 = vunpack.i.l.bf16 %v9524_v21 }
 0x311   : > { %8417 = vmatprep.mubr.msk.bf16.mxu0 %vm3378_vm0, %v2890_v52  ;;  %v4205_v51 = vsel %vm2374_vm13, %v11969_v58, %v9531_v12 }
 0x312   : > { %v12053_v27 = vpop.permute.xlu1 %9538  ;;  %8418 = vmatmul.mubr.msk.bf16.gmra.mxu0 %vm3378_vm0, %v2891_v29  ;;  %8446 = vmatmul.mubr.msk.bf16.vlgmr.msra.gmra.mxu1 %vm3378_vm0, %v4263_v54  ;;  %v4203_v3 = vsel %vm2374_vm13, %v11893_v23, %v9526_v4  ;;  %v4202_v48 = vsel %vm2374_vm13, %v11891_v20, %v9525_v18 }
 0x313   : > { %v9534_v0 = vpop.permute.xlu0 %9533  ;;  %8449 = vmatprep.mubr.msk.bf16.mxu1 %vm3378_vm0, %v4264_v11  ;;  %v9540_v6 = vunpack.i.l.bf16 %v12053_v27 }
 0x314   : > { %v9536_v1 = vunpack.i.h.bf16 %v9534_v0  ;;  %v9535_v55 = vunpack.i.l.bf16 %v9534_v0 }
 0x316   : > { %v9549_v7 = vpop.permute.xlu1 %9548  ;;  %v4234_v59 = vsel %vm2837_vm1, %v4202_v48, %v9535_v55  ;;  %v4235_v17 = vsel %vm2837_vm1, %v4203_v3, %v9536_v1 }
 0x317   : > { %v9544_v38 = vpop.permute.xlu0 %9543  ;;  %v9551_v40 = vunpack.i.h.bf16 %v9549_v7  ;;  %v9550_v31 = vunpack.i.l.bf16 %v9549_v7  ;;  %v4270_v21 = vpack.c.bf16 %v4235_v17, %v4234_v59 }
 0x318   : > { %v9546_v46 = vunpack.i.h.bf16 %v9544_v38  ;;  %v9545_v35 = vunpack.i.l.bf16 %v9544_v38 }
 0x319   : > { %v2828_v10 = vsel %vm2374_vm13, %v11969_v58, %v9551_v40  ;;  %v2827_v42 = vsel %vm2374_vm13, %v11967_v39, %v9550_v31 }
 0x31a   : > { %v9559_v25 = vpop.permute.xlu1 %9558  ;;  %8450 = vmatmul.mubr.msk.bf16.gmra.mxu1 %vm3378_vm0, %v4265_v62  ;;  %v2826_v54 = vsel %vm2374_vm13, %v11893_v23, %v9546_v46  ;;  %v2825_v26 = vsel %vm2374_vm13, %v11891_v20, %v9545_v35  ;;  %v4204_v20 = vsel %vm2374_vm13, %v11967_v39, %v9530_v32 }
 0x31b   : > { %v9561_v13 = vunpack.i.h.bf16 %v9559_v25  ;;  %v9560_v15 = vunpack.i.l.bf16 %v9559_v25  ;;  %v9554_v44 = vpop.permute.xlu0 %9553  ;;  %8453 = vmatprep.mubr.msk.bf16.mxu1 %vm3378_vm0, %v4266_v63  ;;  %v4236_v58 = vsel %vm2837_vm1, %v4204_v20, %v9540_v6 }
 0x31c   : > { %v9556_v11 = vunpack.i.h.bf16 %v9554_v44  ;;  %v9555_v47 = vunpack.i.l.bf16 %v9554_v44 }
 0x31d   : > { %v2860_v22 = vsel %vm2837_vm1, %v2827_v42, %v9560_v15  ;;  %v2861_v36 = vsel %vm2837_vm1, %v2828_v10, %v9561_v13 }
 0x31e   : > { %v12083_v9 = vpop.permute.xlu1 %9568  ;;  %v2858_v63 = vsel %vm2837_vm1, %v2825_v26, %v9555_v47  ;;  %v2859_v62 = vsel %vm2837_vm1, %v2826_v54, %v9556_v11  ;;  %v2893_v5 = vpack.c.bf16 %v2861_v36, %v2860_v22 }
 0x31f   : > { %v2892_v2 = vpack.c.bf16 %v2859_v62, %v2858_v63  ;;  %v9564_v8 = vpop.permute.xlu0 %9563 }
 0x320   : > { %v9566_v45 = vunpack.i.h.bf16 %v9564_v8 }
 0x321   : > { %8421 = vmatprep.mubr.msk.bf16.mxu0 %vm3378_vm0, %v2892_v2 }
 0x322   : > { %v12087_v28 = vpop.permute.xlu1 %9578  ;;  %8422 = vmatmul.mubr.msk.bf16.gmra.mxu0 %vm3378_vm0, %v2893_v5  ;;  %8454 = vmatmul.mubr.msk.bf16.gmra.mxu1 %vm3378_vm0, %v4267_v61  ;;  %v9541_v61 = vunpack.i.h.bf16 %v12053_v27  ;;  %v12896_v27 = vpack.c.bf16 %v11931_v30, %v11928_v49  ;;  %v4207_v39 = vsel %vm2374_vm13, %v11959_v24, %v9566_v45 }
 0x323   : > { %v9574_v56 = vpop.permute.xlu0 %9573  ;;  %8457 = vmatprep.mubr.msk.bf16.mxu1 %vm3378_vm0, %v4268_v41  ;;  %v9565_v41 = vunpack.i.l.bf16 %v9564_v8  ;;  %v9581_v5 = vunpack.i.h.bf16 %v12087_v28  ;;  %v9580_v18 = vunpack.i.l.bf16 %v12087_v28 }
 0x324   : > { %v9576_v38 = vunpack.i.h.bf16 %v9574_v56  ;;  %v9575_v40 = vunpack.i.l.bf16 %v9574_v56  ;;  %v4237_v35 = vsel %vm2837_vm1, %v4205_v51, %v9541_v61 }
 0x325   : > { %v4206_v25 = vsel %vm2374_vm13, %v11957_v43, %v9565_v41  ;;  %v4271_v62 = vpack.c.bf16 %v4237_v35, %v4236_v58 }
 0x326   : > { %v9589_v50 = vpop.permute.xlu1 %9588  ;;  %v4238_v26 = vsel %vm2837_vm1, %v4206_v25, %v9575_v40  ;;  %v4239_v22 = vsel %vm2837_vm1, %v4207_v39, %v9576_v38 }
 0x327   : > { %v9584_v33 = vpop.permute.xlu0 %9583  ;;  %v9591_v52 = vunpack.i.h.bf16 %v9589_v50  ;;  %v9590_v23 = vunpack.i.l.bf16 %v9589_v50  ;;  %v4272_v1 = vpack.c.bf16 %v4239_v22, %v4238_v26  ;;  %v3864_v22 = vld [vmem:[#allocation3 + $0x198] sm:$0xff] }
 0x328   : > { %v9586_v29 = vunpack.i.h.bf16 %v9584_v33  ;;  %v9585_v0 = vunpack.i.l.bf16 %v9584_v33 }
 0x329   : > { %v2832_v15 = vsel %vm2374_vm13, %v12001_v16, %v9591_v52  ;;  %v2831_v49 = vsel %vm2374_vm13, %v11999_v34, %v9590_v23 }
 0x32a   : > { %v9599_v7 = vpop.permute.xlu1 %9598  ;;  %8458 = vmatmul.mubr.msk.bf16.gmra.mxu1 %vm3378_vm0, %v12896_v27  ;;  %v2830_v10 = vsel %vm2374_vm13, %v11959_v24, %v9586_v29  ;;  %v2829_v42 = vsel %vm2374_vm13, %v11957_v43, %v9585_v0  ;;  %v9571_v24 = vunpack.i.h.bf16 %v12083_v9  ;;  %v9570_v43 = vunpack.i.l.bf16 %v12083_v9 }
 0x32b   : > { %v9601_v31 = vunpack.i.h.bf16 %v9599_v7  ;;  %v9600_v46 = vunpack.i.l.bf16 %v9599_v7  ;;  %v9594_v13 = vpop.permute.xlu0 %9593  ;;  %8461 = vmatprep.mubr.msk.bf16.mxu1 %vm3378_vm0, %v4270_v21 }
 0x32c   : > { %v9596_v30 = vunpack.i.h.bf16 %v9594_v13  ;;  %v9595_v44 = vunpack.i.l.bf16 %v9594_v13  ;;  %v4209_v9 = vsel %vm2374_vm13, %v12001_v16, %v9571_v24  ;;  %v4208_v3 = vsel %vm2374_vm13, %v11999_v34, %v9570_v43 }
 0x32d   : > { %v2864_v11 = vsel %vm2837_vm1, %v2831_v49, %v9600_v46  ;;  %v2865_v47 = vsel %vm2837_vm1, %v2832_v15, %v9601_v31  ;;  %v4240_v50 = vsel %vm2837_vm1, %v4208_v3, %v9580_v18  ;;  %v4241_v59 = vsel %vm2837_vm1, %v4209_v9, %v9581_v5 }
 0x32e   : > { %v9609_v54 = vpop.permute.xlu1 %9608  ;;  %v2862_v36 = vsel %vm2837_vm1, %v2829_v42, %v9595_v44  ;;  %v2863_v63 = vsel %vm2837_vm1, %v2830_v10, %v9596_v30  ;;  %v2895_v4 = vpack.c.bf16 %v2865_v47, %v2864_v11  ;;  %v4273_v23 = vpack.c.bf16 %v4241_v59, %v4240_v50  ;;  %v12193_v59 = vpop.f32.mrf.mxu1 }
 0x32f   : > { %v2894_v2 = vpack.c.bf16 %v2863_v63, %v2862_v36  ;;  %v9604_v8 = vpop.permute.xlu0 %9603  ;;  %v9611_v45 = vunpack.i.h.bf16 %v9609_v54  ;;  %v9610_v41 = vunpack.i.l.bf16 %v9609_v54  ;;  %v3865_v36 = vld [vmem:[#allocation3 + $0x1a0] sm:$0xff] }
 0x330   : > { %v9606_v55 = vunpack.i.h.bf16 %v9604_v8  ;;  %v9605_v56 = vunpack.i.l.bf16 %v9604_v8 }
 0x331   : > { %8425 = vmatprep.mubr.msk.bf16.mxu0 %vm3378_vm0, %v2894_v2  ;;  %v4213_v40 = vsel %vm2374_vm13, %v12023_v53, %v9611_v45  ;;  %v4212_v31 = vsel %vm2374_vm13, %v12021_v37, %v9610_v41 }
 0x332   : > { %v9619_v12 = vpop.permute.xlu1 %9618  ;;  %8426 = vmatmul.mubr.msk.bf16.gmra.mxu0 %vm3378_vm0, %v2895_v4  ;;  %8462 = vmatmul.mubr.msk.bf16.gmra.mxu1 %vm3378_vm0, %v4271_v62  ;;  %v4211_v17 = vsel %vm2374_vm13, %v11993_v14, %v9606_v55  ;;  %v4210_v61 = vsel %vm2374_vm13, %v11991_v19, %v9605_v56 }
 0x333   : > { %v9614_v32 = vpop.permute.xlu0 %9613  ;;  %8465 = vmatprep.mubr.msk.bf16.mxu1 %vm3378_vm0, %v4272_v1  ;;  %v9621_v34 = vunpack.i.h.bf16 %v9619_v12  ;;  %v9620_v51 = vunpack.i.l.bf16 %v9619_v12 }
 0x334   : > { %v9616_v28 = vunpack.i.h.bf16 %v9614_v32  ;;  %v9615_v48 = vunpack.i.l.bf16 %v9614_v32 }
 0x335   : > { %v4244_v58 = vsel %vm2837_vm1, %v4212_v31, %v9620_v51  ;;  %v4245_v35 = vsel %vm2837_vm1, %v4213_v40, %v9621_v34 }
 0x336   : > { %v9629_v6 = vpop.permute.xlu1 %9628  ;;  %v4242_v16 = vsel %vm2837_vm1, %v4210_v61, %v9615_v48  ;;  %v4243_v33 = vsel %vm2837_vm1, %v4211_v17, %v9616_v28  ;;  %v4275_v62 = vpack.c.bf16 %v4245_v35, %v4244_v58  ;;  %v12897_v61 = vmov 0.0  }
 0x337   : > { %v9624_v52 = vpop.permute.xlu0 %9623  ;;  %v9631_v20 = vunpack.i.h.bf16 %v9629_v6  ;;  %v9630_v21 = vunpack.i.l.bf16 %v9629_v6  ;;  %v4274_v29 = vpack.c.bf16 %v4243_v33, %v4242_v16  ;;  %4764 = vst.msk [vmem:[#allocation6 + $0x8] sm:$0x3] %vm4763_vm2, %v12897_v61  ;;  %4767 = vst.msk [vmem:[#allocation6 + $0x98] sm:$0x3] %vm4763_vm2, %v12897_v61 }
 0x338   : > { %v9626_v0 = vunpack.i.h.bf16 %v9624_v52  ;;  %v9625_v7 = vunpack.i.l.bf16 %v9624_v52  ;;  %4779 = vst.msk [vmem:[#allocation6 + $0x9] sm:$0x1] %vm4768_vm3, %v12897_v61  ;;  %4780 = vst.msk [vmem:[#allocation6 + $0x19] sm:$0x1] %vm4768_vm3, %v12897_v61 }
 0x339   : > { %v2836_v25 = vsel %vm2374_vm13, %v12023_v53, %v9631_v20  ;;  %v2835_v13 = vsel %vm2374_vm13, %v12021_v37, %v9630_v21  ;;  %4769 = vst.msk [vmem:[#allocation6] sm:$0x1] %vm4768_vm3, %v12897_v61  ;;  %4770 = vst.msk [vmem:[#allocation6 + $0x10] sm:$0x1] %vm4768_vm3, %v12897_v61 }
 0x33a   : > { %v9639_v38 = vpop.permute.xlu1 %9638  ;;  %8466 = vmatmul.mubr.msk.bf16.gmra.mxu1 %vm3378_vm0, %v4273_v23  ;;  %v2834_v30 = vsel %vm2374_vm13, %v11993_v14, %v9626_v0  ;;  %v2833_v44 = vsel %vm2374_vm13, %v11991_v19, %v9625_v7  ;;  %4771 = vst.msk [vmem:[#allocation6 + $0x20] sm:$0x1] %vm4768_vm3, %v12897_v61  ;;  %4772 = vst.msk [vmem:[#allocation6 + $0x30] sm:$0x1] %vm4768_vm3, %v12897_v61  ;;  %v8403_v0 = vpop.f32.mrf.mxu0 }
 0x33b   : > { %v9641_v46 = vunpack.i.h.bf16 %v9639_v38  ;;  %v9640_v27 = vunpack.i.l.bf16 %v9639_v38  ;;  %v9634_v39 = vpop.permute.xlu0 %9633  ;;  %8469 = vmatprep.mubr.msk.bf16.mxu1 %vm3378_vm0, %v4274_v29  ;;  %4773 = vst.msk [vmem:[#allocation6 + $0x40] sm:$0x1] %vm4768_vm3, %v12897_v61  ;;  %4774 = vst.msk [vmem:[#allocation6 + $0x50] sm:$0x1] %vm4768_vm3, %v12897_v61 }
 0x33c   : > { %v9636_v15 = vunpack.i.h.bf16 %v9634_v39  ;;  %v9635_v49 = vunpack.i.l.bf16 %v9634_v39  ;;  %4775 = vst.msk [vmem:[#allocation6 + $0x60] sm:$0x1] %vm4768_vm3, %v12897_v61  ;;  %4776 = vst.msk [vmem:[#allocation6 + $0x70] sm:$0x1] %vm4768_vm3, %v12897_v61  ;;  %v3706_v38 = vpop.f32.mrf.mxu0 }
 0x33d   : > { %v2868_v10 = vsel %vm2837_vm1, %v2835_v13, %v9640_v27  ;;  %v2869_v42 = vsel %vm2837_vm1, %v2836_v25, %v9641_v46  ;;  %4777 = vst.msk [vmem:[#allocation6 + $0x80] sm:$0x1] %vm4768_vm3, %v12897_v61  ;;  %4778 = vst.msk [vmem:[#allocation6 + $0x90] sm:$0x1] %vm4768_vm3, %v12897_v61 }
 0x33e   : > { %v9649_v11 = vpop.permute.xlu1 %9648  ;;  %v2866_v47 = vsel %vm2837_vm1, %v2833_v44, %v9635_v49  ;;  %v2867_v53 = vsel %vm2837_vm1, %v2834_v30, %v9636_v15  ;;  %v2897_v14 = vpack.c.bf16 %v2869_v42, %v2868_v10  ;;  %4781 = vst.msk [vmem:[#allocation6 + $0x29] sm:$0x1] %vm4768_vm3, %v12897_v61  ;;  %4782 = vst.msk [vmem:[#allocation6 + $0x39] sm:$0x1] %vm4768_vm3, %v12897_v61  ;;  %v8404_v31 = vpop.f32.mrf.mxu0 }
 0x33f   : > { %v9651_v54 = vunpack.i.h.bf16 %v9649_v11  ;;  %v9650_v26 = vunpack.i.l.bf16 %v9649_v11  ;;  %v2896_v37 = vpack.c.bf16 %v2867_v53, %v2866_v47  ;;  %v9644_v63 = vpop.permute.xlu0 %9643  ;;  %4783 = vst.msk [vmem:[#allocation6 + $0x49] sm:$0x1] %vm4768_vm3, %v12897_v61  ;;  %4784 = vst.msk [vmem:[#allocation6 + $0x59] sm:$0x1] %vm4768_vm3, %v12897_v61  ;;  %v10300_v53 = vmov 0  }
 0x340   : > { %v9646_v2 = vunpack.i.h.bf16 %v9644_v63  ;;  %v9645_v8 = vunpack.i.l.bf16 %v9644_v63  ;;  %4785 = vst.msk [vmem:[#allocation6 + $0x69] sm:$0x1] %vm4768_vm3, %v12897_v61  ;;  %4786 = vst.msk [vmem:[#allocation6 + $0x79] sm:$0x1] %vm4768_vm3, %v12897_v61  ;;  %v3709_v27 = vpop.f32.mrf.mxu0  ;;  %5074 = vmatprep.subr.bf16.mxu0 %v10300_v53  ;;  %5223 = vmatprep.subr.bf16.mxu1 %v10300_v53 }
 0x341   : > { %8429 = vmatprep.mubr.msk.bf16.mxu0 %vm3378_vm0, %v2896_v37  ;;  %v4217_v24 = vsel %vm2374_vm13, %v3865_v36, %v9651_v54  ;;  %v4216_v43 = vsel %vm2374_vm13, %v3864_v22, %v9650_v26  ;;  %4787 = vst.msk [vmem:[#allocation6 + $0x89] sm:$0x1] %vm4768_vm3, %v12897_v61  ;;  %4788 = vst.msk [vmem:[#allocation6 + $0x99] sm:$0x1] %vm4768_vm3, %v12897_v61  ;;  %v9742_v37 = vld [vmem:[%s12876_s5 + $0x98] sm:$0xff]   ;;  %v9743_v22 = vld [vmem:[%s12876_s5 + $0x90] sm:$0xff]  }
 0x342   : > { %v9659_v19 = vpop.permute.xlu1 %9658  ;;  %8430 = vmatmul.mubr.msk.bf16.gmra.mxu0 %vm3378_vm0, %v2897_v14  ;;  %8470 = vmatmul.mubr.msk.bf16.gmra.mxu1 %vm3378_vm0, %v4275_v62  ;;  %v4215_v56 = vsel %vm2374_vm13, %v12015_v60, %v9646_v2  ;;  %v4214_v12 = vsel %vm2374_vm13, %v12013_v57, %v9645_v8  ;;  %v12195_v60 = vpop.f32.mrf.mxu1  ;;  %v9752_v62 = vld [vmem:[%s12876_s5 + $0x38] sm:$0xff]   ;;  %v9754_v8 = vld [vmem:[%s12876_s5 + $0x30] sm:$0xff]  }
 0x343   : > { %v9661_v5 = vunpack.i.h.bf16 %v9659_v19  ;;  %v9660_v4 = vunpack.i.l.bf16 %v9659_v19  ;;  %v9654_v18 = vpop.permute.xlu0 %9653  ;;  %v12275_v35 = vpop.f32.mrf.mxu0  ;;  %5075 = vmatpush1.bf16.msra.mxu0 %v9742_v37  ;;  %5224 = vmatpush1.bf16.msra.mxu1 %v9752_v62  ;;  %v9744_v19 = vld [vmem:[%s12876_s5 + $0x88] sm:$0xff]   ;;  %v9747_v62 = vld [vmem:[%s12876_s5 + $0x70] sm:$0xff]  }
 0x344   : > { %v9656_v1 = vunpack.i.h.bf16 %v9654_v18  ;;  %v9655_v55 = vunpack.i.l.bf16 %v9654_v18  ;;  %v12197_v17 = vpop.f32.mrf.mxu1  ;;  %5076 = vmatprep.subr.bf16.mxu0 %v10300_v53  ;;  %5225 = vmatprep.subr.bf16.mxu1 %v10300_v53 }
 0x345   : > { %v4248_v32 = vsel %vm2837_vm1, %v4216_v43, %v9660_v4  ;;  %v4249_v9 = vsel %vm2837_vm1, %v4217_v24, %v9661_v5  ;;  %v12279_v25 = vpop.f32.mrf.mxu0  ;;  %v9745_v4 = vld [vmem:[%s12876_s5 + $0x80] sm:$0xff]  }
 0x346   : > { %v4246_v3 = vsel %vm2837_vm1, %v4214_v12, %v9655_v55  ;;  %v4247_v28 = vsel %vm2837_vm1, %v4215_v56, %v9656_v1  ;;  %v4277_v50 = vpack.c.bf16 %v4249_v9, %v4248_v32  ;;  %v12199_v57 = vpop.f32.mrf.mxu1  ;;  %v3715_v1 = vadd.f32 %v8403_v0, %v12193_v59  ;;  %v12350_v12 = vld [vmem:[%s12875_s4] ss:$0 sm:$0xff] }
 0x347   : > { %v4276_v48 = vpack.c.bf16 %v4247_v28, %v4246_v3  ;;  %v12283_v15 = vpop.f32.mrf.mxu0  ;;  %5077 = vmatpush1.bf16.msra.mxu0 %v9743_v22  ;;  %5226 = vmatpush1.bf16.msra.mxu1 %v9754_v8  ;;  %v3707_v32 = vadd.f32 %v3706_v38, %v12195_v60  ;;  %v9746_v3 = vld [vmem:[%s12876_s5 + $0x78] sm:$0xff]   ;;  %v3710_v37 = vadd.f32 %v3709_v27, %v12199_v57 }
 0x348   : > { %v12243_v6 = vpop.f32.mrf.mxu1  ;;  %5078 = vmatprep.subr.bf16.mxu0 %v10300_v53  ;;  %5227 = vmatprep.subr.bf16.mxu1 %v10300_v53 }
 0x349   : > { %8473 = vmatprep.mubr.msk.bf16.mxu1 %vm3378_vm0, %v4276_v48  ;;  %v12287_v30 = vpop.f32.mrf.mxu0  ;;  %v3718_v48 = vadd.f32 %v8404_v31, %v12197_v17  ;;  %v3731_v31 = vadd.f32 %v12275_v35, %v12243_v6  ;;  %v9748_v6 = vld [vmem:[%s12876_s5 + $0x68] sm:$0xff]  }
 0x34a   : > { %8474 = vmatmul.mubr.msk.bf16.gmra.mxu1 %vm3378_vm0, %v4277_v50  ;;  %v12245_v45 = vpop.f32.mrf.mxu1 }
 0x34b   : > { %v12291_v10 = vpop.f32.mrf.mxu0  ;;  %5079 = vmatpush1.bf16.msra.mxu0 %v9744_v19 }
 0x34c   : > { %v12247_v41 = vpop.f32.mrf.mxu1  ;;  %5080 = vmatprep.subr.bf16.mxu0 %v10300_v53 }
 0x34d   : > { %v12295_v11 = vpop.f32.mrf.mxu0 }
 0x34e   : > { %v12249_v16 = vpop.f32.mrf.mxu1 }
 0x34f   : > { %v12301_v54 = vpop.f32.mrf.mxu0  ;;  %5081 = vmatpush1.bf16.msra.mxu0 %v9745_v4 }
 0x350   : > { %v12251_v33 = vpop.f32.mrf.mxu1  ;;  %5082 = vmatprep.subr.bf16.mxu0 %v10300_v53 }
 0x351   : > { %v12311_v36 = vpop.f32.mrf.mxu0 }
 0x352   : > { %v12253_v34 = vpop.f32.mrf.mxu1 }
 0x353   : > { %5083 = vmatpush1.bf16.msra.mxu0 %v9746_v3 }
 0x354   : > { %v12255_v51 = vpop.f32.mrf.mxu1  ;;  %5084 = vmatprep.subr.bf16.mxu0 %v10300_v53 }
 0x356   : > { %v12257_v52 = vpop.f32.mrf.mxu1 }
 0x357   : > { %5085 = vmatpush1.bf16.msra.mxu0 %v9747_v62  ;;  %v3747_v62 = vadd.f32 %v12291_v10, %v12251_v33 }
 0x358   : > { %v12259_v23 = vpop.f32.mrf.mxu1  ;;  %5086 = vmatprep.subr.bf16.mxu0 %v10300_v53 }
 0x35a   : > { %v12261_v20 = vpop.f32.mrf.mxu1  ;;  %v12319_v14 = vpop.f32.mrf.mxu0 }
 0x35b   : > { %5087 = vmatpush1.bf16.msra.mxu0 %v9748_v6 }
 0x35c   : > { %v12263_v21 = vpop.f32.mrf.mxu1  ;;  %v12333_v43 = vpop.f32.mrf.mxu0  ;;  %5088 = vmatprep.subr.bf16.mxu0 %v10300_v53 }
 0x35e   : > { %v12265_v29 = vpop.f32.mrf.mxu1  ;;  %v12345_v55 = vpop.f32.mrf.mxu0 }
 0x360   : > { %v12359_v61 = vpop.f32.mrf.mxu0 }
 0x36d   : > { %v12267_v7 = vpop.f32.mrf.mxu1 }
 0x36f   : > { %v12269_v40 = vpop.f32.mrf.mxu1 }
 0x371   : > { %v12271_v46 = vpop.f32.mrf.mxu1 }
 0x373   : > { %v12273_v58 = vpop.f32.mrf.mxu1 }
 0x38d   : > { %v12277_v39 = vpop.f32.mrf.mxu1 }
 0x38f   : > { %v12281_v13 = vpop.f32.mrf.mxu1 }
 0x391   : > { %v12285_v49 = vpop.f32.mrf.mxu1 }
 0x393   : > { %v12289_v44 = vpop.f32.mrf.mxu1 }
 0x3ad   : > { %v12293_v42 = vpop.f32.mrf.mxu1 }
 0x3af   : > { %v12297_v47 = vpop.f32.mrf.mxu1 }
 0x3b1   : > { %v12303_v26 = vpop.f32.mrf.mxu1 }
 0x3b3   : > { %v12313_v63 = vpop.f32.mrf.mxu1 }
 0x3ca   : > { %v12321_v2 = vpop.f32.mrf.mxu1 }
 0x3cc   : > { %v12330_v24 = vpop.f32.mrf.mxu1 }
 0x3ce   : > { %v12335_v5 = vpop.f32.mrf.mxu1 }
 0x3d0   : > { %v12341_v18 = vpop.f32.mrf.mxu1 }
 0x3d2   : > { %v8447_v56 = vpop.f32.mrf.mxu1  ;;  %v12366_v8 = vpop.f32.mrf.mxu0 }
 0x3d3   : > { %v4525_v9 = vadd.f32 %v8447_v56, %v3715_v1  ;;  %v3723_v1 = vadd.f32 %v12279_v25, %v12245_v45 }
 0x3d4   : > { %v4396_v28 = vpop.f32.mrf.mxu1  ;;  %v12380_v35 = vpop.f32.mrf.mxu0 }
 0x3d5   : > { %v4564_v50 = vadd.f32 %v12350_v12, %v4525_v9  ;;  %v4523_v59 = vadd.f32 %v4396_v28, %v3707_v32  ;;  %v3734_v28 = vadd.f32 %v12283_v15, %v12247_v41  ;;  %v9749_v41 = vld [vmem:[%s12876_s5 + $0x60] sm:$0xff]  }
 0x3d6   : > { %v8448_v0 = vpop.f32.mrf.mxu1  ;;  %v12394_v15 = vpop.f32.mrf.mxu0  ;;  %5089 = vmatpush1.bf16.msra.mxu0 %v9749_v41 }
 0x3d7   : > { %v4596_v60 = vmax.f32 %v4564_v50, 0.0  ;;  %v4562_v38 = vadd.f32 %v12350_v12, %v4523_v59  ;;  %v4526_v22 = vadd.f32 %v8448_v0, %v3718_v48  ;;  %v3726_v59 = vadd.f32 %v12287_v30, %v12249_v16  ;;  %5098 = vmatprep.subr.bf16.mxu0 %v10300_v53 }
 0x3d8   : > { %v4399_v17 = vpop.f32.mrf.mxu1 }
 0x3d9   : > { %4628 = vst.msk [vmem:[#allocation4 + $0x10] sm:$0xff] %vm2837_vm1, %v4596_v60  ;;  %v4594_v57 = vmax.f32 %v4562_v38, 0.0  ;;  %v4565_v27 = vadd.f32 %v12350_v12, %v4526_v22  ;;  %v4524_v19 = vadd.f32 %v4399_v17, %v3710_v37 }
 0x3da   : > { %v8451_v4 = vpop.f32.mrf.mxu1 }
 0x3db   : > { %4626 = vst.msk [vmem:[#allocation4] sm:$0xff] %vm2837_vm1, %v4594_v57  ;;  %v4597_v56 = vmax.f32 %v4565_v27, 0.0  ;;  %v4563_v32 = vadd.f32 %v12350_v12, %v4524_v19  ;;  %v4529_v9 = vadd.f32 %v8451_v4, %v3731_v31  ;;  %v3739_v27 = vadd.f32 %v12295_v11, %v12253_v34 }
 0x3dc   : > { %v4412_v3 = vpop.f32.mrf.mxu1  ;;  %v3750_v34 = vadd.f32 %v12301_v54, %v12255_v51 }
 0x3dd   : > { %4629 = vst.msk [vmem:[#allocation4 + $0x18] sm:$0xff] %vm2837_vm1, %v4597_v56  ;;  %v4595_v45 = vmax.f32 %v4563_v32, 0.0  ;;  %v4568_v25 = vadd.f32 %v12350_v12, %v4529_v9  ;;  %v4527_v48 = vadd.f32 %v4412_v3, %v3723_v1  ;;  %v9750_v56 = vld [vmem:[%s12876_s5 + $0xb8] sm:$0xff]   ;;  %v12408_v32 = vpop.f32.mrf.mxu0 }
 0x3de   : > { %v8452_v50 = vpop.f32.mrf.mxu1  ;;  %5099 = vmatpush2.bf16.msra.mxu0 %v9750_v56 }
 0x3df   : > { %4627 = vst.msk [vmem:[#allocation4 + $0x8] sm:$0xff] %vm2837_vm1, %v4595_v45  ;;  %v4600_v0 = vmax.f32 %v4568_v25, 0.0  ;;  %v4566_v37 = vadd.f32 %v12350_v12, %v4527_v48  ;;  %v4530_v60 = vadd.f32 %v8452_v50, %v3734_v28  ;;  %v3742_v48 = vadd.f32 %v12311_v36, %v12257_v52  ;;  %5100 = vmatprep.subr.bf16.mxu0 %v10300_v53 }
 0x3e0   : > { %v4415_v38 = vpop.f32.mrf.mxu1  ;;  %v4675_v17 = vld [vmem:[#allocation4 + $0x10] sm:$0xff] }
 0x3e1   : > { %4632 = vst.msk [vmem:[#allocation4 + $0x30] sm:$0xff] %vm2837_vm1, %v4600_v0  ;;  %v4598_v22 = vmax.f32 %v4566_v37, 0.0  ;;  %v4569_v16 = vadd.f32 %v12350_v12, %v4530_v60  ;;  %v4528_v30 = vadd.f32 %v4415_v38, %v3726_v59  ;;  %v9751_v59 = vld [vmem:[%s12876_s5 + $0xb0] sm:$0xff]   ;;  %v3763_v60 = vadd.f32 %v12319_v14, %v12259_v23 }
 0x3e2   : > { %v4658_v31 = vld [vmem:[#allocation4] sm:$0xff]  ;;  %v8455_v57 = vpop.f32.mrf.mxu1  ;;  %v12415_v28 = vpop.f32.mrf.mxu0  ;;  %v3755_v38 = vadd.f32 %v12333_v43, %v12261_v20  ;;  %5101 = vmatpush2.bf16.msra.mxu0 %v9751_v59  ;;  %v3766_v43 = vadd.f32 %v12345_v55, %v12263_v21 }
 0x3e3   : > { %v4691_v19 = vmax.f32 %v4658_v31, %v4675_v17  ;;  %4630 = vst.msk [vmem:[#allocation4 + $0x20] sm:$0xff] %vm2837_vm1, %v4598_v22  ;;  %v4601_v4 = vmax.f32 %v4569_v16, 0.0  ;;  %v4567_v1 = vadd.f32 %v12350_v12, %v4528_v30  ;;  %v4533_v33 = vadd.f32 %v8455_v57, %v3747_v62  ;;  %v9753_v57 = vld [vmem:[%s12876_s5 + $0xa8] sm:$0xff]   ;;  %5102 = vmatprep.subr.bf16.mxu0 %v10300_v53 }
 0x3e4   : > { %v4428_v10 = vpop.f32.mrf.mxu1  ;;  %v4676_v6 = vld [vmem:[#allocation4 + $0x18] sm:$0xff]  ;;  %v12433_v30 = vpop.f32.mrf.mxu0 }
 0x3e5   : > { %4707 = vst.msk [vmem:[#allocation5] sm:$0xff] %vm2837_vm1, %v4691_v19  ;;  %4633 = vst.msk [vmem:[#allocation4 + $0x38] sm:$0xff] %vm2837_vm1, %v4601_v4  ;;  %v4599_v11 = vmax.f32 %v4567_v1, 0.0  ;;  %v4531_v9 = vadd.f32 %v4428_v10, %v3739_v27  ;;  %v4572_v45 = vadd.f32 %v12350_v12, %v4533_v33  ;;  %v3758_v1 = vadd.f32 %v12359_v61, %v12265_v29 }
 0x3e6   : > { %v4659_v3 = vld [vmem:[#allocation4 + $0x8] sm:$0xff]  ;;  %v8456_v25 = vpop.f32.mrf.mxu1  ;;  %v12448_v10 = vpop.f32.mrf.mxu0  ;;  %5103 = vmatpush2.bf16.msra.mxu0 %v9753_v57 }
 0x3e7   : > { %v4692_v50 = vmax.f32 %v4659_v3, %v4676_v6  ;;  %4631 = vst.msk [vmem:[#allocation4 + $0x28] sm:$0xff] %vm2837_vm1, %v4599_v11  ;;  %v4570_v51 = vadd.f32 %v12350_v12, %v4531_v9  ;;  %v4534_v54 = vadd.f32 %v8456_v25, %v3750_v34  ;;  %v4604_v0 = vmax.f32 %v4572_v45, 0.0  ;;  %5104 = vmatprep.subr.bf16.mxu0 %v10300_v53 }
 0x3e8   : > { %v4431_v37 = vpop.f32.mrf.mxu1  ;;  %v4677_v22 = vld [vmem:[#allocation4 + $0x30] sm:$0xff]  ;;  %v3789_v59 = vpop.f32.mrf.mxu0 }
 0x3e9   : > { %4708 = vst.msk [vmem:[#allocation5 + $0x8] sm:$0xff] %vm2837_vm1, %v4692_v50  ;;  %v4602_v52 = vmax.f32 %v4570_v51, 0.0  ;;  %v4573_v36 = vadd.f32 %v12350_v12, %v4534_v54  ;;  %v4532_v41 = vadd.f32 %v4431_v37, %v3742_v48  ;;  %4636 = vst.msk [vmem:[#allocation4 + $0x50] sm:$0xff] %vm2837_vm1, %v4604_v0  ;;  %v3779_v50 = vadd.f32 %v12366_v8, %v12267_v7 }
 0x3ea   : > { %v4660_v16 = vld [vmem:[#allocation4 + $0x20] sm:$0xff]  ;;  %v8459_v62 = vpop.f32.mrf.mxu1  ;;  %v3771_v37 = vadd.f32 %v12380_v35, %v12269_v40  ;;  %v3782_v7 = vadd.f32 %v12394_v15, %v12271_v46 }
 0x3eb   : > { %v4693_v17 = vmax.f32 %v4660_v16, %v4677_v22  ;;  %4634 = vst.msk [vmem:[#allocation4 + $0x40] sm:$0xff] %vm2837_vm1, %v4602_v52  ;;  %v4605_v23 = vmax.f32 %v4573_v36, 0.0  ;;  %v4571_v14 = vadd.f32 %v12350_v12, %v4532_v41  ;;  %v4537_v31 = vadd.f32 %v8459_v62, %v3763_v60 }
 0x3ec   : > { %v4444_v20 = vpop.f32.mrf.mxu1  ;;  %v4678_v56 = vld [vmem:[#allocation4 + $0x38] sm:$0xff] }
 0x3ed   : > { %4709 = vst.msk [vmem:[#allocation5 + $0x10] sm:$0xff] %vm2837_vm1, %v4693_v17  ;;  %4637 = vst.msk [vmem:[#allocation4 + $0x58] sm:$0xff] %vm2837_vm1, %v4605_v23  ;;  %v4603_v27 = vmax.f32 %v4571_v14, 0.0  ;;  %v4576_v19 = vadd.f32 %v12350_v12, %v4537_v31  ;;  %v4535_v4 = vadd.f32 %v4444_v20, %v3755_v38  ;;  %v3774_v23 = vadd.f32 %v12408_v32, %v12273_v58 }
 0x3ee   : > { %v4661_v33 = vld [vmem:[#allocation4 + $0x28] sm:$0xff]  ;;  %v8460_v34 = vpop.f32.mrf.mxu1 }
 0x3ef   : > { %v4694_v11 = vmax.f32 %v4661_v33, %v4678_v56  ;;  %4635 = vst.msk [vmem:[#allocation4 + $0x48] sm:$0xff] %vm2837_vm1, %v4603_v27  ;;  %v4608_v21 = vmax.f32 %v4576_v19, 0.0  ;;  %v4574_v55 = vadd.f32 %v12350_v12, %v4535_v4  ;;  %v4538_v9 = vadd.f32 %v8460_v34, %v3766_v43 }
 0x3f0   : > { %v4447_v6 = vpop.f32.mrf.mxu1  ;;  %v4723_v3 = vld [vmem:[#allocation5] ss:$2 sm:$0xff]  ;;  %v4739_v45 = vld [vmem:[#allocation5 + $0x1] ss:$2 sm:$0xff]  ;;  %v4679_v51 = vld [vmem:[#allocation4 + $0x50] sm:$0xff]  ;;  %v3795_v19 = vadd.f32 %v12415_v28, %v12277_v39  ;;  %v3787_v56 = vadd.f32 %v12433_v30, %v12281_v13 }
 0x3f1   : > { %4710 = vst.msk [vmem:[#allocation5 + $0x18] sm:$0xff] %vm2837_vm1, %v4694_v11  ;;  %4640 = vst.msk [vmem:[#allocation4 + $0x70] sm:$0xff] %vm2837_vm1, %v4608_v21  ;;  %v4606_v29 = vmax.f32 %v4574_v55, 0.0  ;;  %v4577_v61 = vadd.f32 %v12350_v12, %v4538_v9  ;;  %v4536_v25 = vadd.f32 %v4447_v6, %v3758_v1  ;;  %v4754_v48 = vmax.f32 %v4723_v3, %v4739_v45  ;;  %v4814_v1 = vld [vmem:[#allocation6 + $0x2] sm:$0xff] }
 0x3f2   : > { %v4662_v54 = vld [vmem:[#allocation4 + $0x40] sm:$0xff]  ;;  %v8463_v0 = vpop.f32.mrf.mxu1  ;;  %v12463_v41 = vpop.f32.mrf.mxu0  ;;  %v9756_v13 = vld [vmem:[%s12876_s5 + $0x28] sm:$0xff]  }
 0x3f3   : > { %v4695_v60 = vmax.f32 %v4662_v54, %v4679_v51  ;;  %4638 = vst.msk [vmem:[#allocation4 + $0x60] sm:$0xff] %vm2837_vm1, %v4606_v29  ;;  %v4609_v52 = vmax.f32 %v4577_v61, 0.0  ;;  %v4575_v36 = vadd.f32 %v12350_v12, %v4536_v25  ;;  %4790 = vst.msk [vmem:[#allocation6 + $0x11] sm:$0xff] %vm2837_vm1, %v4754_v48  ;;  %v4541_v38 = vadd.f32 %v8463_v0, %v3779_v50  ;;  %v9755_v3 = vld [vmem:[%s12876_s5 + $0xa0] sm:$0xff]  }
 0x3f4   : > { %v4460_v22 = vpop.f32.mrf.mxu1  ;;  %v4680_v35 = vld [vmem:[#allocation4 + $0x58] sm:$0xff]  ;;  %v12474_v57 = vpop.f32.mrf.mxu0  ;;  %v3798_v61 = vadd.f32 %v12448_v10, %v12285_v49  ;;  %5105 = vmatpush2.bf16.msra.mxu0 %v9755_v3  ;;  %5228 = vmatpush1.bf16.msra.mxu1 %v9756_v13  ;;  %v3790_v51 = vadd.f32 %v3789_v59, %v12289_v44  ;;  %v9757_v49 = vld [vmem:[%s12876_s5 + $0x20] sm:$0xff]  }
 0x3f5   : > { %4711 = vst.msk [vmem:[#allocation5 + $0x20] sm:$0xff] %vm2837_vm1, %v4695_v60  ;;  %4641 = vst.msk [vmem:[#allocation4 + $0x78] sm:$0xff] %vm2837_vm1, %v4609_v52  ;;  %v4607_v40 = vmax.f32 %v4575_v36, 0.0  ;;  %v4539_v8 = vadd.f32 %v4460_v22, %v3771_v37  ;;  %v4580_v62 = vadd.f32 %v12350_v12, %v4541_v38  ;;  %5229 = vmatprep.subr.bf16.mxu1 %v10300_v53  ;;  %5469 = vmatprep.subr.bf16.mxu0 %v10300_v53 }
 0x3f6   : > { %v4663_v16 = vld [vmem:[#allocation4 + $0x48] sm:$0xff]  ;;  %v8464_v17 = vpop.f32.mrf.mxu1  ;;  %v8428_v30 = vpop.f32.mrf.mxu0 }
 0x3f7   : > { %v4696_v14 = vmax.f32 %v4663_v16, %v4680_v35  ;;  %4639 = vst.msk [vmem:[#allocation4 + $0x68] sm:$0xff] %vm2837_vm1, %v4607_v40  ;;  %v4578_v31 = vadd.f32 %v12350_v12, %v4539_v8  ;;  %v4542_v46 = vadd.f32 %v8464_v17, %v3782_v7  ;;  %v4612_v15 = vmax.f32 %v4580_v62, 0.0  ;;  %v9758_v16 = vld [vmem:[%s12876_s5 + $0x18] sm:$0xff]  }
 0x3f8   : > { %v4463_v20 = vpop.f32.mrf.mxu1  ;;  %v4725_v43 = vld [vmem:[#allocation5 + $0x10] ss:$2 sm:$0xff]  ;;  %v4741_v27 = vld [vmem:[#allocation5 + $0x11] ss:$2 sm:$0xff]  ;;  %v3805_v44 = vpop.f32.mrf.mxu0  ;;  %5230 = vmatpush1.bf16.msra.mxu1 %v9757_v49  ;;  %v3811_v62 = vadd.f32 %v12463_v41, %v12293_v42 }
 0x3f9   : > { %4712 = vst.msk [vmem:[#allocation5 + $0x28] sm:$0xff] %vm2837_vm1, %v4696_v14  ;;  %v4610_v4 = vmax.f32 %v4578_v31, 0.0  ;;  %v4581_v58 = vadd.f32 %v12350_v12, %v4542_v46  ;;  %v4540_v32 = vadd.f32 %v4463_v20, %v3774_v23  ;;  %v4681_v33 = vld [vmem:[#allocation4 + $0x70] sm:$0xff]  ;;  %4644 = vst.msk [vmem:[#allocation4 + $0x90] sm:$0xff] %vm2837_vm1, %v4612_v15  ;;  %v4755_v55 = vmax.f32 %v4725_v43, %v4741_v27 }
 0x3fa   : > { %v4664_v34 = vld [vmem:[#allocation4 + $0x60] sm:$0xff]  ;;  %v8467_v11 = vpop.f32.mrf.mxu1  ;;  %v12483_v21 = vld [vmem:[#allocation6 + $0x12] sm:$0xff]  ;;  %5231 = vmatprep.subr.bf16.mxu1 %v10300_v53  ;;  %v3803_v46 = vadd.f32 %v12474_v57, %v12297_v47 }
 0x3fb   : > { %v4697_v9 = vmax.f32 %v4664_v34, %v4681_v33  ;;  %4642 = vst.msk [vmem:[#allocation4 + $0x80] sm:$0xff] %vm2837_vm1, %v4610_v4  ;;  %v4613_v39 = vmax.f32 %v4581_v58, 0.0  ;;  %v4579_v28 = vadd.f32 %v12350_v12, %v4540_v32  ;;  %v4545_v6 = vadd.f32 %v8467_v11, %v3795_v19  ;;  %4791 = vst.msk [vmem:[#allocation6 + $0x21] sm:$0xff] %vm2837_vm1, %v4755_v55  ;;  %v12524_v19 = vld [vmem:[#allocation6 + $0x11] sm:$0xff] }
 0x3fc   : > { %v4476_v45 = vpop.f32.mrf.mxu1  ;;  %v4887_v29 = vpack.c.bf16 %v12483_v21, %v4814_v1  ;;  %v4682_v54 = vld [vmem:[#allocation4 + $0x78] sm:$0xff]  ;;  %v3814_v32 = vadd.f32 %v8428_v30, %v12303_v26  ;;  %5232 = vmatpush1.bf16.msra.mxu1 %v9758_v16  ;;  %v9759_v33 = vld [vmem:[%s12876_s5 + $0x10] sm:$0xff]   ;;  %v3806_v26 = vadd.f32 %v3805_v44, %v12313_v63 }
 0x3fd   : > { %4713 = vst.msk [vmem:[#allocation5 + $0x30] sm:$0xff] %vm2837_vm1, %v4697_v9  ;;  %4645 = vst.msk [vmem:[#allocation4 + $0x98] sm:$0xff] %vm2837_vm1, %v4613_v39  ;;  %v4611_v25 = vmax.f32 %v4579_v28, 0.0  ;;  %v4584_v48 = vadd.f32 %v12350_v12, %v4545_v6  ;;  %v4543_v50 = vadd.f32 %v4476_v45, %v3787_v56  ;;  %5233 = vmatprep.subr.bf16.mxu1 %v10300_v53 }
 0x3fe   : > { %v4665_v0 = vld [vmem:[#allocation4 + $0x68] sm:$0xff]  ;;  %7906 = vmatprep.mubr.msk.bf16.mxu1 %vm2837_vm1, %v4887_v29  ;;  %v8468_v37 = vpop.f32.mrf.mxu1 }
 0x3ff   : > { %v4698_v10 = vmax.f32 %v4665_v0, %v4682_v54  ;;  %4643 = vst.msk [vmem:[#allocation4 + $0x88] sm:$0xff] %vm2837_vm1, %v4611_v25  ;;  %v4616_v60 = vmax.f32 %v4584_v48, 0.0  ;;  %v4582_v52 = vadd.f32 %v12350_v12, %v4543_v50  ;;  %v4546_v36 = vadd.f32 %v8468_v37, %v3798_v61  ;;  %v9761_v48 = vld [vmem:[%s12876_s5 + $0x8] sm:$0xff]  }
 0x400   : > { %v4479_v59 = vpop.f32.mrf.mxu1  ;;  %v4727_v38 = vld [vmem:[#allocation5 + $0x20] ss:$2 sm:$0xff]  ;;  %v4743_v22 = vld [vmem:[#allocation5 + $0x21] ss:$2 sm:$0xff]  ;;  %v4683_v17 = vld [vmem:[#allocation4 + $0x90] sm:$0xff]  ;;  %5234 = vmatpush1.bf16.msra.mxu1 %v9759_v33 }
 0x401   : > { %4714 = vst.msk [vmem:[#allocation5 + $0x38] sm:$0xff] %vm2837_vm1, %v4698_v10  ;;  %4648 = vst.msk [vmem:[#allocation4 + $0xb0] sm:$0xff] %vm2837_vm1, %v4616_v60  ;;  %v4614_v7 = vmax.f32 %v4582_v52, 0.0  ;;  %v4585_v40 = vadd.f32 %v12350_v12, %v4546_v36  ;;  %v4544_v8 = vadd.f32 %v4479_v59, %v3790_v51  ;;  %v4756_v35 = vmax.f32 %v4727_v38, %v4743_v22 }
 0x402   : > { %v4666_v23 = vld [vmem:[#allocation4 + $0x80] sm:$0xff]  ;;  %v8431_v14 = vpop.f32.mrf.mxu0  ;;  %v8471_v31 = vpop.f32.mrf.mxu1  ;;  %5235 = vmatprep.subr.bf16.mxu1 %v10300_v53 }
 0x403   : > { %v4699_v15 = vmax.f32 %v4666_v23, %v4683_v17  ;;  %4646 = vst.msk [vmem:[#allocation4 + $0xa0] sm:$0xff] %vm2837_vm1, %v4614_v7  ;;  %v4617_v20 = vmax.f32 %v4585_v40, 0.0  ;;  %v4583_v43 = vadd.f32 %v12350_v12, %v4544_v8  ;;  %v12522_v27 = vld [vmem:[#allocation6 + $0x22] sm:$0xff]  ;;  %4792 = vst.msk [vmem:[#allocation6 + $0x31] sm:$0xff] %vm2837_vm1, %v4756_v35  ;;  %v4549_v41 = vadd.f32 %v8471_v31, %v3811_v62 }
 0x404   : > { %v12526_v42 = vld [vmem:[#allocation6 + $0x21] sm:$0xff]  ;;  %v3818_v4 = vpop.f32.mrf.mxu0  ;;  %v4492_v58 = vpop.f32.mrf.mxu1  ;;  %v4983_v47 = vpack.c.bf16 %v12522_v27, %v12483_v21  ;;  %v4684_v34 = vld [vmem:[#allocation4 + $0x98] sm:$0xff]  ;;  %v3827_v29 = vadd.f32 %v8431_v14, %v12321_v2  ;;  %5236 = vmatpush1.bf16.msra.mxu1 %v9761_v48 }
 0x405   : > { %v9662_v57 = vpack.i.bf16 %v12526_v42, %v12524_v19  ;;  %4715 = vst.msk [vmem:[#allocation5 + $0x40] sm:$0xff] %vm2837_vm1, %v4699_v15  ;;  %4649 = vst.msk [vmem:[#allocation4 + $0xb8] sm:$0xff] %vm2837_vm1, %v4617_v20  ;;  %v4615_v1 = vmax.f32 %v4583_v43, 0.0  ;;  %v4547_v56 = vadd.f32 %v4492_v58, %v3803_v46  ;;  %v4588_v21 = vadd.f32 %v12350_v12, %v4549_v41  ;;  %v9763_v35 = vld [vmem:[%s12876_s5] sm:$0xff]   ;;  %v9765_v43 = vld [vmem:[%s12876_s5 + $0x58] sm:$0xff]  }
 0x406   : > { %v4667_v11 = vld [vmem:[#allocation4 + $0x88] sm:$0xff]  ;;  %7890 = vmatprep.mubr.msk.bf16.mxu0 %vm2837_vm1, %v4983_v47  ;;  %v8472_v55 = vpop.f32.mrf.mxu1  ;;  %v8432_v28 = vpop.f32.mrf.mxu0  ;;  %v3819_v54 = vadd.f32 %v3818_v4, %v12330_v24  ;;  %5237 = vmatprep.subr.bf16.mxu1 %v10300_v53 }
 0x407   : > { %9663 = vrot.lane.b32.xlu0 %v9662_v57, %s10299_s13  ;;  %v4700_v9 = vmax.f32 %v4667_v11, %v4684_v34  ;;  %4647 = vst.msk [vmem:[#allocation4 + $0xa8] sm:$0xff] %vm2837_vm1, %v4615_v1  ;;  %v4586_v39 = vadd.f32 %v12350_v12, %v4547_v56  ;;  %v4550_v6 = vadd.f32 %v8472_v55, %v3814_v32  ;;  %v4620_v3 = vmax.f32 %v4588_v21, 0.0  ;;  %v9767_v34 = vld [vmem:[%s12876_s5 + $0x50] sm:$0xff]  }
 0x408   : > { %v4495_v13 = vpop.f32.mrf.mxu1  ;;  %v4729_v30 = vld [vmem:[#allocation5 + $0x30] ss:$2 sm:$0xff]  ;;  %v4745_v45 = vld [vmem:[#allocation5 + $0x31] ss:$2 sm:$0xff]  ;;  %v3821_v10 = vpop.f32.mrf.mxu0  ;;  %v3830_v44 = vadd.f32 %v8432_v28, %v12335_v5  ;;  %5238 = vmatpush1.bf16.msra.mxu1 %v9763_v35 }
 0x409   : > { %4716 = vst.msk [vmem:[#allocation5 + $0x48] sm:$0xff] %vm2837_vm1, %v4700_v9  ;;  %v4618_v61 = vmax.f32 %v4586_v39, 0.0  ;;  %v4589_v63 = vadd.f32 %v12350_v12, %v4550_v6  ;;  %v4548_v25 = vadd.f32 %v4495_v13, %v3806_v26  ;;  %v4685_v50 = vld [vmem:[#allocation4 + $0xb0] sm:$0xff]  ;;  %4652 = vst.msk [vmem:[#allocation4 + $0xd0] sm:$0xff] %vm2837_vm1, %v4620_v3  ;;  %v4757_v37 = vmax.f32 %v4729_v30, %v4745_v45  ;;  %v9769_v39 = vld [vmem:[%s12876_s5 + $0x48] sm:$0xff]  }
 0x40a   : > { %v4668_v51 = vld [vmem:[#allocation4 + $0xa0] sm:$0xff]  ;;  %v8475_v0 = vpop.f32.mrf.mxu1  ;;  %v3822_v40 = vadd.f32 %v3821_v10, %v12341_v18  ;;  %5247 = vmatprep.subr.bf16.mxu1 %v10300_v53  ;;  %v4904_v32 = vld [vmem:[#allocation6 + $0x31] sm:$0xff] }
 0x40b   : > { %v4701_v2 = vmax.f32 %v4668_v51, %v4685_v50  ;;  %4650 = vst.msk [vmem:[#allocation4 + $0xc0] sm:$0xff] %vm2837_vm1, %v4618_v61  ;;  %v4621_v49 = vmax.f32 %v4589_v63, 0.0  ;;  %v4587_v60 = vadd.f32 %v12350_v12, %v4548_v25  ;;  %v4553_v52 = vadd.f32 %v8475_v0, %v3827_v29  ;;  %4793 = vst.msk [vmem:[#allocation6 + $0x41] sm:$0xff] %vm2837_vm1, %v4757_v37  ;;  %v9771_v45 = vld [vmem:[%s12876_s5 + $0x40] sm:$0xff]  }
 0x40c   : > { %v4508_v36 = vpop.f32.mrf.mxu1  ;;  %v4686_v22 = vld [vmem:[#allocation4 + $0xb8] sm:$0xff]  ;;  %5248 = vmatpush2.bf16.msra.mxu1 %v9765_v43  ;;  %v9692_v10 = vpack.i.bf16 %v4904_v32, %v12526_v42  ;;  %v12643_v43 = vld [vmem:[#allocation6 + $0x30] sm:$0xff] }
 0x40d   : > { %4717 = vst.msk [vmem:[#allocation5 + $0x50] sm:$0xff] %vm2837_vm1, %v4701_v2  ;;  %4653 = vst.msk [vmem:[#allocation4 + $0xd8] sm:$0xff] %vm2837_vm1, %v4621_v49  ;;  %v4619_v24 = vmax.f32 %v4587_v60, 0.0  ;;  %v4592_v59 = vadd.f32 %v12350_v12, %v4553_v52  ;;  %v4551_v38 = vadd.f32 %v4508_v36, %v3819_v54  ;;  %5249 = vmatprep.subr.bf16.mxu1 %v10300_v53  ;;  %v4806_v54 = vld [vmem:[#allocation6 + $0x1] sm:$0xff] }
 0x40e   : > { %v4669_v7 = vld [vmem:[#allocation4 + $0xa8] sm:$0xff]  ;;  %v8476_v8 = vpop.f32.mrf.mxu1  ;;  %v9682_v0 = vpack.i.bf16 %v12524_v19, %v4806_v54  ;;  %v5304_v19 = vld [vmem:[#allocation6 + $0x91] sm:$0xff] }
 0x40f   : > { %v4702_v16 = vmax.f32 %v4669_v7, %v4686_v22  ;;  %4651 = vst.msk [vmem:[#allocation4 + $0xc8] sm:$0xff] %vm2837_vm1, %v4619_v24  ;;  %v4624_v5 = vmax.f32 %v4592_v59, 0.0  ;;  %v4590_v62 = vadd.f32 %v12350_v12, %v4551_v38  ;;  %v4554_v17 = vadd.f32 %v8476_v8, %v3830_v44  ;;  %v12613_v7 = vld [vmem:[#allocation6 + $0x20] sm:$0xff] }
 0x410   : > { %v4511_v23 = vpop.f32.mrf.mxu1  ;;  %v4731_v14 = vld [vmem:[#allocation5 + $0x40] ss:$2 sm:$0xff]  ;;  %v4747_v31 = vld [vmem:[#allocation5 + $0x41] ss:$2 sm:$0xff]  ;;  %v4687_v41 = vld [vmem:[#allocation4 + $0xd0] sm:$0xff]  ;;  %5250 = vmatpush2.bf16.msra.mxu1 %v9767_v34 }
 0x411   : > { %4718 = vst.msk [vmem:[#allocation5 + $0x58] sm:$0xff] %vm2837_vm1, %v4702_v16  ;;  %4656 = vst.msk [vmem:[#allocation4 + $0xf0] sm:$0xff] %vm2837_vm1, %v4624_v5  ;;  %v4622_v18 = vmax.f32 %v4590_v62, 0.0  ;;  %v4593_v46 = vadd.f32 %v12350_v12, %v4554_v17  ;;  %v4552_v15 = vadd.f32 %v4511_v23, %v3822_v40  ;;  %v4758_v20 = vmax.f32 %v4731_v14, %v4747_v31  ;;  %v12615_v40 = vld [vmem:[#allocation6 + $0x10] sm:$0xff]  ;;  %v9760_v5 = vld [vmem:[%s12876_s5 + $0xf8] sm:$0xff]  }
 0x412   : > { %v4670_v4 = vld [vmem:[#allocation4 + $0xc0] sm:$0xff]  ;;  %5251 = vmatprep.subr.bf16.mxu1 %v10300_v53  ;;  %v12626_v17 = vld [vmem:[#allocation6 + $0x32] sm:$0xff]  ;;  %v9764_v31 = vld [vmem:[%s12876_s5 + $0xe8] sm:$0xff]  }
 0x413   : > { %v4703_v58 = vmax.f32 %v4670_v4, %v4687_v41  ;;  %4654 = vst.msk [vmem:[#allocation4 + $0xe0] sm:$0xff] %vm2837_vm1, %v4622_v18  ;;  %v4625_v47 = vmax.f32 %v4593_v46, 0.0  ;;  %v4591_v57 = vadd.f32 %v12350_v12, %v4552_v15  ;;  %v4905_v1 = vld [vmem:[#allocation6 + $0x41] sm:$0xff]  ;;  %4794 = vst.msk [vmem:[#allocation6 + $0x51] sm:$0xff] %vm2837_vm1, %v4758_v20  ;;  %v9762_v14 = vld [vmem:[%s12876_s5 + $0xf0] sm:$0xff]  }
 0x414   : > { %v9667_v56 = vpack.i.bf16 %v4905_v1, %v4904_v32  ;;  %v4688_v11 = vld [vmem:[#allocation4 + $0xd8] sm:$0xff]  ;;  %5252 = vmatpush2.bf16.msra.mxu1 %v9769_v39  ;;  %v12617_v8 = vld [vmem:[#allocation6 + $0x42] sm:$0xff] }
 0x415   : > { %4719 = vst.msk [vmem:[#allocation5 + $0x60] sm:$0xff] %vm2837_vm1, %v4703_v58  ;;  %4657 = vst.msk [vmem:[#allocation4 + $0xf8] sm:$0xff] %vm2837_vm1, %v4625_v47  ;;  %v4623_v33 = vmax.f32 %v4591_v57, 0.0  ;;  %5253 = vmatprep.subr.bf16.mxu1 %v10300_v53  ;;  %v4985_v23 = vpack.c.bf16 %v12617_v8, %v12626_v17  ;;  %v9766_v18 = vld [vmem:[%s12876_s5 + $0xe0] sm:$0xff]   ;;  %v9768_v57 = vld [vmem:[%s12876_s5 + $0xd8] sm:$0xff]  }
 0x416   : > { %v4671_v21 = vld [vmem:[#allocation4 + $0xc8] sm:$0xff]  ;;  %9668 = vrot.lane.b32.xlu1 %v9667_v56, %s10299_s13  ;;  %v12645_v41 = vld [vmem:[#allocation6 + $0x40] sm:$0xff] }
 0x417   : > { %v4704_v12 = vmax.f32 %v4671_v21, %v4688_v11  ;;  %4655 = vst.msk [vmem:[#allocation4 + $0xe8] sm:$0xff] %vm2837_vm1, %v4623_v33  ;;  %v9770_v33 = vld [vmem:[%s12876_s5 + $0xd0] sm:$0xff]   ;;  %v9772_v34 = vld [vmem:[%s12876_s5 + $0xc8] sm:$0xff]   ;;  %v9773_v21 = vld [vmem:[%s12876_s5 + $0xc0] sm:$0xff]  }
 0x418   : > { %v4733_v55 = vld [vmem:[#allocation5 + $0x50] ss:$2 sm:$0xff]  ;;  %v4749_v26 = vld [vmem:[#allocation5 + $0x51] ss:$2 sm:$0xff]  ;;  %5254 = vmatpush2.bf16.msra.mxu1 %v9771_v45 }
 0x419   : > { %4720 = vst.msk [vmem:[#allocation5 + $0x68] sm:$0xff] %vm2837_vm1, %v4704_v12  ;;  %v4759_v9 = vmax.f32 %v4733_v55, %v4749_v26  ;;  %v4689_v28 = vld [vmem:[#allocation4 + $0xf0] sm:$0xff] }
 0x41a   : > { %v4672_v6 = vld [vmem:[#allocation4 + $0xe0] sm:$0xff]  ;;  %v4906_v48 = vld [vmem:[#allocation6 + $0x51] sm:$0xff] }
 0x41b   : > { %v4705_v3 = vmax.f32 %v4672_v6, %v4689_v28  ;;  %4795 = vst.msk [vmem:[#allocation6 + $0x61] sm:$0xff] %vm2837_vm1, %v4759_v9  ;;  %v9702_v60 = vpack.i.bf16 %v4906_v48, %v4905_v1  ;;  %v4914_v1 = vld [vmem:[#allocation6 + $0x52] sm:$0xff] }
 0x41c   : > { %v4690_v13 = vld [vmem:[#allocation4 + $0xf8] sm:$0xff]  ;;  %v12671_v26 = vld [vmem:[#allocation6 + $0x50] sm:$0xff] }
 0x41d   : > { %4721 = vst.msk [vmem:[#allocation5 + $0x70] sm:$0xff] %vm2837_vm1, %v4705_v3  ;;  %v4798_v3 = vld [vmem:[#allocation6] sm:$0xff] }
 0x41e   : > { %v4673_v30 = vld [vmem:[#allocation4 + $0xe8] sm:$0xff] }
 0x41f   : > { %v4706_v29 = vmax.f32 %v4673_v30, %v4690_v13 }
 0x420   : > { %v4735_v61 = vld [vmem:[#allocation5 + $0x60] ss:$2 sm:$0xff]  ;;  %v4751_v63 = vld [vmem:[#allocation5 + $0x61] ss:$2 sm:$0xff] }
 0x421   : > { %4722 = vst.msk [vmem:[#allocation5 + $0x78] sm:$0xff] %vm2837_vm1, %v4706_v29  ;;  %v4760_v25 = vmax.f32 %v4735_v61, %v4751_v63  ;;  %v9774_v29 = vld [vmem:[%s12876_s5 + $0x118] sm:$0xff]  }
 0x422   : > { %v4907_v50 = vld [vmem:[#allocation6 + $0x61] sm:$0xff] }
 0x423   : > { %v9672_v51 = vpack.i.bf16 %v4907_v50, %v4906_v48  ;;  %4796 = vst.msk [vmem:[#allocation6 + $0x71] sm:$0xff] %vm2837_vm1, %v4760_v25  ;;  %v12647_v4 = vld [vmem:[#allocation6 + $0x62] sm:$0xff] }
 0x424   : > { %v4987_v56 = vpack.c.bf16 %v12647_v4, %v4914_v1  ;;  %v12673_v9 = vld [vmem:[#allocation6 + $0x60] sm:$0xff] }
 0x425   : > { %9673 = vrot.lane.b32.xlu0 %v9672_v51, %s10299_s13 }
 0x428   : > { %v4737_v37 = vld [vmem:[#allocation5 + $0x70] ss:$2 sm:$0xff]  ;;  %v4753_v2 = vld [vmem:[#allocation5 + $0x71] ss:$2 sm:$0xff] }
 0x429   : > { %9683 = vrot.lane.b32.xlu0 %v9682_v0, %s10299_s13  ;;  %v4761_v49 = vmax.f32 %v4737_v37, %v4753_v2  ;;  %v9775_v0 = vld [vmem:[%s12876_s5 + $0x110] sm:$0xff]  }
 0x42a   : > { %v4908_v52 = vld [vmem:[#allocation6 + $0x71] sm:$0xff] }
 0x42b   : > { %4797 = vst.msk [vmem:[#allocation6 + $0x81] sm:$0xff] %vm2837_vm1, %v4761_v49  ;;  %v9712_v24 = vpack.i.bf16 %v4908_v52, %v4907_v50  ;;  %v4916_v45 = vld [vmem:[#allocation6 + $0x72] sm:$0xff]  ;;  %v4889_v49 = vpack.c.bf16 %v12626_v17, %v12522_v27 }
 0x42d   : > { %9693 = vrot.lane.b32.xlu0 %v9692_v10, %s10299_s13 }
 0x431   : > { %9703 = vrot.lane.b32.xlu0 %v9702_v60, %s10299_s13 }
 0x432   : > { %v4909_v36 = vld [vmem:[#allocation6 + $0x81] sm:$0xff] }
 0x433   : > { %v9677_v44 = vpack.i.bf16 %v4909_v36, %v4908_v52  ;;  %v9717_v42 = vpack.i.bf16 %v5304_v19, %v4909_v36  ;;  %v12675_v39 = vld [vmem:[#allocation6 + $0x82] sm:$0xff] }
 0x434   : > { %v4989_v25 = vpack.c.bf16 %v12675_v39, %v4916_v45  ;;  %v9777_v19 = vld [vmem:[%s12876_s5 + $0x100] sm:$0xff]  }
 0x435   : > { %9678 = vrot.lane.b32.xlu1 %v9677_v44, %s10299_s13  ;;  %9713 = vrot.lane.b32.xlu0 %v9712_v24, %s10299_s13 }
 0x439   : > { %9688 = vrot.lane.b32.xlu1 %v9692_v10, %s10299_s13  ;;  %v9776_v10 = vld [vmem:[%s12876_s5 + $0x108] sm:$0xff]  }
 0x43d   : > { %9698 = vrot.lane.b32.xlu1 %v9702_v60, %s10299_s13 }
 0x441   : > { %9708 = vrot.lane.b32.xlu1 %v9712_v24, %s10299_s13  ;;  %v4891_v24 = vpack.c.bf16 %v4914_v1, %v12617_v8 }
 0x445   : > { %9718 = vrot.lane.b32.xlu1 %v9717_v42, %s10299_s13  ;;  %s10223_s13 = sshll.u32 %s10301_s21, 4  ;;  %s10224_s13 = int_to_ptr.vmem [resolvable:$false] %s10223_s13 }
 0x446   : > { %s10225_s0 = scalar_lea.vmem %s10224_s13, 32  ;;  %p10226_p11 = scmp.lt.s32.totalorder %s7718_s12, %s10224_s13 }
 0x447   : > { %p10227_p12 = scmp.lt.s32.totalorder %s10225_s0, %s10219_s16 }
 0x449   : > { %p10228_p13 = por %p10227_p12, %p10226_p11 }
 0x44b   : > { %p10229_p0 = pnand %p10228_p13, %p10222_p10 }
 0x479   : > { %v9664_v59 = vpop.permute.xlu0 %9663 }
 0x47a   : > { %v9666_v38 = vunpack.i.h.bf16 %v9664_v59  ;;  %v9665_v22 = vunpack.i.l.bf16 %v9664_v59 }
 0x47c   : > { %v4951_v35 = vsel %vm2837_vm1, %v12613_v7, %v9666_v38  ;;  %v4950_v16 = vsel %vm2837_vm1, %v12615_v40, %v9665_v22 }
 0x47d   : > { %v4982_v62 = vpack.c.bf16 %v4951_v35, %v4950_v16  ;;  %v4901_v35 = vld [vmem:[#allocation6 + $0x80] sm:$0xff] }
 0x47f   : > { %5107 = vmatmul.mubr.bf16.vlgmr.msra.gmra.mxu0 %v4982_v62 }
 0x480   : > { %7891 = vmatprep.mubr.msk.bf16.mxu0 %vm2837_vm1, %v4985_v23  ;;  %5470 = vmatpush1.bf16.msra.mxu0 %v9760_v5 }
 0x481   : > { %5471 = vmatprep.subr.bf16.mxu0 %v10300_v53 }
 0x484   : > { %5472 = vmatpush1.bf16.msra.mxu0 %v9762_v14 }
 0x485   : > { %5473 = vmatprep.subr.bf16.mxu0 %v10300_v53 }
 0x488   : > { %5474 = vmatpush1.bf16.msra.mxu0 %v9764_v31  ;;  %v9669_v46 = vpop.permute.xlu1 %9668 }
 0x489   : > { %5475 = vmatprep.subr.bf16.mxu0 %v10300_v53  ;;  %v9671_v15 = vunpack.i.h.bf16 %v9669_v46  ;;  %v9670_v20 = vunpack.i.l.bf16 %v9669_v46  ;;  %v4893_v46 = vpack.c.bf16 %v4916_v45, %v12647_v4 }
 0x48b   : > { %v4952_v58 = vsel %vm2837_vm1, %v12643_v43, %v9670_v20  ;;  %v4953_v47 = vsel %vm2837_vm1, %v12645_v41, %v9671_v15 }
 0x48c   : > { %5476 = vmatpush1.bf16.msra.mxu0 %v9766_v18  ;;  %v4984_v32 = vpack.c.bf16 %v4953_v47, %v4952_v58 }
 0x48d   : > { %5477 = vmatprep.subr.bf16.mxu0 %v10300_v53 }
 0x48e   : > { %5115 = vmatmul.mubr.bf16.gmra.mxu0 %v4984_v32 }
 0x48f   : > { %7892 = vmatprep.mubr.msk.bf16.mxu0 %vm2837_vm1, %v4987_v56 }
 0x490   : > { %5478 = vmatpush1.bf16.msra.mxu0 %v9768_v57 }
 0x491   : > { %5479 = vmatprep.subr.bf16.mxu0 %v10300_v53 }
 0x494   : > { %5480 = vmatpush1.bf16.msra.mxu0 %v9770_v33 }
 0x495   : > { %5481 = vmatprep.subr.bf16.mxu0 %v10300_v53 }
 0x497   : > { %v9674_v11 = vpop.permute.xlu0 %9673 }
 0x498   : > { %5482 = vmatpush1.bf16.msra.mxu0 %v9772_v34  ;;  %v9676_v12 = vunpack.i.h.bf16 %v9674_v11  ;;  %v9675_v55 = vunpack.i.l.bf16 %v9674_v11 }
 0x499   : > { %5483 = vmatprep.subr.bf16.mxu0 %v10300_v53 }
 0x49a   : > { %v4954_v28 = vsel %vm2837_vm1, %v12671_v26, %v9675_v55  ;;  %v4955_v6 = vsel %vm2837_vm1, %v12673_v9, %v9676_v12 }
 0x49b   : > { %v9684_v13 = vpop.permute.xlu0 %9683  ;;  %v4986_v30 = vpack.c.bf16 %v4955_v6, %v4954_v28 }
 0x49c   : > { %5484 = vmatpush1.bf16.msra.mxu0 %v9773_v21  ;;  %v9686_v61 = vunpack.i.h.bf16 %v9684_v13  ;;  %v9685_v63 = vunpack.i.l.bf16 %v9684_v13  ;;  %v5312_v13 = vld [vmem:[#allocation6 + $0x92] sm:$0xff] }
 0x49d   : > { %5493 = vmatprep.subr.bf16.mxu0 %v10300_v53  ;;  %5123 = vmatmul.mubr.bf16.gmra.mxu0 %v4986_v30 }
 0x49e   : > { %v4854_v48 = vsel %vm2837_vm1, %v4798_v3, %v9685_v63  ;;  %v4855_v50 = vsel %vm2837_vm1, %v12615_v40, %v9686_v61  ;;  %7893 = vmatprep.mubr.msk.bf16.mxu0 %vm2837_vm1, %v4989_v25  ;;  %v4900_v40 = vld [vmem:[#allocation6 + $0x70] sm:$0xff] }
 0x49f   : > { %v4886_v51 = vpack.c.bf16 %v4855_v50, %v4854_v48  ;;  %v9694_v54 = vpop.permute.xlu0 %9693  ;;  %v9780_v48 = vld [vmem:[#allocation9 + $0x74] ss:$8 sps:$4 sm:$0xff]   ;;  %v9781_v50 = vld [vmem:[#allocation9 + $0x170] ss:$8 sps:$4 sm:$0xff]  }
 0x4a0   : > { %5494 = vmatpush2.bf16.msra.mxu0 %v9774_v29  ;;  %v9696_v37 = vunpack.i.h.bf16 %v9694_v54  ;;  %v9695_v2 = vunpack.i.l.bf16 %v9694_v54  ;;  %v5296_v29 = vld [vmem:[#allocation6 + $0x90] sm:$0xff]  ;;  %7201 = vmatprep.subr.bf16.mxu1 %v9780_v48  ;;  %v9784_v54 = vld [vmem:[#allocation9 + $0x60] ss:$8 sps:$4 sm:$0xff]  }
 0x4a1   : > { %5495 = vmatprep.subr.bf16.mxu0 %v10300_v53  ;;  %5256 = vmatmul.mubr.bf16.vlgmr.msra.gmra.mxu1 %v4886_v51  ;;  %v9783_v51 = vld [vmem:[#allocation9 + $0x174] ss:$8 sps:$4 sm:$0xff]  }
 0x4a2   : > { %7907 = vmatprep.mubr.msk.bf16.mxu1 %vm2837_vm1, %v4889_v49  ;;  %v4856_v60 = vsel %vm2837_vm1, %v12613_v7, %v9695_v2  ;;  %v4857_v52 = vsel %vm2837_vm1, %v12643_v43, %v9696_v37  ;;  %v9789_v37 = vld [vmem:[#allocation9 + $0x164] ss:$8 sps:$4 sm:$0xff]   ;;  %v9792_v2 = vld [vmem:[#allocation9 + $0x54] ss:$8 sps:$4 sm:$0xff]  }
 0x4a3   : > { %v9704_v36 = vpop.permute.xlu0 %9703  ;;  %v4888_v44 = vpack.c.bf16 %v4857_v52, %v4856_v60  ;;  %v9793_v60 = vld [vmem:[#allocation9 + $0x150] ss:$8 sps:$4 sm:$0xff]   ;;  %v9798_v52 = vld [vmem:[#allocation9 + $0x44] ss:$8 sps:$4 sm:$0xff]   ;;  %v9879_v48 = vld [vmem:[#allocation9 + $0x374] ss:$8 sps:$4 sm:$0xff]  }
 0x4a4   : > { %5496 = vmatpush2.bf16.msra.mxu0 %v9775_v0  ;;  %v9706_v42 = vunpack.i.h.bf16 %v9704_v36  ;;  %v9705_v59 = vunpack.i.l.bf16 %v9704_v36  ;;  %v9787_v0 = vld [vmem:[#allocation9 + $0x160] ss:$8 sps:$4 sm:$0xff]   ;;  %v9801_v36 = vld [vmem:[#allocation9 + $0x144] ss:$8 sps:$4 sm:$0xff]  }
 0x4a5   : > { %5497 = vmatprep.subr.bf16.mxu0 %v10300_v53 }
 0x4a6   : > { %v4858_v14 = vsel %vm2837_vm1, %v12645_v41, %v9705_v59  ;;  %v9807_v59 = vld [vmem:[#allocation9 + $0x134] ss:$8 sps:$4 sm:$0xff]  }
 0x4a7   : > { %v9679_v27 = vpop.permute.xlu1 %9678  ;;  %v9714_v31 = vpop.permute.xlu0 %9713 }
 0x4a8   : > { %5498 = vmatpush2.bf16.msra.mxu0 %v9776_v10  ;;  %v9681_v38 = vunpack.i.h.bf16 %v9679_v27  ;;  %v9680_v22 = vunpack.i.l.bf16 %v9679_v27  ;;  %v9716_v15 = vunpack.i.h.bf16 %v9714_v31  ;;  %v9715_v20 = vunpack.i.l.bf16 %v9714_v31  ;;  %v9790_v10 = vld [vmem:[#allocation9 + $0x50] ss:$8 sps:$4 sm:$0xff]   ;;  %v9796_v27 = vld [vmem:[#allocation9 + $0x40] ss:$8 sps:$4 sm:$0xff]  }
 0x4a9   : > { %5499 = vmatprep.subr.bf16.mxu0 %v10300_v53  ;;  %5264 = vmatmul.mubr.bf16.gmra.mxu1 %v4888_v44  ;;  %v4859_v53 = vsel %vm2837_vm1, %v12671_v26, %v9706_v42  ;;  %v9799_v44 = vld [vmem:[#allocation9 + $0x140] ss:$8 sps:$4 sm:$0xff]   ;;  %v9805_v42 = vld [vmem:[#allocation9 + $0x130] ss:$8 sps:$4 sm:$0xff]  }
 0x4aa   : > { %7908 = vmatprep.mubr.msk.bf16.mxu1 %vm2837_vm1, %v4891_v24  ;;  %v4956_v16 = vsel %vm2837_vm1, %v4900_v40, %v9680_v22  ;;  %v4957_v8 = vsel %vm2837_vm1, %v4901_v35, %v9681_v38  ;;  %v4890_v18 = vpack.c.bf16 %v4859_v53, %v4858_v14  ;;  %v4860_v33 = vsel %vm2837_vm1, %v12673_v9, %v9715_v20  ;;  %v9808_v38 = vld [vmem:[#allocation9 + $0x20] ss:$8 sps:$4 sm:$0xff]   ;;  %v9810_v22 = vld [vmem:[#allocation9 + $0x24] ss:$8 sps:$4 sm:$0xff]   ;;  %v9826_v31 = vld [vmem:[#allocation9 + $0xf0] ss:$8 sps:$4 sm:$0xff]  }
 0x4ab   : > { %v9689_v5 = vpop.permute.xlu1 %9688  ;;  %v4988_v62 = vpack.c.bf16 %v4957_v8, %v4956_v16  ;;  %v4861_v4 = vsel %vm2837_vm1, %v4900_v40, %v9716_v15  ;;  %v9814_v16 = vld [vmem:[#allocation9 + $0x10] ss:$8 sps:$4 sm:$0xff]   ;;  %v9816_v8 = vld [vmem:[#allocation9 + $0x14] ss:$8 sps:$4 sm:$0xff]   ;;  %v9823_v14 = vld [vmem:[#allocation9 + $0x100] ss:$8 sps:$4 sm:$0xff]  }
 0x4ac   : > { %5500 = vmatpush2.bf16.msra.mxu0 %v9777_v19  ;;  %v9691_v17 = vunpack.i.h.bf16 %v9689_v5  ;;  %v9690_v23 = vunpack.i.l.bf16 %v9689_v5  ;;  %v4892_v34 = vpack.c.bf16 %v4861_v4, %v4860_v33  ;;  %v9804_v19 = vld [vmem:[#allocation9 + $0x34] ss:$8 sps:$4 sm:$0xff]   ;;  %v9817_v5 = vld [vmem:[#allocation9 + $0x110] ss:$8 sps:$4 sm:$0xff]   ;;  %v9825_v53 = vld [vmem:[#allocation9 + $0x104] ss:$8 sps:$4 sm:$0xff]  }
 0x4ad   : > { %5131 = vmatmul.mubr.bf16.gmra.mxu0 %v4988_v62  ;;  %7242 = vmatprep.subr.bf16.mxu0 %v9783_v51  ;;  %v9819_v62 = vld [vmem:[#allocation9 + $0x114] ss:$8 sps:$4 sm:$0xff]   ;;  %v9832_v20 = vld [vmem:[#allocation9 + $0xe0] ss:$8 sps:$4 sm:$0xff]   ;;  %v9841_v33 = vld [vmem:[#allocation9 + $0x1d0] ss:$8 sps:$4 sm:$0xff]  }
 0x4ae   : > { %7922 = vmatprep.mubr.msk.bf16.mxu0 %vm2837_vm1, %v4889_v49  ;;  %v5346_v58 = vsel %vm2837_vm1, %v12643_v43, %v9691_v17  ;;  %v5345_v47 = vsel %vm2837_vm1, %v12613_v7, %v9690_v23  ;;  %v9795_v49 = vld [vmem:[#allocation9 + $0x154] ss:$8 sps:$4 sm:$0xff]   ;;  %v9820_v17 = vld [vmem:[#allocation9] ss:$8 sps:$4 sm:$0xff]   ;;  %v9822_v23 = vld [vmem:[#allocation9 + $0x4] ss:$8 sps:$4 sm:$0xff]  }
 0x4af   : > { %v9699_v57 = vpop.permute.xlu1 %9698  ;;  %v5377_v32 = vpack.c.bf16 %v5346_v58, %v5345_v47  ;;  %v9831_v15 = vld [vmem:[#allocation9 + $0x1f4] ss:$8 sps:$4 sm:$0xff]   ;;  %v9834_v58 = vld [vmem:[#allocation9 + $0xe4] ss:$8 sps:$4 sm:$0xff]   ;;  %v9835_v47 = vld [vmem:[#allocation9 + $0x1e0] ss:$8 sps:$4 sm:$0xff]  }
 0x4b0   : > { %v9701_v1 = vunpack.i.h.bf16 %v9699_v57  ;;  %v9700_v56 = vunpack.i.l.bf16 %v9699_v57  ;;  %v9837_v57 = vld [vmem:[#allocation9 + $0x1e4] ss:$8 sps:$4 sm:$0xff]  }
 0x4b1   : > { %5272 = vmatmul.mubr.bf16.gmra.mxu1 %v4890_v18  ;;  %v9828_v18 = vld [vmem:[#allocation9 + $0xf4] ss:$8 sps:$4 sm:$0xff]   ;;  %v9846_v4 = vld [vmem:[#allocation9 + $0xc4] ss:$8 sps:$4 sm:$0xff]  }
 0x4b2   : > { %7909 = vmatprep.mubr.msk.bf16.mxu1 %vm2837_vm1, %v4893_v46  ;;  %v5347_v43 = vsel %vm2837_vm1, %v12645_v41, %v9700_v56  ;;  %v5348_v7 = vsel %vm2837_vm1, %v12671_v26, %v9701_v1  ;;  %v5384_v26 = vpack.c.bf16 %v5312_v13, %v12675_v39  ;;  %v9786_v39 = vld [vmem:[#allocation9 + $0x64] ss:$8 sps:$4 sm:$0xff]   ;;  %v9843_v1 = vld [vmem:[#allocation9 + $0x1d4] ss:$8 sps:$4 sm:$0xff]   ;;  %v9838_v56 = vld [vmem:[#allocation9 + $0xd0] ss:$8 sps:$4 sm:$0xff]  }
 0x4b3   : > { %v9709_v11 = vpop.permute.xlu1 %9708  ;;  %v5379_v21 = vpack.c.bf16 %v5348_v7, %v5347_v43  ;;  %v9844_v43 = vld [vmem:[#allocation9 + $0xc0] ss:$8 sps:$4 sm:$0xff]  }
 0x4b4   : > { %v9711_v12 = vunpack.i.h.bf16 %v9709_v11  ;;  %v9710_v55 = vunpack.i.l.bf16 %v9709_v11  ;;  %v9847_v7 = vld [vmem:[#allocation9 + $0x1c0] ss:$8 sps:$4 sm:$0xff]   ;;  %v9852_v11 = vld [vmem:[#allocation9 + $0xb4] ss:$8 sps:$4 sm:$0xff]  }
 0x4b5   : > { %5502 = vmatmul.mubr.bf16.vlgmr.msra.gmra.mxu0 %v5377_v32  ;;  %v9840_v32 = vld [vmem:[#allocation9 + $0xd4] ss:$8 sps:$4 sm:$0xff]   ;;  %v9859_v13 = vld [vmem:[#allocation9 + $0x1a0] ss:$8 sps:$4 sm:$0xff]  }
 0x4b6   : > { %7923 = vmatprep.mubr.msk.bf16.mxu0 %vm2837_vm1, %v4891_v24  ;;  %v5349_v28 = vsel %vm2837_vm1, %v12673_v9, %v9710_v55  ;;  %v5350_v6 = vsel %vm2837_vm1, %v4900_v40, %v9711_v12  ;;  %v9778_v9 = vld [vmem:[#allocation9 + $0x70] ss:$8 sps:$4 sm:$0xff]   ;;  %7243 = vmatpush1.bf16.msra.mxu0 %v9781_v50  ;;  %v9811_v40 = vld [vmem:[#allocation9 + $0x120] ss:$8 sps:$4 sm:$0xff]  }
 0x4b7   : > { %v9719_v3 = vpop.permute.xlu1 %9718  ;;  %v5381_v30 = vpack.c.bf16 %v5350_v6, %v5349_v28  ;;  %7202 = vmatpush1.bf16.msra.mxu1 %v9778_v9  ;;  %7244 = vmatprep.subr.bf16.mxu0 %v9789_v37  ;;  %v9802_v24 = vld [vmem:[#allocation9 + $0x30] ss:$8 sps:$4 sm:$0xff]   ;;  %v9858_v28 = vld [vmem:[#allocation9 + $0xa4] ss:$8 sps:$4 sm:$0xff]   ;;  %v9876_v9 = vld [vmem:[#allocation9 + $0x274] ss:$8 sps:$4 sm:$0xff]  }
 0x4b8   : > { %v9721_v41 = vunpack.i.h.bf16 %v9719_v3  ;;  %v9720_v45 = vunpack.i.l.bf16 %v9719_v3  ;;  %7203 = vmatprep.subr.bf16.mxu1 %v9786_v39  ;;  %v9850_v12 = vld [vmem:[#allocation9 + $0xb0] ss:$8 sps:$4 sm:$0xff]   ;;  %v9861_v6 = vld [vmem:[#allocation9 + $0x1a4] ss:$8 sps:$4 sm:$0xff]   ;;  %v9856_v3 = vld [vmem:[#allocation9 + $0xa0] ss:$8 sps:$4 sm:$0xff]  }
 0x4b9   : > { %5280 = vmatmul.mubr.bf16.gmra.mxu1 %v4892_v34  ;;  %v9849_v34 = vld [vmem:[#allocation9 + $0x1c4] ss:$8 sps:$4 sm:$0xff]   ;;  %v9853_v55 = vld [vmem:[#allocation9 + $0x1b0] ss:$8 sps:$4 sm:$0xff]  }
 0x4ba   : > { %v5351_v61 = vsel %vm2837_vm1, %v4901_v35, %v9720_v45  ;;  %v5352_v63 = vsel %vm2837_vm1, %v5296_v29, %v9721_v41  ;;  %7245 = vmatpush1.bf16.msra.mxu0 %v9787_v0  ;;  %v9813_v35 = vld [vmem:[#allocation9 + $0x124] ss:$8 sps:$4 sm:$0xff]   ;;  %v9867_v41 = vld [vmem:[#allocation9 + $0x194] ss:$8 sps:$4 sm:$0xff]   ;;  %v9862_v45 = vld [vmem:[#allocation9 + $0x90] ss:$8 sps:$4 sm:$0xff]  }
 0x4bb   : > { %v5383_v25 = vpack.c.bf16 %v5352_v63, %v5351_v61  ;;  %7204 = vmatpush1.bf16.msra.mxu1 %v9784_v54  ;;  %7246 = vmatprep.subr.bf16.mxu0 %v9795_v49  ;;  %v9870_v29 = vld [vmem:[#allocation9 + $0x84] ss:$8 sps:$4 sm:$0xff]   ;;  %v9868_v63 = vld [vmem:[#allocation9 + $0x80] ss:$8 sps:$4 sm:$0xff]  }
 0x4bc   : > { %7205 = vmatprep.subr.bf16.mxu1 %v9792_v2  ;;  %v9873_v61 = vld [vmem:[#allocation9 + $0x184] ss:$8 sps:$4 sm:$0xff]  }
 0x4bd   : > { %5510 = vmatmul.mubr.bf16.gmra.mxu0 %v5379_v21  ;;  %v9855_v21 = vld [vmem:[#allocation9 + $0x1b4] ss:$8 sps:$4 sm:$0xff]  }
 0x4be   : > { %7924 = vmatprep.mubr.msk.bf16.mxu0 %vm2837_vm1, %v4893_v46  ;;  %7247 = vmatpush1.bf16.msra.mxu0 %v9793_v60  ;;  %v9829_v46 = vld [vmem:[#allocation9 + $0x1f0] ss:$8 sps:$4 sm:$0xff]  }
 0x4bf   : > { %7206 = vmatpush1.bf16.msra.mxu1 %v9790_v10  ;;  %7248 = vmatprep.subr.bf16.mxu0 %v9801_v36 }
 0x4c0   : > { %7207 = vmatprep.subr.bf16.mxu1 %v9798_v52 }
 0x4c2   : > { %7249 = vmatpush1.bf16.msra.mxu0 %v9799_v44 }
 0x4c3   : > { %7208 = vmatpush1.bf16.msra.mxu1 %v9796_v27  ;;  %7250 = vmatprep.subr.bf16.mxu0 %v9807_v59 }
 0x4c4   : > { %7209 = vmatprep.subr.bf16.mxu1 %v9804_v19 }
 0x4c5   : > { %5518 = vmatmul.mubr.bf16.gmra.mxu0 %v5381_v30  ;;  %v9864_v30 = vld [vmem:[#allocation9 + $0x94] ss:$8 sps:$4 sm:$0xff]  }
 0x4c6   : > { %7925 = vmatprep.mubr.msk.bf16.mxu0 %vm2837_vm1, %v5384_v26  ;;  %7251 = vmatpush1.bf16.msra.mxu0 %v9805_v42  ;;  %v9865_v26 = vld [vmem:[#allocation9 + $0x190] ss:$8 sps:$4 sm:$0xff]  }
 0x4c7   : > { %7210 = vmatpush1.bf16.msra.mxu1 %v9802_v24  ;;  %7252 = vmatprep.subr.bf16.mxu0 %v9813_v35 }
 0x4c8   : > { %7211 = vmatprep.subr.bf16.mxu1 %v9810_v22 }
 0x4ca   : > { %7253 = vmatpush1.bf16.msra.mxu0 %v9811_v40 }
 0x4cb   : > { %7212 = vmatpush1.bf16.msra.mxu1 %v9808_v38  ;;  %7254 = vmatprep.subr.bf16.mxu0 %v9819_v62 }
 0x4cc   : > { %7213 = vmatprep.subr.bf16.mxu1 %v9816_v8 }
 0x4cd   : > { %5526 = vmatmul.mubr.bf16.gmra.mxu0 %v5383_v25  ;;  %v9871_v25 = vld [vmem:[#allocation9 + $0x180] ss:$8 sps:$4 sm:$0xff]  }
 0x4ce   : > { %7255 = vmatpush1.bf16.msra.mxu0 %v9817_v5 }
 0x4cf   : > { %7214 = vmatpush1.bf16.msra.mxu1 %v9814_v16  ;;  %7256 = vmatprep.subr.bf16.mxu0 %v9825_v53 }
 0x4d0   : > { %7215 = vmatprep.subr.bf16.mxu1 %v9822_v23 }
 0x4d2   : > { %7257 = vmatpush1.bf16.msra.mxu0 %v9823_v14 }
 0x4d3   : > { %7216 = vmatpush1.bf16.msra.mxu1 %v9820_v17  ;;  %7258 = vmatprep.subr.bf16.mxu0 %v9831_v15 }
 0x4d4   : > { %7217 = vmatprep.subr.bf16.mxu1 %v9828_v18 }
 0x4d6   : > { %7259 = vmatpush2.bf16.msra.mxu0 %v9829_v46 }
 0x4d7   : > { %7218 = vmatpush2.bf16.msra.mxu1 %v9826_v31  ;;  %7260 = vmatprep.subr.bf16.mxu0 %v9837_v57  ;;  %v12745_v31 = vld [vmem:[%s12877_s6] ss:$0 sm:$0xff] }
 0x4d8   : > { %7219 = vmatprep.subr.bf16.mxu1 %v9834_v58 }
 0x4da   : > { %7261 = vmatpush2.bf16.msra.mxu0 %v9835_v47 }
 0x4db   : > { %7220 = vmatpush2.bf16.msra.mxu1 %v9832_v20  ;;  %7262 = vmatprep.subr.bf16.mxu0 %v9843_v1 }
 0x4dc   : > { %7221 = vmatprep.subr.bf16.mxu1 %v9840_v32 }
 0x4de   : > { %7263 = vmatpush2.bf16.msra.mxu0 %v9841_v33 }
 0x4df   : > { %7222 = vmatpush2.bf16.msra.mxu1 %v9838_v56  ;;  %7264 = vmatprep.subr.bf16.mxu0 %v9849_v34 }
 0x4e0   : > { %7223 = vmatprep.subr.bf16.mxu1 %v9846_v4 }
 0x4e2   : > { %7265 = vmatpush2.bf16.msra.mxu0 %v9847_v7 }
 0x4e3   : > { %7224 = vmatpush2.bf16.msra.mxu1 %v9844_v43  ;;  %7266 = vmatprep.subr.bf16.mxu0 %v9855_v21 }
 0x4e4   : > { %7225 = vmatprep.subr.bf16.mxu1 %v9852_v11 }
 0x4e6   : > { %7267 = vmatpush2.bf16.msra.mxu0 %v9853_v55 }
 0x4e7   : > { %7226 = vmatpush2.bf16.msra.mxu1 %v9850_v12  ;;  %7268 = vmatprep.subr.bf16.mxu0 %v9861_v6 }
 0x4e8   : > { %7227 = vmatprep.subr.bf16.mxu1 %v9858_v28 }
 0x4ea   : > { %7269 = vmatpush2.bf16.msra.mxu0 %v9859_v13 }
 0x4eb   : > { %7228 = vmatpush2.bf16.msra.mxu1 %v9856_v3  ;;  %7270 = vmatprep.subr.bf16.mxu0 %v9867_v41 }
 0x4ec   : > { %7229 = vmatprep.subr.bf16.mxu1 %v9864_v30 }
 0x4ee   : > { %7271 = vmatpush2.bf16.msra.mxu0 %v9865_v26 }
 0x4ef   : > { %7230 = vmatpush2.bf16.msra.mxu1 %v9862_v45  ;;  %7272 = vmatprep.subr.bf16.mxu0 %v9873_v61 }
 0x4f0   : > { %7231 = vmatprep.subr.bf16.mxu1 %v9870_v29 }
 0x4f2   : > { %7273 = vmatpush2.bf16.msra.mxu0 %v9871_v25 }
 0x4f3   : > { %7232 = vmatpush2.bf16.msra.mxu1 %v9868_v63  ;;  %7324 = vmatprep.subr.bf16.mxu0 %v9879_v48 }
 0x4f4   : > { %7283 = vmatprep.subr.bf16.mxu1 %v9876_v9 }
 0x53f   : > { %v5108_v50 = vpop.f32.mrf.mxu0 }
 0x541   : > { %v5110_v51 = vpop.f32.mrf.mxu0 }
 0x543   : > { %v5111_v54 = vpop.f32.mrf.mxu0 }
 0x545   : > { %v5113_v39 = vpop.f32.mrf.mxu0 }
 0x54e   : > { %v5116_v0 = vpop.f32.mrf.mxu0 }
 0x550   : > { %v5118_v37 = vpop.f32.mrf.mxu0 }
 0x552   : > { %v5119_v2 = vpop.f32.mrf.mxu0 }
 0x554   : > { %v5121_v49 = vpop.f32.mrf.mxu0 }
 0x55d   : > { %v5124_v10 = vpop.f32.mrf.mxu0 }
 0x55f   : > { %v5126_v60 = vpop.f32.mrf.mxu0 }
 0x561   : > { %v5127_v52 = vpop.f32.mrf.mxu0  ;;  %v5257_v36 = vpop.f32.mrf.mxu1 }
 0x562   : > { %v5258_v17 = vadd.f32 %v5257_v36, %v5108_v50 }
 0x563   : > { %v5129_v27 = vpop.f32.mrf.mxu0  ;;  %v5259_v44 = vpop.f32.mrf.mxu1 }
 0x565   : > { %v5260_v24 = vpop.f32.mrf.mxu1 }
 0x566   : > { %v5261_v15 = vadd.f32 %v5260_v24, %v5111_v54 }
 0x567   : > { %v5262_v19 = vpop.f32.mrf.mxu1 }
 0x569   : > { %v5265_v42 = vpop.f32.mrf.mxu1 }
 0x56a   : > { %v5266_v56 = vadd.f32 %v5265_v42, %v5116_v0 }
 0x56b   : > { %v5267_v59 = vpop.f32.mrf.mxu1 }
 0x56d   : > { %v5132_v38 = vpop.f32.mrf.mxu0  ;;  %v5268_v22 = vpop.f32.mrf.mxu1 }
 0x56e   : > { %v5269_v55 = vadd.f32 %v5268_v22, %v5119_v2  ;;  %v9874_v22 = vld [vmem:[#allocation9 + $0x270] ss:$8 sps:$4 sm:$0xff]  }
 0x56f   : > { %v5134_v40 = vpop.f32.mrf.mxu0  ;;  %v5270_v35 = vpop.f32.mrf.mxu1 }
 0x570   : > { %v9877_v40 = vld [vmem:[#allocation9 + $0x370] ss:$8 sps:$4 sm:$0xff]  }
 0x571   : > { %v12740_v16 = vpop.f32.mrf.mxu0  ;;  %v5273_v8 = vpop.f32.mrf.mxu1 }
 0x572   : > { %v5274_v41 = vadd.f32 %v5273_v8, %v5124_v10 }
 0x573   : > { %v5137_v5 = vpop.f32.mrf.mxu0  ;;  %v5275_v62 = vpop.f32.mrf.mxu1 }
 0x574   : > { %v9882_v62 = vld [vmem:[#allocation9 + $0x264] ss:$8 sps:$4 sm:$0xff]  }
 0x575   : > { %v5276_v23 = vpop.f32.mrf.mxu1  ;;  %v5503_v14 = vpop.f32.mrf.mxu0 }
 0x576   : > { %v5534_v53 = vadd.f32 %v5503_v14, %v5258_v17  ;;  %v5277_v9 = vadd.f32 %v5276_v23, %v5127_v52  ;;  %v9885_v17 = vld [vmem:[#allocation9 + $0x364] ss:$8 sps:$4 sm:$0xff]  }
 0x577   : > { %v5278_v18 = vpop.f32.mrf.mxu1  ;;  %v5505_v46 = vpop.f32.mrf.mxu0 }
 0x578   : > { %v5549_v47 = vadd.f32 %v12745_v31, %v5534_v53 }
 0x579   : > { %v5281_v20 = vpop.f32.mrf.mxu1  ;;  %v5506_v58 = vpop.f32.mrf.mxu0 }
 0x57a   : > { %v5535_v57 = vadd.f32 %v5506_v58, %v5261_v15  ;;  %v5557_v43 = vmax.f32 %v5549_v47, 0.0  ;;  %v5282_v49 = vadd.f32 %v5281_v20, %v5132_v38  ;;  %v9880_v20 = vld [vmem:[#allocation9 + $0x260] ss:$8 sps:$4 sm:$0xff]  }
 0x57b   : > { %v5283_v32 = vpop.f32.mrf.mxu1  ;;  %v5508_v1 = vpop.f32.mrf.mxu0  ;;  %v9883_v58 = vld [vmem:[#allocation9 + $0x360] ss:$8 sps:$4 sm:$0xff]  }
 0x57c   : > { %v5550_v33 = vadd.f32 %v12745_v31, %v5535_v57  ;;  %v9891_v32 = vld [vmem:[#allocation9 + $0x354] ss:$8 sps:$4 sm:$0xff]  }
 0x57d   : > { %v5284_v4 = vpop.f32.mrf.mxu1  ;;  %v5511_v34 = vpop.f32.mrf.mxu0 }
 0x57e   : > { %v5558_v7 = vmax.f32 %v5550_v33, 0.0  ;;  %v5536_v11 = vadd.f32 %v5511_v34, %v5266_v56  ;;  %v5285_v38 = vadd.f32 %v5284_v4, %v12740_v16  ;;  %v9888_v16 = vld [vmem:[#allocation9 + $0x254] ss:$8 sps:$4 sm:$0xff]  }
 0x57f   : > { %v5286_v21 = vpop.f32.mrf.mxu1  ;;  %v5513_v12 = vpop.f32.mrf.mxu0 }
 0x580   : > { %v5582_v28 = vmax.f32 %v5557_v43, %v5558_v7  ;;  %v5551_v3 = vadd.f32 %v12745_v31, %v5536_v11  ;;  %v9886_v43 = vld [vmem:[#allocation9 + $0x250] ss:$8 sps:$4 sm:$0xff]   ;;  %v9894_v12 = vld [vmem:[#allocation9 + $0x244] ss:$8 sps:$4 sm:$0xff]  }
 0x581   : > { %v5514_v6 = vpop.f32.mrf.mxu0  ;;  %v9889_v11 = vld [vmem:[#allocation9 + $0x350] ss:$8 sps:$4 sm:$0xff]  }
 0x582   : > { %5586 = vst [vmem:[#allocation8] sm:$0xff] %v5582_v28  ;;  %v5537_v13 = vadd.f32 %v5514_v6, %v5269_v55  ;;  %v5559_v29 = vmax.f32 %v5551_v3, 0.0  ;;  %v9897_v55 = vld [vmem:[#allocation9 + $0x344] ss:$8 sps:$4 sm:$0xff]   ;;  %v9895_v6 = vld [vmem:[#allocation9 + $0x340] ss:$8 sps:$4 sm:$0xff]  }
 0x583   : > { %v5516_v30 = vpop.f32.mrf.mxu0  ;;  %v9900_v3 = vld [vmem:[#allocation9 + $0x234] ss:$8 sps:$4 sm:$0xff]  }
 0x584   : > { %v5552_v45 = vadd.f32 %v12745_v31, %v5537_v13  ;;  %v9903_v13 = vld [vmem:[#allocation9 + $0x334] ss:$8 sps:$4 sm:$0xff]   ;;  %v9898_v30 = vld [vmem:[#allocation9 + $0x230] ss:$8 sps:$4 sm:$0xff]  }
 0x585   : > { %v5519_v26 = vpop.f32.mrf.mxu0 }
 0x586   : > { %v5560_v61 = vmax.f32 %v5552_v45, 0.0  ;;  %v5538_v63 = vadd.f32 %v5519_v26, %v5274_v41  ;;  %v9901_v41 = vld [vmem:[#allocation9 + $0x330] ss:$8 sps:$4 sm:$0xff]   ;;  %v9906_v45 = vld [vmem:[#allocation9 + $0x224] ss:$8 sps:$4 sm:$0xff]  }
 0x587   : > { %v5521_v25 = vpop.f32.mrf.mxu0  ;;  %v9909_v26 = vld [vmem:[#allocation9 + $0x324] ss:$8 sps:$4 sm:$0xff]  }
 0x588   : > { %v5583_v48 = vmax.f32 %v5559_v29, %v5560_v61  ;;  %v5553_v50 = vadd.f32 %v12745_v31, %v5538_v63  ;;  %v9904_v29 = vld [vmem:[#allocation9 + $0x220] ss:$8 sps:$4 sm:$0xff]   ;;  %v9912_v63 = vld [vmem:[#allocation9 + $0x214] ss:$8 sps:$4 sm:$0xff]  }
 0x589   : > { %v5522_v51 = vpop.f32.mrf.mxu0  ;;  %v5590_v54 = vld [vmem:[#allocation8] ss:$2 sm:$0xf]  ;;  %v5598_v39 = vld [vmem:[#allocation8 + $0x1] ss:$2 sm:$0xf] }
 0x58a   : > { %5587 = vst [vmem:[#allocation8 + $0x8] sm:$0xff] %v5583_v48  ;;  %v5539_v0 = vadd.f32 %v5522_v51, %v5277_v9  ;;  %v5605_v37 = vmax.f32 %v5590_v54, %v5598_v39  ;;  %v5561_v27 = vmax.f32 %v5553_v50, 0.0  ;;  %v9907_v61 = vld [vmem:[#allocation9 + $0x320] ss:$8 sps:$4 sm:$0xff]   ;;  %v9915_v25 = vld [vmem:[#allocation9 + $0x314] ss:$8 sps:$4 sm:$0xff]  }
 0x58b   : > { %v5524_v2 = vpop.f32.mrf.mxu0  ;;  %v9910_v9 = vld [vmem:[#allocation9 + $0x210] ss:$8 sps:$4 sm:$0xff]   ;;  %v9918_v50 = vld [vmem:[#allocation9 + $0x204] ss:$8 sps:$4 sm:$0xff]   ;;  %v9916_v54 = vld [vmem:[#allocation9 + $0x200] ss:$8 sps:$4 sm:$0xff]  }
 0x58c   : > { %v5554_v10 = vadd.f32 %v12745_v31, %v5539_v0  ;;  %v5610_v60 = vrot.slane %v5605_v37, 1  ;;  %v5614_v36 = vrot.slane %v5605_v37, 3  ;;  %v5612_v24 = vrot.slane %v5605_v37, 2  ;;  %v9913_v48 = vld [vmem:[#allocation9 + $0x310] ss:$8 sps:$4 sm:$0xff]  }
 0x58d   : > { %v5527_v44 = vpop.f32.mrf.mxu0  ;;  %v5637_v8 = vpack.c.bf16 %v5605_v37, %v5605_v37  ;;  %v9921_v51 = vld [vmem:[#allocation9 + $0x304] ss:$8 sps:$4 sm:$0xff]   ;;  %v9919_v39 = vld [vmem:[#allocation9 + $0x300] ss:$8 sps:$4 sm:$0xff]   ;;  %v9924_v0 = vld [vmem:[#allocation9 + $0x2f4] ss:$8 sps:$4 sm:$0xff]  }
 0x58e   : > { %v5562_v19 = vmax.f32 %v5554_v10, 0.0  ;;  %v5540_v52 = vadd.f32 %v5527_v44, %v5282_v49  ;;  %v5638_v42 = vpack.c.bf16 %v5610_v60, %v5610_v60  ;;  %v5640_v59 = vpack.c.bf16 %v5614_v36, %v5614_v36  ;;  %v9927_v37 = vld [vmem:[#allocation9 + $0x3f4] ss:$8 sps:$4 sm:$0xff]   ;;  %v9922_v2 = vld [vmem:[#allocation9 + $0x2f0] ss:$8 sps:$4 sm:$0xff]  }
 0x58f   : > { %v5529_v35 = vpop.f32.mrf.mxu0  ;;  %v5639_v5 = vpack.c.bf16 %v5612_v24, %v5612_v24  ;;  %v9925_v49 = vld [vmem:[#allocation9 + $0x3f0] ss:$8 sps:$4 sm:$0xff]   ;;  %v9930_v10 = vld [vmem:[#allocation9 + $0x2e4] ss:$8 sps:$4 sm:$0xff]   ;;  %v9928_v36 = vld [vmem:[#allocation9 + $0x2e0] ss:$8 sps:$4 sm:$0xff]  }
 0x590   : > { %v5584_v23 = vmax.f32 %v5561_v27, %v5562_v19  ;;  %7233 = vmatprep.mubr.bf16.mxu1 %v5638_v42  ;;  %7274 = vmatprep.mubr.bf16.mxu0 %v5640_v59  ;;  %v5555_v46 = vadd.f32 %v12745_v31, %v5540_v52  ;;  %v9933_v60 = vld [vmem:[#allocation9 + $0x3e4] ss:$8 sps:$4 sm:$0xff]   ;;  %v9931_v27 = vld [vmem:[#allocation9 + $0x3e0] ss:$8 sps:$4 sm:$0xff]   ;;  %v9936_v44 = vld [vmem:[#allocation9 + $0x2d4] ss:$8 sps:$4 sm:$0xff]  }
 0x591   : > { %v5530_v14 = vpop.f32.mrf.mxu0  ;;  %7234 = vmatmul.mubr.bf16.vlgmr.msra.gmra.mxu1 %v5637_v8  ;;  %7275 = vmatmul.mubr.bf16.vlgmr.msra.gmra.mxu0 %v5639_v5  ;;  %v5592_v53 = vld [vmem:[#allocation8 + $0x8] ss:$2 sm:$0xf]  ;;  %v5600_v18 = vld [vmem:[#allocation8 + $0x9] ss:$2 sm:$0xf] }
 0x592   : > { %5588 = vst [vmem:[#allocation8 + $0x10] sm:$0xff] %v5584_v23  ;;  %v5541_v15 = vadd.f32 %v5530_v14, %v5285_v38  ;;  %7284 = vmatpush1.bf16.msra.mxu1 %v9874_v22  ;;  %7325 = vmatpush1.bf16.msra.mxu0 %v9877_v40  ;;  %v12755_v47 = vmax.f32 %v5592_v53, %v5600_v18  ;;  %v5563_v4 = vmax.f32 %v5555_v46, 0.0  ;;  %v9939_v24 = vld [vmem:[#allocation9 + $0x3d4] ss:$8 sps:$4 sm:$0xff]   ;;  %v9934_v19 = vld [vmem:[#allocation9 + $0x2d0] ss:$8 sps:$4 sm:$0xff]  }
 0x593   : > { %v5532_v57 = vpop.f32.mrf.mxu0  ;;  %7285 = vmatprep.subr.bf16.mxu1 %v9882_v62  ;;  %7326 = vmatprep.subr.bf16.mxu0 %v9885_v17  ;;  %v9937_v52 = vld [vmem:[#allocation9 + $0x3d0] ss:$8 sps:$4 sm:$0xff]   ;;  %v9942_v42 = vld [vmem:[#allocation9 + $0x2c4] ss:$8 sps:$4 sm:$0xff]   ;;  %v9940_v22 = vld [vmem:[#allocation9 + $0x2c0] ss:$8 sps:$4 sm:$0xff]  }
 0x594   : > { %v5556_v1 = vadd.f32 %v12745_v31, %v5541_v15  ;;  %v5617_v56 = vrot.slane %v12755_v47, 1  ;;  %v5621_v33 = vrot.slane %v12755_v47, 3  ;;  %v9892_v31 = vld [vmem:[#allocation9 + $0x240] ss:$8 sps:$4 sm:$0xff]   ;;  %v9945_v59 = vld [vmem:[#allocation9 + $0x3c4] ss:$8 sps:$4 sm:$0xff]  }
 0x595   : > { %v9943_v40 = vld [vmem:[#allocation9 + $0x3c0] ss:$8 sps:$4 sm:$0xff]   ;;  %v9948_v35 = vld [vmem:[#allocation9 + $0x2b4] ss:$8 sps:$4 sm:$0xff]   ;;  %v9946_v5 = vld [vmem:[#allocation9 + $0x2b0] ss:$8 sps:$4 sm:$0xff]  }
 0x596   : > { %v5564_v34 = vmax.f32 %v5556_v1, 0.0  ;;  %7286 = vmatpush1.bf16.msra.mxu1 %v9880_v20  ;;  %7327 = vmatpush1.bf16.msra.mxu0 %v9883_v58  ;;  %v5642_v7 = vpack.c.bf16 %v5617_v56, %v5617_v56  ;;  %v5644_v21 = vpack.c.bf16 %v5621_v33, %v5621_v33  ;;  %v9951_v8 = vld [vmem:[#allocation9 + $0x3b4] ss:$8 sps:$4 sm:$0xff]   ;;  %v9949_v62 = vld [vmem:[#allocation9 + $0x3b0] ss:$8 sps:$4 sm:$0xff]   ;;  %v5619_v33 = vrot.slane %v12755_v47, 2 }
 0x597   : > { %7287 = vmatprep.subr.bf16.mxu1 %v9888_v16  ;;  %7328 = vmatprep.subr.bf16.mxu0 %v9891_v32  ;;  %v9954_v17 = vld [vmem:[#allocation9 + $0x2a4] ss:$8 sps:$4 sm:$0xff]   ;;  %v9952_v23 = vld [vmem:[#allocation9 + $0x2a0] ss:$8 sps:$4 sm:$0xff]   ;;  %v9960_v53 = vld [vmem:[#allocation9 + $0x294] ss:$8 sps:$4 sm:$0xff]  }
 0x598   : > { %v5585_v28 = vmax.f32 %v5563_v4, %v5564_v34  ;;  %7315 = vmatprep.mubr.bf16.mxu1 %v5642_v7  ;;  %7356 = vmatprep.mubr.bf16.mxu0 %v5644_v21  ;;  %v9957_v38 = vld [vmem:[#allocation9 + $0x3a4] ss:$8 sps:$4 sm:$0xff]   ;;  %v9955_v14 = vld [vmem:[#allocation9 + $0x3a0] ss:$8 sps:$4 sm:$0xff]   ;;  %v9963_v18 = vld [vmem:[#allocation9 + $0x394] ss:$8 sps:$4 sm:$0xff]   ;;  %v5641_v21 = vpack.c.bf16 %v12755_v47, %v12755_v47 }
 0x599   : > { %v5594_v46 = vld [vmem:[#allocation8 + $0x10] ss:$2 sm:$0xf]  ;;  %v5602_v15 = vld [vmem:[#allocation8 + $0x11] ss:$2 sm:$0xf] }
 0x59a   : > { %5589 = vst [vmem:[#allocation8 + $0x18] sm:$0xff] %v5585_v28  ;;  %7288 = vmatpush1.bf16.msra.mxu1 %v9886_v43  ;;  %7329 = vmatpush1.bf16.msra.mxu0 %v9889_v11  ;;  %v9958_v20 = vld [vmem:[#allocation9 + $0x290] ss:$8 sps:$4 sm:$0xff]   ;;  %v9966_v57 = vld [vmem:[#allocation9 + $0x284] ss:$8 sps:$4 sm:$0xff]   ;;  %v12760_v32 = vmax.f32 %v5594_v46, %v5602_v15 }
 0x59b   : > { %7289 = vmatprep.subr.bf16.mxu1 %v9894_v12  ;;  %7330 = vmatprep.subr.bf16.mxu0 %v9897_v55  ;;  %v9961_v58 = vld [vmem:[#allocation9 + $0x390] ss:$8 sps:$4 sm:$0xff]   ;;  %v9969_v16 = vld [vmem:[#allocation9 + $0x384] ss:$8 sps:$4 sm:$0xff]   ;;  %v9964_v1 = vld [vmem:[#allocation9 + $0x280] ss:$8 sps:$4 sm:$0xff]   ;;  %v5643_v12 = vpack.c.bf16 %v5619_v33, %v5619_v33 }
 0x59c   : > { %v9967_v56 = vld [vmem:[#allocation9 + $0x380] ss:$8 sps:$4 sm:$0xff]   ;;  %v9972_v4 = vld [vmem:[#allocation9 + $0x474] ss:$8 sps:$4 sm:$0xff]   ;;  %v5624_v43 = vrot.slane %v12760_v32, 1  ;;  %v5628_v7 = vrot.slane %v12760_v32, 3 }
 0x59d   : > { %v9975_v34 = vld [vmem:[#allocation9 + $0x574] ss:$8 sps:$4 sm:$0xff]   ;;  %v9970_v11 = vld [vmem:[#allocation9 + $0x470] ss:$8 sps:$4 sm:$0xff]  }
 0x59e   : > { %7290 = vmatpush1.bf16.msra.mxu1 %v9892_v31  ;;  %7331 = vmatpush1.bf16.msra.mxu0 %v9895_v6  ;;  %v9973_v55 = vld [vmem:[#allocation9 + $0x570] ss:$8 sps:$4 sm:$0xff]   ;;  %v5646_v28 = vpack.c.bf16 %v5624_v43, %v5624_v43  ;;  %v9978_v31 = vld [vmem:[#allocation9 + $0x464] ss:$8 sps:$4 sm:$0xff]   ;;  %v9987_v47 = vld [vmem:[#allocation9 + $0x554] ss:$8 sps:$4 sm:$0xff]  }
 0x59f   : > { %7291 = vmatprep.subr.bf16.mxu1 %v9900_v3  ;;  %7332 = vmatprep.subr.bf16.mxu0 %v9903_v13  ;;  %v9981_v6 = vld [vmem:[#allocation9 + $0x564] ss:$8 sps:$4 sm:$0xff]   ;;  %v5648_v3 = vpack.c.bf16 %v5628_v7, %v5628_v7  ;;  %v9976_v13 = vld [vmem:[#allocation9 + $0x460] ss:$8 sps:$4 sm:$0xff]   ;;  %v10044_v46 = vld [vmem:[#allocation9 + $0x4b4] ss:$8 sps:$4 sm:$0xff]  }
 0x5a0   : > { %v10047_v15 = vld [vmem:[#allocation9 + $0x5b4] ss:$8 sps:$4 sm:$0xff]  }
 0x5a1   : > { %v10056_v33 = vld [vmem:[#allocation9 + $0x494] ss:$8 sps:$4 sm:$0xff]  }
 0x5a2   : > { %7292 = vmatpush1.bf16.msra.mxu1 %v9898_v30  ;;  %7333 = vmatpush1.bf16.msra.mxu0 %v9901_v41  ;;  %v9979_v30 = vld [vmem:[#allocation9 + $0x560] ss:$8 sps:$4 sm:$0xff]   ;;  %v9984_v41 = vld [vmem:[#allocation9 + $0x454] ss:$8 sps:$4 sm:$0xff]  }
 0x5a3   : > { %7293 = vmatprep.subr.bf16.mxu1 %v9906_v45  ;;  %7334 = vmatprep.subr.bf16.mxu0 %v9909_v26  ;;  %v9982_v45 = vld [vmem:[#allocation9 + $0x450] ss:$8 sps:$4 sm:$0xff]  }
 0x5a4   : > { %v9985_v26 = vld [vmem:[#allocation9 + $0x550] ss:$8 sps:$4 sm:$0xff]  }
 0x5a5   : > { %v5596_v43 = vld [vmem:[#allocation8 + $0x18] ss:$2 sm:$0xf]  ;;  %v5604_v7 = vld [vmem:[#allocation8 + $0x19] ss:$2 sm:$0xf] }
 0x5a6   : > { %7294 = vmatpush1.bf16.msra.mxu1 %v9904_v29  ;;  %7335 = vmatpush1.bf16.msra.mxu0 %v9907_v61  ;;  %v9990_v29 = vld [vmem:[#allocation9 + $0x444] ss:$8 sps:$4 sm:$0xff]  }
 0x5a7   : > { %7295 = vmatprep.subr.bf16.mxu1 %v9912_v63  ;;  %7336 = vmatprep.subr.bf16.mxu0 %v9915_v25  ;;  %v9993_v61 = vld [vmem:[#allocation9 + $0x544] ss:$8 sps:$4 sm:$0xff]   ;;  %v9988_v63 = vld [vmem:[#allocation9 + $0x440] ss:$8 sps:$4 sm:$0xff]  }
 0x5a8   : > { %v9991_v25 = vld [vmem:[#allocation9 + $0x540] ss:$8 sps:$4 sm:$0xff]  }
 0x5aa   : > { %7296 = vmatpush1.bf16.msra.mxu1 %v9910_v9  ;;  %7337 = vmatpush1.bf16.msra.mxu0 %v9913_v48  ;;  %v9996_v9 = vld [vmem:[#allocation9 + $0x434] ss:$8 sps:$4 sm:$0xff]  }
 0x5ab   : > { %7297 = vmatprep.subr.bf16.mxu1 %v9918_v50  ;;  %7338 = vmatprep.subr.bf16.mxu0 %v9921_v51  ;;  %v9999_v48 = vld [vmem:[#allocation9 + $0x534] ss:$8 sps:$4 sm:$0xff]   ;;  %v9994_v50 = vld [vmem:[#allocation9 + $0x430] ss:$8 sps:$4 sm:$0xff]  }
 0x5ac   : > { %v9997_v51 = vld [vmem:[#allocation9 + $0x530] ss:$8 sps:$4 sm:$0xff]  }
 0x5ae   : > { %7298 = vmatpush1.bf16.msra.mxu1 %v9916_v54  ;;  %7339 = vmatpush1.bf16.msra.mxu0 %v9919_v39  ;;  %v10002_v54 = vld [vmem:[#allocation9 + $0x424] ss:$8 sps:$4 sm:$0xff]  }
 0x5af   : > { %7299 = vmatprep.subr.bf16.mxu1 %v9924_v0  ;;  %7340 = vmatprep.subr.bf16.mxu0 %v9927_v37  ;;  %v10005_v39 = vld [vmem:[#allocation9 + $0x524] ss:$8 sps:$4 sm:$0xff]   ;;  %v10000_v0 = vld [vmem:[#allocation9 + $0x420] ss:$8 sps:$4 sm:$0xff]  }
 0x5b0   : > { %v10003_v37 = vld [vmem:[#allocation9 + $0x520] ss:$8 sps:$4 sm:$0xff]  }
 0x5b2   : > { %7300 = vmatpush2.bf16.msra.mxu1 %v9922_v2  ;;  %7341 = vmatpush2.bf16.msra.mxu0 %v9925_v49  ;;  %v10008_v2 = vld [vmem:[#allocation9 + $0x414] ss:$8 sps:$4 sm:$0xff]  }
 0x5b3   : > { %7301 = vmatprep.subr.bf16.mxu1 %v9930_v10  ;;  %7342 = vmatprep.subr.bf16.mxu0 %v9933_v60  ;;  %v10011_v49 = vld [vmem:[#allocation9 + $0x514] ss:$8 sps:$4 sm:$0xff]   ;;  %v10006_v10 = vld [vmem:[#allocation9 + $0x410] ss:$8 sps:$4 sm:$0xff]  }
 0x5b4   : > { %v10009_v60 = vld [vmem:[#allocation9 + $0x510] ss:$8 sps:$4 sm:$0xff]  }
 0x5b6   : > { %7302 = vmatpush2.bf16.msra.mxu1 %v9928_v36  ;;  %7343 = vmatpush2.bf16.msra.mxu0 %v9931_v27  ;;  %v10014_v36 = vld [vmem:[#allocation9 + $0x404] ss:$8 sps:$4 sm:$0xff]  }
 0x5b7   : > { %7303 = vmatprep.subr.bf16.mxu1 %v9936_v44  ;;  %7344 = vmatprep.subr.bf16.mxu0 %v9939_v24  ;;  %v10017_v27 = vld [vmem:[#allocation9 + $0x504] ss:$8 sps:$4 sm:$0xff]   ;;  %v10012_v44 = vld [vmem:[#allocation9 + $0x400] ss:$8 sps:$4 sm:$0xff]  }
 0x5b8   : > { %v10015_v24 = vld [vmem:[#allocation9 + $0x500] ss:$8 sps:$4 sm:$0xff]  }
 0x5ba   : > { %7304 = vmatpush2.bf16.msra.mxu1 %v9934_v19  ;;  %7345 = vmatpush2.bf16.msra.mxu0 %v9937_v52  ;;  %v10020_v19 = vld [vmem:[#allocation9 + $0x4f4] ss:$8 sps:$4 sm:$0xff]  }
 0x5bb   : > { %7305 = vmatprep.subr.bf16.mxu1 %v9942_v42  ;;  %7346 = vmatprep.subr.bf16.mxu0 %v9945_v59  ;;  %v10023_v52 = vld [vmem:[#allocation9 + $0x5f4] ss:$8 sps:$4 sm:$0xff]   ;;  %v10018_v42 = vld [vmem:[#allocation9 + $0x4f0] ss:$8 sps:$4 sm:$0xff]  }
 0x5bc   : > { %v10021_v59 = vld [vmem:[#allocation9 + $0x5f0] ss:$8 sps:$4 sm:$0xff]  }
 0x5be   : > { %7306 = vmatpush2.bf16.msra.mxu1 %v9940_v22  ;;  %7347 = vmatpush2.bf16.msra.mxu0 %v9943_v40  ;;  %v10026_v22 = vld [vmem:[#allocation9 + $0x4e4] ss:$8 sps:$4 sm:$0xff]  }
 0x5bf   : > { %7307 = vmatprep.subr.bf16.mxu1 %v9948_v35  ;;  %7348 = vmatprep.subr.bf16.mxu0 %v9951_v8  ;;  %v10029_v40 = vld [vmem:[#allocation9 + $0x5e4] ss:$8 sps:$4 sm:$0xff]   ;;  %v10024_v35 = vld [vmem:[#allocation9 + $0x4e0] ss:$8 sps:$4 sm:$0xff]  }
 0x5c0   : > { %v10027_v8 = vld [vmem:[#allocation9 + $0x5e0] ss:$8 sps:$4 sm:$0xff]  }
 0x5c2   : > { %7308 = vmatpush2.bf16.msra.mxu1 %v9946_v5  ;;  %7349 = vmatpush2.bf16.msra.mxu0 %v9949_v62  ;;  %v10032_v5 = vld [vmem:[#allocation9 + $0x4d4] ss:$8 sps:$4 sm:$0xff]  }
 0x5c3   : > { %7309 = vmatprep.subr.bf16.mxu1 %v9954_v17  ;;  %7350 = vmatprep.subr.bf16.mxu0 %v9957_v38  ;;  %v10035_v62 = vld [vmem:[#allocation9 + $0x5d4] ss:$8 sps:$4 sm:$0xff]   ;;  %v10030_v17 = vld [vmem:[#allocation9 + $0x4d0] ss:$8 sps:$4 sm:$0xff]  }
 0x5c4   : > { %v10033_v38 = vld [vmem:[#allocation9 + $0x5d0] ss:$8 sps:$4 sm:$0xff]  }
 0x5c6   : > { %7310 = vmatpush2.bf16.msra.mxu1 %v9952_v23  ;;  %7351 = vmatpush2.bf16.msra.mxu0 %v9955_v14  ;;  %v10038_v23 = vld [vmem:[#allocation9 + $0x4c4] ss:$8 sps:$4 sm:$0xff]  }
 0x5c7   : > { %7311 = vmatprep.subr.bf16.mxu1 %v9960_v53  ;;  %7352 = vmatprep.subr.bf16.mxu0 %v9963_v18  ;;  %v10041_v14 = vld [vmem:[#allocation9 + $0x5c4] ss:$8 sps:$4 sm:$0xff]   ;;  %v10036_v53 = vld [vmem:[#allocation9 + $0x4c0] ss:$8 sps:$4 sm:$0xff]  }
 0x5c8   : > { %v10039_v18 = vld [vmem:[#allocation9 + $0x5c0] ss:$8 sps:$4 sm:$0xff]  }
 0x5ca   : > { %7312 = vmatpush2.bf16.msra.mxu1 %v9958_v20  ;;  %7353 = vmatpush2.bf16.msra.mxu0 %v9961_v58  ;;  %v10042_v20 = vld [vmem:[#allocation9 + $0x4b0] ss:$8 sps:$4 sm:$0xff]  }
 0x5cb   : > { %7313 = vmatprep.subr.bf16.mxu1 %v9966_v57  ;;  %7354 = vmatprep.subr.bf16.mxu0 %v9969_v16  ;;  %v10045_v58 = vld [vmem:[#allocation9 + $0x5b0] ss:$8 sps:$4 sm:$0xff]   ;;  %v10050_v57 = vld [vmem:[#allocation9 + $0x4a4] ss:$8 sps:$4 sm:$0xff]  }
 0x5cc   : > { %v10053_v16 = vld [vmem:[#allocation9 + $0x5a4] ss:$8 sps:$4 sm:$0xff]  }
 0x5ce   : > { %7314 = vmatpush2.bf16.msra.mxu1 %v9964_v1  ;;  %7355 = vmatpush2.bf16.msra.mxu0 %v9967_v56  ;;  %v10048_v1 = vld [vmem:[#allocation9 + $0x4a0] ss:$8 sps:$4 sm:$0xff]  }
 0x5cf   : > { %7365 = vmatprep.subr.bf16.mxu1 %v9972_v4  ;;  %7406 = vmatprep.subr.bf16.mxu0 %v9975_v34  ;;  %v10051_v56 = vld [vmem:[#allocation9 + $0x5a0] ss:$8 sps:$4 sm:$0xff]   ;;  %v10059_v4 = vld [vmem:[#allocation9 + $0x594] ss:$8 sps:$4 sm:$0xff]   ;;  %v10054_v34 = vld [vmem:[#allocation9 + $0x490] ss:$8 sps:$4 sm:$0xff]  }
 0x5d1   : > { %7316 = vmatmul.mubr.bf16.vlgmr.msra.gmra.mxu1 %v5641_v21  ;;  %7357 = vmatmul.mubr.bf16.vlgmr.msra.gmra.mxu0 %v5643_v12  ;;  %v10062_v21 = vld [vmem:[#allocation9 + $0x484] ss:$8 sps:$4 sm:$0xff]  }
 0x5d2   : > { %7366 = vmatpush1.bf16.msra.mxu1 %v9970_v11  ;;  %7397 = vmatprep.mubr.bf16.mxu1 %v5646_v28  ;;  %v10057_v11 = vld [vmem:[#allocation9 + $0x590] ss:$8 sps:$4 sm:$0xff]   ;;  %v10065_v12 = vld [vmem:[#allocation9 + $0x584] ss:$8 sps:$4 sm:$0xff]   ;;  %v10060_v28 = vld [vmem:[#allocation9 + $0x480] ss:$8 sps:$4 sm:$0xff]  }
 0x5d3   : > { %7407 = vmatpush1.bf16.msra.mxu0 %v9973_v55  ;;  %7438 = vmatprep.mubr.bf16.mxu0 %v5648_v3  ;;  %v12767_v55 = vmax.f32 %v5596_v43, %v5604_v7  ;;  %v5626_v3 = vrot.slane %v12760_v32, 2  ;;  %v10143_v43 = vld [vmem:[#allocation9 + $0x7b4] ss:$8 sps:$4 sm:$0xff]   ;;  %v10138_v7 = vld [vmem:[#allocation9 + $0x6b0] ss:$8 sps:$4 sm:$0xff]  }
 0x5d4   : > { %7367 = vmatprep.subr.bf16.mxu1 %v9978_v31  ;;  %7408 = vmatprep.subr.bf16.mxu0 %v9981_v6  ;;  %v10063_v31 = vld [vmem:[#allocation9 + $0x580] ss:$8 sps:$4 sm:$0xff]   ;;  %v10068_v6 = vld [vmem:[#allocation9 + $0x674] ss:$8 sps:$4 sm:$0xff]  }
 0x5d6   : > { %7368 = vmatpush1.bf16.msra.mxu1 %v9976_v13  ;;  %v10071_v13 = vld [vmem:[#allocation9 + $0x774] ss:$8 sps:$4 sm:$0xff]  }
 0x5d7   : > { %7409 = vmatpush1.bf16.msra.mxu0 %v9979_v30  ;;  %7369 = vmatprep.subr.bf16.mxu1 %v9984_v41  ;;  %v5631_v30 = vrot.slane %v12767_v55, 1  ;;  %v10066_v41 = vld [vmem:[#allocation9 + $0x670] ss:$8 sps:$4 sm:$0xff]  }
 0x5d8   : > { %7410 = vmatprep.subr.bf16.mxu0 %v9987_v47  ;;  %v5635_v47 = vrot.slane %v12767_v55, 3 }
 0x5da   : > { %7370 = vmatpush1.bf16.msra.mxu1 %v9982_v45  ;;  %v5645_v45 = vpack.c.bf16 %v12760_v32, %v12760_v32  ;;  %v10078_v32 = vld [vmem:[#allocation9 + $0x650] ss:$8 sps:$4 sm:$0xff]  }
 0x5db   : > { %7411 = vmatpush1.bf16.msra.mxu0 %v9985_v26  ;;  %7371 = vmatprep.subr.bf16.mxu1 %v9990_v29  ;;  %v10069_v26 = vld [vmem:[#allocation9 + $0x770] ss:$8 sps:$4 sm:$0xff]   ;;  %v5647_v29 = vpack.c.bf16 %v5626_v3, %v5626_v3  ;;  %v10152_v3 = vld [vmem:[#allocation9 + $0x694] ss:$8 sps:$4 sm:$0xff]  }
 0x5dc   : > { %7412 = vmatprep.subr.bf16.mxu0 %v9993_v61  ;;  %v10074_v61 = vld [vmem:[#allocation9 + $0x664] ss:$8 sps:$4 sm:$0xff]  }
 0x5de   : > { %7372 = vmatpush1.bf16.msra.mxu1 %v9988_v63  ;;  %v5650_v63 = vpack.c.bf16 %v5631_v30, %v5631_v30  ;;  %v10150_v30 = vld [vmem:[#allocation9 + $0x690] ss:$8 sps:$4 sm:$0xff]  }
 0x5df   : > { %7413 = vmatpush1.bf16.msra.mxu0 %v9991_v25  ;;  %7373 = vmatprep.subr.bf16.mxu1 %v9996_v9  ;;  %v10077_v25 = vld [vmem:[#allocation9 + $0x764] ss:$8 sps:$4 sm:$0xff]   ;;  %v5652_v9 = vpack.c.bf16 %v5635_v47, %v5635_v47  ;;  %v10153_v47 = vld [vmem:[#allocation9 + $0x790] ss:$8 sps:$4 sm:$0xff]  }
 0x5e0   : > { %7414 = vmatprep.subr.bf16.mxu0 %v9999_v48  ;;  %v10072_v48 = vld [vmem:[#allocation9 + $0x660] ss:$8 sps:$4 sm:$0xff]  }
 0x5e2   : > { %7374 = vmatpush1.bf16.msra.mxu1 %v9994_v50  ;;  %v10075_v50 = vld [vmem:[#allocation9 + $0x760] ss:$8 sps:$4 sm:$0xff]  }
 0x5e3   : > { %7415 = vmatpush1.bf16.msra.mxu0 %v9997_v51  ;;  %7375 = vmatprep.subr.bf16.mxu1 %v10002_v54  ;;  %v10080_v51 = vld [vmem:[#allocation9 + $0x654] ss:$8 sps:$4 sm:$0xff]  }
 0x5e4   : > { %7416 = vmatprep.subr.bf16.mxu0 %v10005_v39  ;;  %v10083_v54 = vld [vmem:[#allocation9 + $0x754] ss:$8 sps:$4 sm:$0xff]   ;;  %v10081_v39 = vld [vmem:[#allocation9 + $0x750] ss:$8 sps:$4 sm:$0xff]  }
 0x5e6   : > { %7376 = vmatpush1.bf16.msra.mxu1 %v10000_v0  ;;  %v10086_v0 = vld [vmem:[#allocation9 + $0x644] ss:$8 sps:$4 sm:$0xff]  }
 0x5e7   : > { %7417 = vmatpush1.bf16.msra.mxu0 %v10003_v37  ;;  %7377 = vmatprep.subr.bf16.mxu1 %v10008_v2  ;;  %v10089_v37 = vld [vmem:[#allocation9 + $0x744] ss:$8 sps:$4 sm:$0xff]   ;;  %v10084_v2 = vld [vmem:[#allocation9 + $0x640] ss:$8 sps:$4 sm:$0xff]  }
 0x5e8   : > { %7418 = vmatprep.subr.bf16.mxu0 %v10011_v49  ;;  %v10087_v49 = vld [vmem:[#allocation9 + $0x740] ss:$8 sps:$4 sm:$0xff]  }
 0x5ea   : > { %7378 = vmatpush1.bf16.msra.mxu1 %v10006_v10  ;;  %v10092_v10 = vld [vmem:[#allocation9 + $0x634] ss:$8 sps:$4 sm:$0xff]  }
 0x5eb   : > { %7419 = vmatpush1.bf16.msra.mxu0 %v10009_v60  ;;  %7379 = vmatprep.subr.bf16.mxu1 %v10014_v36  ;;  %v10095_v60 = vld [vmem:[#allocation9 + $0x734] ss:$8 sps:$4 sm:$0xff]   ;;  %v10090_v36 = vld [vmem:[#allocation9 + $0x630] ss:$8 sps:$4 sm:$0xff]  }
 0x5ec   : > { %7420 = vmatprep.subr.bf16.mxu0 %v10017_v27  ;;  %v10093_v27 = vld [vmem:[#allocation9 + $0x730] ss:$8 sps:$4 sm:$0xff]  }
 0x5ee   : > { %7380 = vmatpush1.bf16.msra.mxu1 %v10012_v44  ;;  %v10098_v44 = vld [vmem:[#allocation9 + $0x624] ss:$8 sps:$4 sm:$0xff]  }
 0x5ef   : > { %7421 = vmatpush1.bf16.msra.mxu0 %v10015_v24  ;;  %7381 = vmatprep.subr.bf16.mxu1 %v10020_v19  ;;  %v10101_v24 = vld [vmem:[#allocation9 + $0x724] ss:$8 sps:$4 sm:$0xff]   ;;  %v10096_v19 = vld [vmem:[#allocation9 + $0x620] ss:$8 sps:$4 sm:$0xff]  }
 0x5f0   : > { %7422 = vmatprep.subr.bf16.mxu0 %v10023_v52  ;;  %v10099_v52 = vld [vmem:[#allocation9 + $0x720] ss:$8 sps:$4 sm:$0xff]  }
 0x5f2   : > { %7382 = vmatpush2.bf16.msra.mxu1 %v10018_v42  ;;  %v10104_v42 = vld [vmem:[#allocation9 + $0x614] ss:$8 sps:$4 sm:$0xff]  }
 0x5f3   : > { %7423 = vmatpush2.bf16.msra.mxu0 %v10021_v59  ;;  %7383 = vmatprep.subr.bf16.mxu1 %v10026_v22  ;;  %v10107_v59 = vld [vmem:[#allocation9 + $0x714] ss:$8 sps:$4 sm:$0xff]   ;;  %v10102_v22 = vld [vmem:[#allocation9 + $0x610] ss:$8 sps:$4 sm:$0xff]  }
 0x5f4   : > { %7424 = vmatprep.subr.bf16.mxu0 %v10029_v40  ;;  %v10105_v40 = vld [vmem:[#allocation9 + $0x710] ss:$8 sps:$4 sm:$0xff]  }
 0x5f6   : > { %7384 = vmatpush2.bf16.msra.mxu1 %v10024_v35  ;;  %v10110_v35 = vld [vmem:[#allocation9 + $0x604] ss:$8 sps:$4 sm:$0xff]  }
 0x5f7   : > { %7425 = vmatpush2.bf16.msra.mxu0 %v10027_v8  ;;  %7385 = vmatprep.subr.bf16.mxu1 %v10032_v5  ;;  %v10113_v8 = vld [vmem:[#allocation9 + $0x704] ss:$8 sps:$4 sm:$0xff]   ;;  %v10108_v5 = vld [vmem:[#allocation9 + $0x600] ss:$8 sps:$4 sm:$0xff]  }
 0x5f8   : > { %7426 = vmatprep.subr.bf16.mxu0 %v10035_v62  ;;  %v10111_v62 = vld [vmem:[#allocation9 + $0x700] ss:$8 sps:$4 sm:$0xff]  }
 0x5fa   : > { %7386 = vmatpush2.bf16.msra.mxu1 %v10030_v17  ;;  %v10116_v17 = vld [vmem:[#allocation9 + $0x6f4] ss:$8 sps:$4 sm:$0xff]  }
 0x5fb   : > { %7427 = vmatpush2.bf16.msra.mxu0 %v10033_v38  ;;  %7387 = vmatprep.subr.bf16.mxu1 %v10038_v23  ;;  %v10119_v38 = vld [vmem:[#allocation9 + $0x7f4] ss:$8 sps:$4 sm:$0xff]   ;;  %v10114_v23 = vld [vmem:[#allocation9 + $0x6f0] ss:$8 sps:$4 sm:$0xff]  }
 0x5fc   : > { %7428 = vmatprep.subr.bf16.mxu0 %v10041_v14  ;;  %v10117_v14 = vld [vmem:[#allocation9 + $0x7f0] ss:$8 sps:$4 sm:$0xff]  }
 0x5fe   : > { %7388 = vmatpush2.bf16.msra.mxu1 %v10036_v53  ;;  %v10122_v53 = vld [vmem:[#allocation9 + $0x6e4] ss:$8 sps:$4 sm:$0xff]  }
 0x5ff   : > { %7429 = vmatpush2.bf16.msra.mxu0 %v10039_v18  ;;  %7389 = vmatprep.subr.bf16.mxu1 %v10044_v46  ;;  %v10125_v18 = vld [vmem:[#allocation9 + $0x7e4] ss:$8 sps:$4 sm:$0xff]   ;;  %v10120_v46 = vld [vmem:[#allocation9 + $0x6e0] ss:$8 sps:$4 sm:$0xff]  }
 0x600   : > { %7430 = vmatprep.subr.bf16.mxu0 %v10047_v15  ;;  %v10123_v15 = vld [vmem:[#allocation9 + $0x7e0] ss:$8 sps:$4 sm:$0xff]  }
 0x602   : > { %7390 = vmatpush2.bf16.msra.mxu1 %v10042_v20  ;;  %v10128_v20 = vld [vmem:[#allocation9 + $0x6d4] ss:$8 sps:$4 sm:$0xff]  }
 0x603   : > { %7431 = vmatpush2.bf16.msra.mxu0 %v10045_v58  ;;  %7391 = vmatprep.subr.bf16.mxu1 %v10050_v57  ;;  %v10131_v58 = vld [vmem:[#allocation9 + $0x7d4] ss:$8 sps:$4 sm:$0xff]   ;;  %v10126_v57 = vld [vmem:[#allocation9 + $0x6d0] ss:$8 sps:$4 sm:$0xff]  }
 0x604   : > { %7432 = vmatprep.subr.bf16.mxu0 %v10053_v16  ;;  %v10129_v16 = vld [vmem:[#allocation9 + $0x7d0] ss:$8 sps:$4 sm:$0xff]  }
 0x606   : > { %7392 = vmatpush2.bf16.msra.mxu1 %v10048_v1  ;;  %v10134_v1 = vld [vmem:[#allocation9 + $0x6c4] ss:$8 sps:$4 sm:$0xff]  }
 0x607   : > { %7433 = vmatpush2.bf16.msra.mxu0 %v10051_v56  ;;  %7393 = vmatprep.subr.bf16.mxu1 %v10056_v33  ;;  %v10137_v56 = vld [vmem:[#allocation9 + $0x7c4] ss:$8 sps:$4 sm:$0xff]   ;;  %v10132_v33 = vld [vmem:[#allocation9 + $0x6c0] ss:$8 sps:$4 sm:$0xff]  }
 0x608   : > { %7434 = vmatprep.subr.bf16.mxu0 %v10059_v4  ;;  %v10135_v4 = vld [vmem:[#allocation9 + $0x7c0] ss:$8 sps:$4 sm:$0xff]  }
 0x60a   : > { %7394 = vmatpush2.bf16.msra.mxu1 %v10054_v34  ;;  %v10140_v34 = vld [vmem:[#allocation9 + $0x6b4] ss:$8 sps:$4 sm:$0xff]  }
 0x60b   : > { %7435 = vmatpush2.bf16.msra.mxu0 %v10057_v11  ;;  %7395 = vmatprep.subr.bf16.mxu1 %v10062_v21  ;;  %v10141_v11 = vld [vmem:[#allocation9 + $0x7b0] ss:$8 sps:$4 sm:$0xff]   ;;  %v10146_v21 = vld [vmem:[#allocation9 + $0x6a4] ss:$8 sps:$4 sm:$0xff]  }
 0x60c   : > { %7436 = vmatprep.subr.bf16.mxu0 %v10065_v12  ;;  %v10149_v12 = vld [vmem:[#allocation9 + $0x7a4] ss:$8 sps:$4 sm:$0xff]  }
 0x60e   : > { %7396 = vmatpush2.bf16.msra.mxu1 %v10060_v28  ;;  %v10144_v28 = vld [vmem:[#allocation9 + $0x6a0] ss:$8 sps:$4 sm:$0xff]  }
 0x60f   : > { %7437 = vmatpush2.bf16.msra.mxu0 %v10063_v31  ;;  %7447 = vmatprep.subr.bf16.mxu1 %v10068_v6  ;;  %v7191_v31 = vlaneseq  ;;  %v10147_v6 = vld [vmem:[#allocation9 + $0x7a0] ss:$8 sps:$4 sm:$0xff]  }
 0x610   : > { %7488 = vmatprep.subr.bf16.mxu0 %v10071_v13  ;;  %v10155_v13 = vld [vmem:[#allocation9 + $0x794] ss:$8 sps:$4 sm:$0xff]  }
 0x611   : > { %7398 = vmatmul.mubr.bf16.vlgmr.msra.gmra.mxu1 %v5645_v45  ;;  %v10158_v45 = vld [vmem:[#allocation9 + $0x684] ss:$8 sps:$4 sm:$0xff]  }
 0x612   : > { %7439 = vmatmul.mubr.bf16.vlgmr.msra.gmra.mxu0 %v5647_v29  ;;  %7448 = vmatpush1.bf16.msra.mxu1 %v10066_v41  ;;  %v7192_v41 = vshrl.u32 %v7191_v31, 7  ;;  %v10156_v29 = vld [vmem:[#allocation9 + $0x680] ss:$8 sps:$4 sm:$0xff]  }
 0x613   : > { %7479 = vmatprep.mubr.bf16.mxu1 %v5650_v63  ;;  %7489 = vmatpush1.bf16.msra.mxu0 %v10069_v26  ;;  %v10161_v26 = vld [vmem:[#allocation9 + $0x784] ss:$8 sps:$4 sm:$0xff]   ;;  %v10159_v63 = vld [vmem:[#allocation9 + $0x780] ss:$8 sps:$4 sm:$0xff]  }
 0x614   : > { %7520 = vmatprep.mubr.bf16.mxu0 %v5652_v9  ;;  %7449 = vmatprep.subr.bf16.mxu1 %v10074_v61  ;;  %v7193_v61 = vsub.s32 0, %v7192_v41  ;;  %v5633_v9 = vrot.slane %v12767_v55, 2 }
 0x615   : > { %7490 = vmatprep.subr.bf16.mxu0 %v10077_v25  ;;  %v5909_v25 = vld [vmem:[%s12879_s8] sm:$0x3] }
 0x616   : > { %7450 = vmatpush1.bf16.msra.mxu1 %v10072_v48  ;;  %v7197_v48 = vsub.s32 1, %v7192_v41 }
 0x617   : > { %7491 = vmatpush1.bf16.msra.mxu0 %v10075_v50  ;;  %7451 = vmatprep.subr.bf16.mxu1 %v10080_v51  ;;  %v7194_v50 = vrot.slane %v5909_v25, %v7193_v61  ;;  %v5649_v51 = vpack.c.bf16 %v12767_v55, %v12767_v55  ;;  %v10162_v55 = vld [vmem:[%s12880_s9 + $0x78] sm:$0xff]  }
 0x618   : > { %7492 = vmatprep.subr.bf16.mxu0 %v10083_v54  ;;  %v5651_v54 = vpack.c.bf16 %v5633_v9, %v5633_v9 }
 0x61a   : > { %7452 = vmatpush1.bf16.msra.mxu1 %v10078_v32  ;;  %v7198_v32 = vrot.slane %v5909_v25, %v7197_v48 }
 0x61b   : > { %7493 = vmatpush1.bf16.msra.mxu0 %v10081_v39  ;;  %7453 = vmatprep.subr.bf16.mxu1 %v10086_v0 }
 0x61c   : > { %7494 = vmatprep.subr.bf16.mxu0 %v10089_v37 }
 0x61e   : > { %7454 = vmatpush1.bf16.msra.mxu1 %v10084_v2 }
 0x61f   : > { %7495 = vmatpush1.bf16.msra.mxu0 %v10087_v49  ;;  %7455 = vmatprep.subr.bf16.mxu1 %v10092_v10 }
 0x620   : > { %7496 = vmatprep.subr.bf16.mxu0 %v10095_v60 }
 0x622   : > { %7456 = vmatpush1.bf16.msra.mxu1 %v10090_v36 }
 0x623   : > { %7497 = vmatpush1.bf16.msra.mxu0 %v10093_v27  ;;  %7457 = vmatprep.subr.bf16.mxu1 %v10098_v44 }
 0x624   : > { %7498 = vmatprep.subr.bf16.mxu0 %v10101_v24 }
 0x626   : > { %7458 = vmatpush1.bf16.msra.mxu1 %v10096_v19 }
 0x627   : > { %7499 = vmatpush1.bf16.msra.mxu0 %v10099_v52  ;;  %7459 = vmatprep.subr.bf16.mxu1 %v10104_v42  ;;  %v10163_v52 = vld [vmem:[%s12880_s9 + $0x38] sm:$0xff]   ;;  %v10164_v42 = vld [vmem:[%s12880_s9 + $0x70] sm:$0xff]  }
 0x628   : > { %7500 = vmatprep.subr.bf16.mxu0 %v10107_v59  ;;  %v10165_v59 = vld [vmem:[%s12880_s9 + $0x30] sm:$0xff]  }
 0x62a   : > { %7460 = vmatpush1.bf16.msra.mxu1 %v10102_v22  ;;  %v10166_v22 = vld [vmem:[%s12880_s9 + $0x68] sm:$0xff]  }
 0x62b   : > { %7501 = vmatpush1.bf16.msra.mxu0 %v10105_v40  ;;  %7461 = vmatprep.subr.bf16.mxu1 %v10110_v35  ;;  %v10167_v40 = vld [vmem:[%s12880_s9 + $0x28] sm:$0xff]   ;;  %v10168_v35 = vld [vmem:[%s12880_s9 + $0x60] sm:$0xff]  }
 0x62c   : > { %7502 = vmatprep.subr.bf16.mxu0 %v10113_v8  ;;  %v10169_v8 = vld [vmem:[%s12880_s9 + $0x20] sm:$0xff]  }
 0x62e   : > { %7462 = vmatpush1.bf16.msra.mxu1 %v10108_v5  ;;  %v10170_v5 = vld [vmem:[%s12880_s9 + $0x58] sm:$0xff]  }
 0x62f   : > { %7503 = vmatpush1.bf16.msra.mxu0 %v10111_v62  ;;  %7463 = vmatprep.subr.bf16.mxu1 %v10116_v17  ;;  %v10171_v62 = vld [vmem:[%s12880_s9 + $0x18] sm:$0xff]  }
 0x630   : > { %7504 = vmatprep.subr.bf16.mxu0 %v10119_v38 }
 0x632   : > { %7464 = vmatpush2.bf16.msra.mxu1 %v10114_v23  ;;  %v10172_v23 = vld [vmem:[%s12880_s9 + $0x50] sm:$0xff]  }
 0x633   : > { %7505 = vmatpush2.bf16.msra.mxu0 %v10117_v14  ;;  %7465 = vmatprep.subr.bf16.mxu1 %v10122_v53  ;;  %v10173_v53 = vld [vmem:[%s12880_s9 + $0x10] sm:$0xff]  }
 0x634   : > { %7506 = vmatprep.subr.bf16.mxu0 %v10125_v18 }
 0x636   : > { %7466 = vmatpush2.bf16.msra.mxu1 %v10120_v46 }
 0x637   : > { %7507 = vmatpush2.bf16.msra.mxu0 %v10123_v15  ;;  %7467 = vmatprep.subr.bf16.mxu1 %v10128_v20 }
 0x638   : > { %7508 = vmatprep.subr.bf16.mxu0 %v10131_v58 }
 0x63a   : > { %7468 = vmatpush2.bf16.msra.mxu1 %v10126_v57 }
 0x63b   : > { %7509 = vmatpush2.bf16.msra.mxu0 %v10129_v16  ;;  %7469 = vmatprep.subr.bf16.mxu1 %v10134_v1  ;;  %v10174_v16 = vld [vmem:[%s12880_s9 + $0x48] sm:$0xff]  }
 0x63c   : > { %7510 = vmatprep.subr.bf16.mxu0 %v10137_v56  ;;  %v10175_v56 = vld [vmem:[%s12880_s9 + $0x8] sm:$0xff]  }
 0x63e   : > { %7470 = vmatpush2.bf16.msra.mxu1 %v10132_v33 }
 0x63f   : > { %7511 = vmatpush2.bf16.msra.mxu0 %v10135_v4  ;;  %7471 = vmatprep.subr.bf16.mxu1 %v10140_v34  ;;  %v10176_v34 = vld [vmem:[%s12880_s9 + $0x40] sm:$0xff]  }
 0x640   : > { %7512 = vmatprep.subr.bf16.mxu0 %v10143_v43  ;;  %v10177_v43 = vld [vmem:[%s12880_s9] sm:$0xff]  }
 0x642   : > { %7472 = vmatpush2.bf16.msra.mxu1 %v10138_v7 }
 0x643   : > { %7513 = vmatpush2.bf16.msra.mxu0 %v10141_v11  ;;  %7473 = vmatprep.subr.bf16.mxu1 %v10146_v21 }
 0x644   : > { %7514 = vmatprep.subr.bf16.mxu0 %v10149_v12 }
 0x646   : > { %7474 = vmatpush2.bf16.msra.mxu1 %v10144_v28 }
 0x647   : > { %7515 = vmatpush2.bf16.msra.mxu0 %v10147_v6  ;;  %7475 = vmatprep.subr.bf16.mxu1 %v10152_v3 }
 0x648   : > { %7516 = vmatprep.subr.bf16.mxu0 %v10155_v13 }
 0x64a   : > { %7476 = vmatpush2.bf16.msra.mxu1 %v10150_v30 }
 0x64b   : > { %7517 = vmatpush2.bf16.msra.mxu0 %v10153_v47  ;;  %7477 = vmatprep.subr.bf16.mxu1 %v10158_v45 }
 0x64c   : > { %7518 = vmatprep.subr.bf16.mxu0 %v10161_v26 }
 0x64e   : > { %7478 = vmatpush2.bf16.msra.mxu1 %v10156_v29 }
 0x64f   : > { %7519 = vmatpush2.bf16.msra.mxu0 %v10159_v63  ;;  %8287 = vmatprep.subr.bf16.mxu1 %v10162_v55 }
 0x651   : > { %7480 = vmatmul.mubr.bf16.vlgmr.msra.gmra.mxu1 %v5649_v51  ;;  %v7235_v39 = vpop.f32.mrf.mxu1  ;;  %v7276_v0 = vpop.f32.mrf.mxu0 }
 0x652   : > { %7521 = vmatmul.mubr.bf16.vlgmr.msra.gmra.mxu0 %v5651_v54  ;;  %v7236_v37 = vadd.f32 %v7235_v39, %v7194_v50  ;;  %8288 = vmatpush3.bf16.msra.mxu1 %v10163_v52 }
 0x653   : > { %v7237_v2 = vpop.f32.mrf.mxu1  ;;  %v7278_v49 = vpop.f32.mrf.mxu0  ;;  %8289 = vmatprep.subr.bf16.mxu1 %v10164_v42 }
 0x654   : > { %v7277_v10 = vadd.f32 %v7276_v0, %v7236_v37  ;;  %v7238_v60 = vadd.f32 %v7237_v2, %v7198_v32 }
 0x655   : > { %v7239_v36 = vpop.f32.mrf.mxu1  ;;  %v7280_v27 = vpop.f32.mrf.mxu0 }
 0x656   : > { %v7279_v44 = vadd.f32 %v7278_v49, %v7238_v60  ;;  %8290 = vmatpush3.bf16.msra.mxu1 %v10165_v59 }
 0x657   : > { %v7240_v24 = vpop.f32.mrf.mxu1  ;;  %v7281_v19 = vpop.f32.mrf.mxu0  ;;  %8291 = vmatprep.subr.bf16.mxu1 %v10166_v22 }
 0x65a   : > { %8292 = vmatpush3.bf16.msra.mxu1 %v10167_v40 }
 0x65b   : > { %8293 = vmatprep.subr.bf16.mxu1 %v10168_v35 }
 0x65e   : > { %8294 = vmatpush3.bf16.msra.mxu1 %v10169_v8 }
 0x65f   : > { %8295 = vmatprep.subr.bf16.mxu1 %v10170_v5 }
 0x662   : > { %8296 = vmatpush3.bf16.msra.mxu1 %v10171_v62 }
 0x663   : > { %8297 = vmatprep.subr.bf16.mxu1 %v10172_v23 }
 0x666   : > { %8298 = vmatpush3.bf16.msra.mxu1 %v10173_v53 }
 0x667   : > { %8299 = vmatprep.subr.bf16.mxu1 %v10174_v16 }
 0x66a   : > { %8300 = vmatpush3.bf16.msra.mxu1 %v10175_v56 }
 0x66b   : > { %8301 = vmatprep.subr.bf16.mxu1 %v10176_v34 }
 0x66e   : > { %8302 = vmatpush3.bf16.msra.mxu1 %v10177_v43 }
 0x691   : > { %v7317_v17 = vpop.f32.mrf.mxu1  ;;  %v7358_v38 = vpop.f32.mrf.mxu0 }
 0x692   : > { %v7318_v14 = vadd.f32 %v7317_v17, %v7277_v10  ;;  %v7565_v10 = vld [vmem:[%s12881_s10] sm:$0x1] }
 0x693   : > { %v7319_v18 = vpop.f32.mrf.mxu1  ;;  %v7360_v46 = vpop.f32.mrf.mxu0 }
 0x694   : > { %v7359_v15 = vadd.f32 %v7358_v38, %v7318_v14  ;;  %v7320_v20 = vadd.f32 %v7319_v18, %v7279_v44 }
 0x695   : > { %v7321_v58 = vpop.f32.mrf.mxu1  ;;  %v7362_v57 = vpop.f32.mrf.mxu0 }
 0x696   : > { %v7361_v1 = vadd.f32 %v7360_v46, %v7320_v20 }
 0x697   : > { %v7322_v33 = vpop.f32.mrf.mxu1  ;;  %v7363_v4 = vpop.f32.mrf.mxu0 }
 0x6d1   : > { %v7399_v7 = vpop.f32.mrf.mxu1 }
 0x6d2   : > { %v7400_v11 = vadd.f32 %v7399_v7, %v7359_v15  ;;  %v7440_v21 = vpop.f32.mrf.mxu0 }
 0x6d3   : > { %v7401_v12 = vpop.f32.mrf.mxu1 }
 0x6d4   : > { %v7441_v28 = vadd.f32 %v7440_v21, %v7400_v11  ;;  %v7442_v31 = vpop.f32.mrf.mxu0  ;;  %v7402_v41 = vadd.f32 %v7401_v12, %v7361_v1 }
 0x6d5   : > { %v7403_v6 = vpop.f32.mrf.mxu1 }
 0x6d6   : > { %v7444_v3 = vpop.f32.mrf.mxu0  ;;  %v7443_v45 = vadd.f32 %v7442_v31, %v7402_v41 }
 0x6d7   : > { %v7404_v13 = vpop.f32.mrf.mxu1 }
 0x6d8   : > { %v7445_v30 = vpop.f32.mrf.mxu0 }
 0x711   : > { %v7481_v47 = vpop.f32.mrf.mxu1 }
 0x712   : > { %v7482_v26 = vadd.f32 %v7481_v47, %v7441_v28  ;;  %v7522_v29 = vpop.f32.mrf.mxu0 }
 0x713   : > { %v7483_v61 = vpop.f32.mrf.mxu1 }
 0x714   : > { %v7523_v63 = vadd.f32 %v7522_v29, %v7482_v26  ;;  %v7484_v25 = vadd.f32 %v7483_v61, %v7443_v45  ;;  %v7524_v9 = vpop.f32.mrf.mxu0 }
 0x715   : > { %v7485_v48 = vpop.f32.mrf.mxu1 }
 0x716   : > { %v7525_v50 = vadd.f32 %v7524_v9, %v7484_v25  ;;  %v7526_v51 = vpop.f32.mrf.mxu0  ;;  %v7529_v54 = vmax.f32 %v7523_v63, 0.0 }
 0x717   : > { %v7486_v32 = vpop.f32.mrf.mxu1 }
 0x718   : > { %v7530_v39 = vmax.f32 %v7525_v50, 0.0  ;;  %v7527_v0 = vpop.f32.mrf.mxu0  ;;  %v7531_v2 = vpack.c.bf16 %v7529_v54, %v7529_v54 }
 0x71a   : > { %v7532_v37 = vpack.c.bf16 %v7530_v39, %v7530_v39 }
 0x71c   : > { %7694 = vmatprep.mubr.bf16.mxu1 %v7532_v37 }
 0x71d   : > { %7695 = vmatmul.mubr.bf16.vlgmr.msra.gmra.mxu1 %v7531_v2 }
 0x7dd   : > { %v8303_v49 = vpop.f32.mrf.mxu1 }
 0x7df   : > { %v8304_v60 = vpop.f32.mrf.mxu1 }
 0x7e0   : > { %v8305_v36 = vadd.f32 %v8304_v60, %v8303_v49 }
 0x7e1   : > { %v8306_v27 = vpop.f32.mrf.mxu1 }
 0x7e2   : > { %v7697_v44 = vadd.f32 %v8305_v36, %v7565_v10 }
 0x7e3   : > { %v8307_v24 = vpop.f32.mrf.mxu1 }
 0x7e4   : > { %7703 = vst.msk [vmem:[%s393_s29] sm:$0x1] %vm7702_vm4, %v7697_v44 }
 0x7e5   : > { %10232 = shalt.err (!%p10229_p0)
}
 0x7e6   : > { %s10233_s25 = scalar_lea.hbm %s12836_s22, 16  ;;  %s10237_s14 = scalar_lea.hbm %s12882_s11, 32 }
 0x7e7   : > { %p10234_p1 = scmp.ne.s32.totalorder %s12836_s22, %s10233_s25  ;;  %p10238_p4 = scmp.lt.s32.totalorder %s12836_s22, %s12882_s11 }
 0x7e8   : > { %p10239_p7 = scmp.lt.s32.totalorder %s10237_s14, %s10233_s25 }
 0x7e9   : > { %p10235_p2 = pnand %p10234_p1, %p10400_p5 }
 0x7ea   : > { %p10240_p6 = por %p10239_p7, %p10238_p4 }
 0x7eb   : > { %p10236_p3 = pneg %p10235_p2 }
 0x7ed   : > { %p10241_p8 = pnand %p10240_p6, %p10236_p3 }
 0x7ef   : > { %10244 = shalt.err (!%p10241_p8)
}
 0x7f0   : > { %8481 = dma.vmem_to_hbm [thread:$0]  (%p10400_p5), %s7718_s12, 16, %s12836_s22, %s7705_s24  }
 0x7f1 PF: > { %p8493_p9 = scmp.ge.s32.totalorder %s10283_s20, 2  ;;  %s7729_s0 = sand.u32 1, %s10271_s17  }
 0x7f2   : > { %p12898_p10 = scmp.ne.s32.totalorder %s12891_s28, 0  ;;  %s7730_s16 = scalar_lea.sflag [#allocation11], %s7729_s0 }
 0x7f4   : > { %p8488_p11 = pnand %p8493_p9, %p12898_p10 }
 0x7f6   : > { %p8489_p12 = pneg %p8488_p11 }
 0x7f8   : > { %10266 = dma.done.wait (%p8489_p12), %s7730_s16, 16  }
 0x7f9   : > { %10268 = vsyncadd (%p8489_p12), %s7730_s16, 4294967280  ;;  %p22_p13 = scmp.ge.s32.totalorder %s10387_s23, 4   ;;  %s12899_s17 = smov %s10275_s18 }
 0x7fa   : > { %s12900_s18 = smov %s10279_s19  ;;  %s12901_s19 = smov %s10398_s26 }
 0x7fb   : > { %s12902_s20 = smov %s10387_s23  ;;  %24 = sbr.rel (!%p22_p13) target bundleno = 6 (0x6), region = 137 }
 0x800   :  { %7734 = vsyncpa [#allocation10], 1 }
 0x801   :  { %7736 = vsyncpa [#allocation10 + $0x1], 1 }
 0x802   :  { %7737 = vsyncpa [#allocation11], 1 }
 0x803   :  { %7739 = vsyncpa [#allocation11 + $0x1], 1 }

</bundles_post_ra>
